<compile_context>
chip_gen: v7x
topology: tpu7x:2x2x1
jax: 0.10.0
libtpu: 0.0.40
codegen_flags: <defaults>
</compile_context>

<pallas_src>
import jax
import jax.numpy as jnp
from jax.experimental import pallas as pl
from jax.experimental.pallas import tpu as pltpu

D_HID = 512   # matches the PyTorch module's d_hid


def example_code_kernel(x_ref, p0_ref, p1_ref, w1_ref, b1_ref,
                        p2_ref, w2_ref, b2_ref, o_ref):
    # Activations / weights arrive as bf16; every dot accumulates in f32 on the MXU.
    x = x_ref[...]
    # stage 0: x @ mm_param0 ; relu
    h = jnp.dot(x, p0_ref[...], preferred_element_type=jnp.float32)
    h = jnp.maximum(h, 0.0).astype(jnp.bfloat16)
    # stage 1: @ mm_param1 ; lin1
    h = jnp.dot(h, p1_ref[...], preferred_element_type=jnp.float32)
    h = jnp.dot(h.astype(jnp.bfloat16), w1_ref[...],
                preferred_element_type=jnp.float32) + b1_ref[...]
    # stage 2: relu ; @ mm_param2
    h = jnp.maximum(h, 0.0).astype(jnp.bfloat16)
    h = jnp.dot(h, p2_ref[...], preferred_element_type=jnp.float32)
    # stage 3: lin2 ; relu
    h = jnp.dot(h.astype(jnp.bfloat16), w2_ref[...],
                preferred_element_type=jnp.float32) + b2_ref[...]
    o_ref[...] = jnp.maximum(h, 0.0).astype(o_ref.dtype)


def _build_call(B_pad, D, block_b, single_buffer_weights):
    grid = (B_pad // block_b,)
    batch_map = lambda i: (i, 0)
    full = lambda i: (0, 0)            # weights resident across all batch tiles

    # Weights never change across batch tiles -> single-buffer them so the
    # pipeline does not keep two copies of every (D, D) matrix in VMEM.
    wkw = dict(pipeline_mode=pl.Buffered(1)) if single_buffer_weights else {}

    # Explicit VMEM budget (bytes) with 2x headroom; clamp to [32 MiB, 48 MiB]
    # so we never exceed what v7x's 64 MiB physical VMEM can grant.
    weight_bufs = 1 if single_buffer_weights else 2
    budget = 2 * (
        weight_bufs * 5 * D * D * 2        # five bf16 (D, D) weights
        + 2 * 2 * D * 4                    # two f32 biases, double-buffered
        + 2 * block_b * D * (2 + 4)        # x (bf16) + out (f32) tiles, double-buffered
        + 4 * block_b * D * 4              # chained f32 intermediates
    )
    vmem_limit = min(max(budget, 32 * 1024 * 1024), 48 * 1024 * 1024)

    return pl.pallas_call(
        example_code_kernel,
        out_shape=jax.ShapeDtypeStruct((B_pad, D), jnp.float32),
        grid_spec=pltpu.PrefetchScalarGridSpec(
            num_scalar_prefetch=0,
            grid=grid,
            in_specs=[
                pl.BlockSpec((block_b, D), batch_map),   # x tile (bf16)
                pl.BlockSpec((D, D), full, **wkw),       # mm_param0
                pl.BlockSpec((D, D), full, **wkw),       # mm_param1
                pl.BlockSpec((D, D), full, **wkw),       # lin1 W^T
                pl.BlockSpec((1, D), full),              # lin1 b (f32)
                pl.BlockSpec((D, D), full, **wkw),       # mm_param2
                pl.BlockSpec((D, D), full, **wkw),       # lin2 W^T
                pl.BlockSpec((1, D), full),              # lin2 b (f32)
            ],
            out_specs=pl.BlockSpec((block_b, D), batch_map),
        ),
        compiler_params=pltpu.CompilerParams(
            dimension_semantics=("parallel",),
            vmem_limit_bytes=vmem_limit,
        ),
    )


def example_code_forward(x, params, *, block_b=None):
    """x: (B, D) f32.  params: dict of weights (see init_params)."""
    B, D = x.shape
    assert D % 128 == 0, "d_hid must be lane-aligned (multiple of 128)"
    if block_b is None:
        # 256 rows saturate the 256x256 MXU on v6e/v7x; for small batches the
        # grid collapses to a single invocation.
        block_b = min(max(8, B), 256)
    block_b = max(8, (block_b // 8) * 8)

    # Pad the batch to a multiple of the tile (zero rows flow through harmlessly).
    pad = (-B) % block_b
    B_pad = B + pad

    # bf16 operands for the MXU (accumulation stays f32 inside the kernel);
    # Linear weights are pre-transposed so every matmul is a plain x @ W.
    x_bf = x.astype(jnp.bfloat16)
    if pad:
        x_bf = jnp.pad(x_bf, ((0, pad), (0, 0)))
    p0 = params["mm_param0"].astype(jnp.bfloat16)
    p1 = params["mm_param1"].astype(jnp.bfloat16)
    p2 = params["mm_param2"].astype(jnp.bfloat16)
    w1 = params["lin1_w"].T.astype(jnp.bfloat16)   # torch Linear stores (out, in)
    w2 = params["lin2_w"].T.astype(jnp.bfloat16)
    b1 = params["lin1_b"].reshape(1, D).astype(jnp.float32)
    b2 = params["lin2_b"].reshape(1, D).astype(jnp.float32)

    args = (x_bf, p0, p1, w1, b1, p2, w2, b2)
    try:
        out = _build_call(B_pad, D, block_b, single_buffer_weights=True)(*args)
    except Exception:
        # Fallback for jax builds where pipeline_mode=pl.Buffered is not
        # accepted on the TPU pallas_call pipeline (default double-buffering).
        out = _build_call(B_pad, D, block_b, single_buffer_weights=False)(*args)
    return out[:B] if pad else out


def init_params(key, d):
    ks = jax.random.split(key, 7)
    # mm_params ~ torch.randn; Linear weights/biases: small deterministic normals
    return {
        "mm_param0": jax.random.normal(ks[0], (d, d), jnp.float32),
        "mm_param1": jax.random.normal(ks[1], (d, d), jnp.float32),
        "mm_param2": jax.random.normal(ks[2], (d, d), jnp.float32),
        "lin1_w": jax.random.normal(ks[3], (d, d), jnp.float32) / jnp.sqrt(d),
        "lin1_b": jax.random.normal(ks[4], (d,), jnp.float32) * 0.01,
        "lin2_w": jax.random.normal(ks[5], (d, d), jnp.float32) / jnp.sqrt(d),
        "lin2_b": jax.random.normal(ks[6], (d,), jnp.float32) * 0.01,
    }


def reference_forward_bf16(x, params):
    """Pure-JAX reference with the *same* bf16-operand / f32-accumulate
    semantics as the kernel, so the correctness check stays tight."""
    bf = jnp.bfloat16
    D = x.shape[1]
    h = jnp.dot(x.astype(bf), params["mm_param0"].astype(bf),
                preferred_element_type=jnp.float32)
    h = jnp.maximum(h, 0.0).astype(bf)
    h = jnp.dot(h, params["mm_param1"].astype(bf),
                preferred_element_type=jnp.float32)
    h = jnp.dot(h.astype(bf), params["lin1_w"].T.astype(bf),
                preferred_element_type=jnp.float32) + params["lin1_b"].reshape(1, D)
    h = jnp.maximum(h, 0.0).astype(bf)
    h = jnp.dot(h, params["mm_param2"].astype(bf),
                preferred_element_type=jnp.float32)
    h = jnp.dot(h.astype(bf), params["lin2_w"].T.astype(bf),
                preferred_element_type=jnp.float32) + params["lin2_b"].reshape(1, D)
    return jnp.maximum(h, 0.0)


if __name__ == "__main__":
    key = jax.random.PRNGKey(0)
    kx, kp = jax.random.split(key)
    B = 128
    x = jax.random.normal(kx, (B, D_HID), jnp.float32)
    params = init_params(kp, D_HID)

    ref = jax.block_until_ready(reference_forward_bf16(x, params))

    # Default path: one (128, 512) batch tile -> single grid step.
    out = jax.block_until_ready(example_code_forward(x, params))
    assert out.shape == (B, D_HID)
    assert jnp.allclose(out, ref, rtol=2e-2, atol=1e-2), "mismatch (single tile)"

    # Multi-step grid path (64-row tiles, weights stay resident across tiles).
    out2 = jax.block_until_ready(example_code_forward(x, params, block_b=64))
    assert jnp.allclose(out2, ref, rtol=2e-2, atol=1e-2), "mismatch (tiled)"

    print("KERNEL_OK")
</pallas_src>

<mosaic_0001>
module attributes {stable_mosaic.version = 11 : i64} {
  func.func @example_code_kernel(%arg0: i32, %arg1: memref<128x512xbf16, #tpu.memory_space<vmem>>, %arg2: memref<512x512xbf16, #tpu.memory_space<vmem>>, %arg3: memref<512x512xbf16, #tpu.memory_space<vmem>>, %arg4: memref<512x512xbf16, #tpu.memory_space<vmem>>, %arg5: memref<1x512xf32, #tpu.memory_space<vmem>>, %arg6: memref<512x512xbf16, #tpu.memory_space<vmem>>, %arg7: memref<512x512xbf16, #tpu.memory_space<vmem>>, %arg8: memref<1x512xf32, #tpu.memory_space<vmem>>, %arg9: memref<128x512xf32, #tpu.memory_space<vmem>>) attributes {dimension_semantics = [#tpu.dimension_semantics<parallel>], iteration_bounds = array<i64: 1>, scalar_prefetch = 0 : i64, scratch_operands = 0 : i64, tpu.core_type = #tpu.core_type<tc>, window_params = [{transform_indices = @transform_0, window_bounds = array<i64: 128, 512>}, {pipeline_mode = #tpu.pipeline_mode<synchronous>, transform_indices = @transform_1, window_bounds = array<i64: 512, 512>}, {pipeline_mode = #tpu.pipeline_mode<synchronous>, transform_indices = @transform_2, window_bounds = array<i64: 512, 512>}, {pipeline_mode = #tpu.pipeline_mode<synchronous>, transform_indices = @transform_3, window_bounds = array<i64: 512, 512>}, {pipeline_mode = #tpu.pipeline_mode<synchronous>, transform_indices = @transform_4, window_bounds = array<i64: 1, 512>}, {pipeline_mode = #tpu.pipeline_mode<synchronous>, transform_indices = @transform_5, window_bounds = array<i64: 512, 512>}, {pipeline_mode = #tpu.pipeline_mode<synchronous>, transform_indices = @transform_6, window_bounds = array<i64: 512, 512>}, {pipeline_mode = #tpu.pipeline_mode<synchronous>, transform_indices = @transform_7, window_bounds = array<i64: 1, 512>}, {transform_indices = @transform_8, window_bounds = array<i64: 128, 512>}]} {
    %c0 = arith.constant 0 : index
    %c0_0 = arith.constant 0 : index
    %0 = vector.load %arg1[%c0, %c0_0] : memref<128x512xbf16, #tpu.memory_space<vmem>>, vector<128x512xbf16>
    %c0_1 = arith.constant 0 : index
    %c0_2 = arith.constant 0 : index
    %1 = vector.load %arg2[%c0_1, %c0_2] : memref<512x512xbf16, #tpu.memory_space<vmem>>, vector<512x512xbf16>
    %cst = arith.constant dense<0.000000e+00> : vector<128x512xf32>
    %2 = tpu.matmul %0, %1, %cst {dimension_numbers = #tpu.dot_dimension_numbers<[1], [0], [0], [1], [0, 0, 1, 1], [], []>} : vector<128x512xbf16>, vector<512x512xbf16>, vector<128x512xf32> -> vector<128x512xf32>
    %cst_3 = arith.constant 0.000000e+00 : f32
    %3 = vector.broadcast %cst_3 : f32 to vector<128x512xf32>
    %4 = arith.maximumf %2, %3 : vector<128x512xf32>
    %5 = arith.truncf %4 : vector<128x512xf32> to vector<128x512xbf16>
    %c0_4 = arith.constant 0 : index
    %c0_5 = arith.constant 0 : index
    %6 = vector.load %arg3[%c0_4, %c0_5] : memref<512x512xbf16, #tpu.memory_space<vmem>>, vector<512x512xbf16>
    %cst_6 = arith.constant dense<0.000000e+00> : vector<128x512xf32>
    %7 = tpu.matmul %5, %6, %cst_6 {dimension_numbers = #tpu.dot_dimension_numbers<[1], [0], [0], [1], [0, 0, 1, 1], [], []>} : vector<128x512xbf16>, vector<512x512xbf16>, vector<128x512xf32> -> vector<128x512xf32>
    %8 = arith.truncf %7 : vector<128x512xf32> to vector<128x512xbf16>
    %c0_7 = arith.constant 0 : index
    %c0_8 = arith.constant 0 : index
    %9 = vector.load %arg4[%c0_7, %c0_8] : memref<512x512xbf16, #tpu.memory_space<vmem>>, vector<512x512xbf16>
    %cst_9 = arith.constant dense<0.000000e+00> : vector<128x512xf32>
    %10 = tpu.matmul %8, %9, %cst_9 {dimension_numbers = #tpu.dot_dimension_numbers<[1], [0], [0], [1], [0, 0, 1, 1], [], []>} : vector<128x512xbf16>, vector<512x512xbf16>, vector<128x512xf32> -> vector<128x512xf32>
    %c0_10 = arith.constant 0 : index
    %c0_11 = arith.constant 0 : index
    %11 = vector.load %arg5[%c0_10, %c0_11] : memref<1x512xf32, #tpu.memory_space<vmem>>, vector<1x512xf32>
    %12 = vector.broadcast %11 : vector<1x512xf32> to vector<128x512xf32>
    %13 = arith.addf %10, %12 : vector<128x512xf32>
    %cst_12 = arith.constant 0.000000e+00 : f32
    %14 = vector.broadcast %cst_12 : f32 to vector<128x512xf32>
    %15 = arith.maximumf %13, %14 : vector<128x512xf32>
    %16 = arith.truncf %15 : vector<128x512xf32> to vector<128x512xbf16>
    %c0_13 = arith.constant 0 : index
    %c0_14 = arith.constant 0 : index
    %17 = vector.load %arg6[%c0_13, %c0_14] : memref<512x512xbf16, #tpu.memory_space<vmem>>, vector<512x512xbf16>
    %cst_15 = arith.constant dense<0.000000e+00> : vector<128x512xf32>
    %18 = tpu.matmul %16, %17, %cst_15 {dimension_numbers = #tpu.dot_dimension_numbers<[1], [0], [0], [1], [0, 0, 1, 1], [], []>} : vector<128x512xbf16>, vector<512x512xbf16>, vector<128x512xf32> -> vector<128x512xf32>
    %19 = arith.truncf %18 : vector<128x512xf32> to vector<128x512xbf16>
    %c0_16 = arith.constant 0 : index
    %c0_17 = arith.constant 0 : index
    %20 = vector.load %arg7[%c0_16, %c0_17] : memref<512x512xbf16, #tpu.memory_space<vmem>>, vector<512x512xbf16>
    %cst_18 = arith.constant dense<0.000000e+00> : vector<128x512xf32>
    %21 = tpu.matmul %19, %20, %cst_18 {dimension_numbers = #tpu.dot_dimension_numbers<[1], [0], [0], [1], [0, 0, 1, 1], [], []>} : vector<128x512xbf16>, vector<512x512xbf16>, vector<128x512xf32> -> vector<128x512xf32>
    %c0_19 = arith.constant 0 : index
    %c0_20 = arith.constant 0 : index
    %22 = vector.load %arg8[%c0_19, %c0_20] : memref<1x512xf32, #tpu.memory_space<vmem>>, vector<1x512xf32>
    %23 = vector.broadcast %22 : vector<1x512xf32> to vector<128x512xf32>
    %24 = arith.addf %21, %23 : vector<128x512xf32>
    %cst_21 = arith.constant 0.000000e+00 : f32
    %25 = vector.broadcast %cst_21 : f32 to vector<128x512xf32>
    %26 = arith.maximumf %24, %25 : vector<128x512xf32>
    %c0_22 = arith.constant 0 : index
    %c0_23 = arith.constant 0 : index
    %27 = vector.load %arg9[%c0_22, %c0_23] : memref<128x512xf32, #tpu.memory_space<vmem>>, vector<128x512xf32>
    tpu.vector_store %arg9[%c0_22, %c0_23], %26 {strides = array<i32>} : memref<128x512xf32, #tpu.memory_space<vmem>>, vector<128x512xf32>,
    return
  }
  func.func @transform_0(%arg0: i32) -> (i32, i32) {
    %c0_i32 = arith.constant 0 : i32
    %c0_i32_0 = arith.constant 0 : i32
    return %arg0, %c0_i32 : i32, i32
  }
  func.func @transform_1(%arg0: i32) -> (i32, i32) {
    %c0_i32 = arith.constant 0 : i32
    %c0_i32_0 = arith.constant 0 : i32
    %c0_i32_1 = arith.constant 0 : i32
    return %c0_i32, %c0_i32_0 : i32, i32
  }
  func.func @transform_2(%arg0: i32) -> (i32, i32) {
    %c0_i32 = arith.constant 0 : i32
    %c0_i32_0 = arith.constant 0 : i32
    %c0_i32_1 = arith.constant 0 : i32
    return %c0_i32, %c0_i32_0 : i32, i32
  }
  func.func @transform_3(%arg0: i32) -> (i32, i32) {
    %c0_i32 = arith.constant 0 : i32
    %c0_i32_0 = arith.constant 0 : i32
    %c0_i32_1 = arith.constant 0 : i32
    return %c0_i32, %c0_i32_0 : i32, i32
  }
  func.func @transform_4(%arg0: i32) -> (i32, i32) {
    %c0_i32 = arith.constant 0 : i32
    %c0_i32_0 = arith.constant 0 : i32
    %c0_i32_1 = arith.constant 0 : i32
    return %c0_i32, %c0_i32_0 : i32, i32
  }
  func.func @transform_5(%arg0: i32) -> (i32, i32) {
    %c0_i32 = arith.constant 0 : i32
    %c0_i32_0 = arith.constant 0 : i32
    %c0_i32_1 = arith.constant 0 : i32
    return %c0_i32, %c0_i32_0 : i32, i32
  }
  func.func @transform_6(%arg0: i32) -> (i32, i32) {
    %c0_i32 = arith.constant 0 : i32
    %c0_i32_0 = arith.constant 0 : i32
    %c0_i32_1 = arith.constant 0 : i32
    return %c0_i32, %c0_i32_0 : i32, i32
  }
  func.func @transform_7(%arg0: i32) -> (i32, i32) {
    %c0_i32 = arith.constant 0 : i32
    %c0_i32_0 = arith.constant 0 : i32
    %c0_i32_1 = arith.constant 0 : i32
    return %c0_i32, %c0_i32_0 : i32, i32
  }
  func.func @transform_8(%arg0: i32) -> (i32, i32) {
    %c0_i32 = arith.constant 0 : i32
    %c0_i32_0 = arith.constant 0 : i32
    return %arg0, %c0_i32 : i32, i32
  }
}

module attributes {stable_mosaic.version = 11 : i64} {
  func.func @example_code_kernel(%arg0: i32, %arg1: memref<128x512xbf16, #tpu.memory_space<vmem>>, %arg2: memref<512x512xbf16, #tpu.memory_space<vmem>>, %arg3: memref<512x512xbf16, #tpu.memory_space<vmem>>, %arg4: memref<512x512xbf16, #tpu.memory_space<vmem>>, %arg5: memref<1x512xf32, #tpu.memory_space<vmem>>, %arg6: memref<512x512xbf16, #tpu.memory_space<vmem>>, %arg7: memref<512x512xbf16, #tpu.memory_space<vmem>>, %arg8: memref<1x512xf32, #tpu.memory_space<vmem>>, %arg9: memref<128x512xf32, #tpu.memory_space<vmem>>) attributes {dimension_semantics = [#tpu.dimension_semantics<parallel>], iteration_bounds = array<i64: 1>, scalar_prefetch = 0 : i64, scratch_operands = 0 : i64, tpu.core_type = #tpu.core_type<tc>, window_params = [{transform_indices = @transform_0, window_bounds = array<i64: 128, 512>}, {pipeline_mode = #tpu.pipeline_mode<synchronous>, transform_indices = @transform_1, window_bounds = array<i64: 512, 512>}, {pipeline_mode = #tpu.pipeline_mode<synchronous>, transform_indices = @transform_2, window_bounds = array<i64: 512, 512>}, {pipeline_mode = #tpu.pipeline_mode<synchronous>, transform_indices = @transform_3, window_bounds = array<i64: 512, 512>}, {pipeline_mode = #tpu.pipeline_mode<synchronous>, transform_indices = @transform_4, window_bounds = array<i64: 1, 512>}, {pipeline_mode = #tpu.pipeline_mode<synchronous>, transform_indices = @transform_5, window_bounds = array<i64: 512, 512>}, {pipeline_mode = #tpu.pipeline_mode<synchronous>, transform_indices = @transform_6, window_bounds = array<i64: 512, 512>}, {pipeline_mode = #tpu.pipeline_mode<synchronous>, transform_indices = @transform_7, window_bounds = array<i64: 1, 512>}, {transform_indices = @transform_8, window_bounds = array<i64: 128, 512>}]} {
    %c0 = arith.constant 0 : index
    %c0_0 = arith.constant 0 : index
    %0 = vector.load %arg1[%c0, %c0_0] : memref<128x512xbf16, #tpu.memory_space<vmem>>, vector<128x512xbf16>
    %c0_1 = arith.constant 0 : index
    %c0_2 = arith.constant 0 : index
    %1 = vector.load %arg2[%c0_1, %c0_2] : memref<512x512xbf16, #tpu.memory_space<vmem>>, vector<512x512xbf16>
    %cst = arith.constant dense<0.000000e+00> : vector<128x512xf32>
    %2 = tpu.matmul %0, %1, %cst {dimension_numbers = #tpu.dot_dimension_numbers<[1], [0], [0], [1], [0, 0, 1, 1], [], []>} : vector<128x512xbf16>, vector<512x512xbf16>, vector<128x512xf32> -> vector<128x512xf32>
    %cst_3 = arith.constant 0.000000e+00 : f32
    %3 = vector.broadcast %cst_3 : f32 to vector<128x512xf32>
    %4 = arith.maximumf %2, %3 : vector<128x512xf32>
    %5 = arith.truncf %4 : vector<128x512xf32> to vector<128x512xbf16>
    %c0_4 = arith.constant 0 : index
    %c0_5 = arith.constant 0 : index
    %6 = vector.load %arg3[%c0_4, %c0_5] : memref<512x512xbf16, #tpu.memory_space<vmem>>, vector<512x512xbf16>
    %cst_6 = arith.constant dense<0.000000e+00> : vector<128x512xf32>
    %7 = tpu.matmul %5, %6, %cst_6 {dimension_numbers = #tpu.dot_dimension_numbers<[1], [0], [0], [1], [0, 0, 1, 1], [], []>} : vector<128x512xbf16>, vector<512x512xbf16>, vector<128x512xf32> -> vector<128x512xf32>
    %8 = arith.truncf %7 : vector<128x512xf32> to vector<128x512xbf16>
    %c0_7 = arith.constant 0 : index
    %c0_8 = arith.constant 0 : index
    %9 = vector.load %arg4[%c0_7, %c0_8] : memref<512x512xbf16, #tpu.memory_space<vmem>>, vector<512x512xbf16>
    %cst_9 = arith.constant dense<0.000000e+00> : vector<128x512xf32>
    %10 = tpu.matmul %8, %9, %cst_9 {dimension_numbers = #tpu.dot_dimension_numbers<[1], [0], [0], [1], [0, 0, 1, 1], [], []>} : vector<128x512xbf16>, vector<512x512xbf16>, vector<128x512xf32> -> vector<128x512xf32>
    %c0_10 = arith.constant 0 : index
    %c0_11 = arith.constant 0 : index
    %11 = vector.load %arg5[%c0_10, %c0_11] : memref<1x512xf32, #tpu.memory_space<vmem>>, vector<1x512xf32>
    %12 = vector.broadcast %11 : vector<1x512xf32> to vector<128x512xf32>
    %13 = arith.addf %10, %12 : vector<128x512xf32>
    %cst_12 = arith.constant 0.000000e+00 : f32
    %14 = vector.broadcast %cst_12 : f32 to vector<128x512xf32>
    %15 = arith.maximumf %13, %14 : vector<128x512xf32>
    %16 = arith.truncf %15 : vector<128x512xf32> to vector<128x512xbf16>
    %c0_13 = arith.constant 0 : index
    %c0_14 = arith.constant 0 : index
    %17 = vector.load %arg6[%c0_13, %c0_14] : memref<512x512xbf16, #tpu.memory_space<vmem>>, vector<512x512xbf16>
    %cst_15 = arith.constant dense<0.000000e+00> : vector<128x512xf32>
    %18 = tpu.matmul %16, %17, %cst_15 {dimension_numbers = #tpu.dot_dimension_numbers<[1], [0], [0], [1], [0, 0, 1, 1], [], []>} : vector<128x512xbf16>, vector<512x512xbf16>, vector<128x512xf32> -> vector<128x512xf32>
    %19 = arith.truncf %18 : vector<128x512xf32> to vector<128x512xbf16>
    %c0_16 = arith.constant 0 : index
    %c0_17 = arith.constant 0 : index
    %20 = vector.load %arg7[%c0_16, %c0_17] : memref<512x512xbf16, #tpu.memory_space<vmem>>, vector<512x512xbf16>
    %cst_18 = arith.constant dense<0.000000e+00> : vector<128x512xf32>
    %21 = tpu.matmul %19, %20, %cst_18 {dimension_numbers = #tpu.dot_dimension_numbers<[1], [0], [0], [1], [0, 0, 1, 1], [], []>} : vector<128x512xbf16>, vector<512x512xbf16>, vector<128x512xf32> -> vector<128x512xf32>
    %c0_19 = arith.constant 0 : index
    %c0_20 = arith.constant 0 : index
    %22 = vector.load %arg8[%c0_19, %c0_20] : memref<1x512xf32, #tpu.memory_space<vmem>>, vector<1x512xf32>
    %23 = vector.broadcast %22 : vector<1x512xf32> to vector<128x512xf32>
    %24 = arith.addf %21, %23 : vector<128x512xf32>
    %cst_21 = arith.constant 0.000000e+00 : f32
    %25 = vector.broadcast %cst_21 : f32 to vector<128x512xf32>
    %26 = arith.maximumf %24, %25 : vector<128x512xf32>
    %c0_22 = arith.constant 0 : index
    %c0_23 = arith.constant 0 : index
    %27 = vector.load %arg9[%c0_22, %c0_23] : memref<128x512xf32, #tpu.memory_space<vmem>>, vector<128x512xf32>
    tpu.vector_store %arg9[%c0_22, %c0_23], %26 {strides = array<i32>} : memref<128x512xf32, #tpu.memory_space<vmem>>, vector<128x512xf32>,
    return
  }
  func.func @transform_0(%arg0: i32) -> (i32, i32) {
    %c0_i32 = arith.constant 0 : i32
    %c0_i32_0 = arith.constant 0 : i32
    return %arg0, %c0_i32 : i32, i32
  }
  func.func @transform_1(%arg0: i32) -> (i32, i32) {
    %c0_i32 = arith.constant 0 : i32
    %c0_i32_0 = arith.constant 0 : i32
    %c0_i32_1 = arith.constant 0 : i32
    return %c0_i32, %c0_i32_0 : i32, i32
  }
  func.func @transform_2(%arg0: i32) -> (i32, i32) {
    %c0_i32 = arith.constant 0 : i32
    %c0_i32_0 = arith.constant 0 : i32
    %c0_i32_1 = arith.constant 0 : i32
    return %c0_i32, %c0_i32_0 : i32, i32
  }
  func.func @transform_3(%arg0: i32) -> (i32, i32) {
    %c0_i32 = arith.constant 0 : i32
    %c0_i32_0 = arith.constant 0 : i32
    %c0_i32_1 = arith.constant 0 : i32
    return %c0_i32, %c0_i32_0 : i32, i32
  }
  func.func @transform_4(%arg0: i32) -> (i32, i32) {
    %c0_i32 = arith.constant 0 : i32
    %c0_i32_0 = arith.constant 0 : i32
    %c0_i32_1 = arith.constant 0 : i32
    return %c0_i32, %c0_i32_0 : i32, i32
  }
  func.func @transform_5(%arg0: i32) -> (i32, i32) {
    %c0_i32 = arith.constant 0 : i32
    %c0_i32_0 = arith.constant 0 : i32
    %c0_i32_1 = arith.constant 0 : i32
    return %c0_i32, %c0_i32_0 : i32, i32
  }
  func.func @transform_6(%arg0: i32) -> (i32, i32) {
    %c0_i32 = arith.constant 0 : i32
    %c0_i32_0 = arith.constant 0 : i32
    %c0_i32_1 = arith.constant 0 : i32
    return %c0_i32, %c0_i32_0 : i32, i32
  }
  func.func @transform_7(%arg0: i32) -> (i32, i32) {
    %c0_i32 = arith.constant 0 : i32
    %c0_i32_0 = arith.constant 0 : i32
    %c0_i32_1 = arith.constant 0 : i32
    return %c0_i32, %c0_i32_0 : i32, i32
  }
  func.func @transform_8(%arg0: i32) -> (i32, i32) {
    %c0_i32 = arith.constant 0 : i32
    %c0_i32_0 = arith.constant 0 : i32
    return %arg0, %c0_i32 : i32, i32
  }
}

</mosaic_0001>

<bundles_post_ra>
// kernel: tpu_custom_call.1
= control target key start
LH: loop header
LB: loop body
LE: loop exit
PB: predicated region body
PF: predicated region fallthrough
CT: control target
= control target key end

     0   :  { %13 = vsyncpa [#allocation3], 0  ;;  %s9754_s0 = inlined_call_operand.hbm [shape: bf16[128,512], index: 0, kind: input, shape index: {}]   ;;  %s9755_s1 = inlined_call_operand.hbm [shape: bf16[512,512], index: 1, kind: input, shape index: {}]   ;;  %s9756_s2 = inlined_call_operand.hbm [shape: bf16[512,512], index: 2, kind: input, shape index: {}]   ;;  %s9757_s3 = inlined_call_operand.hbm [shape: bf16[512,512], index: 3, kind: input, shape index: {}]   ;;  %s9758_s4 = inlined_call_operand.vmem [shape: f32[1,512], index: 4, kind: input, shape index: {}]   ;;  %s9759_s5 = inlined_call_operand.hbm [shape: bf16[512,512], index: 5, kind: input, shape index: {}]   ;;  %s9760_s6 = inlined_call_operand.hbm [shape: bf16[512,512], index: 6, kind: input, shape index: {}]   ;;  %s9761_s7 = inlined_call_operand.vmem [shape: f32[1,512], index: 7, kind: input, shape index: {}]   ;;  %s9762_s8 = inlined_call_operand.hbm [shape: f32[128,512], index: 8, kind: output, shape index: {}]  }
   0x1   :  { %14 = vsyncpa [#allocation6], 0 }
   0x2   :  { %15 = vsyncpa [#allocation9], 0 }
   0x3   :  { %16 = vsyncpa [#allocation12], 0 }
   0x4   :  { %17 = vsyncpa [#allocation4], 0  ;;  %s9155_s27 = smov [#allocation5]   ;;  %s9156_s29 = smov [#allocation8]  }
   0x5   :  { %s35_s28 = sshll.u32 %s9155_s27, 4  ;;  %s59_s30 = sshll.u32 %s9156_s29, 4  ;;  %s36_s28 = int_to_ptr.vmem [resolvable:$true] %s35_s28  ;;  %s9211_s30 = int_to_ptr.vmem [resolvable:$true] %s59_s30 }
   0x6   :  { %s8991_s11 = scalar_lea.hbm %s9755_s1, 16384 }
   0x7   :  { %p8992_p0 = scmp.ne.s32.totalorder %s9755_s1, %s8991_s11  ;;  %p8995_p1 = scmp.lt.u32.totalorder %s8991_s11, %s9755_s1 }
   0x9   :  { %p8997_p2 = pnand %p8995_p1, %p8992_p0 }
   0xb   :  { %9000 = shalt.err (!%p8997_p2)
}
   0xc   :  { %s9001_s16 = scalar_lea.vmem %s36_s28, 16384  ;;  %p9006_p4 = scmp.lt.s32.totalorder %s36_s28, %s36_s28 }
   0xd   :  { %p9002_p3 = scmp.ne.s32.totalorder %s36_s28, %s9001_s16  ;;  %p9007_p5 = scmp.lt.s32.totalorder %s9001_s16, %s9001_s16 }
   0xf   :  { %p9008_p6 = por %p9007_p5, %p9006_p4 }
  0x11   :  { %p9009_p7 = pnand %p9008_p6, %p9002_p3 }
  0x13   :  { %9012 = shalt.err (!%p9009_p7)
}
  0x14   :  { %s9157_s17 = smov 256   ;;  %s9158_s18 = smov 16  }
  0x15   :  { %41 = dma.hbm_to_vmem [thread:$0]  %s9755_s1, 16384, %s36_s28, [#allocation6], %s9157_s17, %s9157_s17, %s9158_s18  }
  0x16   :  { %s9013_s23 = scalar_lea.hbm %s9757_s3, 16384 }
  0x17   :  { %p9014_p8 = scmp.ne.s32.totalorder %s9757_s3, %s9013_s23  ;;  %p9017_p9 = scmp.lt.u32.totalorder %s9013_s23, %s9757_s3 }
  0x19   :  { %p9019_p10 = pnand %p9017_p9, %p9014_p8 }
  0x1b   :  { %9022 = shalt.err (!%p9019_p10)
}
  0x1c   :  { %s9023_s29 = scalar_lea.vmem %s9211_s30, 16384  ;;  %p9028_p12 = scmp.lt.s32.totalorder %s9211_s30, %s9211_s30 }
  0x1d   :  { %p9024_p11 = scmp.ne.s32.totalorder %s9211_s30, %s9023_s29  ;;  %p9029_p13 = scmp.lt.s32.totalorder %s9023_s29, %s9023_s29 }
  0x1f   :  { %p9030_p0 = por %p9029_p13, %p9028_p12 }
  0x21   :  { %p9031_p1 = pnand %p9030_p0, %p9024_p11 }
  0x23   :  { %9034 = shalt.err (!%p9031_p1)
}
  0x24   :  { %65 = dma.hbm_to_vmem [thread:$0]  %s9757_s3, 16384, %s9211_s30, [#allocation9], %s9157_s17, %s9157_s17, %s9158_s18  }
  0x25   :  { %s9159_s9 = smov [#allocation2]   ;;  %s9160_s11 = smov [#allocation7]  }
  0x26   :  { %s23_s10 = sshll.u32 %s9159_s9, 4  ;;  %s47_s12 = sshll.u32 %s9160_s11, 4  ;;  %s24_s10 = int_to_ptr.vmem [resolvable:$true] %s23_s10  ;;  %s9248_s12 = int_to_ptr.vmem [resolvable:$true] %s47_s12 }
  0x27   :  { %s9035_s15 = scalar_lea.hbm %s9754_s0, 4096 }
  0x28   :  { %p9036_p2 = scmp.ne.s32.totalorder %s9754_s0, %s9035_s15  ;;  %p9039_p3 = scmp.lt.u32.totalorder %s9035_s15, %s9754_s0 }
  0x2a   :  { %p9041_p4 = pnand %p9039_p3, %p9036_p2 }
  0x2c   :  { %9044 = shalt.err (!%p9041_p4)
}
  0x2d   :  { %s9045_s3 = scalar_lea.vmem %s24_s10, 4096  ;;  %p9050_p6 = scmp.lt.s32.totalorder %s24_s10, %s24_s10 }
  0x2e   :  { %p9046_p5 = scmp.ne.s32.totalorder %s24_s10, %s9045_s3  ;;  %p9051_p7 = scmp.lt.s32.totalorder %s9045_s3, %s9045_s3 }
  0x30   :  { %p9052_p8 = por %p9051_p7, %p9050_p6 }
  0x32   :  { %p9053_p9 = pnand %p9052_p8, %p9046_p5 }
  0x34   :  { %9056 = shalt.err (!%p9053_p9)
}
  0x35   :  { %29 = dma.hbm_to_vmem [thread:$0]  %s9754_s0, 4096, %s24_s10, [#allocation3], %s9157_s17, %s9157_s17, %s9158_s18  }
  0x36   :  { %s9057_s25 = scalar_lea.hbm %s9756_s2, 16384 }
  0x37   :  { %p9058_p10 = scmp.ne.s32.totalorder %s9756_s2, %s9057_s25  ;;  %p9061_p11 = scmp.lt.u32.totalorder %s9057_s25, %s9756_s2 }
  0x39   :  { %p9063_p12 = pnand %p9061_p11, %p9058_p10 }
  0x3b   :  { %9066 = shalt.err (!%p9063_p12)
}
  0x3c   :  { %s9067_s28 = scalar_lea.vmem %s9248_s12, 16384  ;;  %p9072_p0 = scmp.lt.s32.totalorder %s9248_s12, %s9248_s12 }
  0x3d   :  { %p9068_p13 = scmp.ne.s32.totalorder %s9248_s12, %s9067_s28  ;;  %p9073_p1 = scmp.lt.s32.totalorder %s9067_s28, %s9067_s28 }
  0x3f   :  { %p9074_p2 = por %p9073_p1, %p9072_p0 }
  0x41   :  { %p9075_p3 = pnand %p9074_p2, %p9068_p13 }
  0x43   :  { %9078 = shalt.err (!%p9075_p3)
}
  0x44   :  { %53 = dma.hbm_to_vmem [thread:$0]  %s9756_s2, 16384, %s9248_s12, [#allocation6], %s9157_s17, %s9157_s17, %s9158_s18  }
  0x45   :  { %s9161_s10 = smov [#allocation10]   ;;  %s9162_s13 = smov [#allocation11]  }
  0x46   :  { %s73_s11 = sshll.u32 %s9161_s10, 4  ;;  %s85_s14 = sshll.u32 %s9162_s13, 4  ;;  %s74_s11 = int_to_ptr.vmem [resolvable:$true] %s73_s11  ;;  %s9285_s14 = int_to_ptr.vmem [resolvable:$true] %s85_s14 }
  0x47   :  { %s9079_s19 = scalar_lea.hbm %s9759_s5, 16384 }
  0x48   :  { %p9080_p4 = scmp.ne.s32.totalorder %s9759_s5, %s9079_s19  ;;  %p9083_p5 = scmp.lt.u32.totalorder %s9079_s19, %s9759_s5 }
  0x4a   :  { %p9085_p6 = pnand %p9083_p5, %p9080_p4 }
  0x4c   :  { %9088 = shalt.err (!%p9085_p6)
}
  0x4d   :  { %s9089_s2 = scalar_lea.vmem %s74_s11, 16384  ;;  %p9094_p8 = scmp.lt.s32.totalorder %s74_s11, %s74_s11 }
  0x4e   :  { %p9090_p7 = scmp.ne.s32.totalorder %s74_s11, %s9089_s2  ;;  %p9095_p9 = scmp.lt.s32.totalorder %s9089_s2, %s9089_s2 }
  0x50   :  { %p9096_p10 = por %p9095_p9, %p9094_p8 }
  0x52   :  { %p9097_p11 = pnand %p9096_p10, %p9090_p7 }
  0x54   :  { %9100 = shalt.err (!%p9097_p11)
}
  0x55   :  { %79 = dma.hbm_to_vmem [thread:$0]  %s9759_s5, 16384, %s74_s11, [#allocation9], %s9157_s17, %s9157_s17, %s9158_s18  }
  0x56   :  { %s9101_s25 = scalar_lea.hbm %s9760_s6, 16384 }
  0x57   :  { %p9102_p12 = scmp.ne.s32.totalorder %s9760_s6, %s9101_s25  ;;  %p9105_p13 = scmp.lt.u32.totalorder %s9101_s25, %s9760_s6 }
  0x59   :  { %p9107_p0 = pnand %p9105_p13, %p9102_p12 }
  0x5b   :  { %9110 = shalt.err (!%p9107_p0)
}
  0x5c   :  { %s9111_s28 = scalar_lea.vmem %s9285_s14, 16384  ;;  %p9116_p2 = scmp.lt.s32.totalorder %s9285_s14, %s9285_s14 }
  0x5d   :  { %p9112_p1 = scmp.ne.s32.totalorder %s9285_s14, %s9111_s28  ;;  %p9117_p3 = scmp.lt.s32.totalorder %s9111_s28, %s9111_s28 }
  0x5f   :  { %p9118_p4 = por %p9117_p3, %p9116_p2 }
  0x61   :  { %p9119_p5 = pnand %p9118_p4, %p9112_p1 }
  0x63   :  { %9122 = shalt.err (!%p9119_p5)
}
  0x64   :  { %91 = dma.hbm_to_vmem [thread:$0]  %s9760_s6, 16384, %s9285_s14, [#allocation12], %s9157_s17, %s9157_s17, %s9158_s18  }
  0x65   :  { %9145 = dma.done.wait [#allocation3], 4096  }
  0x66   :  { %9146 = vsyncadd [#allocation3], 4294963200 }
  0x67   :  { %9147 = dma.done.wait [#allocation6], 32768  }
  0x68   :  { %9148 = vsyncadd [#allocation6], 4294934528 }
  0x69   :  { %9149 = dma.done.wait [#allocation9], 32768  }
  0x6a   :  { %9150 = vsyncadd [#allocation9], 4294934528 }
  0x6b   :  { %9151 = dma.done.wait [#allocation12], 16384  }
  0x6c   :  { %9152 = vsyncadd [#allocation12], 4294950912  ;;  %v7983_v0 = vld [vmem:[#allocation5 + $0x4] ss:$16 sps:$4 sm:$0xff]   ;;  %v7985_v1 = vld [vmem:[#allocation5 + $0xc] ss:$16 sps:$4 sm:$0xff]  }
  0x6d   :  { %1072 = vmatprep.subr.bf16.mxu0 %v7983_v0  ;;  %v7987_v2 = vld [vmem:[#allocation5] ss:$16 sps:$4 sm:$0xff]   ;;  %v7988_v3 = vld [vmem:[#allocation5 + $0x8] ss:$16 sps:$4 sm:$0xff]   ;;  %1298 = vmatprep.subr.bf16.mxu1 %v7985_v1  ;;  %v7989_v4 = vld [vmem:[#allocation5 + $0x24] ss:$16 sps:$4 sm:$0xff]  }
  0x6e   :  { %1073 = vmatpush1.bf16.msra.mxu0 %v7987_v2  ;;  %1299 = vmatpush1.bf16.msra.mxu1 %v7988_v3  ;;  %v7991_v5 = vld [vmem:[#allocation5 + $0x2c] ss:$16 sps:$4 sm:$0xff]   ;;  %v7993_v6 = vld [vmem:[#allocation5 + $0x20] ss:$16 sps:$4 sm:$0xff]   ;;  %v7994_v7 = vld [vmem:[#allocation5 + $0x28] ss:$16 sps:$4 sm:$0xff]  }
  0x6f   :  { %1074 = vmatprep.subr.bf16.mxu0 %v7989_v4  ;;  %1300 = vmatprep.subr.bf16.mxu1 %v7991_v5  ;;  %v7995_v8 = vld [vmem:[#allocation5 + $0x44] ss:$16 sps:$4 sm:$0xff]   ;;  %v7997_v9 = vld [vmem:[#allocation5 + $0x4c] ss:$16 sps:$4 sm:$0xff]   ;;  %v7999_v10 = vld [vmem:[#allocation5 + $0x40] ss:$16 sps:$4 sm:$0xff]  }
  0x70   :  { %v8000_v11 = vld [vmem:[#allocation5 + $0x48] ss:$16 sps:$4 sm:$0xff]   ;;  %v8001_v12 = vld [vmem:[#allocation5 + $0x64] ss:$16 sps:$4 sm:$0xff]   ;;  %v8003_v13 = vld [vmem:[#allocation5 + $0x6c] ss:$16 sps:$4 sm:$0xff]  }
  0x71   :  { %v8005_v14 = vld [vmem:[#allocation5 + $0x60] ss:$16 sps:$4 sm:$0xff]   ;;  %v8006_v15 = vld [vmem:[#allocation5 + $0x68] ss:$16 sps:$4 sm:$0xff]   ;;  %v8007_v16 = vld [vmem:[#allocation5 + $0x84] ss:$16 sps:$4 sm:$0xff]  }
  0x72   :  { %1075 = vmatpush1.bf16.msra.mxu0 %v7993_v6  ;;  %1301 = vmatpush1.bf16.msra.mxu1 %v7994_v7  ;;  %v8009_v17 = vld [vmem:[#allocation5 + $0x8c] ss:$16 sps:$4 sm:$0xff]   ;;  %v8011_v18 = vld [vmem:[#allocation5 + $0x80] ss:$16 sps:$4 sm:$0xff]   ;;  %v8012_v19 = vld [vmem:[#allocation5 + $0x88] ss:$16 sps:$4 sm:$0xff]  }
  0x73   :  { %1076 = vmatprep.subr.bf16.mxu0 %v7995_v8  ;;  %1302 = vmatprep.subr.bf16.mxu1 %v7997_v9  ;;  %v8013_v20 = vld [vmem:[#allocation5 + $0xa4] ss:$16 sps:$4 sm:$0xff]   ;;  %v8015_v21 = vld [vmem:[#allocation5 + $0xac] ss:$16 sps:$4 sm:$0xff]   ;;  %v8017_v22 = vld [vmem:[#allocation5 + $0xa0] ss:$16 sps:$4 sm:$0xff]  }
  0x74   :  { %v8018_v23 = vld [vmem:[#allocation5 + $0xa8] ss:$16 sps:$4 sm:$0xff]   ;;  %v8019_v24 = vld [vmem:[#allocation5 + $0xc4] ss:$16 sps:$4 sm:$0xff]   ;;  %v8021_v25 = vld [vmem:[#allocation5 + $0xcc] ss:$16 sps:$4 sm:$0xff]  }
  0x75   :  { %v8023_v26 = vld [vmem:[#allocation5 + $0xc0] ss:$16 sps:$4 sm:$0xff]   ;;  %v8024_v27 = vld [vmem:[#allocation5 + $0xc8] ss:$16 sps:$4 sm:$0xff]   ;;  %v8025_v28 = vld [vmem:[#allocation5 + $0xe4] ss:$16 sps:$4 sm:$0xff]  }
  0x76   :  { %1077 = vmatpush1.bf16.msra.mxu0 %v7999_v10  ;;  %1303 = vmatpush1.bf16.msra.mxu1 %v8000_v11  ;;  %v8027_v29 = vld [vmem:[#allocation5 + $0xec] ss:$16 sps:$4 sm:$0xff]   ;;  %v8029_v30 = vld [vmem:[#allocation5 + $0xe0] ss:$16 sps:$4 sm:$0xff]   ;;  %v8030_v31 = vld [vmem:[#allocation5 + $0xe8] ss:$16 sps:$4 sm:$0xff]  }
  0x77   :  { %1078 = vmatprep.subr.bf16.mxu0 %v8001_v12  ;;  %1304 = vmatprep.subr.bf16.mxu1 %v8003_v13  ;;  %v8031_v32 = vld [vmem:[#allocation5 + $0x104] ss:$16 sps:$4 sm:$0xff]   ;;  %v8033_v33 = vld [vmem:[#allocation5 + $0x10c] ss:$16 sps:$4 sm:$0xff]   ;;  %v8035_v34 = vld [vmem:[#allocation5 + $0x100] ss:$16 sps:$4 sm:$0xff]  }
  0x78   :  { %v8036_v35 = vld [vmem:[#allocation5 + $0x108] ss:$16 sps:$4 sm:$0xff]   ;;  %v8037_v36 = vld [vmem:[#allocation5 + $0x124] ss:$16 sps:$4 sm:$0xff]   ;;  %v8039_v37 = vld [vmem:[#allocation5 + $0x12c] ss:$16 sps:$4 sm:$0xff]  }
  0x79   :  { %v8041_v38 = vld [vmem:[#allocation5 + $0x120] ss:$16 sps:$4 sm:$0xff]   ;;  %v8042_v39 = vld [vmem:[#allocation5 + $0x128] ss:$16 sps:$4 sm:$0xff]   ;;  %v8043_v40 = vld [vmem:[#allocation5 + $0x144] ss:$16 sps:$4 sm:$0xff]  }
  0x7a   :  { %1079 = vmatpush1.bf16.msra.mxu0 %v8005_v14  ;;  %1305 = vmatpush1.bf16.msra.mxu1 %v8006_v15  ;;  %v8045_v41 = vld [vmem:[#allocation5 + $0x14c] ss:$16 sps:$4 sm:$0xff]   ;;  %v8047_v42 = vld [vmem:[#allocation5 + $0x140] ss:$16 sps:$4 sm:$0xff]   ;;  %v8048_v43 = vld [vmem:[#allocation5 + $0x148] ss:$16 sps:$4 sm:$0xff]  }
  0x7b   :  { %1080 = vmatprep.subr.bf16.mxu0 %v8007_v16  ;;  %1306 = vmatprep.subr.bf16.mxu1 %v8009_v17  ;;  %v8049_v44 = vld [vmem:[#allocation5 + $0x164] ss:$16 sps:$4 sm:$0xff]   ;;  %v8051_v45 = vld [vmem:[#allocation5 + $0x16c] ss:$16 sps:$4 sm:$0xff]   ;;  %v8053_v46 = vld [vmem:[#allocation5 + $0x160] ss:$16 sps:$4 sm:$0xff]  }
  0x7c   :  { %v8054_v47 = vld [vmem:[#allocation5 + $0x168] ss:$16 sps:$4 sm:$0xff]   ;;  %v8081_v48 = vld [vmem:[#allocation2 + $0x4] ss:$16 sps:$4 sm:$0xff]   ;;  %v8057_v50 = vld [vmem:[#allocation5 + $0x18c] ss:$16 sps:$4 sm:$0xff]  }
  0x7d   :  { %v8055_v49 = vld [vmem:[#allocation5 + $0x184] ss:$16 sps:$4 sm:$0xff]   ;;  %1104 = vmatprep.mubr.bf16.mxu0 %v8081_v48  ;;  %1330 = vmatprep.mubr.bf16.mxu1 %v8081_v48  ;;  %v8059_v51 = vld [vmem:[#allocation5 + $0x180] ss:$16 sps:$4 sm:$0xff]   ;;  %v8060_v52 = vld [vmem:[#allocation5 + $0x188] ss:$16 sps:$4 sm:$0xff]  }
  0x7e   :  { %1081 = vmatpush1.bf16.msra.mxu0 %v8011_v18  ;;  %1307 = vmatpush1.bf16.msra.mxu1 %v8012_v19  ;;  %v8061_v53 = vld [vmem:[#allocation5 + $0x1a4] ss:$16 sps:$4 sm:$0xff]   ;;  %v8063_v54 = vld [vmem:[#allocation5 + $0x1ac] ss:$16 sps:$4 sm:$0xff]   ;;  %v8065_v55 = vld [vmem:[#allocation5 + $0x1a0] ss:$16 sps:$4 sm:$0xff]  }
  0x7f   :  { %1082 = vmatprep.subr.bf16.mxu0 %v8013_v20  ;;  %1308 = vmatprep.subr.bf16.mxu1 %v8015_v21  ;;  %v8066_v56 = vld [vmem:[#allocation5 + $0x1a8] ss:$16 sps:$4 sm:$0xff]   ;;  %v8067_v57 = vld [vmem:[#allocation5 + $0x1c4] ss:$16 sps:$4 sm:$0xff]   ;;  %v8069_v58 = vld [vmem:[#allocation5 + $0x1cc] ss:$16 sps:$4 sm:$0xff]  }
  0x80   :  { %v8071_v59 = vld [vmem:[#allocation5 + $0x1c0] ss:$16 sps:$4 sm:$0xff]   ;;  %v8072_v60 = vld [vmem:[#allocation5 + $0x1c8] ss:$16 sps:$4 sm:$0xff]   ;;  %v8073_v61 = vld [vmem:[#allocation5 + $0x1e4] ss:$16 sps:$4 sm:$0xff]  }
  0x81   :  { %v8075_v62 = vld [vmem:[#allocation5 + $0x1ec] ss:$16 sps:$4 sm:$0xff]   ;;  %v8077_v63 = vld [vmem:[#allocation5 + $0x1e0] ss:$16 sps:$4 sm:$0xff]   ;;  %v8078_v0 = vld [vmem:[#allocation5 + $0x1e8] ss:$16 sps:$4 sm:$0xff]  }
  0x82   :  { %1083 = vmatpush1.bf16.msra.mxu0 %v8017_v22  ;;  %1309 = vmatpush1.bf16.msra.mxu1 %v8018_v23  ;;  %v8084_v1 = vld [vmem:[#allocation5 + $0x204] ss:$16 sps:$4 sm:$0xff]   ;;  %v8087_v2 = vld [vmem:[#allocation5 + $0x20c] ss:$16 sps:$4 sm:$0xff]   ;;  %v8079_v3 = vld [vmem:[#allocation2] ss:$16 sps:$4 sm:$0xff]  }
  0x83   :  { %1084 = vmatprep.subr.bf16.mxu0 %v8019_v24  ;;  %1310 = vmatprep.subr.bf16.mxu1 %v8021_v25  ;;  %v8082_v4 = vld [vmem:[#allocation5 + $0x200] ss:$16 sps:$4 sm:$0xff]   ;;  %v8085_v5 = vld [vmem:[#allocation5 + $0x208] ss:$16 sps:$4 sm:$0xff]   ;;  %v8090_v6 = vld [vmem:[#allocation5 + $0x224] ss:$16 sps:$4 sm:$0xff]  }
  0x84   :  { %v8093_v7 = vld [vmem:[#allocation5 + $0x22c] ss:$16 sps:$4 sm:$0xff]   ;;  %v8094_v8 = vld [vmem:[#allocation2 + $0x24] ss:$16 sps:$4 sm:$0xff]   ;;  %v8088_v9 = vld [vmem:[#allocation5 + $0x220] ss:$16 sps:$4 sm:$0xff]  }
  0x85   :  { %v8091_v10 = vld [vmem:[#allocation5 + $0x228] ss:$16 sps:$4 sm:$0xff]   ;;  %v8099_v11 = vld [vmem:[#allocation5 + $0x244] ss:$16 sps:$4 sm:$0xff]   ;;  %v8102_v12 = vld [vmem:[#allocation5 + $0x24c] ss:$16 sps:$4 sm:$0xff]  }
  0x86   :  { %1085 = vmatpush1.bf16.msra.mxu0 %v8023_v26  ;;  %1311 = vmatpush1.bf16.msra.mxu1 %v8024_v27  ;;  %v8096_v13 = vld [vmem:[#allocation2 + $0x20] ss:$16 sps:$4 sm:$0xff]   ;;  %v8100_v15 = vld [vmem:[#allocation5 + $0x248] ss:$16 sps:$4 sm:$0xff]   ;;  %v8105_v16 = vld [vmem:[#allocation5 + $0x264] ss:$16 sps:$4 sm:$0xff]  }
  0x87   :  { %1086 = vmatprep.subr.bf16.mxu0 %v8025_v28  ;;  %1312 = vmatprep.subr.bf16.mxu1 %v8027_v29  ;;  %v8097_v14 = vld [vmem:[#allocation5 + $0x240] ss:$16 sps:$4 sm:$0xff]   ;;  %v8108_v17 = vld [vmem:[#allocation5 + $0x26c] ss:$16 sps:$4 sm:$0xff]   ;;  %v8109_v18 = vld [vmem:[#allocation2 + $0x44] ss:$16 sps:$4 sm:$0xff]  }
  0x88   :  { %v8103_v19 = vld [vmem:[#allocation5 + $0x260] ss:$16 sps:$4 sm:$0xff]   ;;  %v8106_v20 = vld [vmem:[#allocation5 + $0x268] ss:$16 sps:$4 sm:$0xff]   ;;  %v8114_v21 = vld [vmem:[#allocation5 + $0x284] ss:$16 sps:$4 sm:$0xff]  }
  0x89   :  { %v8117_v22 = vld [vmem:[#allocation5 + $0x28c] ss:$16 sps:$4 sm:$0xff]   ;;  %v8111_v23 = vld [vmem:[#allocation2 + $0x40] ss:$16 sps:$4 sm:$0xff]   ;;  %v8115_v25 = vld [vmem:[#allocation5 + $0x288] ss:$16 sps:$4 sm:$0xff]  }
  0x8a   :  { %1087 = vmatpush1.bf16.msra.mxu0 %v8029_v30  ;;  %1313 = vmatpush1.bf16.msra.mxu1 %v8030_v31  ;;  %v8112_v24 = vld [vmem:[#allocation5 + $0x280] ss:$16 sps:$4 sm:$0xff]   ;;  %v8120_v26 = vld [vmem:[#allocation5 + $0x2a4] ss:$16 sps:$4 sm:$0xff]   ;;  %v8123_v27 = vld [vmem:[#allocation5 + $0x2ac] ss:$16 sps:$4 sm:$0xff]  }
  0x8b   :  { %1088 = vmatprep.subr.bf16.mxu0 %v8031_v32  ;;  %1314 = vmatprep.subr.bf16.mxu1 %v8033_v33  ;;  %v8124_v28 = vld [vmem:[#allocation2 + $0x64] ss:$16 sps:$4 sm:$0xff]   ;;  %v8118_v29 = vld [vmem:[#allocation5 + $0x2a0] ss:$16 sps:$4 sm:$0xff]   ;;  %v8121_v30 = vld [vmem:[#allocation5 + $0x2a8] ss:$16 sps:$4 sm:$0xff]  }
  0x8c   :  { %v8129_v31 = vld [vmem:[#allocation5 + $0x2c4] ss:$16 sps:$4 sm:$0xff]   ;;  %v8132_v32 = vld [vmem:[#allocation5 + $0x2cc] ss:$16 sps:$4 sm:$0xff]   ;;  %v8126_v33 = vld [vmem:[#allocation2 + $0x60] ss:$16 sps:$4 sm:$0xff]  }
  0x8d   :  { %v8154_v48 = vld [vmem:[#allocation2 + $0xa4] ss:$16 sps:$4 sm:$0xff]  }
  0x8e   :  { %1089 = vmatpush1.bf16.msra.mxu0 %v8035_v34  ;;  %1315 = vmatpush1.bf16.msra.mxu1 %v8036_v35  ;;  %v8127_v34 = vld [vmem:[#allocation5 + $0x2c0] ss:$16 sps:$4 sm:$0xff]   ;;  %v8130_v35 = vld [vmem:[#allocation5 + $0x2c8] ss:$16 sps:$4 sm:$0xff]  }
  0x8f   :  { %1090 = vmatprep.subr.bf16.mxu0 %v8037_v36  ;;  %1316 = vmatprep.subr.bf16.mxu1 %v8039_v37  ;;  %v8135_v36 = vld [vmem:[#allocation5 + $0x2e4] ss:$16 sps:$4 sm:$0xff]   ;;  %v8138_v37 = vld [vmem:[#allocation5 + $0x2ec] ss:$16 sps:$4 sm:$0xff]  }
  0x92   :  { %1091 = vmatpush1.bf16.msra.mxu0 %v8041_v38  ;;  %1317 = vmatpush1.bf16.msra.mxu1 %v8042_v39  ;;  %v8139_v38 = vld [vmem:[#allocation2 + $0x84] ss:$16 sps:$4 sm:$0xff]   ;;  %v8133_v39 = vld [vmem:[#allocation5 + $0x2e0] ss:$16 sps:$4 sm:$0xff]  }
  0x93   :  { %1092 = vmatprep.subr.bf16.mxu0 %v8043_v40  ;;  %1318 = vmatprep.subr.bf16.mxu1 %v8045_v41  ;;  %v8136_v40 = vld [vmem:[#allocation5 + $0x2e8] ss:$16 sps:$4 sm:$0xff]   ;;  %v8144_v41 = vld [vmem:[#allocation5 + $0x304] ss:$16 sps:$4 sm:$0xff]  }
  0x96   :  { %1093 = vmatpush1.bf16.msra.mxu0 %v8047_v42  ;;  %1319 = vmatpush1.bf16.msra.mxu1 %v8048_v43  ;;  %v8147_v42 = vld [vmem:[#allocation5 + $0x30c] ss:$16 sps:$4 sm:$0xff]   ;;  %v8141_v43 = vld [vmem:[#allocation2 + $0x80] ss:$16 sps:$4 sm:$0xff]  }
  0x97   :  { %1094 = vmatprep.subr.bf16.mxu0 %v8049_v44  ;;  %1320 = vmatprep.subr.bf16.mxu1 %v8051_v45  ;;  %v8142_v44 = vld [vmem:[#allocation5 + $0x300] ss:$16 sps:$4 sm:$0xff]   ;;  %v8145_v45 = vld [vmem:[#allocation5 + $0x308] ss:$16 sps:$4 sm:$0xff]  }
  0x9a   :  { %1095 = vmatpush1.bf16.msra.mxu0 %v8053_v46  ;;  %1321 = vmatpush1.bf16.msra.mxu1 %v8054_v47  ;;  %v8150_v46 = vld [vmem:[#allocation5 + $0x324] ss:$16 sps:$4 sm:$0xff]   ;;  %v8153_v47 = vld [vmem:[#allocation5 + $0x32c] ss:$16 sps:$4 sm:$0xff]  }
  0x9b   :  { %1096 = vmatprep.subr.bf16.mxu0 %v8055_v49  ;;  %1322 = vmatprep.subr.bf16.mxu1 %v8057_v50  ;;  %v8148_v49 = vld [vmem:[#allocation5 + $0x320] ss:$16 sps:$4 sm:$0xff]   ;;  %v8151_v50 = vld [vmem:[#allocation5 + $0x328] ss:$16 sps:$4 sm:$0xff]  }
  0x9e   :  { %1097 = vmatpush1.bf16.msra.mxu0 %v8059_v51  ;;  %1323 = vmatpush1.bf16.msra.mxu1 %v8060_v52  ;;  %v8159_v51 = vld [vmem:[#allocation5 + $0x344] ss:$16 sps:$4 sm:$0xff]   ;;  %v8162_v52 = vld [vmem:[#allocation5 + $0x34c] ss:$16 sps:$4 sm:$0xff]  }
  0x9f   :  { %1098 = vmatprep.subr.bf16.mxu0 %v8061_v53  ;;  %1324 = vmatprep.subr.bf16.mxu1 %v8063_v54  ;;  %v8156_v53 = vld [vmem:[#allocation2 + $0xa0] ss:$16 sps:$4 sm:$0xff]  }
  0xa0   :  { %v8157_v54 = vld [vmem:[#allocation5 + $0x340] ss:$16 sps:$4 sm:$0xff]  }
  0xa2   :  { %1099 = vmatpush1.bf16.msra.mxu0 %v8065_v55  ;;  %1325 = vmatpush1.bf16.msra.mxu1 %v8066_v56  ;;  %v8160_v55 = vld [vmem:[#allocation5 + $0x348] ss:$16 sps:$4 sm:$0xff]   ;;  %v8165_v56 = vld [vmem:[#allocation5 + $0x364] ss:$16 sps:$4 sm:$0xff]  }
  0xa3   :  { %1100 = vmatprep.subr.bf16.mxu0 %v8067_v57  ;;  %1326 = vmatprep.subr.bf16.mxu1 %v8069_v58  ;;  %v8168_v57 = vld [vmem:[#allocation5 + $0x36c] ss:$16 sps:$4 sm:$0xff]   ;;  %v8169_v58 = vld [vmem:[#allocation2 + $0xc4] ss:$16 sps:$4 sm:$0xff]  }
  0xa6   :  { %1101 = vmatpush1.bf16.msra.mxu0 %v8071_v59  ;;  %1327 = vmatpush1.bf16.msra.mxu1 %v8072_v60  ;;  %v8163_v59 = vld [vmem:[#allocation5 + $0x360] ss:$16 sps:$4 sm:$0xff]   ;;  %v8166_v60 = vld [vmem:[#allocation5 + $0x368] ss:$16 sps:$4 sm:$0xff]  }
  0xa7   :  { %1102 = vmatprep.subr.bf16.mxu0 %v8073_v61  ;;  %1328 = vmatprep.subr.bf16.mxu1 %v8075_v62  ;;  %v8174_v61 = vld [vmem:[#allocation5 + $0x384] ss:$16 sps:$4 sm:$0xff]   ;;  %v8177_v62 = vld [vmem:[#allocation5 + $0x38c] ss:$16 sps:$4 sm:$0xff]  }
  0xaa   :  { %1103 = vmatpush1.bf16.msra.mxu0 %v8077_v63  ;;  %1329 = vmatpush1.bf16.msra.mxu1 %v8078_v0  ;;  %v8171_v63 = vld [vmem:[#allocation2 + $0xc0] ss:$16 sps:$4 sm:$0xff]  }
  0xab   :  { %1185 = vmatprep.subr.bf16.mxu0 %v8084_v1  ;;  %1411 = vmatprep.subr.bf16.mxu1 %v8087_v2  ;;  %v8172_v0 = vld [vmem:[#allocation5 + $0x380] ss:$16 sps:$4 sm:$0xff]   ;;  %v8175_v1 = vld [vmem:[#allocation5 + $0x388] ss:$16 sps:$4 sm:$0xff]   ;;  %v8180_v2 = vld [vmem:[#allocation5 + $0x3a4] ss:$16 sps:$4 sm:$0xff]  }
  0xad   :  { %1105 = vmatmul.mubr.bf16.vlgmr.msra.gmra.mrb[0].mxu0 %v8079_v3  ;;  %1331 = vmatmul.mubr.bf16.vlgmr.msra.gmra.mrb[0].mxu1 %v8079_v3  ;;  %v8183_v3 = vld [vmem:[#allocation5 + $0x3ac] ss:$16 sps:$4 sm:$0xff]  }
  0xae   :  { %1186 = vmatpush1.bf16.msra.mxu0 %v8082_v4  ;;  %1412 = vmatpush1.bf16.msra.mxu1 %v8085_v5  ;;  %v8184_v4 = vld [vmem:[#allocation2 + $0xe4] ss:$16 sps:$4 sm:$0xff]   ;;  %v8178_v5 = vld [vmem:[#allocation5 + $0x3a0] ss:$16 sps:$4 sm:$0xff]  }
  0xaf   :  { %1187 = vmatprep.subr.bf16.mxu0 %v8090_v6  ;;  %1413 = vmatprep.subr.bf16.mxu1 %v8093_v7  ;;  %v8181_v6 = vld [vmem:[#allocation5 + $0x3a8] ss:$16 sps:$4 sm:$0xff]   ;;  %v8189_v7 = vld [vmem:[#allocation5 + $0x3c4] ss:$16 sps:$4 sm:$0xff]  }
  0xb0   :  { %1114 = vmatprep.mubr.bf16.mxu0 %v8094_v8  ;;  %1340 = vmatprep.mubr.bf16.mxu1 %v8094_v8  ;;  %v8192_v8 = vld [vmem:[#allocation5 + $0x3cc] ss:$16 sps:$4 sm:$0xff]  }
  0xb2   :  { %1188 = vmatpush1.bf16.msra.mxu0 %v8088_v9  ;;  %1414 = vmatpush1.bf16.msra.mxu1 %v8091_v10  ;;  %v8186_v9 = vld [vmem:[#allocation2 + $0xe0] ss:$16 sps:$4 sm:$0xff]  }
  0xb3   :  { %1189 = vmatprep.subr.bf16.mxu0 %v8099_v11  ;;  %1415 = vmatprep.subr.bf16.mxu1 %v8102_v12  ;;  %v8187_v10 = vld [vmem:[#allocation5 + $0x3c0] ss:$16 sps:$4 sm:$0xff]   ;;  %v8190_v11 = vld [vmem:[#allocation5 + $0x3c8] ss:$16 sps:$4 sm:$0xff]   ;;  %v8195_v12 = vld [vmem:[#allocation5 + $0x3e4] ss:$16 sps:$4 sm:$0xff]  }
  0xb5   :  { %1115 = vmatmul.mubr.bf16.gmra.mrb[4].mxu0 %v8096_v13  ;;  %1341 = vmatmul.mubr.bf16.gmra.mrb[4].mxu1 %v8096_v13  ;;  %v8198_v13 = vld [vmem:[#allocation5 + $0x3ec] ss:$16 sps:$4 sm:$0xff]  }
  0xb6   :  { %1190 = vmatpush1.bf16.msra.mxu0 %v8097_v14  ;;  %1416 = vmatpush1.bf16.msra.mxu1 %v8100_v15  ;;  %v8201_v14 = vld [vmem:[#allocation2 + $0xc] ss:$16 sps:$4 sm:$0xff]   ;;  %v8193_v15 = vld [vmem:[#allocation5 + $0x3e0] ss:$16 sps:$4 sm:$0xff]  }
  0xb7   :  { %1191 = vmatprep.subr.bf16.mxu0 %v8105_v16  ;;  %1417 = vmatprep.subr.bf16.mxu1 %v8108_v17  ;;  %v8196_v16 = vld [vmem:[#allocation5 + $0x3e8] ss:$16 sps:$4 sm:$0xff]   ;;  %v8225_v17 = vld [vmem:[#allocation7 + $0x4] ss:$16 sps:$4 sm:$0xff]  }
  0xb8   :  { %1124 = vmatprep.mubr.bf16.mxu0 %v8109_v18  ;;  %1350 = vmatprep.mubr.bf16.mxu1 %v8109_v18  ;;  %v8228_v18 = vld [vmem:[#allocation7 + $0xc] ss:$16 sps:$4 sm:$0xff]  }
  0xba   :  { %1192 = vmatpush1.bf16.msra.mxu0 %v8103_v19  ;;  %1418 = vmatpush1.bf16.msra.mxu1 %v8106_v20  ;;  %v8199_v19 = vld [vmem:[#allocation2 + $0x8] ss:$16 sps:$4 sm:$0xff]   ;;  %v8202_v20 = vld [vmem:[#allocation2 + $0x2c] ss:$16 sps:$4 sm:$0xff]  }
  0xbb   :  { %1193 = vmatprep.subr.bf16.mxu0 %v8114_v21  ;;  %1419 = vmatprep.subr.bf16.mxu1 %v8117_v22  ;;  %v8223_v21 = vld [vmem:[#allocation7] ss:$16 sps:$4 sm:$0xff]   ;;  %v8226_v22 = vld [vmem:[#allocation7 + $0x8] ss:$16 sps:$4 sm:$0xff]  }
  0xbd   :  { %1125 = vmatmul.mubr.bf16.gmra.mrb[8].mxu0 %v8111_v23  ;;  %1351 = vmatmul.mubr.bf16.gmra.mrb[8].mxu1 %v8111_v23  ;;  %v8231_v23 = vld [vmem:[#allocation7 + $0x24] ss:$16 sps:$4 sm:$0xff]  }
  0xbe   :  { %1194 = vmatpush1.bf16.msra.mxu0 %v8112_v24  ;;  %1420 = vmatpush1.bf16.msra.mxu1 %v8115_v25  ;;  %v8234_v24 = vld [vmem:[#allocation7 + $0x2c] ss:$16 sps:$4 sm:$0xff]   ;;  %v8229_v25 = vld [vmem:[#allocation7 + $0x20] ss:$16 sps:$4 sm:$0xff]  }
  0xbf   :  { %1195 = vmatprep.subr.bf16.mxu0 %v8120_v26  ;;  %1421 = vmatprep.subr.bf16.mxu1 %v8123_v27  ;;  %v8232_v26 = vld [vmem:[#allocation7 + $0x28] ss:$16 sps:$4 sm:$0xff]   ;;  %v8237_v27 = vld [vmem:[#allocation7 + $0x44] ss:$16 sps:$4 sm:$0xff]  }
  0xc0   :  { %1134 = vmatprep.mubr.bf16.mxu0 %v8124_v28  ;;  %1360 = vmatprep.mubr.bf16.mxu1 %v8124_v28  ;;  %v8240_v28 = vld [vmem:[#allocation7 + $0x4c] ss:$16 sps:$4 sm:$0xff]  }
  0xc2   :  { %1196 = vmatpush1.bf16.msra.mxu0 %v8118_v29  ;;  %1422 = vmatpush1.bf16.msra.mxu1 %v8121_v30  ;;  %v8204_v29 = vld [vmem:[#allocation2 + $0x28] ss:$16 sps:$4 sm:$0xff]   ;;  %v8205_v30 = vld [vmem:[#allocation2 + $0x4c] ss:$16 sps:$4 sm:$0xff]  }
  0xc3   :  { %1197 = vmatprep.subr.bf16.mxu0 %v8129_v31  ;;  %1423 = vmatprep.subr.bf16.mxu1 %v8132_v32  ;;  %v8235_v31 = vld [vmem:[#allocation7 + $0x40] ss:$16 sps:$4 sm:$0xff]   ;;  %v8238_v32 = vld [vmem:[#allocation7 + $0x48] ss:$16 sps:$4 sm:$0xff]  }
  0xc5   :  { %1135 = vmatmul.mubr.bf16.gmra.mrb[12].mxu0 %v8126_v33  ;;  %1361 = vmatmul.mubr.bf16.gmra.mrb[12].mxu1 %v8126_v33  ;;  %v8243_v33 = vld [vmem:[#allocation7 + $0x64] ss:$16 sps:$4 sm:$0xff]  }
  0xc6   :  { %1198 = vmatpush1.bf16.msra.mxu0 %v8127_v34  ;;  %1424 = vmatpush1.bf16.msra.mxu1 %v8130_v35  ;;  %v8246_v34 = vld [vmem:[#allocation7 + $0x6c] ss:$16 sps:$4 sm:$0xff]   ;;  %v8241_v35 = vld [vmem:[#allocation7 + $0x60] ss:$16 sps:$4 sm:$0xff]  }
  0xc7   :  { %1199 = vmatprep.subr.bf16.mxu0 %v8135_v36  ;;  %1425 = vmatprep.subr.bf16.mxu1 %v8138_v37  ;;  %v8207_v36 = vld [vmem:[#allocation2 + $0x48] ss:$16 sps:$4 sm:$0xff]  }
  0xc8   :  { %1144 = vmatprep.mubr.bf16.mxu0 %v8139_v38  ;;  %1370 = vmatprep.mubr.bf16.mxu1 %v8139_v38  ;;  %v8244_v37 = vld [vmem:[#allocation7 + $0x68] ss:$16 sps:$4 sm:$0xff]   ;;  %v8208_v38 = vld [vmem:[#allocation2 + $0x6c] ss:$16 sps:$4 sm:$0xff]  }
  0xca   :  { %1200 = vmatpush1.bf16.msra.mxu0 %v8133_v39  ;;  %1426 = vmatpush1.bf16.msra.mxu1 %v8136_v40  ;;  %v8249_v39 = vld [vmem:[#allocation7 + $0x84] ss:$16 sps:$4 sm:$0xff]   ;;  %v8252_v40 = vld [vmem:[#allocation7 + $0x8c] ss:$16 sps:$4 sm:$0xff]  }
  0xcb   :  { %1201 = vmatprep.subr.bf16.mxu0 %v8144_v41  ;;  %1427 = vmatprep.subr.bf16.mxu1 %v8147_v42  ;;  %v8247_v41 = vld [vmem:[#allocation7 + $0x80] ss:$16 sps:$4 sm:$0xff]   ;;  %v8250_v42 = vld [vmem:[#allocation7 + $0x88] ss:$16 sps:$4 sm:$0xff]  }
  0xcd   :  { %1145 = vmatmul.mubr.bf16.gmra.mrb[16].mxu0 %v8141_v43  ;;  %1371 = vmatmul.mubr.bf16.gmra.mrb[16].mxu1 %v8141_v43  ;;  %v8255_v43 = vld [vmem:[#allocation7 + $0xa4] ss:$16 sps:$4 sm:$0xff]  }
  0xce   :  { %1202 = vmatpush1.bf16.msra.mxu0 %v8142_v44  ;;  %1428 = vmatpush1.bf16.msra.mxu1 %v8145_v45  ;;  %v8258_v44 = vld [vmem:[#allocation7 + $0xac] ss:$16 sps:$4 sm:$0xff]   ;;  %v8253_v45 = vld [vmem:[#allocation7 + $0xa0] ss:$16 sps:$4 sm:$0xff]  }
  0xcf   :  { %1203 = vmatprep.subr.bf16.mxu0 %v8150_v46  ;;  %1429 = vmatprep.subr.bf16.mxu1 %v8153_v47  ;;  %v8256_v46 = vld [vmem:[#allocation7 + $0xa8] ss:$16 sps:$4 sm:$0xff]   ;;  %v8261_v47 = vld [vmem:[#allocation7 + $0xc4] ss:$16 sps:$4 sm:$0xff]  }
  0xd0   :  { %1154 = vmatprep.mubr.bf16.mxu0 %v8154_v48  ;;  %1380 = vmatprep.mubr.bf16.mxu1 %v8154_v48  ;;  %v8264_v48 = vld [vmem:[#allocation7 + $0xcc] ss:$16 sps:$4 sm:$0xff]  }
  0xd2   :  { %1204 = vmatpush1.bf16.msra.mxu0 %v8148_v49  ;;  %1430 = vmatpush1.bf16.msra.mxu1 %v8151_v50  ;;  %v8210_v49 = vld [vmem:[#allocation2 + $0x68] ss:$16 sps:$4 sm:$0xff]   ;;  %v8211_v50 = vld [vmem:[#allocation2 + $0x8c] ss:$16 sps:$4 sm:$0xff]  }
  0xd3   :  { %1205 = vmatprep.subr.bf16.mxu0 %v8159_v51  ;;  %1431 = vmatprep.subr.bf16.mxu1 %v8162_v52  ;;  %v8259_v51 = vld [vmem:[#allocation7 + $0xc0] ss:$16 sps:$4 sm:$0xff]   ;;  %v8262_v52 = vld [vmem:[#allocation7 + $0xc8] ss:$16 sps:$4 sm:$0xff]  }
  0xd5   :  { %1155 = vmatmul.mubr.bf16.gmra.mrb[20].mxu0 %v8156_v53  ;;  %1381 = vmatmul.mubr.bf16.gmra.mrb[20].mxu1 %v8156_v53  ;;  %v8267_v53 = vld [vmem:[#allocation7 + $0xe4] ss:$16 sps:$4 sm:$0xff]  }
  0xd6   :  { %1206 = vmatpush1.bf16.msra.mxu0 %v8157_v54  ;;  %1432 = vmatpush1.bf16.msra.mxu1 %v8160_v55  ;;  %v8270_v54 = vld [vmem:[#allocation7 + $0xec] ss:$16 sps:$4 sm:$0xff]   ;;  %v8265_v55 = vld [vmem:[#allocation7 + $0xe0] ss:$16 sps:$4 sm:$0xff]  }
  0xd7   :  { %1207 = vmatprep.subr.bf16.mxu0 %v8165_v56  ;;  %1433 = vmatprep.subr.bf16.mxu1 %v8168_v57  ;;  %v8268_v56 = vld [vmem:[#allocation7 + $0xe8] ss:$16 sps:$4 sm:$0xff]   ;;  %v8273_v57 = vld [vmem:[#allocation7 + $0x104] ss:$16 sps:$4 sm:$0xff]  }
  0xd8   :  { %1164 = vmatprep.mubr.bf16.mxu0 %v8169_v58  ;;  %1390 = vmatprep.mubr.bf16.mxu1 %v8169_v58  ;;  %v8276_v58 = vld [vmem:[#allocation7 + $0x10c] ss:$16 sps:$4 sm:$0xff]  }
  0xda   :  { %1208 = vmatpush1.bf16.msra.mxu0 %v8163_v59  ;;  %1434 = vmatpush1.bf16.msra.mxu1 %v8166_v60  ;;  %v8213_v59 = vld [vmem:[#allocation2 + $0x88] ss:$16 sps:$4 sm:$0xff]   ;;  %v8214_v60 = vld [vmem:[#allocation2 + $0xac] ss:$16 sps:$4 sm:$0xff]  }
  0xdb   :  { %1209 = vmatprep.subr.bf16.mxu0 %v8174_v61  ;;  %1435 = vmatprep.subr.bf16.mxu1 %v8177_v62  ;;  %v8271_v61 = vld [vmem:[#allocation7 + $0x100] ss:$16 sps:$4 sm:$0xff]   ;;  %v8274_v62 = vld [vmem:[#allocation7 + $0x108] ss:$16 sps:$4 sm:$0xff]  }
  0xdd   :  { %1165 = vmatmul.mubr.bf16.gmra.mrb[24].mxu0 %v8171_v63  ;;  %1391 = vmatmul.mubr.bf16.gmra.mrb[24].mxu1 %v8171_v63  ;;  %v8279_v63 = vld [vmem:[#allocation7 + $0x124] ss:$16 sps:$4 sm:$0xff]  }
  0xde   :  { %1210 = vmatpush1.bf16.msra.mxu0 %v8172_v0  ;;  %1436 = vmatpush1.bf16.msra.mxu1 %v8175_v1  ;;  %v8282_v0 = vld [vmem:[#allocation7 + $0x12c] ss:$16 sps:$4 sm:$0xff]   ;;  %v8277_v1 = vld [vmem:[#allocation7 + $0x120] ss:$16 sps:$4 sm:$0xff]  }
  0xdf   :  { %1211 = vmatprep.subr.bf16.mxu0 %v8180_v2  ;;  %1437 = vmatprep.subr.bf16.mxu1 %v8183_v3  ;;  %v8280_v2 = vld [vmem:[#allocation7 + $0x128] ss:$16 sps:$4 sm:$0xff]   ;;  %v8285_v3 = vld [vmem:[#allocation7 + $0x144] ss:$16 sps:$4 sm:$0xff]  }
  0xe0   :  { %1174 = vmatprep.mubr.bf16.mxu0 %v8184_v4  ;;  %1400 = vmatprep.mubr.bf16.mxu1 %v8184_v4  ;;  %v8288_v4 = vld [vmem:[#allocation7 + $0x14c] ss:$16 sps:$4 sm:$0xff]  }
  0xe2   :  { %1212 = vmatpush1.bf16.msra.mxu0 %v8178_v5  ;;  %1438 = vmatpush1.bf16.msra.mxu1 %v8181_v6  ;;  %v8216_v5 = vld [vmem:[#allocation2 + $0xa8] ss:$16 sps:$4 sm:$0xff]   ;;  %v8217_v6 = vld [vmem:[#allocation2 + $0xcc] ss:$16 sps:$4 sm:$0xff]  }
  0xe3   :  { %1213 = vmatprep.subr.bf16.mxu0 %v8189_v7  ;;  %1439 = vmatprep.subr.bf16.mxu1 %v8192_v8  ;;  %v8283_v7 = vld [vmem:[#allocation7 + $0x140] ss:$16 sps:$4 sm:$0xff]   ;;  %v8286_v8 = vld [vmem:[#allocation7 + $0x148] ss:$16 sps:$4 sm:$0xff]  }
  0xe5   :  { %1175 = vmatmul.mubr.bf16.gmra.mrb[28].mxu0 %v8186_v9  ;;  %1401 = vmatmul.mubr.bf16.gmra.mrb[28].mxu1 %v8186_v9  ;;  %v8291_v9 = vld [vmem:[#allocation7 + $0x164] ss:$16 sps:$4 sm:$0xff]  }
  0xe6   :  { %1214 = vmatpush1.bf16.msra.mxu0 %v8187_v10  ;;  %1440 = vmatpush1.bf16.msra.mxu1 %v8190_v11  ;;  %v8294_v10 = vld [vmem:[#allocation7 + $0x16c] ss:$16 sps:$4 sm:$0xff]   ;;  %v8289_v11 = vld [vmem:[#allocation7 + $0x160] ss:$16 sps:$4 sm:$0xff]  }
  0xe7   :  { %1215 = vmatprep.subr.bf16.mxu0 %v8195_v12  ;;  %1441 = vmatprep.subr.bf16.mxu1 %v8198_v13  ;;  %v8292_v12 = vld [vmem:[#allocation7 + $0x168] ss:$16 sps:$4 sm:$0xff]   ;;  %v8297_v13 = vld [vmem:[#allocation7 + $0x184] ss:$16 sps:$4 sm:$0xff]  }
  0xe8   :  { %1217 = vmatprep.mubr.bf16.mxu0 %v8201_v14  ;;  %1443 = vmatprep.mubr.bf16.mxu1 %v8201_v14  ;;  %v8300_v14 = vld [vmem:[#allocation7 + $0x18c] ss:$16 sps:$4 sm:$0xff]  }
  0xea   :  { %1216 = vmatpush1.bf16.msra.mxu0 %v8193_v15  ;;  %1442 = vmatpush1.bf16.msra.mxu1 %v8196_v16  ;;  %v8219_v15 = vld [vmem:[#allocation2 + $0xc8] ss:$16 sps:$4 sm:$0xff]   ;;  %v8220_v16 = vld [vmem:[#allocation2 + $0xec] ss:$16 sps:$4 sm:$0xff]  }
  0xeb   :  { %2388 = vmatprep.subr.bf16.mxu0 %v8225_v17  ;;  %2614 = vmatprep.subr.bf16.mxu1 %v8228_v18  ;;  %v8295_v17 = vld [vmem:[#allocation7 + $0x180] ss:$16 sps:$4 sm:$0xff]   ;;  %v8298_v18 = vld [vmem:[#allocation7 + $0x188] ss:$16 sps:$4 sm:$0xff]  }
  0xed   :  { %1218 = vmatmul.mubr.bf16.vlgmr.msra.gmra.mrb[0].mxu0 %v8199_v19  ;;  %1444 = vmatmul.mubr.bf16.vlgmr.msra.gmra.mrb[0].mxu1 %v8199_v19  ;;  %v8303_v19 = vld [vmem:[#allocation7 + $0x1a4] ss:$16 sps:$4 sm:$0xff]  }
  0xee   :  { %1227 = vmatprep.mubr.bf16.mxu0 %v8202_v20  ;;  %1453 = vmatprep.mubr.bf16.mxu1 %v8202_v20  ;;  %v8306_v20 = vld [vmem:[#allocation7 + $0x1ac] ss:$16 sps:$4 sm:$0xff]  }
  0xef   :  { %2389 = vmatpush1.bf16.msra.mxu0 %v8223_v21  ;;  %2615 = vmatpush1.bf16.msra.mxu1 %v8226_v22  ;;  %v8301_v21 = vld [vmem:[#allocation7 + $0x1a0] ss:$16 sps:$4 sm:$0xff]   ;;  %v8304_v22 = vld [vmem:[#allocation7 + $0x1a8] ss:$16 sps:$4 sm:$0xff]  }
  0xf0   :  { %2390 = vmatprep.subr.bf16.mxu0 %v8231_v23  ;;  %2616 = vmatprep.subr.bf16.mxu1 %v8234_v24  ;;  %v8222_v23 = vld [vmem:[#allocation2 + $0xe8] ss:$16 sps:$4 sm:$0xff]   ;;  %v8309_v24 = vld [vmem:[#allocation7 + $0x1c4] ss:$16 sps:$4 sm:$0xff]  }
  0xf3   :  { %2391 = vmatpush1.bf16.msra.mxu0 %v8229_v25  ;;  %2617 = vmatpush1.bf16.msra.mxu1 %v8232_v26  ;;  %v8312_v25 = vld [vmem:[#allocation7 + $0x1cc] ss:$16 sps:$4 sm:$0xff]   ;;  %v8307_v26 = vld [vmem:[#allocation7 + $0x1c0] ss:$16 sps:$4 sm:$0xff]  }
  0xf4   :  { %2392 = vmatprep.subr.bf16.mxu0 %v8237_v27  ;;  %2618 = vmatprep.subr.bf16.mxu1 %v8240_v28  ;;  %v8310_v27 = vld [vmem:[#allocation7 + $0x1c8] ss:$16 sps:$4 sm:$0xff]   ;;  %v8315_v28 = vld [vmem:[#allocation7 + $0x1e4] ss:$16 sps:$4 sm:$0xff]  }
  0xf5   :  { %1228 = vmatmul.mubr.bf16.gmra.mrb[4].mxu0 %v8204_v29  ;;  %1454 = vmatmul.mubr.bf16.gmra.mrb[4].mxu1 %v8204_v29  ;;  %v8318_v29 = vld [vmem:[#allocation7 + $0x1ec] ss:$16 sps:$4 sm:$0xff]  }
  0xf6   :  { %1237 = vmatprep.mubr.bf16.mxu0 %v8205_v30  ;;  %1463 = vmatprep.mubr.bf16.mxu1 %v8205_v30  ;;  %v8313_v30 = vld [vmem:[#allocation7 + $0x1e0] ss:$16 sps:$4 sm:$0xff]  }
  0xf7   :  { %2393 = vmatpush1.bf16.msra.mxu0 %v8235_v31  ;;  %2619 = vmatpush1.bf16.msra.mxu1 %v8238_v32  ;;  %v8316_v31 = vld [vmem:[#allocation7 + $0x1e8] ss:$16 sps:$4 sm:$0xff]   ;;  %v8321_v32 = vld [vmem:[#allocation7 + $0x204] ss:$16 sps:$4 sm:$0xff]  }
  0xf8   :  { %2394 = vmatprep.subr.bf16.mxu0 %v8243_v33  ;;  %2620 = vmatprep.subr.bf16.mxu1 %v8246_v34  ;;  %v8324_v33 = vld [vmem:[#allocation7 + $0x20c] ss:$16 sps:$4 sm:$0xff]  }
  0xfb   :  { %2395 = vmatpush1.bf16.msra.mxu0 %v8241_v35  ;;  %2621 = vmatpush1.bf16.msra.mxu1 %v8244_v37 }
  0xfc   :  { %2396 = vmatprep.subr.bf16.mxu0 %v8249_v39  ;;  %2622 = vmatprep.subr.bf16.mxu1 %v8252_v40 }
  0xfd   :  { %1238 = vmatmul.mubr.bf16.gmra.mrb[8].mxu0 %v8207_v36  ;;  %1464 = vmatmul.mubr.bf16.gmra.mrb[8].mxu1 %v8207_v36 }
  0xfe   :  { %1247 = vmatprep.mubr.bf16.mxu0 %v8208_v38  ;;  %1473 = vmatprep.mubr.bf16.mxu1 %v8208_v38 }
  0xff   :  { %2397 = vmatpush1.bf16.msra.mxu0 %v8247_v41  ;;  %2623 = vmatpush1.bf16.msra.mxu1 %v8250_v42 }
 0x100   :  { %2398 = vmatprep.subr.bf16.mxu0 %v8255_v43  ;;  %2624 = vmatprep.subr.bf16.mxu1 %v8258_v44 }
 0x103   :  { %2399 = vmatpush1.bf16.msra.mxu0 %v8253_v45  ;;  %2625 = vmatpush1.bf16.msra.mxu1 %v8256_v46 }
 0x104   :  { %2400 = vmatprep.subr.bf16.mxu0 %v8261_v47  ;;  %2626 = vmatprep.subr.bf16.mxu1 %v8264_v48 }
 0x105   :  { %1248 = vmatmul.mubr.bf16.gmra.mrb[12].mxu0 %v8210_v49  ;;  %1474 = vmatmul.mubr.bf16.gmra.mrb[12].mxu1 %v8210_v49 }
 0x106   :  { %1257 = vmatprep.mubr.bf16.mxu0 %v8211_v50  ;;  %1483 = vmatprep.mubr.bf16.mxu1 %v8211_v50 }
 0x107   :  { %2401 = vmatpush1.bf16.msra.mxu0 %v8259_v51  ;;  %2627 = vmatpush1.bf16.msra.mxu1 %v8262_v52 }
 0x108   :  { %2402 = vmatprep.subr.bf16.mxu0 %v8267_v53  ;;  %2628 = vmatprep.subr.bf16.mxu1 %v8270_v54  ;;  %v8319_v54 = vld [vmem:[#allocation7 + $0x200] ss:$16 sps:$4 sm:$0xff]  }
 0x10b   :  { %2403 = vmatpush1.bf16.msra.mxu0 %v8265_v55  ;;  %2629 = vmatpush1.bf16.msra.mxu1 %v8268_v56  ;;  %v8322_v55 = vld [vmem:[#allocation7 + $0x208] ss:$16 sps:$4 sm:$0xff]   ;;  %v8327_v56 = vld [vmem:[#allocation7 + $0x224] ss:$16 sps:$4 sm:$0xff]  }
 0x10c   :  { %2404 = vmatprep.subr.bf16.mxu0 %v8273_v57  ;;  %2630 = vmatprep.subr.bf16.mxu1 %v8276_v58  ;;  %v8330_v57 = vld [vmem:[#allocation7 + $0x22c] ss:$16 sps:$4 sm:$0xff]  }
 0x10d   :  { %1258 = vmatmul.mubr.bf16.gmra.mrb[16].mxu0 %v8213_v59  ;;  %1484 = vmatmul.mubr.bf16.gmra.mrb[16].mxu1 %v8213_v59 }
 0x10e   :  { %1267 = vmatprep.mubr.bf16.mxu0 %v8214_v60  ;;  %1493 = vmatprep.mubr.bf16.mxu1 %v8214_v60 }
 0x10f   :  { %2405 = vmatpush1.bf16.msra.mxu0 %v8271_v61  ;;  %2631 = vmatpush1.bf16.msra.mxu1 %v8274_v62  ;;  %v8325_v62 = vld [vmem:[#allocation7 + $0x220] ss:$16 sps:$4 sm:$0xff]  }
 0x110   :  { %2406 = vmatprep.subr.bf16.mxu0 %v8279_v63  ;;  %2632 = vmatprep.subr.bf16.mxu1 %v8282_v0  ;;  %v8328_v63 = vld [vmem:[#allocation7 + $0x228] ss:$16 sps:$4 sm:$0xff]  }
 0x113   :  { %2407 = vmatpush1.bf16.msra.mxu0 %v8277_v1  ;;  %2633 = vmatpush1.bf16.msra.mxu1 %v8280_v2  ;;  %v8333_v2 = vld [vmem:[#allocation7 + $0x244] ss:$16 sps:$4 sm:$0xff]  }
 0x114   :  { %2408 = vmatprep.subr.bf16.mxu0 %v8285_v3  ;;  %2634 = vmatprep.subr.bf16.mxu1 %v8288_v4  ;;  %v8336_v3 = vld [vmem:[#allocation7 + $0x24c] ss:$16 sps:$4 sm:$0xff]  }
 0x115   :  { %1268 = vmatmul.mubr.bf16.gmra.mrb[20].mxu0 %v8216_v5  ;;  %1494 = vmatmul.mubr.bf16.gmra.mrb[20].mxu1 %v8216_v5 }
 0x116   :  { %1277 = vmatprep.mubr.bf16.mxu0 %v8217_v6  ;;  %1503 = vmatprep.mubr.bf16.mxu1 %v8217_v6 }
 0x117   :  { %2409 = vmatpush1.bf16.msra.mxu0 %v8283_v7  ;;  %2635 = vmatpush1.bf16.msra.mxu1 %v8286_v8 }
 0x118   :  { %2410 = vmatprep.subr.bf16.mxu0 %v8291_v9  ;;  %2636 = vmatprep.subr.bf16.mxu1 %v8294_v10 }
 0x11b   :  { %2411 = vmatpush1.bf16.msra.mxu0 %v8289_v11  ;;  %2637 = vmatpush1.bf16.msra.mxu1 %v8292_v12 }
 0x11c   :  { %2412 = vmatprep.subr.bf16.mxu0 %v8297_v13  ;;  %2638 = vmatprep.subr.bf16.mxu1 %v8300_v14 }
 0x11d   :  { %1278 = vmatmul.mubr.bf16.gmra.mrb[24].mxu0 %v8219_v15  ;;  %1504 = vmatmul.mubr.bf16.gmra.mrb[24].mxu1 %v8219_v15 }
 0x11e   :  { %1287 = vmatprep.mubr.bf16.mxu0 %v8220_v16  ;;  %1513 = vmatprep.mubr.bf16.mxu1 %v8220_v16 }
 0x11f   :  { %2413 = vmatpush1.bf16.msra.mxu0 %v8295_v17  ;;  %2639 = vmatpush1.bf16.msra.mxu1 %v8298_v18  ;;  %v8331_v18 = vld [vmem:[#allocation7 + $0x240] ss:$16 sps:$4 sm:$0xff]  }
 0x120   :  { %2414 = vmatprep.subr.bf16.mxu0 %v8303_v19  ;;  %2640 = vmatprep.subr.bf16.mxu1 %v8306_v20  ;;  %v8334_v19 = vld [vmem:[#allocation7 + $0x248] ss:$16 sps:$4 sm:$0xff]   ;;  %v8339_v20 = vld [vmem:[#allocation7 + $0x264] ss:$16 sps:$4 sm:$0xff]  }
 0x123   :  { %2415 = vmatpush1.bf16.msra.mxu0 %v8301_v21  ;;  %2641 = vmatpush1.bf16.msra.mxu1 %v8304_v22  ;;  %v8342_v21 = vld [vmem:[#allocation7 + $0x26c] ss:$16 sps:$4 sm:$0xff]  }
 0x124   :  { %2416 = vmatprep.subr.bf16.mxu0 %v8309_v24  ;;  %2642 = vmatprep.subr.bf16.mxu1 %v8312_v25 }
 0x125   :  { %1288 = vmatmul.mubr.bf16.gmra.mrb[28].mxu0 %v8222_v23  ;;  %1514 = vmatmul.mubr.bf16.gmra.mrb[28].mxu1 %v8222_v23 }
 0x127   :  { %2417 = vmatpush1.bf16.msra.mxu0 %v8307_v26  ;;  %2643 = vmatpush1.bf16.msra.mxu1 %v8310_v27  ;;  %v8337_v26 = vld [vmem:[#allocation7 + $0x260] ss:$16 sps:$4 sm:$0xff]   ;;  %v8340_v27 = vld [vmem:[#allocation7 + $0x268] ss:$16 sps:$4 sm:$0xff]  }
 0x128   :  { %2418 = vmatprep.subr.bf16.mxu0 %v8315_v28  ;;  %2644 = vmatprep.subr.bf16.mxu1 %v8318_v29 }
 0x12b   :  { %2419 = vmatpush1.bf16.msra.mxu0 %v8313_v30  ;;  %2645 = vmatpush1.bf16.msra.mxu1 %v8316_v31  ;;  %v8345_v30 = vld [vmem:[#allocation7 + $0x284] ss:$16 sps:$4 sm:$0xff]   ;;  %v8348_v31 = vld [vmem:[#allocation7 + $0x28c] ss:$16 sps:$4 sm:$0xff]  }
 0x12c   :  { %2501 = vmatprep.subr.bf16.mxu0 %v8321_v32  ;;  %2727 = vmatprep.subr.bf16.mxu1 %v8324_v33 }
 0x1c0   :  { %v1219_v34 = vpop.f32.mrb[0].mxu0  ;;  %v1445_v35 = vpop.f32.mrb[0].mxu1 }
 0x1c1   :  { %v1221_v36 = vpop.f32.mrb[1].mxu0  ;;  %v1447_v37 = vpop.f32.mrb[1].mxu1  ;;  %v1524_v40 = vmax.f32 %v1219_v34, 0.0  ;;  %v1526_v41 = vmax.f32 %v1445_v35, 0.0 }
 0x1c2   :  { %v1223_v38 = vpop.f32.mrb[2].mxu0  ;;  %v1449_v39 = vpop.f32.mrb[2].mxu1  ;;  %v1525_v46 = vmax.f32 %v1221_v36, 0.0  ;;  %v1527_v47 = vmax.f32 %v1447_v37, 0.0 }
 0x1c3   :  { %v1528_v42 = vmax.f32 %v1223_v38, 0.0  ;;  %v1530_v43 = vmax.f32 %v1449_v39, 0.0  ;;  %v1225_v44 = vpop.f32.mrb[3].mxu0  ;;  %v1451_v45 = vpop.f32.mrb[3].mxu1 }
 0x1c4   :  { %v1529_v48 = vmax.f32 %v1225_v44, 0.0  ;;  %v1531_v49 = vmax.f32 %v1451_v45, 0.0 }
 0x1c5   :  { %v1588_v50 = vpack.c.bf16 %v1528_v42, %v1524_v40  ;;  %v9322_v51 = vpack.c.bf16 %v1530_v43, %v1526_v41 }
 0x1c6   :  { %v1589_v52 = vpack.c.bf16 %v1529_v48, %v1525_v46  ;;  %v9324_v53 = vpack.c.bf16 %v1531_v49, %v1527_v47  ;;  %v8343_v46 = vld [vmem:[#allocation7 + $0x280] ss:$16 sps:$4 sm:$0xff]   ;;  %v8346_v47 = vld [vmem:[#allocation7 + $0x288] ss:$16 sps:$4 sm:$0xff]   ;;  %v8351_v48 = vld [vmem:[#allocation7 + $0x2a4] ss:$16 sps:$4 sm:$0xff]  }
 0x1c7   :  { %v8354_v49 = vld [vmem:[#allocation7 + $0x2ac] ss:$16 sps:$4 sm:$0xff]  }
 0x1c8   :  { %v1229_v58 = vpop.f32.mrb[4].mxu0  ;;  %v1455_v59 = vpop.f32.mrb[4].mxu1  ;;  %2420 = vmatprep.mubr.bf16.mxu0 %v1589_v52  ;;  %2646 = vmatprep.mubr.bf16.mxu1 %v1589_v52 }
 0x1c9   :  { %v1231_v60 = vpop.f32.mrb[5].mxu0  ;;  %v1457_v61 = vpop.f32.mrb[5].mxu1  ;;  %2421 = vmatmul.mubr.bf16.vlgmr.msra.gmra.mrb[32].mxu0 %v1588_v50  ;;  %2647 = vmatmul.mubr.bf16.vlgmr.msra.gmra.mrb[32].mxu1 %v1588_v50  ;;  %v1532_v4 = vmax.f32 %v1229_v58, 0.0  ;;  %v1534_v5 = vmax.f32 %v1455_v59, 0.0 }
 0x1ca   :  { %v1233_v0 = vpop.f32.mrb[6].mxu0  ;;  %v1459_v1 = vpop.f32.mrb[6].mxu1  ;;  %2502 = vmatpush1.bf16.msra.mxu0 %v8319_v54  ;;  %2728 = vmatpush1.bf16.msra.mxu1 %v8322_v55  ;;  %v1533_v10 = vmax.f32 %v1231_v60, 0.0  ;;  %v1535_v11 = vmax.f32 %v1457_v61, 0.0  ;;  %v8357_v60 = vld [vmem:[#allocation7 + $0x2c4] ss:$16 sps:$4 sm:$0xff]  }
 0x1cb   :  { %v1536_v6 = vmax.f32 %v1233_v0, 0.0  ;;  %v1538_v7 = vmax.f32 %v1459_v1, 0.0  ;;  %v1235_v8 = vpop.f32.mrb[7].mxu0  ;;  %v1461_v9 = vpop.f32.mrb[7].mxu1  ;;  %2503 = vmatprep.subr.bf16.mxu0 %v8327_v56  ;;  %2729 = vmatprep.subr.bf16.mxu1 %v8330_v57  ;;  %v8349_v56 = vld [vmem:[#allocation7 + $0x2a0] ss:$16 sps:$4 sm:$0xff]  }
 0x1cc   :  { %v1537_v12 = vmax.f32 %v1235_v8, 0.0  ;;  %v1539_v13 = vmax.f32 %v1461_v9, 0.0  ;;  %v8352_v57 = vld [vmem:[#allocation7 + $0x2a8] ss:$16 sps:$4 sm:$0xff]   ;;  %v8360_v61 = vld [vmem:[#allocation7 + $0x2cc] ss:$16 sps:$4 sm:$0xff]  }
 0x1cd   :  { %v1592_v14 = vpack.c.bf16 %v1536_v6, %v1532_v4  ;;  %v9326_v15 = vpack.c.bf16 %v1538_v7, %v1534_v5 }
 0x1ce   :  { %v1593_v16 = vpack.c.bf16 %v1537_v12, %v1533_v10  ;;  %v9328_v17 = vpack.c.bf16 %v1539_v13, %v1535_v11  ;;  %2504 = vmatpush1.bf16.msra.mxu0 %v8325_v62  ;;  %2730 = vmatpush1.bf16.msra.mxu1 %v8328_v63  ;;  %v8355_v12 = vld [vmem:[#allocation7 + $0x2c0] ss:$16 sps:$4 sm:$0xff]   ;;  %v8358_v13 = vld [vmem:[#allocation7 + $0x2c8] ss:$16 sps:$4 sm:$0xff]  }
 0x1cf   :  { %2505 = vmatprep.subr.bf16.mxu0 %v8333_v2  ;;  %2731 = vmatprep.subr.bf16.mxu1 %v8336_v3 }
 0x1d0   :  { %v1239_v22 = vpop.f32.mrb[8].mxu0  ;;  %v1465_v23 = vpop.f32.mrb[8].mxu1  ;;  %2430 = vmatprep.mubr.bf16.mxu0 %v1593_v16  ;;  %2656 = vmatprep.mubr.bf16.mxu1 %v1593_v16  ;;  %v8366_v16 = vld [vmem:[#allocation7 + $0x2ec] ss:$16 sps:$4 sm:$0xff]  }
 0x1d1   :  { %v1241_v24 = vpop.f32.mrb[9].mxu0  ;;  %v1467_v25 = vpop.f32.mrb[9].mxu1  ;;  %2431 = vmatmul.mubr.bf16.gmra.mrb[36].mxu0 %v1592_v14  ;;  %2657 = vmatmul.mubr.bf16.gmra.mrb[36].mxu1 %v1592_v14  ;;  %v1540_v32 = vmax.f32 %v1239_v22, 0.0  ;;  %v1542_v33 = vmax.f32 %v1465_v23, 0.0  ;;  %v8363_v14 = vld [vmem:[#allocation7 + $0x2e4] ss:$16 sps:$4 sm:$0xff]  }
 0x1d2   :  { %v1243_v28 = vpop.f32.mrb[10].mxu0  ;;  %v1469_v29 = vpop.f32.mrb[10].mxu1  ;;  %2506 = vmatpush1.bf16.msra.mxu0 %v8331_v18  ;;  %2732 = vmatpush1.bf16.msra.mxu1 %v8334_v19  ;;  %v1541_v38 = vmax.f32 %v1241_v24, 0.0  ;;  %v1543_v39 = vmax.f32 %v1467_v25, 0.0  ;;  %v8361_v22 = vld [vmem:[#allocation7 + $0x2e0] ss:$16 sps:$4 sm:$0xff]  }
 0x1d3   :  { %v1544_v34 = vmax.f32 %v1243_v28, 0.0  ;;  %v1546_v35 = vmax.f32 %v1469_v29, 0.0  ;;  %v1245_v36 = vpop.f32.mrb[11].mxu0  ;;  %v1471_v37 = vpop.f32.mrb[11].mxu1  ;;  %2507 = vmatprep.subr.bf16.mxu0 %v8339_v20  ;;  %2733 = vmatprep.subr.bf16.mxu1 %v8342_v21  ;;  %v8364_v23 = vld [vmem:[#allocation7 + $0x2e8] ss:$16 sps:$4 sm:$0xff]  }
 0x1d4   :  { %v1545_v40 = vmax.f32 %v1245_v36, 0.0  ;;  %v1547_v41 = vmax.f32 %v1471_v37, 0.0 }
 0x1d5   :  { %v1596_v42 = vpack.c.bf16 %v1544_v34, %v1540_v32  ;;  %v9330_v43 = vpack.c.bf16 %v1546_v35, %v1542_v33 }
 0x1d6   :  { %v1597_v44 = vpack.c.bf16 %v1545_v40, %v1541_v38  ;;  %v9332_v45 = vpack.c.bf16 %v1547_v41, %v1543_v39  ;;  %2508 = vmatpush1.bf16.msra.mxu0 %v8337_v26  ;;  %2734 = vmatpush1.bf16.msra.mxu1 %v8340_v27  ;;  %v8369_v26 = vld [vmem:[#allocation7 + $0x304] ss:$16 sps:$4 sm:$0xff]   ;;  %v8372_v27 = vld [vmem:[#allocation7 + $0x30c] ss:$16 sps:$4 sm:$0xff]  }
 0x1d7   :  { %2509 = vmatprep.subr.bf16.mxu0 %v8345_v30  ;;  %2735 = vmatprep.subr.bf16.mxu1 %v8348_v31 }
 0x1d8   :  { %v1249_v50 = vpop.f32.mrb[12].mxu0  ;;  %v1475_v52 = vpop.f32.mrb[12].mxu1  ;;  %2440 = vmatprep.mubr.bf16.mxu0 %v1597_v44  ;;  %2666 = vmatprep.mubr.bf16.mxu1 %v1597_v44  ;;  %v8370_v44 = vld [vmem:[#allocation7 + $0x308] ss:$16 sps:$4 sm:$0xff]  }
 0x1d9   :  { %v1251_v54 = vpop.f32.mrb[13].mxu0  ;;  %v1477_v55 = vpop.f32.mrb[13].mxu1  ;;  %2441 = vmatmul.mubr.bf16.gmra.mrb[40].mxu0 %v1596_v42  ;;  %2667 = vmatmul.mubr.bf16.gmra.mrb[40].mxu1 %v1596_v42  ;;  %v1548_v62 = vmax.f32 %v1249_v50, 0.0  ;;  %v1550_v63 = vmax.f32 %v1475_v52, 0.0  ;;  %v8367_v42 = vld [vmem:[#allocation7 + $0x300] ss:$16 sps:$4 sm:$0xff]  }
 0x1da   :  { %v1253_v58 = vpop.f32.mrb[14].mxu0  ;;  %v1479_v59 = vpop.f32.mrb[14].mxu1  ;;  %2510 = vmatpush1.bf16.msra.mxu0 %v8343_v46  ;;  %2736 = vmatpush1.bf16.msra.mxu1 %v8346_v47  ;;  %v1549_v4 = vmax.f32 %v1251_v54, 0.0  ;;  %v1551_v5 = vmax.f32 %v1477_v55, 0.0  ;;  %v8375_v46 = vld [vmem:[#allocation7 + $0x324] ss:$16 sps:$4 sm:$0xff]  }
 0x1db   :  { %v1552_v0 = vmax.f32 %v1253_v58, 0.0  ;;  %v1554_v1 = vmax.f32 %v1479_v59, 0.0  ;;  %v1255_v2 = vpop.f32.mrb[15].mxu0  ;;  %v1481_v3 = vpop.f32.mrb[15].mxu1  ;;  %2511 = vmatprep.subr.bf16.mxu0 %v8351_v48  ;;  %2737 = vmatprep.subr.bf16.mxu1 %v8354_v49  ;;  %v8378_v47 = vld [vmem:[#allocation7 + $0x32c] ss:$16 sps:$4 sm:$0xff]  }
 0x1dc   :  { %v1553_v6 = vmax.f32 %v1255_v2, 0.0  ;;  %v1555_v7 = vmax.f32 %v1481_v3, 0.0  ;;  %v8373_v54 = vld [vmem:[#allocation7 + $0x320] ss:$16 sps:$4 sm:$0xff]   ;;  %v8376_v55 = vld [vmem:[#allocation7 + $0x328] ss:$16 sps:$4 sm:$0xff]  }
 0x1dd   :  { %v1600_v8 = vpack.c.bf16 %v1552_v0, %v1548_v62  ;;  %v9334_v9 = vpack.c.bf16 %v1554_v1, %v1550_v63  ;;  %v8381_v58 = vld [vmem:[#allocation7 + $0x344] ss:$16 sps:$4 sm:$0xff]   ;;  %v8384_v59 = vld [vmem:[#allocation7 + $0x34c] ss:$16 sps:$4 sm:$0xff]  }
 0x1de   :  { %v1601_v10 = vpack.c.bf16 %v1553_v6, %v1549_v4  ;;  %v9336_v11 = vpack.c.bf16 %v1555_v7, %v1551_v5  ;;  %2512 = vmatpush1.bf16.msra.mxu0 %v8349_v56  ;;  %2738 = vmatpush1.bf16.msra.mxu1 %v8352_v57 }
 0x1df   :  { %2513 = vmatprep.subr.bf16.mxu0 %v8357_v60  ;;  %2739 = vmatprep.subr.bf16.mxu1 %v8360_v61 }
 0x1e0   :  { %v1259_v18 = vpop.f32.mrb[16].mxu0  ;;  %v1485_v19 = vpop.f32.mrb[16].mxu1  ;;  %2450 = vmatprep.mubr.bf16.mxu0 %v1601_v10  ;;  %2676 = vmatprep.mubr.bf16.mxu1 %v1601_v10 }
 0x1e1   :  { %v1261_v20 = vpop.f32.mrb[17].mxu0  ;;  %v1487_v21 = vpop.f32.mrb[17].mxu1  ;;  %2451 = vmatmul.mubr.bf16.gmra.mrb[44].mxu0 %v1600_v8  ;;  %2677 = vmatmul.mubr.bf16.gmra.mrb[44].mxu1 %v1600_v8  ;;  %v1556_v28 = vmax.f32 %v1259_v18, 0.0  ;;  %v1558_v29 = vmax.f32 %v1485_v19, 0.0 }
 0x1e2   :  { %v1263_v24 = vpop.f32.mrb[18].mxu0  ;;  %v1489_v25 = vpop.f32.mrb[18].mxu1  ;;  %2514 = vmatpush1.bf16.msra.mxu0 %v8355_v12  ;;  %2740 = vmatpush1.bf16.msra.mxu1 %v8358_v13  ;;  %v1557_v34 = vmax.f32 %v1261_v20, 0.0  ;;  %v1559_v35 = vmax.f32 %v1487_v21, 0.0  ;;  %v8379_v12 = vld [vmem:[#allocation7 + $0x340] ss:$16 sps:$4 sm:$0xff]  }
 0x1e3   :  { %v1560_v30 = vmax.f32 %v1263_v24, 0.0  ;;  %v1562_v31 = vmax.f32 %v1489_v25, 0.0  ;;  %v1265_v32 = vpop.f32.mrb[19].mxu0  ;;  %v1491_v33 = vpop.f32.mrb[19].mxu1  ;;  %2515 = vmatprep.subr.bf16.mxu0 %v8363_v14  ;;  %2741 = vmatprep.subr.bf16.mxu1 %v8366_v16  ;;  %v8382_v13 = vld [vmem:[#allocation7 + $0x348] ss:$16 sps:$4 sm:$0xff]  }
 0x1e4   :  { %v1561_v36 = vmax.f32 %v1265_v32, 0.0  ;;  %v1563_v37 = vmax.f32 %v1491_v33, 0.0  ;;  %v8387_v14 = vld [vmem:[#allocation7 + $0x364] ss:$16 sps:$4 sm:$0xff]   ;;  %v8390_v16 = vld [vmem:[#allocation7 + $0x36c] ss:$16 sps:$4 sm:$0xff]  }
 0x1e5   :  { %v1604_v38 = vpack.c.bf16 %v1560_v30, %v1556_v28  ;;  %v9338_v39 = vpack.c.bf16 %v1562_v31, %v1558_v29 }
 0x1e6   :  { %v1605_v40 = vpack.c.bf16 %v1561_v36, %v1557_v34  ;;  %v9340_v41 = vpack.c.bf16 %v1563_v37, %v1559_v35  ;;  %2516 = vmatpush1.bf16.msra.mxu0 %v8361_v22  ;;  %2742 = vmatpush1.bf16.msra.mxu1 %v8364_v23  ;;  %v8385_v22 = vld [vmem:[#allocation7 + $0x360] ss:$16 sps:$4 sm:$0xff]   ;;  %v8388_v23 = vld [vmem:[#allocation7 + $0x368] ss:$16 sps:$4 sm:$0xff]  }
 0x1e7   :  { %2517 = vmatprep.subr.bf16.mxu0 %v8369_v26  ;;  %2743 = vmatprep.subr.bf16.mxu1 %v8372_v27  ;;  %v8393_v26 = vld [vmem:[#allocation7 + $0x384] ss:$16 sps:$4 sm:$0xff]   ;;  %v8396_v27 = vld [vmem:[#allocation7 + $0x38c] ss:$16 sps:$4 sm:$0xff]  }
 0x1e8   :  { %v1269_v48 = vpop.f32.mrb[20].mxu0  ;;  %v1495_v49 = vpop.f32.mrb[20].mxu1  ;;  %2460 = vmatprep.mubr.bf16.mxu0 %v1605_v40  ;;  %2686 = vmatprep.mubr.bf16.mxu1 %v1605_v40 }
 0x1e9   :  { %v1271_v50 = vpop.f32.mrb[21].mxu0  ;;  %v1497_v52 = vpop.f32.mrb[21].mxu1  ;;  %2461 = vmatmul.mubr.bf16.gmra.mrb[48].mxu0 %v1604_v38  ;;  %2687 = vmatmul.mubr.bf16.gmra.mrb[48].mxu1 %v1604_v38  ;;  %v1564_v60 = vmax.f32 %v1269_v48, 0.0  ;;  %v1566_v61 = vmax.f32 %v1495_v49, 0.0  ;;  %v8399_v48 = vld [vmem:[#allocation7 + $0x3a4] ss:$16 sps:$4 sm:$0xff]  }
 0x1ea   :  { %v1273_v56 = vpop.f32.mrb[22].mxu0  ;;  %v1499_v57 = vpop.f32.mrb[22].mxu1  ;;  %2518 = vmatpush1.bf16.msra.mxu0 %v8367_v42  ;;  %2744 = vmatpush1.bf16.msra.mxu1 %v8370_v44  ;;  %v1565_v2 = vmax.f32 %v1271_v50, 0.0  ;;  %v1567_v3 = vmax.f32 %v1497_v52, 0.0  ;;  %v8402_v49 = vld [vmem:[#allocation7 + $0x3ac] ss:$16 sps:$4 sm:$0xff]  }
 0x1eb   :  { %v1568_v62 = vmax.f32 %v1273_v56, 0.0  ;;  %v1570_v63 = vmax.f32 %v1499_v57, 0.0  ;;  %v1275_v0 = vpop.f32.mrb[23].mxu0  ;;  %v1501_v1 = vpop.f32.mrb[23].mxu1  ;;  %2519 = vmatprep.subr.bf16.mxu0 %v8375_v46  ;;  %2745 = vmatprep.subr.bf16.mxu1 %v8378_v47  ;;  %v8391_v46 = vld [vmem:[#allocation7 + $0x380] ss:$16 sps:$4 sm:$0xff]  }
 0x1ec   :  { %v1569_v4 = vmax.f32 %v1275_v0, 0.0  ;;  %v1571_v5 = vmax.f32 %v1501_v1, 0.0  ;;  %v8394_v47 = vld [vmem:[#allocation7 + $0x388] ss:$16 sps:$4 sm:$0xff]   ;;  %v8397_v56 = vld [vmem:[#allocation7 + $0x3a0] ss:$16 sps:$4 sm:$0xff]  }
 0x1ed   :  { %v1608_v6 = vpack.c.bf16 %v1568_v62, %v1564_v60  ;;  %v9342_v7 = vpack.c.bf16 %v1570_v63, %v1566_v61  ;;  %v8400_v57 = vld [vmem:[#allocation7 + $0x3a8] ss:$16 sps:$4 sm:$0xff]   ;;  %v8405_v60 = vld [vmem:[#allocation7 + $0x3c4] ss:$16 sps:$4 sm:$0xff]   ;;  %v8408_v61 = vld [vmem:[#allocation7 + $0x3cc] ss:$16 sps:$4 sm:$0xff]  }
 0x1ee   :  { %v1609_v8 = vpack.c.bf16 %v1569_v4, %v1565_v2  ;;  %v9344_v10 = vpack.c.bf16 %v1571_v5, %v1567_v3  ;;  %2520 = vmatpush1.bf16.msra.mxu0 %v8373_v54  ;;  %2746 = vmatpush1.bf16.msra.mxu1 %v8376_v55 }
 0x1ef   :  { %2521 = vmatprep.subr.bf16.mxu0 %v8381_v58  ;;  %2747 = vmatprep.subr.bf16.mxu1 %v8384_v59 }
 0x1f0   :  { %v1279_v18 = vpop.f32.mrb[24].mxu0  ;;  %v1505_v19 = vpop.f32.mrb[24].mxu1  ;;  %2470 = vmatprep.mubr.bf16.mxu0 %v1609_v8  ;;  %2696 = vmatprep.mubr.bf16.mxu1 %v1609_v8 }
 0x1f1   :  { %v1281_v20 = vpop.f32.mrb[25].mxu0  ;;  %v1507_v21 = vpop.f32.mrb[25].mxu1  ;;  %2471 = vmatmul.mubr.bf16.gmra.mrb[52].mxu0 %v1608_v6  ;;  %2697 = vmatmul.mubr.bf16.gmra.mrb[52].mxu1 %v1608_v6  ;;  %v1572_v28 = vmax.f32 %v1279_v18, 0.0  ;;  %v1574_v29 = vmax.f32 %v1505_v19, 0.0  ;;  %v8403_v18 = vld [vmem:[#allocation7 + $0x3c0] ss:$16 sps:$4 sm:$0xff]  }
 0x1f2   :  { %v1283_v24 = vpop.f32.mrb[26].mxu0  ;;  %v1509_v25 = vpop.f32.mrb[26].mxu1  ;;  %2522 = vmatpush1.bf16.msra.mxu0 %v8379_v12  ;;  %2748 = vmatpush1.bf16.msra.mxu1 %v8382_v13  ;;  %v1573_v34 = vmax.f32 %v1281_v20, 0.0  ;;  %v1575_v35 = vmax.f32 %v1507_v21, 0.0  ;;  %v8406_v19 = vld [vmem:[#allocation7 + $0x3c8] ss:$16 sps:$4 sm:$0xff]  }
 0x1f3   :  { %v1576_v30 = vmax.f32 %v1283_v24, 0.0  ;;  %v1578_v31 = vmax.f32 %v1509_v25, 0.0  ;;  %v1285_v32 = vpop.f32.mrb[27].mxu0  ;;  %v1511_v33 = vpop.f32.mrb[27].mxu1  ;;  %2523 = vmatprep.subr.bf16.mxu0 %v8387_v14  ;;  %2749 = vmatprep.subr.bf16.mxu1 %v8390_v16  ;;  %v8411_v20 = vld [vmem:[#allocation7 + $0x3e4] ss:$16 sps:$4 sm:$0xff]  }
 0x1f4   :  { %v1577_v36 = vmax.f32 %v1285_v32, 0.0  ;;  %v1579_v37 = vmax.f32 %v1511_v33, 0.0  ;;  %v8414_v21 = vld [vmem:[#allocation7 + $0x3ec] ss:$16 sps:$4 sm:$0xff]   ;;  %v8417_v24 = vld [vmem:[#allocation8 + $0x4] ss:$16 sps:$4 sm:$0xff]  }
 0x1f5   :  { %v1612_v38 = vpack.c.bf16 %v1576_v30, %v1572_v28  ;;  %v9346_v40 = vpack.c.bf16 %v1578_v31, %v1574_v29  ;;  %v8420_v25 = vld [vmem:[#allocation8 + $0xc] ss:$16 sps:$4 sm:$0xff]   ;;  %v8423_v28 = vld [vmem:[#allocation8 + $0x24] ss:$16 sps:$4 sm:$0xff]   ;;  %v8424_v30 = vld [vmem:[#allocation8 + $0x28] ss:$16 sps:$4 sm:$0xff]  }
 0x1f6   :  { %v1613_v42 = vpack.c.bf16 %v1577_v36, %v1573_v34  ;;  %v9348_v44 = vpack.c.bf16 %v1579_v37, %v1575_v35  ;;  %2524 = vmatpush1.bf16.msra.mxu0 %v8385_v22  ;;  %2750 = vmatpush1.bf16.msra.mxu1 %v8388_v23  ;;  %v8409_v22 = vld [vmem:[#allocation7 + $0x3e0] ss:$16 sps:$4 sm:$0xff]   ;;  %v8412_v23 = vld [vmem:[#allocation7 + $0x3e8] ss:$16 sps:$4 sm:$0xff]   ;;  %v8426_v29 = vld [vmem:[#allocation8 + $0x2c] ss:$16 sps:$4 sm:$0xff]  }
 0x1f7   :  { %2525 = vmatprep.subr.bf16.mxu0 %v8393_v26  ;;  %2751 = vmatprep.subr.bf16.mxu1 %v8396_v27  ;;  %v8415_v26 = vld [vmem:[#allocation8] ss:$16 sps:$4 sm:$0xff]   ;;  %v8418_v27 = vld [vmem:[#allocation8 + $0x8] ss:$16 sps:$4 sm:$0xff]   ;;  %v8429_v31 = vld [vmem:[#allocation8 + $0x44] ss:$16 sps:$4 sm:$0xff]  }
 0x1f8   :  { %v1289_v50 = vpop.f32.mrb[28].mxu0  ;;  %v1515_v52 = vpop.f32.mrb[28].mxu1  ;;  %2480 = vmatprep.mubr.bf16.mxu0 %v1613_v42  ;;  %2706 = vmatprep.mubr.bf16.mxu1 %v1613_v42  ;;  %v8432_v32 = vld [vmem:[#allocation8 + $0x4c] ss:$16 sps:$4 sm:$0xff]   ;;  %v8427_v33 = vld [vmem:[#allocation8 + $0x40] ss:$16 sps:$4 sm:$0xff]  }
 0x1f9   :  { %v1291_v54 = vpop.f32.mrb[29].mxu0  ;;  %v1517_v55 = vpop.f32.mrb[29].mxu1  ;;  %2481 = vmatmul.mubr.bf16.gmra.mrb[56].mxu0 %v1612_v38  ;;  %2707 = vmatmul.mubr.bf16.gmra.mrb[56].mxu1 %v1612_v38  ;;  %v1580_v62 = vmax.f32 %v1289_v50, 0.0  ;;  %v1582_v63 = vmax.f32 %v1515_v52, 0.0  ;;  %v8430_v34 = vld [vmem:[#allocation8 + $0x48] ss:$16 sps:$4 sm:$0xff]  }
 0x1fa   :  { %v1293_v58 = vpop.f32.mrb[30].mxu0  ;;  %v1519_v59 = vpop.f32.mrb[30].mxu1  ;;  %2526 = vmatpush1.bf16.msra.mxu0 %v8391_v46  ;;  %2752 = vmatpush1.bf16.msra.mxu1 %v8394_v47  ;;  %v1581_v4 = vmax.f32 %v1291_v54, 0.0  ;;  %v1583_v5 = vmax.f32 %v1517_v55, 0.0  ;;  %v8435_v35 = vld [vmem:[#allocation8 + $0x64] ss:$16 sps:$4 sm:$0xff]  }
 0x1fb   :  { %v1584_v0 = vmax.f32 %v1293_v58, 0.0  ;;  %v1586_v1 = vmax.f32 %v1519_v59, 0.0  ;;  %v1295_v2 = vpop.f32.mrb[31].mxu0  ;;  %v1521_v3 = vpop.f32.mrb[31].mxu1  ;;  %2527 = vmatprep.subr.bf16.mxu0 %v8399_v48  ;;  %2753 = vmatprep.subr.bf16.mxu1 %v8402_v49  ;;  %v8436_v36 = vld [vmem:[#allocation8 + $0x68] ss:$16 sps:$4 sm:$0xff]  }
 0x1fc   :  { %v1585_v6 = vmax.f32 %v1295_v2, 0.0  ;;  %v1587_v8 = vmax.f32 %v1521_v3, 0.0  ;;  %v8441_v37 = vld [vmem:[#allocation8 + $0x84] ss:$16 sps:$4 sm:$0xff]   ;;  %v8444_v38 = vld [vmem:[#allocation8 + $0x8c] ss:$16 sps:$4 sm:$0xff]  }
 0x1fd   :  { %v1616_v12 = vpack.c.bf16 %v1584_v0, %v1580_v62  ;;  %v9350_v13 = vpack.c.bf16 %v1586_v1, %v1582_v63  ;;  %v8439_v42 = vld [vmem:[#allocation8 + $0x80] ss:$16 sps:$4 sm:$0xff]   ;;  %v8442_v46 = vld [vmem:[#allocation8 + $0x88] ss:$16 sps:$4 sm:$0xff]   ;;  %v8447_v47 = vld [vmem:[#allocation8 + $0xa4] ss:$16 sps:$4 sm:$0xff]  }
 0x1fe   :  { %v1617_v14 = vpack.c.bf16 %v1585_v6, %v1581_v4  ;;  %v9352_v16 = vpack.c.bf16 %v1587_v8, %v1583_v5  ;;  %2528 = vmatpush1.bf16.msra.mxu0 %v8397_v56  ;;  %2754 = vmatpush1.bf16.msra.mxu1 %v8400_v57  ;;  %v8448_v48 = vld [vmem:[#allocation8 + $0xa8] ss:$16 sps:$4 sm:$0xff]   ;;  %v8453_v49 = vld [vmem:[#allocation8 + $0xc4] ss:$16 sps:$4 sm:$0xff]   ;;  %v8456_v50 = vld [vmem:[#allocation8 + $0xcc] ss:$16 sps:$4 sm:$0xff]  }
 0x1ff   :  { %2529 = vmatprep.subr.bf16.mxu0 %v8405_v60  ;;  %2755 = vmatprep.subr.bf16.mxu1 %v8408_v61  ;;  %v8451_v52 = vld [vmem:[#allocation8 + $0xc0] ss:$16 sps:$4 sm:$0xff]   ;;  %v8454_v54 = vld [vmem:[#allocation8 + $0xc8] ss:$16 sps:$4 sm:$0xff]   ;;  %v8459_v55 = vld [vmem:[#allocation8 + $0xe4] ss:$16 sps:$4 sm:$0xff]  }
 0x200   :  { %2490 = vmatprep.mubr.bf16.mxu0 %v1617_v14  ;;  %2716 = vmatprep.mubr.bf16.mxu1 %v1617_v14  ;;  %v8460_v56 = vld [vmem:[#allocation8 + $0xe8] ss:$16 sps:$4 sm:$0xff]   ;;  %v8465_v57 = vld [vmem:[#allocation8 + $0x104] ss:$16 sps:$4 sm:$0xff]   ;;  %v8468_v58 = vld [vmem:[#allocation8 + $0x10c] ss:$16 sps:$4 sm:$0xff]  }
 0x201   :  { %2491 = vmatmul.mubr.bf16.gmra.mrb[60].mxu0 %v1616_v12  ;;  %2717 = vmatmul.mubr.bf16.gmra.mrb[60].mxu1 %v1616_v12  ;;  %v8463_v59 = vld [vmem:[#allocation8 + $0x100] ss:$16 sps:$4 sm:$0xff]   ;;  %v8466_v60 = vld [vmem:[#allocation8 + $0x108] ss:$16 sps:$4 sm:$0xff]   ;;  %v8471_v61 = vld [vmem:[#allocation8 + $0x124] ss:$16 sps:$4 sm:$0xff]  }
 0x202   :  { %2530 = vmatpush1.bf16.msra.mxu0 %v8403_v18  ;;  %2533 = vmatprep.mubr.bf16.mxu0 %v9324_v53  ;;  %v8472_v62 = vld [vmem:[#allocation8 + $0x128] ss:$16 sps:$4 sm:$0xff]   ;;  %v8477_v63 = vld [vmem:[#allocation8 + $0x144] ss:$16 sps:$4 sm:$0xff]   ;;  %v8480_v0 = vld [vmem:[#allocation8 + $0x14c] ss:$16 sps:$4 sm:$0xff]  }
 0x203   :  { %2756 = vmatpush1.bf16.msra.mxu1 %v8406_v19  ;;  %2759 = vmatprep.mubr.bf16.mxu1 %v9324_v53  ;;  %v8421_v53 = vld [vmem:[#allocation8 + $0x20] ss:$16 sps:$4 sm:$0xff]   ;;  %v8478_v2 = vld [vmem:[#allocation8 + $0x148] ss:$16 sps:$4 sm:$0xff]   ;;  %v8483_v3 = vld [vmem:[#allocation8 + $0x164] ss:$16 sps:$4 sm:$0xff]  }
 0x204   :  { %2531 = vmatprep.subr.bf16.mxu0 %v8411_v20  ;;  %2757 = vmatprep.subr.bf16.mxu1 %v8414_v21  ;;  %v8475_v1 = vld [vmem:[#allocation8 + $0x140] ss:$16 sps:$4 sm:$0xff]   ;;  %v8484_v4 = vld [vmem:[#allocation8 + $0x168] ss:$16 sps:$4 sm:$0xff]   ;;  %v8489_v5 = vld [vmem:[#allocation8 + $0x184] ss:$16 sps:$4 sm:$0xff]  }
 0x205   :  { %v8492_v6 = vld [vmem:[#allocation8 + $0x18c] ss:$16 sps:$4 sm:$0xff]   ;;  %v8487_v8 = vld [vmem:[#allocation8 + $0x180] ss:$16 sps:$4 sm:$0xff]   ;;  %v8490_v12 = vld [vmem:[#allocation8 + $0x188] ss:$16 sps:$4 sm:$0xff]  }
 0x206   :  { %2532 = vmatpush1.bf16.msra.mxu0 %v8409_v22  ;;  %v8495_v14 = vld [vmem:[#allocation8 + $0x1a4] ss:$16 sps:$4 sm:$0xff]   ;;  %v8496_v18 = vld [vmem:[#allocation8 + $0x1a8] ss:$16 sps:$4 sm:$0xff]   ;;  %v8504_v20 = vld [vmem:[#allocation8 + $0x1cc] ss:$16 sps:$4 sm:$0xff]  }
 0x207   :  { %2758 = vmatpush1.bf16.msra.mxu1 %v8412_v23  ;;  %3662 = vmatprep.subr.bf16.mxu0 %v8417_v24  ;;  %v8501_v19 = vld [vmem:[#allocation8 + $0x1c4] ss:$16 sps:$4 sm:$0xff]   ;;  %v8499_v21 = vld [vmem:[#allocation8 + $0x1c0] ss:$16 sps:$4 sm:$0xff]   ;;  %v8502_v22 = vld [vmem:[#allocation8 + $0x1c8] ss:$16 sps:$4 sm:$0xff]  }
 0x208   :  { %3888 = vmatprep.subr.bf16.mxu1 %v8420_v25  ;;  %v8505_v23 = vld [vmem:[#allocation8 + $0x1e0] ss:$16 sps:$4 sm:$0xff]   ;;  %v8508_v24 = vld [vmem:[#allocation8 + $0x1e8] ss:$16 sps:$4 sm:$0xff]   ;;  %v8513_v25 = vld [vmem:[#allocation8 + $0x204] ss:$16 sps:$4 sm:$0xff]  }
 0x209   :  { %2534 = vmatmul.mubr.bf16.vlgmr.msra.gmra.mrb[32].mxu0 %v9322_v51 }
 0x20a   :  { %2760 = vmatmul.mubr.bf16.vlgmr.msra.gmra.mrb[32].mxu1 %v9322_v51  ;;  %2543 = vmatprep.mubr.bf16.mxu0 %v9328_v17  ;;  %v8438_v51 = vld [vmem:[#allocation8 + $0x6c] ss:$16 sps:$4 sm:$0xff]  }
 0x20b   :  { %2769 = vmatprep.mubr.bf16.mxu1 %v9328_v17  ;;  %3663 = vmatpush1.bf16.msra.mxu0 %v8415_v26  ;;  %v8433_v17 = vld [vmem:[#allocation8 + $0x60] ss:$16 sps:$4 sm:$0xff]   ;;  %v8516_v26 = vld [vmem:[#allocation8 + $0x20c] ss:$16 sps:$4 sm:$0xff]  }
 0x20c   :  { %3889 = vmatpush1.bf16.msra.mxu1 %v8418_v27  ;;  %3664 = vmatprep.subr.bf16.mxu0 %v8423_v28 }
 0x20d   :  { %3890 = vmatprep.subr.bf16.mxu1 %v8426_v29 }
 0x20f   :  { %3665 = vmatpush1.bf16.msra.mxu0 %v8421_v53 }
 0x210   :  { %3891 = vmatpush1.bf16.msra.mxu1 %v8424_v30  ;;  %3666 = vmatprep.subr.bf16.mxu0 %v8429_v31 }
 0x211   :  { %2544 = vmatmul.mubr.bf16.gmra.mrb[36].mxu0 %v9326_v15  ;;  %3892 = vmatprep.subr.bf16.mxu1 %v8432_v32 }
 0x212   :  { %2770 = vmatmul.mubr.bf16.gmra.mrb[36].mxu1 %v9326_v15  ;;  %2553 = vmatprep.mubr.bf16.mxu0 %v9332_v45  ;;  %v8450_v15 = vld [vmem:[#allocation8 + $0xac] ss:$16 sps:$4 sm:$0xff]  }
 0x213   :  { %2779 = vmatprep.mubr.bf16.mxu1 %v9332_v45  ;;  %3667 = vmatpush1.bf16.msra.mxu0 %v8427_v33  ;;  %v8445_v45 = vld [vmem:[#allocation8 + $0xa0] ss:$16 sps:$4 sm:$0xff]  }
 0x214   :  { %3893 = vmatpush1.bf16.msra.mxu1 %v8430_v34  ;;  %3668 = vmatprep.subr.bf16.mxu0 %v8435_v35 }
 0x215   :  { %3894 = vmatprep.subr.bf16.mxu1 %v8438_v51  ;;  %v8511_v51 = vld [vmem:[#allocation8 + $0x200] ss:$16 sps:$4 sm:$0xff]  }
 0x217   :  { %3669 = vmatpush1.bf16.msra.mxu0 %v8433_v17  ;;  %v8514_v17 = vld [vmem:[#allocation8 + $0x208] ss:$16 sps:$4 sm:$0xff]  }
 0x218   :  { %3895 = vmatpush1.bf16.msra.mxu1 %v8436_v36  ;;  %3670 = vmatprep.subr.bf16.mxu0 %v8441_v37  ;;  %v8519_v37 = vld [vmem:[#allocation8 + $0x224] ss:$16 sps:$4 sm:$0xff]  }
 0x219   :  { %2554 = vmatmul.mubr.bf16.gmra.mrb[40].mxu0 %v9330_v43  ;;  %3896 = vmatprep.subr.bf16.mxu1 %v8444_v38  ;;  %v8522_v38 = vld [vmem:[#allocation8 + $0x22c] ss:$16 sps:$4 sm:$0xff]  }
 0x21a   :  { %2780 = vmatmul.mubr.bf16.gmra.mrb[40].mxu1 %v9330_v43  ;;  %2563 = vmatprep.mubr.bf16.mxu0 %v9336_v11  ;;  %v8462_v43 = vld [vmem:[#allocation8 + $0xec] ss:$16 sps:$4 sm:$0xff]  }
 0x21b   :  { %2789 = vmatprep.mubr.bf16.mxu1 %v9336_v11  ;;  %3671 = vmatpush1.bf16.msra.mxu0 %v8439_v42  ;;  %v8457_v11 = vld [vmem:[#allocation8 + $0xe0] ss:$16 sps:$4 sm:$0xff]  }
 0x21c   :  { %3897 = vmatpush1.bf16.msra.mxu1 %v8442_v46  ;;  %3672 = vmatprep.subr.bf16.mxu0 %v8447_v47  ;;  %v8517_v46 = vld [vmem:[#allocation8 + $0x220] ss:$16 sps:$4 sm:$0xff]   ;;  %v8520_v47 = vld [vmem:[#allocation8 + $0x228] ss:$16 sps:$4 sm:$0xff]  }
 0x21d   :  { %3898 = vmatprep.subr.bf16.mxu1 %v8450_v15 }
 0x21f   :  { %3673 = vmatpush1.bf16.msra.mxu0 %v8445_v45 }
 0x220   :  { %3899 = vmatpush1.bf16.msra.mxu1 %v8448_v48  ;;  %3674 = vmatprep.subr.bf16.mxu0 %v8453_v49  ;;  %v8525_v48 = vld [vmem:[#allocation8 + $0x244] ss:$16 sps:$4 sm:$0xff]   ;;  %v8528_v49 = vld [vmem:[#allocation8 + $0x24c] ss:$16 sps:$4 sm:$0xff]  }
 0x221   :  { %2564 = vmatmul.mubr.bf16.gmra.mrb[44].mxu0 %v9334_v9  ;;  %3900 = vmatprep.subr.bf16.mxu1 %v8456_v50 }
 0x222   :  { %2790 = vmatmul.mubr.bf16.gmra.mrb[44].mxu1 %v9334_v9  ;;  %2573 = vmatprep.mubr.bf16.mxu0 %v9340_v41  ;;  %v8474_v9 = vld [vmem:[#allocation8 + $0x12c] ss:$16 sps:$4 sm:$0xff]  }
 0x223   :  { %2799 = vmatprep.mubr.bf16.mxu1 %v9340_v41  ;;  %3675 = vmatpush1.bf16.msra.mxu0 %v8451_v52  ;;  %v8469_v41 = vld [vmem:[#allocation8 + $0x120] ss:$16 sps:$4 sm:$0xff]  }
 0x224   :  { %3901 = vmatpush1.bf16.msra.mxu1 %v8454_v54  ;;  %3676 = vmatprep.subr.bf16.mxu0 %v8459_v55 }
 0x225   :  { %3902 = vmatprep.subr.bf16.mxu1 %v8462_v43 }
 0x227   :  { %3677 = vmatpush1.bf16.msra.mxu0 %v8457_v11 }
 0x228   :  { %3903 = vmatpush1.bf16.msra.mxu1 %v8460_v56  ;;  %3678 = vmatprep.subr.bf16.mxu0 %v8465_v57 }
 0x229   :  { %2574 = vmatmul.mubr.bf16.gmra.mrb[48].mxu0 %v9338_v39  ;;  %3904 = vmatprep.subr.bf16.mxu1 %v8468_v58  ;;  %v8523_v58 = vld [vmem:[#allocation8 + $0x240] ss:$16 sps:$4 sm:$0xff]  }
 0x22a   :  { %2800 = vmatmul.mubr.bf16.gmra.mrb[48].mxu1 %v9338_v39  ;;  %2583 = vmatprep.mubr.bf16.mxu0 %v9344_v10  ;;  %v8486_v39 = vld [vmem:[#allocation8 + $0x16c] ss:$16 sps:$4 sm:$0xff]  }
 0x22b   :  { %2809 = vmatprep.mubr.bf16.mxu1 %v9344_v10  ;;  %3679 = vmatpush1.bf16.msra.mxu0 %v8463_v59  ;;  %v8481_v10 = vld [vmem:[#allocation8 + $0x160] ss:$16 sps:$4 sm:$0xff]   ;;  %v8526_v59 = vld [vmem:[#allocation8 + $0x248] ss:$16 sps:$4 sm:$0xff]  }
 0x22c   :  { %3905 = vmatpush1.bf16.msra.mxu1 %v8466_v60  ;;  %3680 = vmatprep.subr.bf16.mxu0 %v8471_v61  ;;  %v8531_v61 = vld [vmem:[#allocation8 + $0x264] ss:$16 sps:$4 sm:$0xff]  }
 0x22d   :  { %3906 = vmatprep.subr.bf16.mxu1 %v8474_v9  ;;  %v8534_v9 = vld [vmem:[#allocation8 + $0x26c] ss:$16 sps:$4 sm:$0xff]  }
 0x22f   :  { %3681 = vmatpush1.bf16.msra.mxu0 %v8469_v41 }
 0x230   :  { %3907 = vmatpush1.bf16.msra.mxu1 %v8472_v62  ;;  %3682 = vmatprep.subr.bf16.mxu0 %v8477_v63  ;;  %v8529_v62 = vld [vmem:[#allocation8 + $0x260] ss:$16 sps:$4 sm:$0xff]   ;;  %v8532_v63 = vld [vmem:[#allocation8 + $0x268] ss:$16 sps:$4 sm:$0xff]  }
 0x231   :  { %2584 = vmatmul.mubr.bf16.gmra.mrb[52].mxu0 %v9342_v7  ;;  %3908 = vmatprep.subr.bf16.mxu1 %v8480_v0 }
 0x232   :  { %2810 = vmatmul.mubr.bf16.gmra.mrb[52].mxu1 %v9342_v7  ;;  %2593 = vmatprep.mubr.bf16.mxu0 %v9348_v44  ;;  %v8498_v7 = vld [vmem:[#allocation8 + $0x1ac] ss:$16 sps:$4 sm:$0xff]  }
 0x233   :  { %2819 = vmatprep.mubr.bf16.mxu1 %v9348_v44  ;;  %3683 = vmatpush1.bf16.msra.mxu0 %v8475_v1  ;;  %v8493_v44 = vld [vmem:[#allocation8 + $0x1a0] ss:$16 sps:$4 sm:$0xff]  }
 0x234   :  { %3909 = vmatpush1.bf16.msra.mxu1 %v8478_v2  ;;  %3684 = vmatprep.subr.bf16.mxu0 %v8483_v3  ;;  %v8537_v2 = vld [vmem:[#allocation8 + $0x284] ss:$16 sps:$4 sm:$0xff]   ;;  %v8540_v3 = vld [vmem:[#allocation8 + $0x28c] ss:$16 sps:$4 sm:$0xff]  }
 0x235   :  { %3910 = vmatprep.subr.bf16.mxu1 %v8486_v39 }
 0x237   :  { %3685 = vmatpush1.bf16.msra.mxu0 %v8481_v10 }
 0x238   :  { %3911 = vmatpush1.bf16.msra.mxu1 %v8484_v4  ;;  %3686 = vmatprep.subr.bf16.mxu0 %v8489_v5 }
 0x239   :  { %2594 = vmatmul.mubr.bf16.gmra.mrb[56].mxu0 %v9346_v40  ;;  %3912 = vmatprep.subr.bf16.mxu1 %v8492_v6 }
 0x23a   :  { %2820 = vmatmul.mubr.bf16.gmra.mrb[56].mxu1 %v9346_v40  ;;  %2603 = vmatprep.mubr.bf16.mxu0 %v9352_v16  ;;  %v8507_v40 = vld [vmem:[#allocation8 + $0x1e4] ss:$16 sps:$4 sm:$0xff]  }
 0x23b   :  { %2829 = vmatprep.mubr.bf16.mxu1 %v9352_v16  ;;  %3687 = vmatpush1.bf16.msra.mxu0 %v8487_v8  ;;  %v8510_v16 = vld [vmem:[#allocation8 + $0x1ec] ss:$16 sps:$4 sm:$0xff]  }
 0x23c   :  { %3913 = vmatpush1.bf16.msra.mxu1 %v8490_v12  ;;  %3688 = vmatprep.subr.bf16.mxu0 %v8495_v14 }
 0x23d   :  { %3914 = vmatprep.subr.bf16.mxu1 %v8498_v7  ;;  %v8535_v7 = vld [vmem:[#allocation8 + $0x280] ss:$16 sps:$4 sm:$0xff]  }
 0x23f   :  { %3689 = vmatpush1.bf16.msra.mxu0 %v8493_v44  ;;  %v8538_v44 = vld [vmem:[#allocation8 + $0x288] ss:$16 sps:$4 sm:$0xff]  }
 0x240   :  { %3915 = vmatpush1.bf16.msra.mxu1 %v8496_v18  ;;  %3690 = vmatprep.subr.bf16.mxu0 %v8501_v19  ;;  %v8543_v19 = vld [vmem:[#allocation8 + $0x2a4] ss:$16 sps:$4 sm:$0xff]  }
 0x241   :  { %2604 = vmatmul.mubr.bf16.gmra.mrb[60].mxu0 %v9350_v13  ;;  %3916 = vmatprep.subr.bf16.mxu1 %v8504_v20  ;;  %v8546_v20 = vld [vmem:[#allocation8 + $0x2ac] ss:$16 sps:$4 sm:$0xff]  }
 0x242   :  { %2830 = vmatmul.mubr.bf16.gmra.mrb[60].mxu1 %v9350_v13 }
 0x243   :  { %3691 = vmatpush1.bf16.msra.mxu0 %v8499_v21 }
 0x244   :  { %3917 = vmatpush1.bf16.msra.mxu1 %v8502_v22  ;;  %3692 = vmatprep.subr.bf16.mxu0 %v8507_v40  ;;  %v8541_v22 = vld [vmem:[#allocation8 + $0x2a0] ss:$16 sps:$4 sm:$0xff]   ;;  %v8544_v40 = vld [vmem:[#allocation8 + $0x2a8] ss:$16 sps:$4 sm:$0xff]  }
 0x245   :  { %3918 = vmatprep.subr.bf16.mxu1 %v8510_v16 }
 0x247   :  { %3693 = vmatpush1.bf16.msra.mxu0 %v8505_v23 }
 0x248   :  { %3919 = vmatpush1.bf16.msra.mxu1 %v8508_v24  ;;  %3775 = vmatprep.subr.bf16.mxu0 %v8513_v25  ;;  %v8549_v24 = vld [vmem:[#allocation8 + $0x2c4] ss:$16 sps:$4 sm:$0xff]   ;;  %v8552_v25 = vld [vmem:[#allocation8 + $0x2cc] ss:$16 sps:$4 sm:$0xff]  }
 0x249   :  { %4001 = vmatprep.subr.bf16.mxu1 %v8516_v26 }
 0x2dc   :  { %v2535_v27 = vpop.f32.mrb[32].mxu0 }
 0x2dd   :  { %v2761_v28 = vpop.f32.mrb[32].mxu1  ;;  %v2537_v29 = vpop.f32.mrb[33].mxu0 }
 0x2de   :  { %v2763_v53 = vpop.f32.mrb[33].mxu1  ;;  %v2539_v30 = vpop.f32.mrb[34].mxu0 }
 0x2df   :  { %v2840_v13 = vpack.c.bf16 %v2539_v30, %v2535_v27  ;;  %v2765_v31 = vpop.f32.mrb[34].mxu1  ;;  %v2541_v32 = vpop.f32.mrb[35].mxu0 }
 0x2e0   :  { %v9386_v33 = vpack.c.bf16 %v2765_v31, %v2761_v28  ;;  %v2841_v34 = vpack.c.bf16 %v2541_v32, %v2537_v29  ;;  %v2767_v35 = vpop.f32.mrb[35].mxu1  ;;  %v8547_v32 = vld [vmem:[#allocation8 + $0x2c0] ss:$16 sps:$4 sm:$0xff]  }
 0x2e1   :  { %v9388_v36 = vpack.c.bf16 %v2767_v35, %v2763_v53 }
 0x2e2   :  { %3694 = vmatprep.mubr.bf16.mxu0 %v2841_v34  ;;  %3920 = vmatprep.mubr.bf16.mxu1 %v2841_v34  ;;  %v8550_v34 = vld [vmem:[#allocation8 + $0x2c8] ss:$16 sps:$4 sm:$0xff]  }
 0x2e3   :  { %3695 = vmatmul.mubr.bf16.vlgmr.msra.gmra.mrb[64].mxu0 %v2840_v13  ;;  %3921 = vmatmul.mubr.bf16.vlgmr.msra.gmra.mrb[64].mxu1 %v2840_v13 }
 0x2e4   :  { %v2545_v42 = vpop.f32.mrb[36].mxu0  ;;  %3776 = vmatpush1.bf16.msra.mxu0 %v8511_v51  ;;  %4002 = vmatpush1.bf16.msra.mxu1 %v8514_v17  ;;  %v8555_v51 = vld [vmem:[#allocation8 + $0x2e4] ss:$16 sps:$4 sm:$0xff]   ;;  %v8558_v17 = vld [vmem:[#allocation8 + $0x2ec] ss:$16 sps:$4 sm:$0xff]  }
 0x2e5   :  { %v2771_v15 = vpop.f32.mrb[36].mxu1  ;;  %v2547_v45 = vpop.f32.mrb[37].mxu0  ;;  %3777 = vmatprep.subr.bf16.mxu0 %v8519_v37  ;;  %4003 = vmatprep.subr.bf16.mxu1 %v8522_v38  ;;  %v8553_v38 = vld [vmem:[#allocation8 + $0x2e0] ss:$16 sps:$4 sm:$0xff]  }
 0x2e6   :  { %v2773_v50 = vpop.f32.mrb[37].mxu1  ;;  %v2549_v52 = vpop.f32.mrb[38].mxu0 }
 0x2e7   :  { %v2844_v54 = vpack.c.bf16 %v2549_v52, %v2545_v42  ;;  %v2775_v55 = vpop.f32.mrb[38].mxu1  ;;  %v2551_v43 = vpop.f32.mrb[39].mxu0  ;;  %v8556_v42 = vld [vmem:[#allocation8 + $0x2e8] ss:$16 sps:$4 sm:$0xff]  }
 0x2e8   :  { %v9390_v11 = vpack.c.bf16 %v2775_v55, %v2771_v15  ;;  %v2845_v56 = vpack.c.bf16 %v2551_v43, %v2547_v45  ;;  %v2777_v57 = vpop.f32.mrb[39].mxu1  ;;  %3778 = vmatpush1.bf16.msra.mxu0 %v8517_v46  ;;  %4004 = vmatpush1.bf16.msra.mxu1 %v8520_v47  ;;  %v8561_v15 = vld [vmem:[#allocation8 + $0x304] ss:$16 sps:$4 sm:$0xff]   ;;  %v8564_v45 = vld [vmem:[#allocation8 + $0x30c] ss:$16 sps:$4 sm:$0xff]  }
 0x2e9   :  { %v9392_v60 = vpack.c.bf16 %v2777_v57, %v2773_v50  ;;  %3779 = vmatprep.subr.bf16.mxu0 %v8525_v48  ;;  %4005 = vmatprep.subr.bf16.mxu1 %v8528_v49  ;;  %v8559_v57 = vld [vmem:[#allocation8 + $0x300] ss:$16 sps:$4 sm:$0xff]  }
 0x2ea   :  { %3704 = vmatprep.mubr.bf16.mxu0 %v2845_v56  ;;  %3930 = vmatprep.mubr.bf16.mxu1 %v2845_v56 }
 0x2eb   :  { %3705 = vmatmul.mubr.bf16.gmra.mrb[68].mxu0 %v2844_v54  ;;  %3931 = vmatmul.mubr.bf16.gmra.mrb[68].mxu1 %v2844_v54 }
 0x2ec   :  { %v2555_v41 = vpop.f32.mrb[40].mxu0  ;;  %3780 = vmatpush1.bf16.msra.mxu0 %v8523_v58  ;;  %4006 = vmatpush1.bf16.msra.mxu1 %v8526_v59  ;;  %v8562_v58 = vld [vmem:[#allocation8 + $0x308] ss:$16 sps:$4 sm:$0xff]  }
 0x2ed   :  { %v2781_v0 = vpop.f32.mrb[40].mxu1  ;;  %v2557_v1 = vpop.f32.mrb[41].mxu0  ;;  %3781 = vmatprep.subr.bf16.mxu0 %v8531_v61  ;;  %4007 = vmatprep.subr.bf16.mxu1 %v8534_v9  ;;  %v8567_v61 = vld [vmem:[#allocation8 + $0x324] ss:$16 sps:$4 sm:$0xff]   ;;  %v8570_v9 = vld [vmem:[#allocation8 + $0x32c] ss:$16 sps:$4 sm:$0xff]  }
 0x2ee   :  { %v2783_v39 = vpop.f32.mrb[41].mxu1  ;;  %v2559_v10 = vpop.f32.mrb[42].mxu0 }
 0x2ef   :  { %v2848_v4 = vpack.c.bf16 %v2559_v10, %v2555_v41  ;;  %v2785_v5 = vpop.f32.mrb[42].mxu1  ;;  %v2561_v6 = vpop.f32.mrb[43].mxu0 }
 0x2f0   :  { %v9394_v8 = vpack.c.bf16 %v2785_v5, %v2781_v0  ;;  %v2849_v12 = vpack.c.bf16 %v2561_v6, %v2557_v1  ;;  %v2787_v14 = vpop.f32.mrb[43].mxu1  ;;  %3782 = vmatpush1.bf16.msra.mxu0 %v8529_v62  ;;  %4008 = vmatpush1.bf16.msra.mxu1 %v8532_v63  ;;  %v8565_v62 = vld [vmem:[#allocation8 + $0x320] ss:$16 sps:$4 sm:$0xff]   ;;  %v8568_v63 = vld [vmem:[#allocation8 + $0x328] ss:$16 sps:$4 sm:$0xff]  }
 0x2f1   :  { %v9396_v18 = vpack.c.bf16 %v2787_v14, %v2783_v39  ;;  %3783 = vmatprep.subr.bf16.mxu0 %v8537_v2  ;;  %4009 = vmatprep.subr.bf16.mxu1 %v8540_v3  ;;  %v8573_v2 = vld [vmem:[#allocation8 + $0x344] ss:$16 sps:$4 sm:$0xff]   ;;  %v8576_v3 = vld [vmem:[#allocation8 + $0x34c] ss:$16 sps:$4 sm:$0xff]  }
 0x2f2   :  { %3714 = vmatprep.mubr.bf16.mxu0 %v2849_v12  ;;  %3940 = vmatprep.mubr.bf16.mxu1 %v2849_v12 }
 0x2f3   :  { %3715 = vmatmul.mubr.bf16.gmra.mrb[72].mxu0 %v2848_v4  ;;  %3941 = vmatmul.mubr.bf16.gmra.mrb[72].mxu1 %v2848_v4 }
 0x2f4   :  { %v2565_v21 = vpop.f32.mrb[44].mxu0  ;;  %3784 = vmatpush1.bf16.msra.mxu0 %v8535_v7  ;;  %4010 = vmatpush1.bf16.msra.mxu1 %v8538_v44  ;;  %v8571_v44 = vld [vmem:[#allocation8 + $0x340] ss:$16 sps:$4 sm:$0xff]  }
 0x2f5   :  { %v2791_v16 = vpop.f32.mrb[44].mxu1  ;;  %v2567_v23 = vpop.f32.mrb[45].mxu0  ;;  %3785 = vmatprep.subr.bf16.mxu0 %v8543_v19  ;;  %4011 = vmatprep.subr.bf16.mxu1 %v8546_v20  ;;  %v8574_v19 = vld [vmem:[#allocation8 + $0x348] ss:$16 sps:$4 sm:$0xff]  }
 0x2f6   :  { %v2793_v26 = vpop.f32.mrb[45].mxu1  ;;  %v2569_v27 = vpop.f32.mrb[46].mxu0 }
 0x2f7   :  { %v2852_v28 = vpack.c.bf16 %v2569_v27, %v2565_v21  ;;  %v2795_v29 = vpop.f32.mrb[46].mxu1  ;;  %v2571_v53 = vpop.f32.mrb[47].mxu0  ;;  %v8579_v21 = vld [vmem:[#allocation8 + $0x364] ss:$16 sps:$4 sm:$0xff]   ;;  %v8588_v27 = vld [vmem:[#allocation8 + $0x38c] ss:$16 sps:$4 sm:$0xff]  }
 0x2f8   :  { %v9398_v30 = vpack.c.bf16 %v2795_v29, %v2791_v16  ;;  %v2853_v13 = vpack.c.bf16 %v2571_v53, %v2567_v23  ;;  %v2797_v31 = vpop.f32.mrb[47].mxu1  ;;  %3786 = vmatpush1.bf16.msra.mxu0 %v8541_v22  ;;  %4012 = vmatpush1.bf16.msra.mxu1 %v8544_v40  ;;  %v8582_v22 = vld [vmem:[#allocation8 + $0x36c] ss:$16 sps:$4 sm:$0xff]   ;;  %v8577_v16 = vld [vmem:[#allocation8 + $0x360] ss:$16 sps:$4 sm:$0xff]  }
 0x2f9   :  { %v9400_v35 = vpack.c.bf16 %v2797_v31, %v2793_v26  ;;  %3787 = vmatprep.subr.bf16.mxu0 %v8549_v24  ;;  %4013 = vmatprep.subr.bf16.mxu1 %v8552_v25  ;;  %v8580_v23 = vld [vmem:[#allocation8 + $0x368] ss:$16 sps:$4 sm:$0xff]   ;;  %v8585_v26 = vld [vmem:[#allocation8 + $0x384] ss:$16 sps:$4 sm:$0xff]  }
 0x2fa   :  { %3724 = vmatprep.mubr.bf16.mxu0 %v2853_v13  ;;  %3950 = vmatprep.mubr.bf16.mxu1 %v2853_v13 }
 0x2fb   :  { %3725 = vmatmul.mubr.bf16.gmra.mrb[76].mxu0 %v2852_v28  ;;  %3951 = vmatmul.mubr.bf16.gmra.mrb[76].mxu1 %v2852_v28 }
 0x2fc   :  { %v2575_v37 = vpop.f32.mrb[48].mxu0  ;;  %3788 = vmatpush1.bf16.msra.mxu0 %v8547_v32  ;;  %4014 = vmatpush1.bf16.msra.mxu1 %v8550_v34 }
 0x2fd   :  { %v2801_v46 = vpop.f32.mrb[48].mxu1  ;;  %v2577_v47 = vpop.f32.mrb[49].mxu0  ;;  %3789 = vmatprep.subr.bf16.mxu0 %v8555_v51  ;;  %4015 = vmatprep.subr.bf16.mxu1 %v8558_v17  ;;  %v8583_v17 = vld [vmem:[#allocation8 + $0x380] ss:$16 sps:$4 sm:$0xff]  }
 0x2fe   :  { %v2803_v48 = vpop.f32.mrb[49].mxu1  ;;  %v2579_v49 = vpop.f32.mrb[50].mxu0 }
 0x2ff   :  { %v2856_v50 = vpack.c.bf16 %v2579_v49, %v2575_v37  ;;  %v2805_v52 = vpop.f32.mrb[50].mxu1  ;;  %v2581_v54 = vpop.f32.mrb[51].mxu0  ;;  %v8586_v37 = vld [vmem:[#allocation8 + $0x388] ss:$16 sps:$4 sm:$0xff]  }
 0x300   :  { %v9402_v55 = vpack.c.bf16 %v2805_v52, %v2801_v46  ;;  %v2857_v43 = vpack.c.bf16 %v2581_v54, %v2577_v47  ;;  %v2807_v56 = vpop.f32.mrb[51].mxu1  ;;  %3790 = vmatpush1.bf16.msra.mxu0 %v8553_v38  ;;  %4016 = vmatpush1.bf16.msra.mxu1 %v8556_v42  ;;  %v8591_v42 = vld [vmem:[#allocation8 + $0x3a4] ss:$16 sps:$4 sm:$0xff]   ;;  %v8594_v46 = vld [vmem:[#allocation8 + $0x3ac] ss:$16 sps:$4 sm:$0xff]  }
 0x301   :  { %v9404_v59 = vpack.c.bf16 %v2807_v56, %v2803_v48  ;;  %3791 = vmatprep.subr.bf16.mxu0 %v8561_v15  ;;  %4017 = vmatprep.subr.bf16.mxu1 %v8564_v45  ;;  %v8589_v15 = vld [vmem:[#allocation8 + $0x3a0] ss:$16 sps:$4 sm:$0xff]   ;;  %v8592_v45 = vld [vmem:[#allocation8 + $0x3a8] ss:$16 sps:$4 sm:$0xff]   ;;  %v8600_v52 = vld [vmem:[#allocation8 + $0x3cc] ss:$16 sps:$4 sm:$0xff]  }
 0x302   :  { %3734 = vmatprep.mubr.bf16.mxu0 %v2857_v43  ;;  %3960 = vmatprep.mubr.bf16.mxu1 %v2857_v43 }
 0x303   :  { %3735 = vmatmul.mubr.bf16.gmra.mrb[80].mxu0 %v2856_v50  ;;  %3961 = vmatmul.mubr.bf16.gmra.mrb[80].mxu1 %v2856_v50  ;;  %v8597_v50 = vld [vmem:[#allocation8 + $0x3c4] ss:$16 sps:$4 sm:$0xff]  }
 0x304   :  { %v2585_v41 = vpop.f32.mrb[52].mxu0  ;;  %3792 = vmatpush1.bf16.msra.mxu0 %v8559_v57  ;;  %4018 = vmatpush1.bf16.msra.mxu1 %v8562_v58 }
 0x305   :  { %v2811_v0 = vpop.f32.mrb[52].mxu1  ;;  %v2587_v1 = vpop.f32.mrb[53].mxu0  ;;  %3793 = vmatprep.subr.bf16.mxu0 %v8567_v61  ;;  %4019 = vmatprep.subr.bf16.mxu1 %v8570_v9 }
 0x306   :  { %v2813_v39 = vpop.f32.mrb[53].mxu1  ;;  %v2589_v10 = vpop.f32.mrb[54].mxu0 }
 0x307   :  { %v2860_v4 = vpack.c.bf16 %v2589_v10, %v2585_v41  ;;  %v2815_v5 = vpop.f32.mrb[54].mxu1  ;;  %v2591_v6 = vpop.f32.mrb[55].mxu0  ;;  %v8609_v10 = vld [vmem:[#allocation10 + $0x4] ss:$16 sps:$4 sm:$0xff]  }
 0x308   :  { %v9406_v12 = vpack.c.bf16 %v2815_v5, %v2811_v0  ;;  %v2861_v14 = vpack.c.bf16 %v2591_v6, %v2587_v1  ;;  %v2817_v7 = vpop.f32.mrb[55].mxu1  ;;  %3794 = vmatpush1.bf16.msra.mxu0 %v8565_v62  ;;  %4020 = vmatpush1.bf16.msra.mxu1 %v8568_v63  ;;  %v8595_v62 = vld [vmem:[#allocation8 + $0x3c0] ss:$16 sps:$4 sm:$0xff]   ;;  %v8598_v0 = vld [vmem:[#allocation8 + $0x3c8] ss:$16 sps:$4 sm:$0xff]  }
 0x309   :  { %v9408_v20 = vpack.c.bf16 %v2817_v7, %v2813_v39  ;;  %3795 = vmatprep.subr.bf16.mxu0 %v8573_v2  ;;  %4021 = vmatprep.subr.bf16.mxu1 %v8576_v3  ;;  %v8603_v1 = vld [vmem:[#allocation8 + $0x3e4] ss:$16 sps:$4 sm:$0xff]   ;;  %v8606_v2 = vld [vmem:[#allocation8 + $0x3ec] ss:$16 sps:$4 sm:$0xff]   ;;  %v8601_v3 = vld [vmem:[#allocation8 + $0x3e0] ss:$16 sps:$4 sm:$0xff]  }
 0x30a   :  { %3744 = vmatprep.mubr.bf16.mxu0 %v2861_v14  ;;  %3970 = vmatprep.mubr.bf16.mxu1 %v2861_v14  ;;  %v8604_v39 = vld [vmem:[#allocation8 + $0x3e8] ss:$16 sps:$4 sm:$0xff]   ;;  %v8607_v5 = vld [vmem:[#allocation10] ss:$16 sps:$4 sm:$0xff]   ;;  %v8615_v14 = vld [vmem:[#allocation10 + $0x24] ss:$16 sps:$4 sm:$0xff]  }
 0x30b   :  { %3745 = vmatmul.mubr.bf16.gmra.mrb[84].mxu0 %v2860_v4  ;;  %3971 = vmatmul.mubr.bf16.gmra.mrb[84].mxu1 %v2860_v4  ;;  %v8612_v4 = vld [vmem:[#allocation10 + $0xc] ss:$16 sps:$4 sm:$0xff]   ;;  %v8610_v6 = vld [vmem:[#allocation10 + $0x8] ss:$16 sps:$4 sm:$0xff]  }
 0x30c   :  { %v2595_v40 = vpop.f32.mrb[56].mxu0  ;;  %3796 = vmatpush1.bf16.msra.mxu0 %v8571_v44  ;;  %4022 = vmatpush1.bf16.msra.mxu1 %v8574_v19  ;;  %v8618_v7 = vld [vmem:[#allocation10 + $0x2c] ss:$16 sps:$4 sm:$0xff]   ;;  %v8616_v44 = vld [vmem:[#allocation10 + $0x28] ss:$16 sps:$4 sm:$0xff]  }
 0x30d   :  { %v2821_v24 = vpop.f32.mrb[56].mxu1  ;;  %v2597_v25 = vpop.f32.mrb[57].mxu0  ;;  %3797 = vmatprep.subr.bf16.mxu0 %v8579_v21  ;;  %4023 = vmatprep.subr.bf16.mxu1 %v8582_v22  ;;  %v8621_v19 = vld [vmem:[#allocation10 + $0x44] ss:$16 sps:$4 sm:$0xff]   ;;  %v8624_v21 = vld [vmem:[#allocation10 + $0x4c] ss:$16 sps:$4 sm:$0xff]  }
 0x30e   :  { %v2823_v28 = vpop.f32.mrb[57].mxu1  ;;  %v2599_v29 = vpop.f32.mrb[58].mxu0  ;;  %v8619_v22 = vld [vmem:[#allocation10 + $0x40] ss:$16 sps:$4 sm:$0xff]  }
 0x30f   :  { %v2864_v53 = vpack.c.bf16 %v2599_v29, %v2595_v40  ;;  %v2825_v13 = vpop.f32.mrb[58].mxu1  ;;  %v2601_v31 = vpop.f32.mrb[59].mxu0  ;;  %v8622_v40 = vld [vmem:[#allocation10 + $0x48] ss:$16 sps:$4 sm:$0xff]  }
 0x310   :  { %v9410_v32 = vpack.c.bf16 %v2825_v13, %v2821_v24  ;;  %v2865_v34 = vpack.c.bf16 %v2601_v31, %v2597_v25  ;;  %v2827_v51 = vpop.f32.mrb[59].mxu1  ;;  %3798 = vmatpush1.bf16.msra.mxu0 %v8577_v16  ;;  %4024 = vmatpush1.bf16.msra.mxu1 %v8580_v23  ;;  %v8627_v16 = vld [vmem:[#allocation10 + $0x64] ss:$16 sps:$4 sm:$0xff]   ;;  %v8628_v23 = vld [vmem:[#allocation10 + $0x68] ss:$16 sps:$4 sm:$0xff]  }
 0x311   :  { %v9412_v38 = vpack.c.bf16 %v2827_v51, %v2823_v28  ;;  %3799 = vmatprep.subr.bf16.mxu0 %v8585_v26  ;;  %4025 = vmatprep.subr.bf16.mxu1 %v8588_v27  ;;  %v8633_v24 = vld [vmem:[#allocation10 + $0x84] ss:$16 sps:$4 sm:$0xff]   ;;  %v8636_v25 = vld [vmem:[#allocation10 + $0x8c] ss:$16 sps:$4 sm:$0xff]   ;;  %v8631_v26 = vld [vmem:[#allocation10 + $0x80] ss:$16 sps:$4 sm:$0xff]  }
 0x312   :  { %3754 = vmatprep.mubr.bf16.mxu0 %v2865_v34  ;;  %3980 = vmatprep.mubr.bf16.mxu1 %v2865_v34  ;;  %v8634_v27 = vld [vmem:[#allocation10 + $0x88] ss:$16 sps:$4 sm:$0xff]   ;;  %v8639_v28 = vld [vmem:[#allocation10 + $0xa4] ss:$16 sps:$4 sm:$0xff]   ;;  %v8648_v13 = vld [vmem:[#allocation10 + $0xcc] ss:$16 sps:$4 sm:$0xff]  }
 0x313   :  { %3755 = vmatmul.mubr.bf16.gmra.mrb[88].mxu0 %v2864_v53  ;;  %3981 = vmatmul.mubr.bf16.gmra.mrb[88].mxu1 %v2864_v53  ;;  %v8640_v29 = vld [vmem:[#allocation10 + $0xa8] ss:$16 sps:$4 sm:$0xff]   ;;  %v8645_v53 = vld [vmem:[#allocation10 + $0xc4] ss:$16 sps:$4 sm:$0xff]   ;;  %v8643_v31 = vld [vmem:[#allocation10 + $0xc0] ss:$16 sps:$4 sm:$0xff]  }
 0x314   :  { %v2605_v47 = vpop.f32.mrb[60].mxu0  ;;  %3800 = vmatpush1.bf16.msra.mxu0 %v8583_v17  ;;  %4026 = vmatpush1.bf16.msra.mxu1 %v8586_v37  ;;  %v8646_v34 = vld [vmem:[#allocation10 + $0xc8] ss:$16 sps:$4 sm:$0xff]   ;;  %v8651_v51 = vld [vmem:[#allocation10 + $0xe4] ss:$16 sps:$4 sm:$0xff]  }
 0x315   :  { %v2831_v48 = vpop.f32.mrb[60].mxu1  ;;  %v2607_v49 = vpop.f32.mrb[61].mxu0  ;;  %3801 = vmatprep.subr.bf16.mxu0 %v8591_v42  ;;  %4027 = vmatprep.subr.bf16.mxu1 %v8594_v46  ;;  %v8652_v17 = vld [vmem:[#allocation10 + $0xe8] ss:$16 sps:$4 sm:$0xff]   ;;  %v8657_v37 = vld [vmem:[#allocation10 + $0x104] ss:$16 sps:$4 sm:$0xff]  }
 0x316   :  { %v2833_v54 = vpop.f32.mrb[61].mxu1  ;;  %v2609_v43 = vpop.f32.mrb[62].mxu0  ;;  %v8660_v42 = vld [vmem:[#allocation10 + $0x10c] ss:$16 sps:$4 sm:$0xff]   ;;  %v8655_v46 = vld [vmem:[#allocation10 + $0x100] ss:$16 sps:$4 sm:$0xff]  }
 0x317   :  { %v2868_v56 = vpack.c.bf16 %v2609_v43, %v2605_v47  ;;  %v2835_v57 = vpop.f32.mrb[62].mxu1  ;;  %v2611_v58 = vpop.f32.mrb[63].mxu0  ;;  %v8658_v47 = vld [vmem:[#allocation10 + $0x108] ss:$16 sps:$4 sm:$0xff]  }
 0x318   :  { %v9414_v61 = vpack.c.bf16 %v2835_v57, %v2831_v48  ;;  %v2869_v9 = vpack.c.bf16 %v2611_v58, %v2607_v49  ;;  %v2837_v41 = vpop.f32.mrb[63].mxu1  ;;  %3802 = vmatpush1.bf16.msra.mxu0 %v8589_v15  ;;  %4028 = vmatpush1.bf16.msra.mxu1 %v8592_v45  ;;  %v8663_v15 = vld [vmem:[#allocation10 + $0x124] ss:$16 sps:$4 sm:$0xff]   ;;  %v8664_v45 = vld [vmem:[#allocation10 + $0x128] ss:$16 sps:$4 sm:$0xff]  }
 0x319   :  { %v9416_v63 = vpack.c.bf16 %v2837_v41, %v2833_v54  ;;  %3803 = vmatprep.subr.bf16.mxu0 %v8597_v50  ;;  %4029 = vmatprep.subr.bf16.mxu1 %v8600_v52  ;;  %v8669_v48 = vld [vmem:[#allocation10 + $0x144] ss:$16 sps:$4 sm:$0xff]   ;;  %v8672_v49 = vld [vmem:[#allocation10 + $0x14c] ss:$16 sps:$4 sm:$0xff]   ;;  %v8667_v50 = vld [vmem:[#allocation10 + $0x140] ss:$16 sps:$4 sm:$0xff]  }
 0x31a   :  { %3764 = vmatprep.mubr.bf16.mxu0 %v2869_v9  ;;  %3990 = vmatprep.mubr.bf16.mxu1 %v2869_v9  ;;  %v8670_v52 = vld [vmem:[#allocation10 + $0x148] ss:$16 sps:$4 sm:$0xff]   ;;  %v8675_v54 = vld [vmem:[#allocation10 + $0x164] ss:$16 sps:$4 sm:$0xff]   ;;  %v8684_v57 = vld [vmem:[#allocation10 + $0x18c] ss:$16 sps:$4 sm:$0xff]  }
 0x31b   :  { %3765 = vmatmul.mubr.bf16.gmra.mrb[92].mxu0 %v2868_v56  ;;  %3991 = vmatmul.mubr.bf16.gmra.mrb[92].mxu1 %v2868_v56  ;;  %v8676_v43 = vld [vmem:[#allocation10 + $0x168] ss:$16 sps:$4 sm:$0xff]   ;;  %v8681_v56 = vld [vmem:[#allocation10 + $0x184] ss:$16 sps:$4 sm:$0xff]   ;;  %v8679_v58 = vld [vmem:[#allocation10 + $0x180] ss:$16 sps:$4 sm:$0xff]  }
 0x31c   :  { %3804 = vmatpush1.bf16.msra.mxu0 %v8595_v62  ;;  %3807 = vmatprep.mubr.bf16.mxu0 %v9388_v36  ;;  %v8682_v9 = vld [vmem:[#allocation10 + $0x188] ss:$16 sps:$4 sm:$0xff]   ;;  %v8687_v41 = vld [vmem:[#allocation10 + $0x1a4] ss:$16 sps:$4 sm:$0xff]  }
 0x31d   :  { %4030 = vmatpush1.bf16.msra.mxu1 %v8598_v0  ;;  %4033 = vmatprep.mubr.bf16.mxu1 %v9388_v36  ;;  %v8613_v36 = vld [vmem:[#allocation10 + $0x20] ss:$16 sps:$4 sm:$0xff]   ;;  %v8688_v62 = vld [vmem:[#allocation10 + $0x1a8] ss:$16 sps:$4 sm:$0xff]   ;;  %v8693_v0 = vld [vmem:[#allocation10 + $0x1c4] ss:$16 sps:$4 sm:$0xff]  }
 0x31e   :  { %3805 = vmatprep.subr.bf16.mxu0 %v8603_v1  ;;  %4031 = vmatprep.subr.bf16.mxu1 %v8606_v2  ;;  %v8696_v1 = vld [vmem:[#allocation10 + $0x1cc] ss:$16 sps:$4 sm:$0xff]   ;;  %v8691_v2 = vld [vmem:[#allocation10 + $0x1c0] ss:$16 sps:$4 sm:$0xff]  }
 0x320   :  { %3806 = vmatpush1.bf16.msra.mxu0 %v8601_v3  ;;  %v8702_v3 = vld [vmem:[#allocation10 + $0x1ec] ss:$16 sps:$4 sm:$0xff]  }
 0x321   :  { %4032 = vmatpush1.bf16.msra.mxu1 %v8604_v39  ;;  %4978 = vmatprep.subr.bf16.mxu0 %v8609_v10  ;;  %v8697_v39 = vld [vmem:[#allocation10 + $0x1e0] ss:$16 sps:$4 sm:$0xff]   ;;  %v8700_v10 = vld [vmem:[#allocation10 + $0x1e8] ss:$16 sps:$4 sm:$0xff]  }
 0x322   :  { %5204 = vmatprep.subr.bf16.mxu1 %v8612_v4  ;;  %v8705_v4 = vld [vmem:[#allocation10 + $0x204] ss:$16 sps:$4 sm:$0xff]  }
 0x323   :  { %3808 = vmatmul.mubr.bf16.vlgmr.msra.gmra.mrb[64].mxu0 %v9386_v33 }
 0x324   :  { %4034 = vmatmul.mubr.bf16.vlgmr.msra.gmra.mrb[64].mxu1 %v9386_v33  ;;  %3817 = vmatprep.mubr.bf16.mxu0 %v9392_v60  ;;  %v8630_v33 = vld [vmem:[#allocation10 + $0x6c] ss:$16 sps:$4 sm:$0xff]  }
 0x325   :  { %4043 = vmatprep.mubr.bf16.mxu1 %v9392_v60  ;;  %4979 = vmatpush1.bf16.msra.mxu0 %v8607_v5  ;;  %v8625_v60 = vld [vmem:[#allocation10 + $0x60] ss:$16 sps:$4 sm:$0xff]   ;;  %v8708_v5 = vld [vmem:[#allocation10 + $0x20c] ss:$16 sps:$4 sm:$0xff]  }
 0x326   :  { %5205 = vmatpush1.bf16.msra.mxu1 %v8610_v6  ;;  %4980 = vmatprep.subr.bf16.mxu0 %v8615_v14 }
 0x327   :  { %5206 = vmatprep.subr.bf16.mxu1 %v8618_v7  ;;  %v3000_v7 = vld [vmem:[%s9758_s4] sm:$0xf] }
 0x329   :  { %4981 = vmatpush1.bf16.msra.mxu0 %v8613_v36 }
 0x32a   :  { %5207 = vmatpush1.bf16.msra.mxu1 %v8616_v44  ;;  %4982 = vmatprep.subr.bf16.mxu0 %v8621_v19 }
 0x32b   :  { %3818 = vmatmul.mubr.bf16.gmra.mrb[68].mxu0 %v9390_v11  ;;  %5208 = vmatprep.subr.bf16.mxu1 %v8624_v21 }
 0x32c   :  { %4044 = vmatmul.mubr.bf16.gmra.mrb[68].mxu1 %v9390_v11  ;;  %3827 = vmatprep.mubr.bf16.mxu0 %v9396_v18  ;;  %v8642_v11 = vld [vmem:[#allocation10 + $0xac] ss:$16 sps:$4 sm:$0xff]  }
 0x32d   :  { %4053 = vmatprep.mubr.bf16.mxu1 %v9396_v18  ;;  %4983 = vmatpush1.bf16.msra.mxu0 %v8619_v22  ;;  %v8637_v18 = vld [vmem:[#allocation10 + $0xa0] ss:$16 sps:$4 sm:$0xff]  }
 0x32e   :  { %5209 = vmatpush1.bf16.msra.mxu1 %v8622_v40  ;;  %4984 = vmatprep.subr.bf16.mxu0 %v8627_v16 }
 0x32f   :  { %5210 = vmatprep.subr.bf16.mxu1 %v8630_v33 }
 0x331   :  { %4985 = vmatpush1.bf16.msra.mxu0 %v8625_v60 }
 0x332   :  { %5211 = vmatpush1.bf16.msra.mxu1 %v8628_v23  ;;  %4986 = vmatprep.subr.bf16.mxu0 %v8633_v24 }
 0x333   :  { %3828 = vmatmul.mubr.bf16.gmra.mrb[72].mxu0 %v9394_v8  ;;  %5212 = vmatprep.subr.bf16.mxu1 %v8636_v25 }
 0x334   :  { %4054 = vmatmul.mubr.bf16.gmra.mrb[72].mxu1 %v9394_v8  ;;  %3837 = vmatprep.mubr.bf16.mxu0 %v9400_v35  ;;  %v8654_v8 = vld [vmem:[#allocation10 + $0xec] ss:$16 sps:$4 sm:$0xff]  }
 0x335   :  { %4063 = vmatprep.mubr.bf16.mxu1 %v9400_v35  ;;  %4987 = vmatpush1.bf16.msra.mxu0 %v8631_v26  ;;  %v8649_v35 = vld [vmem:[#allocation10 + $0xe0] ss:$16 sps:$4 sm:$0xff]  }
 0x336   :  { %5213 = vmatpush1.bf16.msra.mxu1 %v8634_v27  ;;  %4988 = vmatprep.subr.bf16.mxu0 %v8639_v28 }
 0x337   :  { %5214 = vmatprep.subr.bf16.mxu1 %v8642_v11 }
 0x339   :  { %4989 = vmatpush1.bf16.msra.mxu0 %v8637_v18 }
 0x33a   :  { %5215 = vmatpush1.bf16.msra.mxu1 %v8640_v29  ;;  %4990 = vmatprep.subr.bf16.mxu0 %v8645_v53 }
 0x33b   :  { %3838 = vmatmul.mubr.bf16.gmra.mrb[76].mxu0 %v9398_v30  ;;  %5216 = vmatprep.subr.bf16.mxu1 %v8648_v13 }
 0x33c   :  { %4064 = vmatmul.mubr.bf16.gmra.mrb[76].mxu1 %v9398_v30  ;;  %3847 = vmatprep.mubr.bf16.mxu0 %v9404_v59  ;;  %v8666_v30 = vld [vmem:[#allocation10 + $0x12c] ss:$16 sps:$4 sm:$0xff]  }
 0x33d   :  { %4073 = vmatprep.mubr.bf16.mxu1 %v9404_v59  ;;  %4991 = vmatpush1.bf16.msra.mxu0 %v8643_v31  ;;  %v8661_v59 = vld [vmem:[#allocation10 + $0x120] ss:$16 sps:$4 sm:$0xff]  }
 0x33e   :  { %5217 = vmatpush1.bf16.msra.mxu1 %v8646_v34  ;;  %4992 = vmatprep.subr.bf16.mxu0 %v8651_v51 }
 0x33f   :  { %5218 = vmatprep.subr.bf16.mxu1 %v8654_v8 }
 0x341   :  { %4993 = vmatpush1.bf16.msra.mxu0 %v8649_v35 }
 0x342   :  { %5219 = vmatpush1.bf16.msra.mxu1 %v8652_v17  ;;  %4994 = vmatprep.subr.bf16.mxu0 %v8657_v37 }
 0x343   :  { %3848 = vmatmul.mubr.bf16.gmra.mrb[80].mxu0 %v9402_v55  ;;  %5220 = vmatprep.subr.bf16.mxu1 %v8660_v42 }
 0x344   :  { %4074 = vmatmul.mubr.bf16.gmra.mrb[80].mxu1 %v9402_v55  ;;  %3857 = vmatprep.mubr.bf16.mxu0 %v9408_v20  ;;  %v8678_v55 = vld [vmem:[#allocation10 + $0x16c] ss:$16 sps:$4 sm:$0xff]  }
 0x345   :  { %4083 = vmatprep.mubr.bf16.mxu1 %v9408_v20  ;;  %4995 = vmatpush1.bf16.msra.mxu0 %v8655_v46  ;;  %v8673_v20 = vld [vmem:[#allocation10 + $0x160] ss:$16 sps:$4 sm:$0xff]  }
 0x346   :  { %5221 = vmatpush1.bf16.msra.mxu1 %v8658_v47  ;;  %4996 = vmatprep.subr.bf16.mxu0 %v8663_v15 }
 0x347   :  { %5222 = vmatprep.subr.bf16.mxu1 %v8666_v30 }
 0x349   :  { %4997 = vmatpush1.bf16.msra.mxu0 %v8661_v59 }
 0x34a   :  { %5223 = vmatpush1.bf16.msra.mxu1 %v8664_v45  ;;  %4998 = vmatprep.subr.bf16.mxu0 %v8669_v48 }
 0x34b   :  { %3858 = vmatmul.mubr.bf16.gmra.mrb[84].mxu0 %v9406_v12  ;;  %5224 = vmatprep.subr.bf16.mxu1 %v8672_v49  ;;  %v8703_v49 = vld [vmem:[#allocation10 + $0x200] ss:$16 sps:$4 sm:$0xff]  }
 0x34c   :  { %4084 = vmatmul.mubr.bf16.gmra.mrb[84].mxu1 %v9406_v12  ;;  %3867 = vmatprep.mubr.bf16.mxu0 %v9412_v38  ;;  %v8690_v12 = vld [vmem:[#allocation10 + $0x1ac] ss:$16 sps:$4 sm:$0xff]  }
 0x34d   :  { %4093 = vmatprep.mubr.bf16.mxu1 %v9412_v38  ;;  %4999 = vmatpush1.bf16.msra.mxu0 %v8667_v50  ;;  %v8685_v38 = vld [vmem:[#allocation10 + $0x1a0] ss:$16 sps:$4 sm:$0xff]   ;;  %v8706_v50 = vld [vmem:[#allocation10 + $0x208] ss:$16 sps:$4 sm:$0xff]  }
 0x34e   :  { %5225 = vmatpush1.bf16.msra.mxu1 %v8670_v52  ;;  %5000 = vmatprep.subr.bf16.mxu0 %v8675_v54 }
 0x34f   :  { %5226 = vmatprep.subr.bf16.mxu1 %v8678_v55 }
 0x351   :  { %5001 = vmatpush1.bf16.msra.mxu0 %v8673_v20 }
 0x352   :  { %5227 = vmatpush1.bf16.msra.mxu1 %v8676_v43  ;;  %5002 = vmatprep.subr.bf16.mxu0 %v8681_v56  ;;  %v8711_v43 = vld [vmem:[#allocation10 + $0x224] ss:$16 sps:$4 sm:$0xff]   ;;  %v8714_v56 = vld [vmem:[#allocation10 + $0x22c] ss:$16 sps:$4 sm:$0xff]  }
 0x353   :  { %3868 = vmatmul.mubr.bf16.gmra.mrb[88].mxu0 %v9410_v32  ;;  %5228 = vmatprep.subr.bf16.mxu1 %v8684_v57 }
 0x354   :  { %4094 = vmatmul.mubr.bf16.gmra.mrb[88].mxu1 %v9410_v32  ;;  %3877 = vmatprep.mubr.bf16.mxu0 %v9416_v63  ;;  %v8694_v32 = vld [vmem:[#allocation10 + $0x1c8] ss:$16 sps:$4 sm:$0xff]  }
 0x355   :  { %4103 = vmatprep.mubr.bf16.mxu1 %v9416_v63  ;;  %5003 = vmatpush1.bf16.msra.mxu0 %v8679_v58  ;;  %v8699_v63 = vld [vmem:[#allocation10 + $0x1e4] ss:$16 sps:$4 sm:$0xff]  }
 0x356   :  { %5229 = vmatpush1.bf16.msra.mxu1 %v8682_v9  ;;  %5004 = vmatprep.subr.bf16.mxu0 %v8687_v41 }
 0x357   :  { %5230 = vmatprep.subr.bf16.mxu1 %v8690_v12 }
 0x359   :  { %5005 = vmatpush1.bf16.msra.mxu0 %v8685_v38 }
 0x35a   :  { %5231 = vmatpush1.bf16.msra.mxu1 %v8688_v62  ;;  %5006 = vmatprep.subr.bf16.mxu0 %v8693_v0 }
 0x35b   :  { %3878 = vmatmul.mubr.bf16.gmra.mrb[92].mxu0 %v9414_v61  ;;  %5232 = vmatprep.subr.bf16.mxu1 %v8696_v1 }
 0x35c   :  { %4104 = vmatmul.mubr.bf16.gmra.mrb[92].mxu1 %v9414_v61  ;;  %v3002_v61 = vlaneseq }
 0x35d   :  { %5007 = vmatpush1.bf16.msra.mxu0 %v8691_v2 }
 0x35e   :  { %5233 = vmatpush1.bf16.msra.mxu1 %v8694_v32  ;;  %5008 = vmatprep.subr.bf16.mxu0 %v8699_v63  ;;  %v9450_v6 = vshrl.u32 %v3002_v61, 7  ;;  %v8709_v63 = vld [vmem:[#allocation10 + $0x220] ss:$16 sps:$4 sm:$0xff]   ;;  %v8720_v61 = vld [vmem:[#allocation10 + $0x24c] ss:$16 sps:$4 sm:$0xff]  }
 0x35f   :  { %5234 = vmatprep.subr.bf16.mxu1 %v8702_v3  ;;  %v8712_v3 = vld [vmem:[#allocation10 + $0x228] ss:$16 sps:$4 sm:$0xff]  }
 0x360   :  { %v3004_v14 = vsub.s32 0, %v9450_v6  ;;  %v3012_v36 = vsub.s32 2, %v9450_v6  ;;  %v3008_v44 = vsub.s32 1, %v9450_v6  ;;  %v3016_v19 = vsub.s32 3, %v9450_v6 }
 0x361   :  { %5009 = vmatpush1.bf16.msra.mxu0 %v8697_v39 }
 0x362   :  { %5235 = vmatpush1.bf16.msra.mxu1 %v8700_v10  ;;  %5091 = vmatprep.subr.bf16.mxu0 %v8705_v4  ;;  %v9461_v21 = vrot.slane %v3000_v7, %v3004_v14  ;;  %v9465_v22 = vrot.slane %v3000_v7, %v3012_v36  ;;  %v9469_v40 = vrot.slane %v3000_v7, %v3008_v44 }
 0x363   :  { %5317 = vmatprep.subr.bf16.mxu1 %v8708_v5  ;;  %v9473_v16 = vrot.slane %v3000_v7, %v3016_v19  ;;  %v8717_v5 = vld [vmem:[#allocation10 + $0x244] ss:$16 sps:$4 sm:$0xff]  }
 0x3f6   :  { %v3809_v33 = vpop.f32.mrb[64].mxu0 }
 0x3f7   :  { %v7524_v60 = vadd.f32 %v3809_v33, %v9461_v21  ;;  %v4035_v23 = vpop.f32.mrb[64].mxu1  ;;  %v3811_v24 = vpop.f32.mrb[65].mxu0 }
 0x3f8   :  { %v7556_v25 = vadd.f32 %v4035_v23, %v9465_v22  ;;  %v7525_v26 = vadd.f32 %v3811_v24, %v9469_v40  ;;  %v4037_v27 = vpop.f32.mrb[65].mxu1  ;;  %v3813_v28 = vpop.f32.mrb[66].mxu0 }
 0x3f9   :  { %v7557_v11 = vadd.f32 %v4037_v27, %v9473_v16  ;;  %v7526_v18 = vadd.f32 %v3813_v28, %v9461_v21  ;;  %v4039_v29 = vpop.f32.mrb[66].mxu1  ;;  %v3815_v53 = vpop.f32.mrb[67].mxu0  ;;  %v4114_v51 = vmax.f32 %v7524_v60, 0.0 }
 0x3fa   :  { %v7558_v13 = vadd.f32 %v4039_v29, %v9465_v22  ;;  %v7527_v31 = vadd.f32 %v3815_v53, %v9469_v40  ;;  %v4041_v34 = vpop.f32.mrb[67].mxu1  ;;  %v4116_v17 = vmax.f32 %v7556_v25, 0.0  ;;  %v4115_v37 = vmax.f32 %v7525_v26, 0.0  ;;  %v8718_v29 = vld [vmem:[#allocation10 + $0x248] ss:$16 sps:$4 sm:$0xff]  }
 0x3fb   :  { %v4118_v8 = vmax.f32 %v7526_v18, 0.0  ;;  %v7559_v35 = vadd.f32 %v4041_v34, %v9473_v16  ;;  %v4117_v47 = vmax.f32 %v7557_v11, 0.0  ;;  %v8715_v18 = vld [vmem:[#allocation10 + $0x240] ss:$16 sps:$4 sm:$0xff]  }
 0x3fc   :  { %v4120_v42 = vmax.f32 %v7558_v13, 0.0  ;;  %v4119_v46 = vmax.f32 %v7527_v31, 0.0 }
 0x3fd   :  { %v4178_v15 = vpack.c.bf16 %v4118_v8, %v4114_v51  ;;  %v4121_v30 = vmax.f32 %v7559_v35, 0.0  ;;  %v8723_v51 = vld [vmem:[#allocation10 + $0x264] ss:$16 sps:$4 sm:$0xff]   ;;  %v8726_v8 = vld [vmem:[#allocation10 + $0x26c] ss:$16 sps:$4 sm:$0xff]  }
 0x3fe   :  { %v9483_v59 = vpack.c.bf16 %v4120_v42, %v4116_v17  ;;  %v4179_v45 = vpack.c.bf16 %v4119_v46, %v4115_v37  ;;  %v3819_v48 = vpop.f32.mrb[68].mxu0 }
 0x3ff   :  { %v9485_v52 = vpack.c.bf16 %v4121_v30, %v4117_v47  ;;  %v7528_v54 = vadd.f32 %v3819_v48, %v9461_v21  ;;  %v4045_v55 = vpop.f32.mrb[68].mxu1  ;;  %v3821_v20 = vpop.f32.mrb[69].mxu0 }
 0x400   :  { %v7560_v57 = vadd.f32 %v4045_v55, %v9465_v22  ;;  %v7529_v58 = vadd.f32 %v3821_v20, %v9469_v40  ;;  %v4047_v9 = vpop.f32.mrb[69].mxu1  ;;  %v3823_v41 = vpop.f32.mrb[70].mxu0  ;;  %5010 = vmatprep.mubr.bf16.mxu0 %v4179_v45  ;;  %5236 = vmatprep.mubr.bf16.mxu1 %v4179_v45 }
 0x401   :  { %v7561_v12 = vadd.f32 %v4047_v9, %v9473_v16  ;;  %v7530_v38 = vadd.f32 %v3823_v41, %v9461_v21  ;;  %v4049_v62 = vpop.f32.mrb[70].mxu1  ;;  %v3825_v0 = vpop.f32.mrb[71].mxu0  ;;  %5011 = vmatmul.mubr.bf16.vlgmr.msra.gmra.mrb[96].mxu0 %v4178_v15  ;;  %5237 = vmatmul.mubr.bf16.vlgmr.msra.gmra.mrb[96].mxu1 %v4178_v15  ;;  %v4122_v39 = vmax.f32 %v7528_v54, 0.0  ;;  %v8724_v54 = vld [vmem:[#allocation10 + $0x268] ss:$16 sps:$4 sm:$0xff]  }
 0x402   :  { %v7562_v1 = vadd.f32 %v4049_v62, %v9465_v22  ;;  %v7531_v2 = vadd.f32 %v3825_v0, %v9469_v40  ;;  %v4051_v32 = vpop.f32.mrb[71].mxu1  ;;  %5092 = vmatpush1.bf16.msra.mxu0 %v8703_v49  ;;  %5318 = vmatpush1.bf16.msra.mxu1 %v8706_v50  ;;  %v4124_v7 = vmax.f32 %v7560_v57, 0.0  ;;  %v4123_v33 = vmax.f32 %v7529_v58, 0.0  ;;  %v8721_v50 = vld [vmem:[#allocation10 + $0x260] ss:$16 sps:$4 sm:$0xff]  }
 0x403   :  { %v4126_v10 = vmax.f32 %v7530_v38, 0.0  ;;  %v7563_v4 = vadd.f32 %v4051_v32, %v9473_v16  ;;  %5093 = vmatprep.subr.bf16.mxu0 %v8711_v43  ;;  %5319 = vmatprep.subr.bf16.mxu1 %v8714_v56  ;;  %v4125_v24 = vmax.f32 %v7561_v12, 0.0  ;;  %v8729_v56 = vld [vmem:[#allocation10 + $0x284] ss:$16 sps:$4 sm:$0xff]   ;;  %v8732_v57 = vld [vmem:[#allocation10 + $0x28c] ss:$16 sps:$4 sm:$0xff]  }
 0x404   :  { %v4128_v60 = vmax.f32 %v7562_v1, 0.0  ;;  %v4127_v23 = vmax.f32 %v7531_v2, 0.0 }
 0x405   :  { %v4182_v25 = vpack.c.bf16 %v4126_v10, %v4122_v39  ;;  %v4129_v26 = vmax.f32 %v7563_v4, 0.0 }
 0x406   :  { %v9495_v27 = vpack.c.bf16 %v4128_v60, %v4124_v7  ;;  %v4183_v28 = vpack.c.bf16 %v4127_v23, %v4123_v33  ;;  %v3829_v11 = vpop.f32.mrb[72].mxu0  ;;  %5094 = vmatpush1.bf16.msra.mxu0 %v8709_v63  ;;  %5320 = vmatpush1.bf16.msra.mxu1 %v8712_v3  ;;  %v8727_v63 = vld [vmem:[#allocation10 + $0x280] ss:$16 sps:$4 sm:$0xff]   ;;  %v8730_v3 = vld [vmem:[#allocation10 + $0x288] ss:$16 sps:$4 sm:$0xff]  }
 0x407   :  { %v9497_v53 = vpack.c.bf16 %v4129_v26, %v4125_v24  ;;  %v7532_v13 = vadd.f32 %v3829_v11, %v9461_v21  ;;  %v4055_v31 = vpop.f32.mrb[72].mxu1  ;;  %v3831_v34 = vpop.f32.mrb[73].mxu0  ;;  %5095 = vmatprep.subr.bf16.mxu0 %v8717_v5  ;;  %5321 = vmatprep.subr.bf16.mxu1 %v8720_v61  ;;  %v8735_v61 = vld [vmem:[#allocation10 + $0x2a4] ss:$16 sps:$4 sm:$0xff]   ;;  %v8738_v7 = vld [vmem:[#allocation10 + $0x2ac] ss:$16 sps:$4 sm:$0xff]  }
 0x408   :  { %v7564_v35 = vadd.f32 %v4055_v31, %v9465_v22  ;;  %v7533_v17 = vadd.f32 %v3831_v34, %v9469_v40  ;;  %v4057_v37 = vpop.f32.mrb[73].mxu1  ;;  %v3833_v42 = vpop.f32.mrb[74].mxu0  ;;  %5020 = vmatprep.mubr.bf16.mxu0 %v4183_v28  ;;  %5246 = vmatprep.mubr.bf16.mxu1 %v4183_v28  ;;  %v8733_v31 = vld [vmem:[#allocation10 + $0x2a0] ss:$16 sps:$4 sm:$0xff]   ;;  %v8736_v34 = vld [vmem:[#allocation10 + $0x2a8] ss:$16 sps:$4 sm:$0xff]  }
 0x409   :  { %v7565_v46 = vadd.f32 %v4057_v37, %v9473_v16  ;;  %v7534_v47 = vadd.f32 %v3833_v42, %v9461_v21  ;;  %v4059_v15 = vpop.f32.mrb[74].mxu1  ;;  %v3835_v30 = vpop.f32.mrb[75].mxu0  ;;  %5021 = vmatmul.mubr.bf16.gmra.mrb[100].mxu0 %v4182_v25  ;;  %5247 = vmatmul.mubr.bf16.gmra.mrb[100].mxu1 %v4182_v25  ;;  %v4130_v55 = vmax.f32 %v7532_v13, 0.0  ;;  %v8744_v37 = vld [vmem:[#allocation10 + $0x2cc] ss:$16 sps:$4 sm:$0xff]  }
 0x40a   :  { %v7566_v45 = vadd.f32 %v4059_v15, %v9465_v22  ;;  %v7535_v48 = vadd.f32 %v3835_v30, %v9469_v40  ;;  %v4061_v49 = vpop.f32.mrb[75].mxu1  ;;  %5096 = vmatpush1.bf16.msra.mxu0 %v8715_v18  ;;  %5322 = vmatpush1.bf16.msra.mxu1 %v8718_v29  ;;  %v4132_v58 = vmax.f32 %v7564_v35, 0.0  ;;  %v4131_v9 = vmax.f32 %v7533_v17, 0.0  ;;  %v8741_v17 = vld [vmem:[#allocation10 + $0x2c4] ss:$16 sps:$4 sm:$0xff]  }
 0x40b   :  { %v4134_v20 = vmax.f32 %v7534_v47, 0.0  ;;  %v7567_v43 = vadd.f32 %v4061_v49, %v9473_v16  ;;  %5097 = vmatprep.subr.bf16.mxu0 %v8723_v51  ;;  %5323 = vmatprep.subr.bf16.mxu1 %v8726_v8  ;;  %v4133_v38 = vmax.f32 %v7565_v46, 0.0 }
 0x40c   :  { %v4136_v41 = vmax.f32 %v7566_v45, 0.0  ;;  %v4135_v12 = vmax.f32 %v7535_v48, 0.0 }
 0x40d   :  { %v4186_v62 = vpack.c.bf16 %v4134_v20, %v4130_v55  ;;  %v4137_v0 = vmax.f32 %v7567_v43, 0.0  ;;  %v8739_v55 = vld [vmem:[#allocation10 + $0x2c0] ss:$16 sps:$4 sm:$0xff]   ;;  %v8742_v20 = vld [vmem:[#allocation10 + $0x2c8] ss:$16 sps:$4 sm:$0xff]  }
 0x40e   :  { %v9507_v1 = vpack.c.bf16 %v4136_v41, %v4132_v58  ;;  %v4187_v2 = vpack.c.bf16 %v4135_v12, %v4131_v9  ;;  %v3839_v32 = vpop.f32.mrb[76].mxu0  ;;  %5098 = vmatpush1.bf16.msra.mxu0 %v8721_v50  ;;  %5324 = vmatpush1.bf16.msra.mxu1 %v8724_v54  ;;  %v8747_v9 = vld [vmem:[#allocation10 + $0x2e4] ss:$16 sps:$4 sm:$0xff]   ;;  %v8750_v41 = vld [vmem:[#allocation10 + $0x2ec] ss:$16 sps:$4 sm:$0xff]  }
 0x40f   :  { %v9509_v39 = vpack.c.bf16 %v4137_v0, %v4133_v38  ;;  %v7536_v10 = vadd.f32 %v3839_v32, %v9461_v21  ;;  %v4065_v4 = vpop.f32.mrb[76].mxu1  ;;  %v3841_v5 = vpop.f32.mrb[77].mxu0  ;;  %5099 = vmatprep.subr.bf16.mxu0 %v8729_v56  ;;  %5325 = vmatprep.subr.bf16.mxu1 %v8732_v57 }
 0x410   :  { %v7568_v33 = vadd.f32 %v4065_v4, %v9465_v22  ;;  %v7537_v60 = vadd.f32 %v3841_v5, %v9469_v40  ;;  %v4067_v23 = vpop.f32.mrb[77].mxu1  ;;  %v3843_v24 = vpop.f32.mrb[78].mxu0  ;;  %5030 = vmatprep.mubr.bf16.mxu0 %v4187_v2  ;;  %5256 = vmatprep.mubr.bf16.mxu1 %v4187_v2 }
 0x411   :  { %v7569_v25 = vadd.f32 %v4067_v23, %v9473_v16  ;;  %v7538_v26 = vadd.f32 %v3843_v24, %v9461_v21  ;;  %v4069_v28 = vpop.f32.mrb[78].mxu1  ;;  %v3845_v11 = vpop.f32.mrb[79].mxu0  ;;  %5031 = vmatmul.mubr.bf16.gmra.mrb[104].mxu0 %v4186_v62  ;;  %5257 = vmatmul.mubr.bf16.gmra.mrb[104].mxu1 %v4186_v62  ;;  %v4138_v51 = vmax.f32 %v7536_v10, 0.0  ;;  %v8753_v24 = vld [vmem:[#allocation10 + $0x304] ss:$16 sps:$4 sm:$0xff]  }
 0x412   :  { %v7570_v18 = vadd.f32 %v4069_v28, %v9465_v22  ;;  %v7539_v29 = vadd.f32 %v3845_v11, %v9469_v40  ;;  %v4071_v13 = vpop.f32.mrb[79].mxu1  ;;  %5100 = vmatpush1.bf16.msra.mxu0 %v8727_v63  ;;  %5326 = vmatpush1.bf16.msra.mxu1 %v8730_v3  ;;  %v4140_v42 = vmax.f32 %v7568_v33, 0.0  ;;  %v4139_v46 = vmax.f32 %v7537_v60, 0.0 }
 0x413   :  { %v4142_v8 = vmax.f32 %v7538_v26, 0.0  ;;  %v7571_v35 = vadd.f32 %v4071_v13, %v9473_v16  ;;  %5101 = vmatprep.subr.bf16.mxu0 %v8735_v61  ;;  %5327 = vmatprep.subr.bf16.mxu1 %v8738_v7  ;;  %v4141_v30 = vmax.f32 %v7569_v25, 0.0  ;;  %v8745_v61 = vld [vmem:[#allocation10 + $0x2e0] ss:$16 sps:$4 sm:$0xff]   ;;  %v8748_v7 = vld [vmem:[#allocation10 + $0x2e8] ss:$16 sps:$4 sm:$0xff]  }
 0x414   :  { %v4144_v47 = vmax.f32 %v7570_v18, 0.0  ;;  %v4143_v15 = vmax.f32 %v7539_v29, 0.0  ;;  %v8756_v25 = vld [vmem:[#allocation10 + $0x30c] ss:$16 sps:$4 sm:$0xff]  }
 0x415   :  { %v4190_v45 = vpack.c.bf16 %v4142_v8, %v4138_v51  ;;  %v4145_v48 = vmax.f32 %v7571_v35, 0.0  ;;  %v8751_v35 = vld [vmem:[#allocation10 + $0x300] ss:$16 sps:$4 sm:$0xff]  }
 0x416   :  { %v9519_v49 = vpack.c.bf16 %v4144_v47, %v4140_v42  ;;  %v4191_v50 = vpack.c.bf16 %v4143_v15, %v4139_v46  ;;  %v3849_v54 = vpop.f32.mrb[80].mxu0  ;;  %5102 = vmatpush1.bf16.msra.mxu0 %v8733_v31  ;;  %5328 = vmatpush1.bf16.msra.mxu1 %v8736_v34  ;;  %v8759_v15 = vld [vmem:[#allocation10 + $0x324] ss:$16 sps:$4 sm:$0xff]  }
 0x417   :  { %v9521_v43 = vpack.c.bf16 %v4145_v48, %v4141_v30  ;;  %v7540_v56 = vadd.f32 %v3849_v54, %v9461_v21  ;;  %v4075_v57 = vpop.f32.mrb[80].mxu1  ;;  %v3851_v58 = vpop.f32.mrb[81].mxu0  ;;  %5103 = vmatprep.subr.bf16.mxu0 %v8741_v17  ;;  %5329 = vmatprep.subr.bf16.mxu1 %v8744_v37  ;;  %v8754_v17 = vld [vmem:[#allocation10 + $0x308] ss:$16 sps:$4 sm:$0xff]   ;;  %v8762_v30 = vld [vmem:[#allocation10 + $0x32c] ss:$16 sps:$4 sm:$0xff]  }
 0x418   :  { %v7572_v12 = vadd.f32 %v4075_v57, %v9465_v22  ;;  %v7541_v38 = vadd.f32 %v3851_v58, %v9469_v40  ;;  %v4077_v62 = vpop.f32.mrb[81].mxu1  ;;  %v3853_v0 = vpop.f32.mrb[82].mxu0  ;;  %5040 = vmatprep.mubr.bf16.mxu0 %v4191_v50  ;;  %5266 = vmatprep.mubr.bf16.mxu1 %v4191_v50 }
 0x419   :  { %v7573_v2 = vadd.f32 %v4077_v62, %v9473_v16  ;;  %v7542_v32 = vadd.f32 %v3853_v0, %v9461_v21  ;;  %v4079_v63 = vpop.f32.mrb[82].mxu1  ;;  %v3855_v3 = vpop.f32.mrb[83].mxu0  ;;  %5041 = vmatmul.mubr.bf16.gmra.mrb[108].mxu0 %v4190_v45  ;;  %5267 = vmatmul.mubr.bf16.gmra.mrb[108].mxu1 %v4190_v45  ;;  %v4146_v33 = vmax.f32 %v7540_v56, 0.0 }
 0x41a   :  { %v7574_v10 = vadd.f32 %v4079_v63, %v9465_v22  ;;  %v7543_v4 = vadd.f32 %v3855_v3, %v9469_v40  ;;  %v4081_v5 = vpop.f32.mrb[83].mxu1  ;;  %5104 = vmatpush1.bf16.msra.mxu0 %v8739_v55  ;;  %5330 = vmatpush1.bf16.msra.mxu1 %v8742_v20  ;;  %v4148_v26 = vmax.f32 %v7572_v12, 0.0  ;;  %v4147_v28 = vmax.f32 %v7541_v38, 0.0  ;;  %v8757_v12 = vld [vmem:[#allocation10 + $0x320] ss:$16 sps:$4 sm:$0xff]  }
 0x41b   :  { %v4150_v60 = vmax.f32 %v7542_v32, 0.0  ;;  %v7575_v23 = vadd.f32 %v4081_v5, %v9473_v16  ;;  %5105 = vmatprep.subr.bf16.mxu0 %v8747_v9  ;;  %5331 = vmatprep.subr.bf16.mxu1 %v8750_v41  ;;  %v4149_v29 = vmax.f32 %v7573_v2, 0.0  ;;  %v8760_v38 = vld [vmem:[#allocation10 + $0x328] ss:$16 sps:$4 sm:$0xff]   ;;  %v8765_v32 = vld [vmem:[#allocation10 + $0x344] ss:$16 sps:$4 sm:$0xff]  }
 0x41c   :  { %v4152_v11 = vmax.f32 %v7574_v10, 0.0  ;;  %v4151_v18 = vmax.f32 %v7543_v4, 0.0  ;;  %v8768_v63 = vld [vmem:[#allocation10 + $0x34c] ss:$16 sps:$4 sm:$0xff]  }
 0x41d   :  { %v4194_v13 = vpack.c.bf16 %v4150_v60, %v4146_v33  ;;  %v4153_v31 = vmax.f32 %v7575_v23, 0.0 }
 0x41e   :  { %v9531_v34 = vpack.c.bf16 %v4152_v11, %v4148_v26  ;;  %v4195_v51 = vpack.c.bf16 %v4151_v18, %v4147_v28  ;;  %v3859_v8 = vpop.f32.mrb[84].mxu0  ;;  %5106 = vmatpush1.bf16.msra.mxu0 %v8745_v61  ;;  %5332 = vmatpush1.bf16.msra.mxu1 %v8748_v7  ;;  %v8766_v26 = vld [vmem:[#allocation10 + $0x348] ss:$16 sps:$4 sm:$0xff]  }
 0x41f   :  { %v9533_v37 = vpack.c.bf16 %v4153_v31, %v4149_v29  ;;  %v7544_v42 = vadd.f32 %v3859_v8, %v9461_v21  ;;  %v4085_v46 = vpop.f32.mrb[84].mxu1  ;;  %v3861_v47 = vpop.f32.mrb[85].mxu0  ;;  %5107 = vmatprep.subr.bf16.mxu0 %v8753_v24  ;;  %5333 = vmatprep.subr.bf16.mxu1 %v8756_v25  ;;  %v8763_v25 = vld [vmem:[#allocation10 + $0x340] ss:$16 sps:$4 sm:$0xff]   ;;  %v8774_v31 = vld [vmem:[#allocation10 + $0x36c] ss:$16 sps:$4 sm:$0xff]  }
 0x420   :  { %v7576_v45 = vadd.f32 %v4085_v46, %v9465_v22  ;;  %v7545_v48 = vadd.f32 %v3861_v47, %v9469_v40  ;;  %v4087_v50 = vpop.f32.mrb[85].mxu1  ;;  %v3863_v54 = vpop.f32.mrb[86].mxu0  ;;  %5050 = vmatprep.mubr.bf16.mxu0 %v4195_v51  ;;  %5276 = vmatprep.mubr.bf16.mxu1 %v4195_v51 }
 0x421   :  { %v7577_v55 = vadd.f32 %v4087_v50, %v9473_v16  ;;  %v7546_v20 = vadd.f32 %v3863_v54, %v9461_v21  ;;  %v4089_v56 = vpop.f32.mrb[86].mxu1  ;;  %v3865_v57 = vpop.f32.mrb[87].mxu0  ;;  %5051 = vmatmul.mubr.bf16.gmra.mrb[112].mxu0 %v4194_v13  ;;  %5277 = vmatmul.mubr.bf16.gmra.mrb[112].mxu1 %v4194_v13  ;;  %v4154_v62 = vmax.f32 %v7544_v42, 0.0  ;;  %v8771_v13 = vld [vmem:[#allocation10 + $0x364] ss:$16 sps:$4 sm:$0xff]  }
 0x422   :  { %v7578_v58 = vadd.f32 %v4089_v56, %v9465_v22  ;;  %v7547_v9 = vadd.f32 %v3865_v57, %v9469_v40  ;;  %v4091_v41 = vpop.f32.mrb[87].mxu1  ;;  %5108 = vmatpush1.bf16.msra.mxu0 %v8751_v35  ;;  %5334 = vmatpush1.bf16.msra.mxu1 %v8754_v17  ;;  %v4156_v3 = vmax.f32 %v7576_v45, 0.0  ;;  %v4155_v10 = vmax.f32 %v7545_v48, 0.0  ;;  %v8769_v50 = vld [vmem:[#allocation10 + $0x360] ss:$16 sps:$4 sm:$0xff]  }
 0x423   :  { %v4158_v0 = vmax.f32 %v7546_v20, 0.0  ;;  %v7579_v2 = vadd.f32 %v4091_v41, %v9473_v16  ;;  %5109 = vmatprep.subr.bf16.mxu0 %v8759_v15  ;;  %5335 = vmatprep.subr.bf16.mxu1 %v8762_v30  ;;  %v4157_v61 = vmax.f32 %v7577_v55, 0.0  ;;  %v8772_v54 = vld [vmem:[#allocation10 + $0x368] ss:$16 sps:$4 sm:$0xff]   ;;  %v8777_v57 = vld [vmem:[#allocation10 + $0x384] ss:$16 sps:$4 sm:$0xff]  }
 0x424   :  { %v4160_v4 = vmax.f32 %v7578_v58, 0.0  ;;  %v4159_v5 = vmax.f32 %v7547_v9, 0.0  ;;  %v8780_v58 = vld [vmem:[#allocation10 + $0x38c] ss:$16 sps:$4 sm:$0xff]  }
 0x425   :  { %v4198_v7 = vpack.c.bf16 %v4158_v0, %v4154_v62  ;;  %v4161_v33 = vmax.f32 %v7579_v2, 0.0 }
 0x426   :  { %v9543_v60 = vpack.c.bf16 %v4160_v4, %v4156_v3  ;;  %v4199_v23 = vpack.c.bf16 %v4159_v5, %v4155_v10  ;;  %v3869_v24 = vpop.f32.mrb[88].mxu0  ;;  %5110 = vmatpush1.bf16.msra.mxu0 %v8757_v12  ;;  %5336 = vmatpush1.bf16.msra.mxu1 %v8760_v38  ;;  %v8775_v10 = vld [vmem:[#allocation10 + $0x380] ss:$16 sps:$4 sm:$0xff]   ;;  %v8778_v4 = vld [vmem:[#allocation10 + $0x388] ss:$16 sps:$4 sm:$0xff]  }
 0x427   :  { %v9545_v28 = vpack.c.bf16 %v4161_v33, %v4157_v61  ;;  %v7548_v11 = vadd.f32 %v3869_v24, %v9461_v21  ;;  %v4095_v18 = vpop.f32.mrb[88].mxu1  ;;  %v3871_v29 = vpop.f32.mrb[89].mxu0  ;;  %5111 = vmatprep.subr.bf16.mxu0 %v8765_v32  ;;  %5337 = vmatprep.subr.bf16.mxu1 %v8768_v63  ;;  %v8786_v24 = vld [vmem:[#allocation10 + $0x3ac] ss:$16 sps:$4 sm:$0xff]  }
 0x428   :  { %v7580_v51 = vadd.f32 %v4095_v18, %v9465_v22  ;;  %v7549_v8 = vadd.f32 %v3871_v29, %v9469_v40  ;;  %v4097_v35 = vpop.f32.mrb[89].mxu1  ;;  %v3873_v17 = vpop.f32.mrb[90].mxu0  ;;  %5060 = vmatprep.mubr.bf16.mxu0 %v4199_v23  ;;  %5286 = vmatprep.mubr.bf16.mxu1 %v4199_v23  ;;  %v8783_v23 = vld [vmem:[#allocation10 + $0x3a4] ss:$16 sps:$4 sm:$0xff]  }
 0x429   :  { %v7581_v42 = vadd.f32 %v4097_v35, %v9473_v16  ;;  %v7550_v46 = vadd.f32 %v3873_v17, %v9461_v21  ;;  %v4099_v47 = vpop.f32.mrb[90].mxu1  ;;  %v3875_v15 = vpop.f32.mrb[91].mxu0  ;;  %5061 = vmatmul.mubr.bf16.gmra.mrb[116].mxu0 %v4198_v7  ;;  %5287 = vmatmul.mubr.bf16.gmra.mrb[116].mxu1 %v4198_v7  ;;  %v4162_v55 = vmax.f32 %v7548_v11, 0.0 }
 0x42a   :  { %v7582_v30 = vadd.f32 %v4099_v47, %v9465_v22  ;;  %v7551_v45 = vadd.f32 %v3875_v15, %v9469_v40  ;;  %v4101_v48 = vpop.f32.mrb[91].mxu1  ;;  %5112 = vmatpush1.bf16.msra.mxu0 %v8763_v25  ;;  %5338 = vmatpush1.bf16.msra.mxu1 %v8766_v26  ;;  %v4164_v9 = vmax.f32 %v7580_v51, 0.0  ;;  %v4163_v41 = vmax.f32 %v7549_v8, 0.0 }
 0x42b   :  { %v4166_v20 = vmax.f32 %v7550_v46, 0.0  ;;  %v7583_v56 = vadd.f32 %v4101_v48, %v9473_v16  ;;  %5113 = vmatprep.subr.bf16.mxu0 %v8771_v13  ;;  %5339 = vmatprep.subr.bf16.mxu1 %v8774_v31  ;;  %v4165_v62 = vmax.f32 %v7581_v42, 0.0  ;;  %v8781_v42 = vld [vmem:[#allocation10 + $0x3a0] ss:$16 sps:$4 sm:$0xff]   ;;  %v8784_v46 = vld [vmem:[#allocation10 + $0x3a8] ss:$16 sps:$4 sm:$0xff]  }
 0x42c   :  { %v4168_v12 = vmax.f32 %v7582_v30, 0.0  ;;  %v4167_v38 = vmax.f32 %v7551_v45, 0.0  ;;  %v8792_v45 = vld [vmem:[#allocation10 + $0x3cc] ss:$16 sps:$4 sm:$0xff]  }
 0x42d   :  { %v4202_v0 = vpack.c.bf16 %v4166_v20, %v4162_v55  ;;  %v4169_v2 = vmax.f32 %v7583_v56, 0.0 }
 0x42e   :  { %v9555_v32 = vpack.c.bf16 %v4168_v12, %v4164_v9  ;;  %v4203_v63 = vpack.c.bf16 %v4167_v38, %v4163_v41  ;;  %v3879_v3 = vpop.f32.mrb[92].mxu0  ;;  %5114 = vmatpush1.bf16.msra.mxu0 %v8769_v50  ;;  %5340 = vmatpush1.bf16.msra.mxu1 %v8772_v54  ;;  %v8795_v41 = vld [vmem:[#allocation10 + $0x3e4] ss:$16 sps:$4 sm:$0xff]   ;;  %v8798_v12 = vld [vmem:[#allocation10 + $0x3ec] ss:$16 sps:$4 sm:$0xff]  }
 0x42f   :  { %v9557_v5 = vpack.c.bf16 %v4169_v2, %v4165_v62  ;;  %v7552_v61 = vadd.f32 %v3879_v3, %v9461_v21  ;;  %v4105_v7 = vpop.f32.mrb[92].mxu1  ;;  %v3881_v33 = vpop.f32.mrb[93].mxu0  ;;  %5115 = vmatprep.subr.bf16.mxu0 %v8777_v57  ;;  %5341 = vmatprep.subr.bf16.mxu1 %v8780_v58  ;;  %v8787_v58 = vld [vmem:[#allocation10 + $0x3c0] ss:$16 sps:$4 sm:$0xff]   ;;  %v8796_v62 = vld [vmem:[#allocation10 + $0x3e8] ss:$16 sps:$4 sm:$0xff]  }
 0x430   :  { %v7584_v25 = vadd.f32 %v4105_v7, %v9465_v22  ;;  %v7553_v26 = vadd.f32 %v3881_v33, %v9469_v40  ;;  %v4107_v11 = vpop.f32.mrb[93].mxu1  ;;  %v3883_v18 = vpop.f32.mrb[94].mxu0  ;;  %5070 = vmatprep.mubr.bf16.mxu0 %v4203_v63  ;;  %5296 = vmatprep.mubr.bf16.mxu1 %v4203_v63  ;;  %v8793_v38 = vld [vmem:[#allocation10 + $0x3e0] ss:$16 sps:$4 sm:$0xff]   ;;  %v8804_v2 = vld [vmem:[#allocation11 + $0xc] ss:$16 sps:$4 sm:$0xff]  }
 0x431   :  { %v7585_v29 = vadd.f32 %v4107_v11, %v9473_v16  ;;  %v7554_v13 = vadd.f32 %v3883_v18, %v9461_v21  ;;  %v4109_v31 = vpop.f32.mrb[94].mxu1  ;;  %v3885_v51 = vpop.f32.mrb[95].mxu0  ;;  %5071 = vmatmul.mubr.bf16.gmra.mrb[120].mxu0 %v4202_v0  ;;  %5297 = vmatmul.mubr.bf16.gmra.mrb[120].mxu1 %v4202_v0  ;;  %v4170_v47 = vmax.f32 %v7552_v61, 0.0  ;;  %v8789_v21 = vld [vmem:[#allocation10 + $0x3c4] ss:$16 sps:$4 sm:$0xff]  }
 0x432   :  { %v7586_v8 = vadd.f32 %v4109_v31, %v9465_v22  ;;  %v7555_v35 = vadd.f32 %v3885_v51, %v9469_v40  ;;  %v4111_v17 = vpop.f32.mrb[95].mxu1  ;;  %5116 = vmatpush1.bf16.msra.mxu0 %v8775_v10  ;;  %5342 = vmatpush1.bf16.msra.mxu1 %v8778_v4  ;;  %v4172_v48 = vmax.f32 %v7584_v25, 0.0  ;;  %v4171_v50 = vmax.f32 %v7553_v26, 0.0  ;;  %v8801_v0 = vld [vmem:[#allocation11 + $0x4] ss:$16 sps:$4 sm:$0xff]  }
 0x433   :  { %v4174_v15 = vmax.f32 %v7554_v13, 0.0  ;;  %v7587_v30 = vadd.f32 %v4111_v17, %v9473_v16  ;;  %5117 = vmatprep.subr.bf16.mxu0 %v8783_v23  ;;  %5343 = vmatprep.subr.bf16.mxu1 %v8786_v24  ;;  %v4173_v22 = vmax.f32 %v7585_v29, 0.0  ;;  %v8790_v16 = vld [vmem:[#allocation10 + $0x3c8] ss:$16 sps:$4 sm:$0xff]   ;;  %v8799_v63 = vld [vmem:[#allocation11] ss:$16 sps:$4 sm:$0xff]  }
 0x434   :  { %v4176_v54 = vmax.f32 %v7586_v8, 0.0  ;;  %v4175_v55 = vmax.f32 %v7555_v35, 0.0  ;;  %v8802_v3 = vld [vmem:[#allocation11 + $0x8] ss:$16 sps:$4 sm:$0xff]   ;;  %v8807_v10 = vld [vmem:[#allocation11 + $0x24] ss:$16 sps:$4 sm:$0xff]  }
 0x435   :  { %v4206_v20 = vpack.c.bf16 %v4174_v15, %v4170_v47  ;;  %v4177_v40 = vmax.f32 %v7587_v30, 0.0  ;;  %v8810_v4 = vld [vmem:[#allocation11 + $0x2c] ss:$16 sps:$4 sm:$0xff]   ;;  %v8808_v61 = vld [vmem:[#allocation11 + $0x28] ss:$16 sps:$4 sm:$0xff]  }
 0x436   :  { %v9567_v56 = vpack.c.bf16 %v4176_v54, %v4172_v48  ;;  %v4207_v57 = vpack.c.bf16 %v4175_v55, %v4171_v50  ;;  %5118 = vmatpush1.bf16.msra.mxu0 %v8781_v42  ;;  %5344 = vmatpush1.bf16.msra.mxu1 %v8784_v46  ;;  %v8813_v7 = vld [vmem:[#allocation11 + $0x44] ss:$16 sps:$4 sm:$0xff]   ;;  %v8816_v33 = vld [vmem:[#allocation11 + $0x4c] ss:$16 sps:$4 sm:$0xff]   ;;  %v8811_v23 = vld [vmem:[#allocation11 + $0x40] ss:$16 sps:$4 sm:$0xff]  }
 0x437   :  { %v9569_v9 = vpack.c.bf16 %v4177_v40, %v4173_v22  ;;  %5119 = vmatprep.subr.bf16.mxu0 %v8789_v21  ;;  %5345 = vmatprep.subr.bf16.mxu1 %v8792_v45  ;;  %v8814_v24 = vld [vmem:[#allocation11 + $0x48] ss:$16 sps:$4 sm:$0xff]   ;;  %v8819_v25 = vld [vmem:[#allocation11 + $0x64] ss:$16 sps:$4 sm:$0xff]   ;;  %v8828_v18 = vld [vmem:[#allocation11 + $0x8c] ss:$16 sps:$4 sm:$0xff]  }
 0x438   :  { %5080 = vmatprep.mubr.bf16.mxu0 %v4207_v57  ;;  %5306 = vmatprep.mubr.bf16.mxu1 %v4207_v57  ;;  %v8820_v26 = vld [vmem:[#allocation11 + $0x68] ss:$16 sps:$4 sm:$0xff]   ;;  %v8825_v11 = vld [vmem:[#allocation11 + $0x84] ss:$16 sps:$4 sm:$0xff]   ;;  %v8823_v29 = vld [vmem:[#allocation11 + $0x80] ss:$16 sps:$4 sm:$0xff]  }
 0x439   :  { %5081 = vmatmul.mubr.bf16.gmra.mrb[124].mxu0 %v4206_v20  ;;  %5307 = vmatmul.mubr.bf16.gmra.mrb[124].mxu1 %v4206_v20  ;;  %v8826_v13 = vld [vmem:[#allocation11 + $0x88] ss:$16 sps:$4 sm:$0xff]   ;;  %v8831_v31 = vld [vmem:[#allocation11 + $0xa4] ss:$16 sps:$4 sm:$0xff]   ;;  %v8840_v35 = vld [vmem:[#allocation11 + $0xcc] ss:$16 sps:$4 sm:$0xff]  }
 0x43a   :  { %5120 = vmatpush1.bf16.msra.mxu0 %v8787_v58  ;;  %5123 = vmatprep.mubr.bf16.mxu0 %v9485_v52  ;;  %v8832_v51 = vld [vmem:[#allocation11 + $0xa8] ss:$16 sps:$4 sm:$0xff]   ;;  %v8837_v8 = vld [vmem:[#allocation11 + $0xc4] ss:$16 sps:$4 sm:$0xff]   ;;  %v8835_v17 = vld [vmem:[#allocation11 + $0xc0] ss:$16 sps:$4 sm:$0xff]  }
 0x43b   :  { %5346 = vmatpush1.bf16.msra.mxu1 %v8790_v16  ;;  %5349 = vmatprep.mubr.bf16.mxu1 %v9485_v52  ;;  %v8805_v52 = vld [vmem:[#allocation11 + $0x20] ss:$16 sps:$4 sm:$0xff]   ;;  %v8838_v42 = vld [vmem:[#allocation11 + $0xc8] ss:$16 sps:$4 sm:$0xff]   ;;  %v8843_v46 = vld [vmem:[#allocation11 + $0xe4] ss:$16 sps:$4 sm:$0xff]  }
 0x43c   :  { %5121 = vmatprep.subr.bf16.mxu0 %v8795_v41  ;;  %5347 = vmatprep.subr.bf16.mxu1 %v8798_v12  ;;  %v8844_v47 = vld [vmem:[#allocation11 + $0xe8] ss:$16 sps:$4 sm:$0xff]   ;;  %v8849_v15 = vld [vmem:[#allocation11 + $0x104] ss:$16 sps:$4 sm:$0xff]   ;;  %v8852_v30 = vld [vmem:[#allocation11 + $0x10c] ss:$16 sps:$4 sm:$0xff]  }
 0x43d   :  { %v8847_v21 = vld [vmem:[#allocation11 + $0x100] ss:$16 sps:$4 sm:$0xff]   ;;  %v8850_v45 = vld [vmem:[#allocation11 + $0x108] ss:$16 sps:$4 sm:$0xff]   ;;  %v8855_v48 = vld [vmem:[#allocation11 + $0x124] ss:$16 sps:$4 sm:$0xff]  }
 0x43e   :  { %5122 = vmatpush1.bf16.msra.mxu0 %v8793_v38  ;;  %v8856_v50 = vld [vmem:[#allocation11 + $0x128] ss:$16 sps:$4 sm:$0xff]   ;;  %v8861_v54 = vld [vmem:[#allocation11 + $0x144] ss:$16 sps:$4 sm:$0xff]   ;;  %v8864_v55 = vld [vmem:[#allocation11 + $0x14c] ss:$16 sps:$4 sm:$0xff]  }
 0x43f   :  { %5348 = vmatpush1.bf16.msra.mxu1 %v8796_v62  ;;  %6252 = vmatprep.subr.bf16.mxu0 %v8801_v0  ;;  %v8859_v22 = vld [vmem:[#allocation11 + $0x140] ss:$16 sps:$4 sm:$0xff]   ;;  %v8862_v20 = vld [vmem:[#allocation11 + $0x148] ss:$16 sps:$4 sm:$0xff]   ;;  %v8867_v40 = vld [vmem:[#allocation11 + $0x164] ss:$16 sps:$4 sm:$0xff]  }
 0x440   :  { %6478 = vmatprep.subr.bf16.mxu1 %v8804_v2  ;;  %v8868_v57 = vld [vmem:[#allocation11 + $0x168] ss:$16 sps:$4 sm:$0xff]   ;;  %v8873_v58 = vld [vmem:[#allocation11 + $0x184] ss:$16 sps:$4 sm:$0xff]   ;;  %v8876_v16 = vld [vmem:[#allocation11 + $0x18c] ss:$16 sps:$4 sm:$0xff]  }
 0x441   :  { %5124 = vmatmul.mubr.bf16.vlgmr.msra.gmra.mrb[96].mxu0 %v9483_v59  ;;  %v8871_v41 = vld [vmem:[#allocation11 + $0x180] ss:$16 sps:$4 sm:$0xff]   ;;  %v8874_v12 = vld [vmem:[#allocation11 + $0x188] ss:$16 sps:$4 sm:$0xff]   ;;  %v8879_v38 = vld [vmem:[#allocation11 + $0x1a4] ss:$16 sps:$4 sm:$0xff]  }
 0x442   :  { %5350 = vmatmul.mubr.bf16.vlgmr.msra.gmra.mrb[96].mxu1 %v9483_v59  ;;  %5133 = vmatprep.mubr.bf16.mxu0 %v9497_v53  ;;  %v8822_v59 = vld [vmem:[#allocation11 + $0x6c] ss:$16 sps:$4 sm:$0xff]   ;;  %v8880_v62 = vld [vmem:[#allocation11 + $0x1a8] ss:$16 sps:$4 sm:$0xff]   ;;  %v8885_v0 = vld [vmem:[#allocation11 + $0x1c4] ss:$16 sps:$4 sm:$0xff]  }
 0x443   :  { %5359 = vmatprep.mubr.bf16.mxu1 %v9497_v53  ;;  %6253 = vmatpush1.bf16.msra.mxu0 %v8799_v63  ;;  %v8817_v53 = vld [vmem:[#allocation11 + $0x60] ss:$16 sps:$4 sm:$0xff]   ;;  %v8888_v2 = vld [vmem:[#allocation11 + $0x1cc] ss:$16 sps:$4 sm:$0xff]  }
 0x444   :  { %6479 = vmatpush1.bf16.msra.mxu1 %v8802_v3  ;;  %6254 = vmatprep.subr.bf16.mxu0 %v8807_v10  ;;  %v8883_v63 = vld [vmem:[#allocation11 + $0x1c0] ss:$16 sps:$4 sm:$0xff]   ;;  %v8886_v3 = vld [vmem:[#allocation11 + $0x1c8] ss:$16 sps:$4 sm:$0xff]  }
 0x445   :  { %6480 = vmatprep.subr.bf16.mxu1 %v8810_v4  ;;  %v8889_v10 = vld [vmem:[#allocation11 + $0x1e0] ss:$16 sps:$4 sm:$0xff]   ;;  %v8892_v4 = vld [vmem:[#allocation11 + $0x1e8] ss:$16 sps:$4 sm:$0xff]  }
 0x447   :  { %6255 = vmatpush1.bf16.msra.mxu0 %v8805_v52  ;;  %v8897_v52 = vld [vmem:[#allocation11 + $0x204] ss:$16 sps:$4 sm:$0xff]  }
 0x448   :  { %6481 = vmatpush1.bf16.msra.mxu1 %v8808_v61  ;;  %6256 = vmatprep.subr.bf16.mxu0 %v8813_v7  ;;  %v8900_v61 = vld [vmem:[#allocation11 + $0x20c] ss:$16 sps:$4 sm:$0xff]  }
 0x449   :  { %5134 = vmatmul.mubr.bf16.gmra.mrb[100].mxu0 %v9495_v27  ;;  %6482 = vmatprep.subr.bf16.mxu1 %v8816_v33 }
 0x44a   :  { %5360 = vmatmul.mubr.bf16.gmra.mrb[100].mxu1 %v9495_v27  ;;  %5143 = vmatprep.mubr.bf16.mxu0 %v9509_v39  ;;  %v8834_v27 = vld [vmem:[#allocation11 + $0xac] ss:$16 sps:$4 sm:$0xff]  }
 0x44b   :  { %5369 = vmatprep.mubr.bf16.mxu1 %v9509_v39  ;;  %6257 = vmatpush1.bf16.msra.mxu0 %v8811_v23  ;;  %v8829_v39 = vld [vmem:[#allocation11 + $0xa0] ss:$16 sps:$4 sm:$0xff]  }
 0x44c   :  { %6483 = vmatpush1.bf16.msra.mxu1 %v8814_v24  ;;  %6258 = vmatprep.subr.bf16.mxu0 %v8819_v25 }
 0x44d   :  { %6484 = vmatprep.subr.bf16.mxu1 %v8822_v59 }
 0x44f   :  { %6259 = vmatpush1.bf16.msra.mxu0 %v8817_v53 }
 0x450   :  { %6485 = vmatpush1.bf16.msra.mxu1 %v8820_v26  ;;  %6260 = vmatprep.subr.bf16.mxu0 %v8825_v11 }
 0x451   :  { %5144 = vmatmul.mubr.bf16.gmra.mrb[104].mxu0 %v9507_v1  ;;  %6486 = vmatprep.subr.bf16.mxu1 %v8828_v18 }
 0x452   :  { %5370 = vmatmul.mubr.bf16.gmra.mrb[104].mxu1 %v9507_v1  ;;  %5153 = vmatprep.mubr.bf16.mxu0 %v9521_v43  ;;  %v8846_v1 = vld [vmem:[#allocation11 + $0xec] ss:$16 sps:$4 sm:$0xff]  }
 0x453   :  { %5379 = vmatprep.mubr.bf16.mxu1 %v9521_v43  ;;  %6261 = vmatpush1.bf16.msra.mxu0 %v8823_v29  ;;  %v8841_v43 = vld [vmem:[#allocation11 + $0xe0] ss:$16 sps:$4 sm:$0xff]  }
 0x454   :  { %6487 = vmatpush1.bf16.msra.mxu1 %v8826_v13  ;;  %6262 = vmatprep.subr.bf16.mxu0 %v8831_v31  ;;  %v8895_v29 = vld [vmem:[#allocation11 + $0x200] ss:$16 sps:$4 sm:$0xff]   ;;  %v8898_v13 = vld [vmem:[#allocation11 + $0x208] ss:$16 sps:$4 sm:$0xff]  }
 0x455   :  { %6488 = vmatprep.subr.bf16.mxu1 %v8834_v27  ;;  %v8903_v27 = vld [vmem:[#allocation11 + $0x224] ss:$16 sps:$4 sm:$0xff]  }
 0x457   :  { %6263 = vmatpush1.bf16.msra.mxu0 %v8829_v39  ;;  %v8906_v39 = vld [vmem:[#allocation11 + $0x22c] ss:$16 sps:$4 sm:$0xff]  }
 0x458   :  { %6489 = vmatpush1.bf16.msra.mxu1 %v8832_v51  ;;  %6264 = vmatprep.subr.bf16.mxu0 %v8837_v8  ;;  %v8901_v8 = vld [vmem:[#allocation11 + $0x220] ss:$16 sps:$4 sm:$0xff]  }
 0x459   :  { %5154 = vmatmul.mubr.bf16.gmra.mrb[108].mxu0 %v9519_v49  ;;  %6490 = vmatprep.subr.bf16.mxu1 %v8840_v35  ;;  %v8904_v35 = vld [vmem:[#allocation11 + $0x228] ss:$16 sps:$4 sm:$0xff]  }
 0x45a   :  { %5380 = vmatmul.mubr.bf16.gmra.mrb[108].mxu1 %v9519_v49  ;;  %5163 = vmatprep.mubr.bf16.mxu0 %v9533_v37  ;;  %v8858_v49 = vld [vmem:[#allocation11 + $0x12c] ss:$16 sps:$4 sm:$0xff]  }
 0x45b   :  { %5389 = vmatprep.mubr.bf16.mxu1 %v9533_v37  ;;  %6265 = vmatpush1.bf16.msra.mxu0 %v8835_v17  ;;  %v8853_v37 = vld [vmem:[#allocation11 + $0x120] ss:$16 sps:$4 sm:$0xff]  }
 0x45c   :  { %6491 = vmatpush1.bf16.msra.mxu1 %v8838_v42  ;;  %6266 = vmatprep.subr.bf16.mxu0 %v8843_v46  ;;  %v8909_v46 = vld [vmem:[#allocation11 + $0x244] ss:$16 sps:$4 sm:$0xff]  }
 0x45d   :  { %6492 = vmatprep.subr.bf16.mxu1 %v8846_v1  ;;  %v8912_v1 = vld [vmem:[#allocation11 + $0x24c] ss:$16 sps:$4 sm:$0xff]  }
 0x45f   :  { %6267 = vmatpush1.bf16.msra.mxu0 %v8841_v43 }
 0x460   :  { %6493 = vmatpush1.bf16.msra.mxu1 %v8844_v47  ;;  %6268 = vmatprep.subr.bf16.mxu0 %v8849_v15 }
 0x461   :  { %5164 = vmatmul.mubr.bf16.gmra.mrb[112].mxu0 %v9531_v34  ;;  %6494 = vmatprep.subr.bf16.mxu1 %v8852_v30 }
 0x462   :  { %5390 = vmatmul.mubr.bf16.gmra.mrb[112].mxu1 %v9531_v34  ;;  %5173 = vmatprep.mubr.bf16.mxu0 %v9545_v28  ;;  %v8870_v34 = vld [vmem:[#allocation11 + $0x16c] ss:$16 sps:$4 sm:$0xff]  }
 0x463   :  { %5399 = vmatprep.mubr.bf16.mxu1 %v9545_v28  ;;  %6269 = vmatpush1.bf16.msra.mxu0 %v8847_v21  ;;  %v8865_v28 = vld [vmem:[#allocation11 + $0x160] ss:$16 sps:$4 sm:$0xff]  }
 0x464   :  { %6495 = vmatpush1.bf16.msra.mxu1 %v8850_v45  ;;  %6270 = vmatprep.subr.bf16.mxu0 %v8855_v48 }
 0x465   :  { %6496 = vmatprep.subr.bf16.mxu1 %v8858_v49 }
 0x467   :  { %6271 = vmatpush1.bf16.msra.mxu0 %v8853_v37  ;;  %v8907_v37 = vld [vmem:[#allocation11 + $0x240] ss:$16 sps:$4 sm:$0xff]  }
 0x468   :  { %6497 = vmatpush1.bf16.msra.mxu1 %v8856_v50  ;;  %6272 = vmatprep.subr.bf16.mxu0 %v8861_v54  ;;  %v8910_v50 = vld [vmem:[#allocation11 + $0x248] ss:$16 sps:$4 sm:$0xff]  }
 0x469   :  { %5174 = vmatmul.mubr.bf16.gmra.mrb[116].mxu0 %v9543_v60  ;;  %6498 = vmatprep.subr.bf16.mxu1 %v8864_v55  ;;  %v8915_v55 = vld [vmem:[#allocation11 + $0x264] ss:$16 sps:$4 sm:$0xff]  }
 0x46a   :  { %5400 = vmatmul.mubr.bf16.gmra.mrb[116].mxu1 %v9543_v60  ;;  %5183 = vmatprep.mubr.bf16.mxu0 %v9557_v5  ;;  %v8882_v60 = vld [vmem:[#allocation11 + $0x1ac] ss:$16 sps:$4 sm:$0xff]  }
 0x46b   :  { %5409 = vmatprep.mubr.bf16.mxu1 %v9557_v5  ;;  %6273 = vmatpush1.bf16.msra.mxu0 %v8859_v22  ;;  %v8877_v5 = vld [vmem:[#allocation11 + $0x1a0] ss:$16 sps:$4 sm:$0xff]   ;;  %v8918_v22 = vld [vmem:[#allocation11 + $0x26c] ss:$16 sps:$4 sm:$0xff]  }
 0x46c   :  { %6499 = vmatpush1.bf16.msra.mxu1 %v8862_v20  ;;  %6274 = vmatprep.subr.bf16.mxu0 %v8867_v40  ;;  %v8913_v40 = vld [vmem:[#allocation11 + $0x260] ss:$16 sps:$4 sm:$0xff]  }
 0x46d   :  { %6500 = vmatprep.subr.bf16.mxu1 %v8870_v34  ;;  %v8916_v34 = vld [vmem:[#allocation11 + $0x268] ss:$16 sps:$4 sm:$0xff]  }
 0x46f   :  { %6275 = vmatpush1.bf16.msra.mxu0 %v8865_v28 }
 0x470   :  { %6501 = vmatpush1.bf16.msra.mxu1 %v8868_v57  ;;  %6276 = vmatprep.subr.bf16.mxu0 %v8873_v58  ;;  %v8921_v58 = vld [vmem:[#allocation11 + $0x284] ss:$16 sps:$4 sm:$0xff]  }
 0x471   :  { %5184 = vmatmul.mubr.bf16.gmra.mrb[120].mxu0 %v9555_v32  ;;  %6502 = vmatprep.subr.bf16.mxu1 %v8876_v16  ;;  %v8924_v16 = vld [vmem:[#allocation11 + $0x28c] ss:$16 sps:$4 sm:$0xff]  }
 0x472   :  { %5410 = vmatmul.mubr.bf16.gmra.mrb[120].mxu1 %v9555_v32  ;;  %5193 = vmatprep.mubr.bf16.mxu0 %v9569_v9  ;;  %v8891_v32 = vld [vmem:[#allocation11 + $0x1e4] ss:$16 sps:$4 sm:$0xff]  }
 0x473   :  { %5419 = vmatprep.mubr.bf16.mxu1 %v9569_v9  ;;  %6277 = vmatpush1.bf16.msra.mxu0 %v8871_v41  ;;  %v8894_v9 = vld [vmem:[#allocation11 + $0x1ec] ss:$16 sps:$4 sm:$0xff]  }
 0x474   :  { %6503 = vmatpush1.bf16.msra.mxu1 %v8874_v12  ;;  %6278 = vmatprep.subr.bf16.mxu0 %v8879_v38 }
 0x475   :  { %6504 = vmatprep.subr.bf16.mxu1 %v8882_v60 }
 0x477   :  { %6279 = vmatpush1.bf16.msra.mxu0 %v8877_v5 }
 0x478   :  { %6505 = vmatpush1.bf16.msra.mxu1 %v8880_v62  ;;  %6280 = vmatprep.subr.bf16.mxu0 %v8885_v0 }
 0x479   :  { %5194 = vmatmul.mubr.bf16.gmra.mrb[124].mxu0 %v9567_v56  ;;  %6506 = vmatprep.subr.bf16.mxu1 %v8888_v2 }
 0x47a   :  { %5420 = vmatmul.mubr.bf16.gmra.mrb[124].mxu1 %v9567_v56 }
 0x47b   :  { %6281 = vmatpush1.bf16.msra.mxu0 %v8883_v63  ;;  %v8919_v63 = vld [vmem:[#allocation11 + $0x280] ss:$16 sps:$4 sm:$0xff]  }
 0x47c   :  { %6507 = vmatpush1.bf16.msra.mxu1 %v8886_v3  ;;  %6282 = vmatprep.subr.bf16.mxu0 %v8891_v32  ;;  %v8922_v3 = vld [vmem:[#allocation11 + $0x288] ss:$16 sps:$4 sm:$0xff]  }
 0x47d   :  { %6508 = vmatprep.subr.bf16.mxu1 %v8894_v9  ;;  %v8927_v9 = vld [vmem:[#allocation11 + $0x2a4] ss:$16 sps:$4 sm:$0xff]  }
 0x47f   :  { %6283 = vmatpush1.bf16.msra.mxu0 %v8889_v10  ;;  %v8930_v10 = vld [vmem:[#allocation11 + $0x2ac] ss:$16 sps:$4 sm:$0xff]  }
 0x480   :  { %6509 = vmatpush1.bf16.msra.mxu1 %v8892_v4  ;;  %6365 = vmatprep.subr.bf16.mxu0 %v8897_v52  ;;  %v8925_v52 = vld [vmem:[#allocation11 + $0x2a0] ss:$16 sps:$4 sm:$0xff]  }
 0x481   :  { %6591 = vmatprep.subr.bf16.mxu1 %v8900_v61  ;;  %v8928_v61 = vld [vmem:[#allocation11 + $0x2a8] ss:$16 sps:$4 sm:$0xff]  }
 0x514   :  { %v5125_v7 = vpop.f32.mrb[96].mxu0 }
 0x515   :  { %v5351_v33 = vpop.f32.mrb[96].mxu1  ;;  %v5127_v23 = vpop.f32.mrb[97].mxu0 }
 0x516   :  { %v5353_v24 = vpop.f32.mrb[97].mxu1  ;;  %v5129_v25 = vpop.f32.mrb[98].mxu0 }
 0x517   :  { %v5430_v56 = vpack.c.bf16 %v5129_v25, %v5125_v7  ;;  %v5355_v59 = vpop.f32.mrb[98].mxu1  ;;  %v5131_v53 = vpop.f32.mrb[99].mxu0 }
 0x518   :  { %v9603_v26 = vpack.c.bf16 %v5355_v59, %v5351_v33  ;;  %v5431_v11 = vpack.c.bf16 %v5131_v53, %v5127_v23  ;;  %v5357_v18 = vpop.f32.mrb[99].mxu1  ;;  %v8933_v23 = vld [vmem:[#allocation11 + $0x2c4] ss:$16 sps:$4 sm:$0xff]  }
 0x519   :  { %v9605_v31 = vpack.c.bf16 %v5357_v18, %v5353_v24  ;;  %v8936_v24 = vld [vmem:[#allocation11 + $0x2cc] ss:$16 sps:$4 sm:$0xff]  }
 0x51a   :  { %6284 = vmatprep.mubr.bf16.mxu0 %v5431_v11  ;;  %6510 = vmatprep.mubr.bf16.mxu1 %v5431_v11 }
 0x51b   :  { %6285 = vmatmul.mubr.bf16.vlgmr.msra.gmra.mrb[128].mxu0 %v5430_v56  ;;  %6511 = vmatmul.mubr.bf16.vlgmr.msra.gmra.mrb[128].mxu1 %v5430_v56 }
 0x51c   :  { %v5135_v51 = vpop.f32.mrb[100].mxu0  ;;  %6366 = vmatpush1.bf16.msra.mxu0 %v8895_v29  ;;  %6592 = vmatpush1.bf16.msra.mxu1 %v8898_v13 }
 0x51d   :  { %v5361_v17 = vpop.f32.mrb[100].mxu1  ;;  %v5137_v42 = vpop.f32.mrb[101].mxu0  ;;  %6367 = vmatprep.subr.bf16.mxu0 %v8903_v27  ;;  %6593 = vmatprep.subr.bf16.mxu1 %v8906_v39  ;;  %v8931_v27 = vld [vmem:[#allocation11 + $0x2c0] ss:$16 sps:$4 sm:$0xff]   ;;  %v8934_v39 = vld [vmem:[#allocation11 + $0x2c8] ss:$16 sps:$4 sm:$0xff]  }
 0x51e   :  { %v5363_v43 = vpop.f32.mrb[101].mxu1  ;;  %v5139_v47 = vpop.f32.mrb[102].mxu0 }
 0x51f   :  { %v5434_v15 = vpack.c.bf16 %v5139_v47, %v5135_v51  ;;  %v5365_v30 = vpop.f32.mrb[102].mxu1  ;;  %v5141_v21 = vpop.f32.mrb[103].mxu0  ;;  %v8945_v47 = vld [vmem:[#allocation11 + $0x304] ss:$16 sps:$4 sm:$0xff]  }
 0x520   :  { %v9607_v45 = vpack.c.bf16 %v5365_v30, %v5361_v17  ;;  %v5435_v48 = vpack.c.bf16 %v5141_v21, %v5137_v42  ;;  %v5367_v49 = vpop.f32.mrb[103].mxu1  ;;  %6368 = vmatpush1.bf16.msra.mxu0 %v8901_v8  ;;  %6594 = vmatpush1.bf16.msra.mxu1 %v8904_v35  ;;  %v8939_v8 = vld [vmem:[#allocation11 + $0x2e4] ss:$16 sps:$4 sm:$0xff]   ;;  %v8942_v35 = vld [vmem:[#allocation11 + $0x2ec] ss:$16 sps:$4 sm:$0xff]  }
 0x521   :  { %v9609_v54 = vpack.c.bf16 %v5367_v49, %v5363_v43  ;;  %6369 = vmatprep.subr.bf16.mxu0 %v8909_v46  ;;  %6595 = vmatprep.subr.bf16.mxu1 %v8912_v1  ;;  %v8937_v42 = vld [vmem:[#allocation11 + $0x2e0] ss:$16 sps:$4 sm:$0xff]   ;;  %v8940_v46 = vld [vmem:[#allocation11 + $0x2e8] ss:$16 sps:$4 sm:$0xff]  }
 0x522   :  { %6294 = vmatprep.mubr.bf16.mxu0 %v5435_v48  ;;  %6520 = vmatprep.mubr.bf16.mxu1 %v5435_v48 }
 0x523   :  { %6295 = vmatmul.mubr.bf16.gmra.mrb[132].mxu0 %v5434_v15  ;;  %6521 = vmatmul.mubr.bf16.gmra.mrb[132].mxu1 %v5434_v15  ;;  %v8948_v15 = vld [vmem:[#allocation11 + $0x30c] ss:$16 sps:$4 sm:$0xff]  }
 0x524   :  { %v5145_v20 = vpop.f32.mrb[104].mxu0  ;;  %6370 = vmatpush1.bf16.msra.mxu0 %v8907_v37  ;;  %6596 = vmatpush1.bf16.msra.mxu1 %v8910_v50 }
 0x525   :  { %v5371_v28 = vpop.f32.mrb[104].mxu1  ;;  %v5147_v57 = vpop.f32.mrb[105].mxu0  ;;  %6371 = vmatprep.subr.bf16.mxu0 %v8915_v55  ;;  %6597 = vmatprep.subr.bf16.mxu1 %v8918_v22 }
 0x526   :  { %v5373_v41 = vpop.f32.mrb[105].mxu1  ;;  %v5149_v12 = vpop.f32.mrb[106].mxu0 }
 0x527   :  { %v5438_v38 = vpack.c.bf16 %v5149_v12, %v5145_v20  ;;  %v5375_v60 = vpop.f32.mrb[106].mxu1  ;;  %v5151_v5 = vpop.f32.mrb[107].mxu0  ;;  %v8943_v20 = vld [vmem:[#allocation11 + $0x300] ss:$16 sps:$4 sm:$0xff]  }
 0x528   :  { %v9611_v62 = vpack.c.bf16 %v5375_v60, %v5371_v28  ;;  %v5439_v0 = vpack.c.bf16 %v5151_v5, %v5147_v57  ;;  %v5377_v2 = vpop.f32.mrb[107].mxu1  ;;  %6372 = vmatpush1.bf16.msra.mxu0 %v8913_v40  ;;  %6598 = vmatpush1.bf16.msra.mxu1 %v8916_v34  ;;  %v8946_v40 = vld [vmem:[#allocation11 + $0x308] ss:$16 sps:$4 sm:$0xff]   ;;  %v8951_v28 = vld [vmem:[#allocation11 + $0x324] ss:$16 sps:$4 sm:$0xff]  }
 0x529   :  { %v9613_v32 = vpack.c.bf16 %v5377_v2, %v5373_v41  ;;  %6373 = vmatprep.subr.bf16.mxu0 %v8921_v58  ;;  %6599 = vmatprep.subr.bf16.mxu1 %v8924_v16  ;;  %v8954_v57 = vld [vmem:[#allocation11 + $0x32c] ss:$16 sps:$4 sm:$0xff]   ;;  %v8949_v16 = vld [vmem:[#allocation11 + $0x320] ss:$16 sps:$4 sm:$0xff]   ;;  %v8952_v41 = vld [vmem:[#allocation11 + $0x328] ss:$16 sps:$4 sm:$0xff]  }
 0x52a   :  { %6304 = vmatprep.mubr.bf16.mxu0 %v5439_v0  ;;  %6530 = vmatprep.mubr.bf16.mxu1 %v5439_v0  ;;  %v8957_v60 = vld [vmem:[#allocation11 + $0x344] ss:$16 sps:$4 sm:$0xff]   ;;  %v8960_v5 = vld [vmem:[#allocation11 + $0x34c] ss:$16 sps:$4 sm:$0xff]  }
 0x52b   :  { %6305 = vmatmul.mubr.bf16.gmra.mrb[136].mxu0 %v5438_v38  ;;  %6531 = vmatmul.mubr.bf16.gmra.mrb[136].mxu1 %v5438_v38 }
 0x52c   :  { %v5155_v4 = vpop.f32.mrb[108].mxu0  ;;  %6374 = vmatpush1.bf16.msra.mxu0 %v8919_v63  ;;  %6600 = vmatpush1.bf16.msra.mxu1 %v8922_v3 }
 0x52d   :  { %v5381_v7 = vpop.f32.mrb[108].mxu1  ;;  %v5157_v33 = vpop.f32.mrb[109].mxu0  ;;  %6375 = vmatprep.subr.bf16.mxu0 %v8927_v9  ;;  %6601 = vmatprep.subr.bf16.mxu1 %v8930_v10 }
 0x52e   :  { %v5383_v25 = vpop.f32.mrb[109].mxu1  ;;  %v5159_v56 = vpop.f32.mrb[110].mxu0 }
 0x52f   :  { %v5442_v59 = vpack.c.bf16 %v5159_v56, %v5155_v4  ;;  %v5385_v53 = vpop.f32.mrb[110].mxu1  ;;  %v5161_v11 = vpop.f32.mrb[111].mxu0  ;;  %v8961_v56 = vld [vmem:[#allocation11 + $0x360] ss:$16 sps:$4 sm:$0xff]  }
 0x530   :  { %v9615_v18 = vpack.c.bf16 %v5385_v53, %v5381_v7  ;;  %v5443_v29 = vpack.c.bf16 %v5161_v11, %v5157_v33  ;;  %v5387_v13 = vpop.f32.mrb[111].mxu1  ;;  %6376 = vmatpush1.bf16.msra.mxu0 %v8925_v52  ;;  %6602 = vmatpush1.bf16.msra.mxu1 %v8928_v61  ;;  %v8955_v61 = vld [vmem:[#allocation11 + $0x340] ss:$16 sps:$4 sm:$0xff]   ;;  %v8958_v7 = vld [vmem:[#allocation11 + $0x348] ss:$16 sps:$4 sm:$0xff]  }
 0x531   :  { %v9617_v51 = vpack.c.bf16 %v5387_v13, %v5383_v25  ;;  %6377 = vmatprep.subr.bf16.mxu0 %v8933_v23  ;;  %6603 = vmatprep.subr.bf16.mxu1 %v8936_v24  ;;  %v8963_v23 = vld [vmem:[#allocation11 + $0x364] ss:$16 sps:$4 sm:$0xff]   ;;  %v8966_v24 = vld [vmem:[#allocation11 + $0x36c] ss:$16 sps:$4 sm:$0xff]  }
 0x532   :  { %6314 = vmatprep.mubr.bf16.mxu0 %v5443_v29  ;;  %6540 = vmatprep.mubr.bf16.mxu1 %v5443_v29  ;;  %v8969_v29 = vld [vmem:[#allocation11 + $0x384] ss:$16 sps:$4 sm:$0xff]   ;;  %v8972_v13 = vld [vmem:[#allocation11 + $0x38c] ss:$16 sps:$4 sm:$0xff]  }
 0x533   :  { %6315 = vmatmul.mubr.bf16.gmra.mrb[140].mxu0 %v5442_v59  ;;  %6541 = vmatmul.mubr.bf16.gmra.mrb[140].mxu1 %v5442_v59  ;;  %v8964_v59 = vld [vmem:[#allocation11 + $0x368] ss:$16 sps:$4 sm:$0xff]  }
 0x534   :  { %v5165_v17 = vpop.f32.mrb[112].mxu0  ;;  %6378 = vmatpush1.bf16.msra.mxu0 %v8931_v27  ;;  %6604 = vmatpush1.bf16.msra.mxu1 %v8934_v39 }
 0x535   :  { %v5391_v1 = vpop.f32.mrb[112].mxu1  ;;  %v5167_v43 = vpop.f32.mrb[113].mxu0  ;;  %6379 = vmatprep.subr.bf16.mxu0 %v8939_v8  ;;  %6605 = vmatprep.subr.bf16.mxu1 %v8942_v35 }
 0x536   :  { %v5393_v30 = vpop.f32.mrb[113].mxu1  ;;  %v5169_v21 = vpop.f32.mrb[114].mxu0 }
 0x537   :  { %v5446_v48 = vpack.c.bf16 %v5169_v21, %v5165_v17  ;;  %v5395_v49 = vpop.f32.mrb[114].mxu1  ;;  %v5171_v37 = vpop.f32.mrb[115].mxu0  ;;  %v8978_v21 = vld [vmem:[#allocation11 + $0x3ac] ss:$16 sps:$4 sm:$0xff]  }
 0x538   :  { %v9619_v50 = vpack.c.bf16 %v5395_v49, %v5391_v1  ;;  %v5447_v55 = vpack.c.bf16 %v5171_v37, %v5167_v43  ;;  %v5397_v22 = vpop.f32.mrb[115].mxu1  ;;  %6380 = vmatpush1.bf16.msra.mxu0 %v8937_v42  ;;  %6606 = vmatpush1.bf16.msra.mxu1 %v8940_v46  ;;  %v8967_v43 = vld [vmem:[#allocation11 + $0x380] ss:$16 sps:$4 sm:$0xff]   ;;  %v8976_v37 = vld [vmem:[#allocation11 + $0x3a8] ss:$16 sps:$4 sm:$0xff]  }
 0x539   :  { %v9621_v34 = vpack.c.bf16 %v5397_v22, %v5393_v30  ;;  %6381 = vmatprep.subr.bf16.mxu0 %v8945_v47  ;;  %6607 = vmatprep.subr.bf16.mxu1 %v8948_v15  ;;  %v8970_v47 = vld [vmem:[#allocation11 + $0x388] ss:$16 sps:$4 sm:$0xff]   ;;  %v8975_v30 = vld [vmem:[#allocation11 + $0x3a4] ss:$16 sps:$4 sm:$0xff]   ;;  %v8973_v49 = vld [vmem:[#allocation11 + $0x3a0] ss:$16 sps:$4 sm:$0xff]  }
 0x53a   :  { %6324 = vmatprep.mubr.bf16.mxu0 %v5447_v55  ;;  %6550 = vmatprep.mubr.bf16.mxu1 %v5447_v55 }
 0x53b   :  { %6325 = vmatmul.mubr.bf16.gmra.mrb[144].mxu0 %v5446_v48  ;;  %6551 = vmatmul.mubr.bf16.gmra.mrb[144].mxu1 %v5446_v48 }
 0x53c   :  { %v5175_v58 = vpop.f32.mrb[116].mxu0  ;;  %6382 = vmatpush1.bf16.msra.mxu0 %v8943_v20  ;;  %6608 = vmatpush1.bf16.msra.mxu1 %v8946_v40  ;;  %v8981_v20 = vld [vmem:[#allocation11 + $0x3c4] ss:$16 sps:$4 sm:$0xff]   ;;  %v8984_v40 = vld [vmem:[#allocation11 + $0x3cc] ss:$16 sps:$4 sm:$0xff]  }
 0x53d   :  { %v5401_v12 = vpop.f32.mrb[116].mxu1  ;;  %v5177_v38 = vpop.f32.mrb[117].mxu0  ;;  %6383 = vmatprep.subr.bf16.mxu0 %v8951_v28  ;;  %6609 = vmatprep.subr.bf16.mxu1 %v8954_v57 }
 0x53e   :  { %v5403_v0 = vpop.f32.mrb[117].mxu1  ;;  %v5179_v2 = vpop.f32.mrb[118].mxu0 }
 0x53f   :  { %v5450_v63 = vpack.c.bf16 %v5179_v2, %v5175_v58  ;;  %v5405_v3 = vpop.f32.mrb[118].mxu1  ;;  %v5181_v9 = vpop.f32.mrb[119].mxu0  ;;  %v8982_v2 = vld [vmem:[#allocation11 + $0x3c8] ss:$16 sps:$4 sm:$0xff]  }
 0x540   :  { %v9623_v10 = vpack.c.bf16 %v5405_v3, %v5401_v12  ;;  %v5451_v4 = vpack.c.bf16 %v5181_v9, %v5177_v38  ;;  %v5407_v52 = vpop.f32.mrb[119].mxu1  ;;  %6384 = vmatpush1.bf16.msra.mxu0 %v8949_v16  ;;  %6610 = vmatpush1.bf16.msra.mxu1 %v8952_v41  ;;  %v8990_v3 = vld [vmem:[#allocation11 + $0x3ec] ss:$16 sps:$4 sm:$0xff]   ;;  %v8985_v9 = vld [vmem:[#allocation11 + $0x3e0] ss:$16 sps:$4 sm:$0xff]  }
 0x541   :  { %v9625_v33 = vpack.c.bf16 %v5407_v52, %v5403_v0  ;;  %6385 = vmatprep.subr.bf16.mxu0 %v8957_v60  ;;  %6611 = vmatprep.subr.bf16.mxu1 %v8960_v5  ;;  %v8979_v5 = vld [vmem:[#allocation11 + $0x3c0] ss:$16 sps:$4 sm:$0xff]  }
 0x542   :  { %6334 = vmatprep.mubr.bf16.mxu0 %v5451_v4  ;;  %6560 = vmatprep.mubr.bf16.mxu1 %v5451_v4  ;;  %v8988_v4 = vld [vmem:[#allocation11 + $0x3e8] ss:$16 sps:$4 sm:$0xff]  }
 0x543   :  { %6335 = vmatmul.mubr.bf16.gmra.mrb[148].mxu0 %v5450_v63  ;;  %6561 = vmatmul.mubr.bf16.gmra.mrb[148].mxu1 %v5450_v63  ;;  %v8987_v63 = vld [vmem:[#allocation11 + $0x3e4] ss:$16 sps:$4 sm:$0xff]  }
 0x544   :  { %v5185_v25 = vpop.f32.mrb[120].mxu0  ;;  %6386 = vmatpush1.bf16.msra.mxu0 %v8955_v61  ;;  %6612 = vmatpush1.bf16.msra.mxu1 %v8958_v7 }
 0x545   :  { %v5411_v53 = vpop.f32.mrb[120].mxu1  ;;  %v5187_v11 = vpop.f32.mrb[121].mxu0  ;;  %6387 = vmatprep.subr.bf16.mxu0 %v8963_v23  ;;  %6613 = vmatprep.subr.bf16.mxu1 %v8966_v24 }
 0x546   :  { %v5413_v27 = vpop.f32.mrb[121].mxu1  ;;  %v5189_v39 = vpop.f32.mrb[122].mxu0 }
 0x547   :  { %v5454_v8 = vpack.c.bf16 %v5189_v39, %v5185_v25  ;;  %v5415_v35 = vpop.f32.mrb[122].mxu1  ;;  %v5191_v17 = vpop.f32.mrb[123].mxu0 }
 0x548   :  { %v9627_v42 = vpack.c.bf16 %v5415_v35, %v5411_v53  ;;  %v5455_v46 = vpack.c.bf16 %v5191_v17, %v5187_v11  ;;  %v5417_v1 = vpop.f32.mrb[123].mxu1  ;;  %6388 = vmatpush1.bf16.msra.mxu0 %v8961_v56  ;;  %6614 = vmatpush1.bf16.msra.mxu1 %v8964_v59 }
 0x549   :  { %v9629_v15 = vpack.c.bf16 %v5417_v1, %v5413_v27  ;;  %6389 = vmatprep.subr.bf16.mxu0 %v8969_v29  ;;  %6615 = vmatprep.subr.bf16.mxu1 %v8972_v13 }
 0x54a   :  { %6344 = vmatprep.mubr.bf16.mxu0 %v5455_v46  ;;  %6570 = vmatprep.mubr.bf16.mxu1 %v5455_v46 }
 0x54b   :  { %6345 = vmatmul.mubr.bf16.gmra.mrb[152].mxu0 %v5454_v8  ;;  %6571 = vmatmul.mubr.bf16.gmra.mrb[152].mxu1 %v5454_v8 }
 0x54c   :  { %v5195_v48 = vpop.f32.mrb[124].mxu0  ;;  %6390 = vmatpush1.bf16.msra.mxu0 %v8967_v43  ;;  %6616 = vmatpush1.bf16.msra.mxu1 %v8970_v47 }
 0x54d   :  { %v5421_v55 = vpop.f32.mrb[124].mxu1  ;;  %v5197_v22 = vpop.f32.mrb[125].mxu0  ;;  %6391 = vmatprep.subr.bf16.mxu0 %v8975_v30  ;;  %6617 = vmatprep.subr.bf16.mxu1 %v8978_v21 }
 0x54e   :  { %v5423_v28 = vpop.f32.mrb[125].mxu1  ;;  %v5199_v57 = vpop.f32.mrb[126].mxu0 }
 0x54f   :  { %v5458_v58 = vpack.c.bf16 %v5199_v57, %v5195_v48  ;;  %v5425_v16 = vpop.f32.mrb[126].mxu1  ;;  %v5201_v41 = vpop.f32.mrb[127].mxu0 }
 0x550   :  { %v5460_v12 = vpack.c.bf16 %v5425_v16, %v5421_v55  ;;  %v5459_v38 = vpack.c.bf16 %v5201_v41, %v5197_v22  ;;  %v5427_v60 = vpop.f32.mrb[127].mxu1  ;;  %6392 = vmatpush1.bf16.msra.mxu0 %v8973_v49  ;;  %6618 = vmatpush1.bf16.msra.mxu1 %v8976_v37 }
 0x551   :  { %v5461_v0 = vpack.c.bf16 %v5427_v60, %v5423_v28  ;;  %6393 = vmatprep.subr.bf16.mxu0 %v8981_v20  ;;  %6619 = vmatprep.subr.bf16.mxu1 %v8984_v40 }
 0x552   :  { %6354 = vmatprep.mubr.bf16.mxu0 %v5459_v38  ;;  %6580 = vmatprep.mubr.bf16.mxu1 %v5459_v38 }
 0x553   :  { %6355 = vmatmul.mubr.bf16.gmra.mrb[156].mxu0 %v5458_v58  ;;  %6581 = vmatmul.mubr.bf16.gmra.mrb[156].mxu1 %v5458_v58 }
 0x554   :  { %6394 = vmatpush1.bf16.msra.mxu0 %v8979_v5  ;;  %6397 = vmatprep.mubr.bf16.mxu0 %v9605_v31 }
 0x555   :  { %6620 = vmatpush1.bf16.msra.mxu1 %v8982_v2  ;;  %6623 = vmatprep.mubr.bf16.mxu1 %v9605_v31 }
 0x556   :  { %6395 = vmatprep.subr.bf16.mxu0 %v8987_v63  ;;  %6621 = vmatprep.subr.bf16.mxu1 %v8990_v3 }
 0x558   :  { %6396 = vmatpush1.bf16.msra.mxu0 %v8985_v9 }
 0x559   :  { %6622 = vmatpush1.bf16.msra.mxu1 %v8988_v4 }
 0x55b   :  { %6398 = vmatmul.mubr.bf16.vlgmr.msra.gmra.mrb[128].mxu0 %v9603_v26 }
 0x55c   :  { %6624 = vmatmul.mubr.bf16.vlgmr.msra.gmra.mrb[128].mxu1 %v9603_v26  ;;  %6407 = vmatprep.mubr.bf16.mxu0 %v9609_v54  ;;  %v5590_v26 = vld [vmem:[%s9761_s7] sm:$0xf]  ;;  %s9163_s7 = smov [#allocation13]  }
 0x55d   :  { %6633 = vmatprep.mubr.bf16.mxu1 %v9609_v54  ;;  %v9664_v31 = vrot.slane %v5590_v26, %v3004_v14  ;;  %v9672_v54 = vrot.slane %v5590_v26, %v3008_v44  ;;  %s6837_s9 = sshll.u32 %s9163_s7, 4  ;;  %s6838_s9 = int_to_ptr.vmem [resolvable:$true] %s6837_s9 }
 0x55e   :  { %s9123_s10 = scalar_lea.vmem %s6838_s9, 8192  ;;  %p9128_p7 = scmp.lt.s32.totalorder %s6838_s9, %s6838_s9 }
 0x55f   :  { %p9124_p6 = scmp.ne.s32.totalorder %s6838_s9, %s9123_s10  ;;  %p9129_p8 = scmp.lt.s32.totalorder %s9123_s10, %s9123_s10 }
 0x561   :  { %p9130_p9 = por %p9129_p8, %p9128_p7 }
 0x563   :  { %6408 = vmatmul.mubr.bf16.gmra.mrb[132].mxu0 %v9607_v45  ;;  %p9131_p10 = pnand %p9130_p9, %p9124_p6 }
 0x564   :  { %6634 = vmatmul.mubr.bf16.gmra.mrb[132].mxu1 %v9607_v45  ;;  %6417 = vmatprep.mubr.bf16.mxu0 %v9613_v32  ;;  %v9668_v45 = vrot.slane %v5590_v26, %v3012_v36 }
 0x565   :  { %6643 = vmatprep.mubr.bf16.mxu1 %v9613_v32 }
 0x56b   :  { %6418 = vmatmul.mubr.bf16.gmra.mrb[136].mxu0 %v9611_v62 }
 0x56c   :  { %6644 = vmatmul.mubr.bf16.gmra.mrb[136].mxu1 %v9611_v62  ;;  %6427 = vmatprep.mubr.bf16.mxu0 %v9617_v51  ;;  %v9676_v62 = vrot.slane %v5590_v26, %v3016_v19 }
 0x56d   :  { %6653 = vmatprep.mubr.bf16.mxu1 %v9617_v51 }
 0x573   :  { %6428 = vmatmul.mubr.bf16.gmra.mrb[140].mxu0 %v9615_v18 }
 0x574   :  { %6654 = vmatmul.mubr.bf16.gmra.mrb[140].mxu1 %v9615_v18  ;;  %6437 = vmatprep.mubr.bf16.mxu0 %v9621_v34 }
 0x575   :  { %6663 = vmatprep.mubr.bf16.mxu1 %v9621_v34 }
 0x57b   :  { %6438 = vmatmul.mubr.bf16.gmra.mrb[144].mxu0 %v9619_v50 }
 0x57c   :  { %6664 = vmatmul.mubr.bf16.gmra.mrb[144].mxu1 %v9619_v50  ;;  %6447 = vmatprep.mubr.bf16.mxu0 %v9625_v33 }
 0x57d   :  { %6673 = vmatprep.mubr.bf16.mxu1 %v9625_v33 }
 0x583   :  { %6448 = vmatmul.mubr.bf16.gmra.mrb[148].mxu0 %v9623_v10 }
 0x584   :  { %6674 = vmatmul.mubr.bf16.gmra.mrb[148].mxu1 %v9623_v10  ;;  %6457 = vmatprep.mubr.bf16.mxu0 %v9629_v15 }
 0x585   :  { %6683 = vmatprep.mubr.bf16.mxu1 %v9629_v15 }
 0x58b   :  { %6458 = vmatmul.mubr.bf16.gmra.mrb[152].mxu0 %v9627_v42 }
 0x58c   :  { %6684 = vmatmul.mubr.bf16.gmra.mrb[152].mxu1 %v9627_v42  ;;  %6467 = vmatprep.mubr.bf16.mxu0 %v5461_v0 }
 0x58d   :  { %6693 = vmatprep.mubr.bf16.mxu1 %v5461_v0 }
 0x593   :  { %6468 = vmatmul.mubr.bf16.gmra.mrb[156].mxu0 %v5460_v12 }
 0x594   :  { %6694 = vmatmul.mubr.bf16.gmra.mrb[156].mxu1 %v5460_v12 }
 0x62e   :  { %v6399_v32 = vpop.f32.mrb[128].mxu0 }
 0x62f   :  { %v7588_v18 = vadd.f32 %v6399_v32, %v9664_v31  ;;  %v6625_v51 = vpop.f32.mrb[128].mxu1  ;;  %v6401_v50 = vpop.f32.mrb[129].mxu0 }
 0x630   :  { %v7620_v14 = vadd.f32 %v6625_v51, %v9668_v45  ;;  %v7589_v34 = vadd.f32 %v6401_v50, %v9672_v54  ;;  %v6627_v10 = vpop.f32.mrb[129].mxu1  ;;  %v6403_v36 = vpop.f32.mrb[130].mxu0 }
 0x631   :  { %v6704_v52 = vmax.f32 %v7588_v18, 0.0  ;;  %v7621_v61 = vadd.f32 %v6627_v10, %v9676_v62  ;;  %v7590_v44 = vadd.f32 %v6403_v36, %v9664_v31  ;;  %v6629_v7 = vpop.f32.mrb[130].mxu1  ;;  %v6405_v6 = vpop.f32.mrb[131].mxu0 }
 0x632   :  { %v6706_v19 = vmax.f32 %v7620_v14, 0.0  ;;  %v6705_v33 = vmax.f32 %v7589_v34, 0.0  ;;  %v7622_v23 = vadd.f32 %v6629_v7, %v9668_v45  ;;  %v7591_v24 = vadd.f32 %v6405_v6, %v9672_v54  ;;  %v6631_v25 = vpop.f32.mrb[131].mxu1 }
 0x633   :  { %6768 = vst [vmem:[#allocation13] sm:$0xff] %v6704_v52  ;;  %v6707_v56 = vmax.f32 %v7621_v61, 0.0  ;;  %v6708_v59 = vmax.f32 %v7590_v44, 0.0  ;;  %v7623_v53 = vadd.f32 %v6631_v25, %v9676_v62 }
 0x634   :  { %6770 = vst [vmem:[#allocation13 + $0x10] sm:$0xff] %v6706_v19  ;;  %6769 = vst [vmem:[#allocation13 + $0x8] sm:$0xff] %v6705_v33  ;;  %v6710_v11 = vmax.f32 %v7622_v23, 0.0  ;;  %v6709_v29 = vmax.f32 %v7591_v24, 0.0 }
 0x635   :  { %6771 = vst [vmem:[#allocation13 + $0x18] sm:$0xff] %v6707_v56  ;;  %6772 = vst [vmem:[#allocation13 + $0x20] sm:$0xff] %v6708_v59  ;;  %v6711_v13 = vmax.f32 %v7623_v53, 0.0 }
 0x636   :  { %6774 = vst [vmem:[#allocation13 + $0x30] sm:$0xff] %v6710_v11  ;;  %6773 = vst [vmem:[#allocation13 + $0x28] sm:$0xff] %v6709_v29  ;;  %v6409_v27 = vpop.f32.mrb[132].mxu0 }
 0x637   :  { %6775 = vst [vmem:[#allocation13 + $0x38] sm:$0xff] %v6711_v13  ;;  %v7592_v39 = vadd.f32 %v6409_v27, %v9664_v31  ;;  %v6635_v8 = vpop.f32.mrb[132].mxu1  ;;  %v6411_v35 = vpop.f32.mrb[133].mxu0 }
 0x638   :  { %v7624_v17 = vadd.f32 %v6635_v8, %v9668_v45  ;;  %v7593_v42 = vadd.f32 %v6411_v35, %v9672_v54  ;;  %v6637_v46 = vpop.f32.mrb[133].mxu1  ;;  %v6413_v1 = vpop.f32.mrb[134].mxu0 }
 0x639   :  { %v6712_v43 = vmax.f32 %v7592_v39, 0.0  ;;  %v7625_v47 = vadd.f32 %v6637_v46, %v9676_v62  ;;  %v7594_v15 = vadd.f32 %v6413_v1, %v9664_v31  ;;  %v6639_v30 = vpop.f32.mrb[134].mxu1  ;;  %v6415_v21 = vpop.f32.mrb[135].mxu0 }
 0x63a   :  { %v6714_v48 = vmax.f32 %v7624_v17, 0.0  ;;  %v6713_v49 = vmax.f32 %v7593_v42, 0.0  ;;  %v7626_v37 = vadd.f32 %v6639_v30, %v9668_v45  ;;  %v7595_v55 = vadd.f32 %v6415_v21, %v9672_v54  ;;  %v6641_v22 = vpop.f32.mrb[135].mxu1 }
 0x63b   :  { %6776 = vst [vmem:[#allocation13 + $0x40] sm:$0xff] %v6712_v43  ;;  %v6715_v20 = vmax.f32 %v7625_v47, 0.0  ;;  %v6716_v40 = vmax.f32 %v7594_v15, 0.0  ;;  %v7627_v28 = vadd.f32 %v6641_v22, %v9676_v62 }
 0x63c   :  { %6778 = vst [vmem:[#allocation13 + $0x50] sm:$0xff] %v6714_v48  ;;  %6777 = vst [vmem:[#allocation13 + $0x48] sm:$0xff] %v6713_v49  ;;  %v6718_v57 = vmax.f32 %v7626_v37, 0.0  ;;  %v6717_v58 = vmax.f32 %v7595_v55, 0.0 }
 0x63d   :  { %6779 = vst [vmem:[#allocation13 + $0x58] sm:$0xff] %v6715_v20  ;;  %6780 = vst [vmem:[#allocation13 + $0x60] sm:$0xff] %v6716_v40  ;;  %v6719_v16 = vmax.f32 %v7627_v28, 0.0 }
 0x63e   :  { %6782 = vst [vmem:[#allocation13 + $0x70] sm:$0xff] %v6718_v57  ;;  %6781 = vst [vmem:[#allocation13 + $0x68] sm:$0xff] %v6717_v58  ;;  %v6419_v41 = vpop.f32.mrb[136].mxu0 }
 0x63f   :  { %6783 = vst [vmem:[#allocation13 + $0x78] sm:$0xff] %v6719_v16  ;;  %v7596_v12 = vadd.f32 %v6419_v41, %v9664_v31  ;;  %v6645_v38 = vpop.f32.mrb[136].mxu1  ;;  %v6421_v60 = vpop.f32.mrb[137].mxu0 }
 0x640   :  { %v7628_v5 = vadd.f32 %v6645_v38, %v9668_v45  ;;  %v7597_v0 = vadd.f32 %v6421_v60, %v9672_v54  ;;  %v6647_v2 = vpop.f32.mrb[137].mxu1  ;;  %v6423_v63 = vpop.f32.mrb[138].mxu0 }
 0x641   :  { %v6720_v3 = vmax.f32 %v7596_v12, 0.0  ;;  %v7629_v9 = vadd.f32 %v6647_v2, %v9676_v62  ;;  %v7598_v4 = vadd.f32 %v6423_v63, %v9664_v31  ;;  %v6649_v26 = vpop.f32.mrb[138].mxu1  ;;  %v6425_v32 = vpop.f32.mrb[139].mxu0 }
 0x642   :  { %v6722_v18 = vmax.f32 %v7628_v5, 0.0  ;;  %v6721_v51 = vmax.f32 %v7597_v0, 0.0  ;;  %v7630_v50 = vadd.f32 %v6649_v26, %v9668_v45  ;;  %v7599_v14 = vadd.f32 %v6425_v32, %v9672_v54  ;;  %v6651_v34 = vpop.f32.mrb[139].mxu1 }
 0x643   :  { %6784 = vst [vmem:[#allocation13 + $0x80] sm:$0xff] %v6720_v3  ;;  %v6723_v10 = vmax.f32 %v7629_v9, 0.0  ;;  %v6724_v36 = vmax.f32 %v7598_v4, 0.0  ;;  %v7631_v52 = vadd.f32 %v6651_v34, %v9676_v62 }
 0x644   :  { %6786 = vst [vmem:[#allocation13 + $0x90] sm:$0xff] %v6722_v18  ;;  %6785 = vst [vmem:[#allocation13 + $0x88] sm:$0xff] %v6721_v51  ;;  %v6726_v61 = vmax.f32 %v7630_v50, 0.0  ;;  %v6725_v44 = vmax.f32 %v7599_v14, 0.0 }
 0x645   :  { %6787 = vst [vmem:[#allocation13 + $0x98] sm:$0xff] %v6723_v10  ;;  %6788 = vst [vmem:[#allocation13 + $0xa0] sm:$0xff] %v6724_v36  ;;  %v6727_v7 = vmax.f32 %v7631_v52, 0.0 }
 0x646   :  { %6790 = vst [vmem:[#allocation13 + $0xb0] sm:$0xff] %v6726_v61  ;;  %6789 = vst [vmem:[#allocation13 + $0xa8] sm:$0xff] %v6725_v44  ;;  %v6429_v6 = vpop.f32.mrb[140].mxu0 }
 0x647   :  { %6791 = vst [vmem:[#allocation13 + $0xb8] sm:$0xff] %v6727_v7  ;;  %v7600_v19 = vadd.f32 %v6429_v6, %v9664_v31  ;;  %v6655_v33 = vpop.f32.mrb[140].mxu1  ;;  %v6431_v23 = vpop.f32.mrb[141].mxu0 }
 0x648   :  { %v7632_v24 = vadd.f32 %v6655_v33, %v9668_v45  ;;  %v7601_v25 = vadd.f32 %v6431_v23, %v9672_v54  ;;  %v6657_v56 = vpop.f32.mrb[141].mxu1  ;;  %v6433_v59 = vpop.f32.mrb[142].mxu0 }
 0x649   :  { %v6728_v53 = vmax.f32 %v7600_v19, 0.0  ;;  %v7633_v11 = vadd.f32 %v6657_v56, %v9676_v62  ;;  %v7602_v29 = vadd.f32 %v6433_v59, %v9664_v31  ;;  %v6659_v13 = vpop.f32.mrb[142].mxu1  ;;  %v6435_v27 = vpop.f32.mrb[143].mxu0 }
 0x64a   :  { %v6730_v39 = vmax.f32 %v7632_v24, 0.0  ;;  %v6729_v8 = vmax.f32 %v7601_v25, 0.0  ;;  %v7634_v35 = vadd.f32 %v6659_v13, %v9668_v45  ;;  %v7603_v17 = vadd.f32 %v6435_v27, %v9672_v54  ;;  %v6661_v42 = vpop.f32.mrb[143].mxu1 }
 0x64b   :  { %6792 = vst [vmem:[#allocation13 + $0xc0] sm:$0xff] %v6728_v53  ;;  %v6731_v46 = vmax.f32 %v7633_v11, 0.0  ;;  %v6732_v1 = vmax.f32 %v7602_v29, 0.0  ;;  %v7635_v43 = vadd.f32 %v6661_v42, %v9676_v62 }
 0x64c   :  { %6794 = vst [vmem:[#allocation13 + $0xd0] sm:$0xff] %v6730_v39  ;;  %6793 = vst [vmem:[#allocation13 + $0xc8] sm:$0xff] %v6729_v8  ;;  %v6734_v47 = vmax.f32 %v7634_v35, 0.0  ;;  %v6733_v15 = vmax.f32 %v7603_v17, 0.0 }
 0x64d   :  { %6795 = vst [vmem:[#allocation13 + $0xd8] sm:$0xff] %v6731_v46  ;;  %6796 = vst [vmem:[#allocation13 + $0xe0] sm:$0xff] %v6732_v1  ;;  %v6735_v30 = vmax.f32 %v7635_v43, 0.0 }
 0x64e   :  { %6798 = vst [vmem:[#allocation13 + $0xf0] sm:$0xff] %v6734_v47  ;;  %6797 = vst [vmem:[#allocation13 + $0xe8] sm:$0xff] %v6733_v15  ;;  %v6439_v21 = vpop.f32.mrb[144].mxu0 }
 0x64f   :  { %6799 = vst [vmem:[#allocation13 + $0xf8] sm:$0xff] %v6735_v30  ;;  %v7604_v48 = vadd.f32 %v6439_v21, %v9664_v31  ;;  %v6665_v49 = vpop.f32.mrb[144].mxu1  ;;  %v6441_v37 = vpop.f32.mrb[145].mxu0 }
 0x650   :  { %v7636_v55 = vadd.f32 %v6665_v49, %v9668_v45  ;;  %v7605_v22 = vadd.f32 %v6441_v37, %v9672_v54  ;;  %v6667_v20 = vpop.f32.mrb[145].mxu1  ;;  %v6443_v40 = vpop.f32.mrb[146].mxu0 }
 0x651   :  { %v6736_v28 = vmax.f32 %v7604_v48, 0.0  ;;  %v7637_v57 = vadd.f32 %v6667_v20, %v9676_v62  ;;  %v7606_v58 = vadd.f32 %v6443_v40, %v9664_v31  ;;  %v6669_v16 = vpop.f32.mrb[146].mxu1  ;;  %v6445_v41 = vpop.f32.mrb[147].mxu0 }
 0x652   :  { %v6738_v12 = vmax.f32 %v7636_v55, 0.0  ;;  %v6737_v38 = vmax.f32 %v7605_v22, 0.0  ;;  %v7638_v60 = vadd.f32 %v6669_v16, %v9668_v45  ;;  %v7607_v5 = vadd.f32 %v6445_v41, %v9672_v54  ;;  %v6671_v0 = vpop.f32.mrb[147].mxu1 }
 0x653   :  { %6800 = vst [vmem:[#allocation13 + $0x100] sm:$0xff] %v6736_v28  ;;  %v6739_v2 = vmax.f32 %v7637_v57, 0.0  ;;  %v6740_v63 = vmax.f32 %v7606_v58, 0.0  ;;  %v7639_v3 = vadd.f32 %v6671_v0, %v9676_v62 }
 0x654   :  { %6802 = vst [vmem:[#allocation13 + $0x110] sm:$0xff] %v6738_v12  ;;  %6801 = vst [vmem:[#allocation13 + $0x108] sm:$0xff] %v6737_v38  ;;  %v6742_v9 = vmax.f32 %v7638_v60, 0.0  ;;  %v6741_v4 = vmax.f32 %v7607_v5, 0.0 }
 0x655   :  { %6803 = vst [vmem:[#allocation13 + $0x118] sm:$0xff] %v6739_v2  ;;  %6804 = vst [vmem:[#allocation13 + $0x120] sm:$0xff] %v6740_v63  ;;  %v6743_v26 = vmax.f32 %v7639_v3, 0.0 }
 0x656   :  { %6806 = vst [vmem:[#allocation13 + $0x130] sm:$0xff] %v6742_v9  ;;  %6805 = vst [vmem:[#allocation13 + $0x128] sm:$0xff] %v6741_v4  ;;  %v6449_v32 = vpop.f32.mrb[148].mxu0 }
 0x657   :  { %6807 = vst [vmem:[#allocation13 + $0x138] sm:$0xff] %v6743_v26  ;;  %v7608_v18 = vadd.f32 %v6449_v32, %v9664_v31  ;;  %v6675_v51 = vpop.f32.mrb[148].mxu1  ;;  %v6451_v50 = vpop.f32.mrb[149].mxu0 }
 0x658   :  { %v7640_v14 = vadd.f32 %v6675_v51, %v9668_v45  ;;  %v7609_v34 = vadd.f32 %v6451_v50, %v9672_v54  ;;  %v6677_v10 = vpop.f32.mrb[149].mxu1  ;;  %v6453_v36 = vpop.f32.mrb[150].mxu0 }
 0x659   :  { %v6744_v52 = vmax.f32 %v7608_v18, 0.0  ;;  %v7641_v61 = vadd.f32 %v6677_v10, %v9676_v62  ;;  %v7610_v44 = vadd.f32 %v6453_v36, %v9664_v31  ;;  %v6679_v7 = vpop.f32.mrb[150].mxu1  ;;  %v6455_v6 = vpop.f32.mrb[151].mxu0 }
 0x65a   :  { %v6746_v19 = vmax.f32 %v7640_v14, 0.0  ;;  %v6745_v33 = vmax.f32 %v7609_v34, 0.0  ;;  %v7642_v23 = vadd.f32 %v6679_v7, %v9668_v45  ;;  %v7611_v24 = vadd.f32 %v6455_v6, %v9672_v54  ;;  %v6681_v25 = vpop.f32.mrb[151].mxu1 }
 0x65b   :  { %6808 = vst [vmem:[#allocation13 + $0x140] sm:$0xff] %v6744_v52  ;;  %v6747_v56 = vmax.f32 %v7641_v61, 0.0  ;;  %v6748_v59 = vmax.f32 %v7610_v44, 0.0  ;;  %v7643_v53 = vadd.f32 %v6681_v25, %v9676_v62 }
 0x65c   :  { %6810 = vst [vmem:[#allocation13 + $0x150] sm:$0xff] %v6746_v19  ;;  %6809 = vst [vmem:[#allocation13 + $0x148] sm:$0xff] %v6745_v33  ;;  %v6750_v11 = vmax.f32 %v7642_v23, 0.0  ;;  %v6749_v29 = vmax.f32 %v7611_v24, 0.0 }
 0x65d   :  { %6811 = vst [vmem:[#allocation13 + $0x158] sm:$0xff] %v6747_v56  ;;  %6812 = vst [vmem:[#allocation13 + $0x160] sm:$0xff] %v6748_v59  ;;  %v6751_v13 = vmax.f32 %v7643_v53, 0.0 }
 0x65e   :  { %6814 = vst [vmem:[#allocation13 + $0x170] sm:$0xff] %v6750_v11  ;;  %6813 = vst [vmem:[#allocation13 + $0x168] sm:$0xff] %v6749_v29  ;;  %v6459_v27 = vpop.f32.mrb[152].mxu0 }
 0x65f   :  { %6815 = vst [vmem:[#allocation13 + $0x178] sm:$0xff] %v6751_v13  ;;  %v7612_v39 = vadd.f32 %v6459_v27, %v9664_v31  ;;  %v6685_v8 = vpop.f32.mrb[152].mxu1  ;;  %v6461_v35 = vpop.f32.mrb[153].mxu0 }
 0x660   :  { %v7644_v17 = vadd.f32 %v6685_v8, %v9668_v45  ;;  %v7613_v42 = vadd.f32 %v6461_v35, %v9672_v54  ;;  %v6687_v46 = vpop.f32.mrb[153].mxu1  ;;  %v6463_v1 = vpop.f32.mrb[154].mxu0 }
 0x661   :  { %v6752_v43 = vmax.f32 %v7612_v39, 0.0  ;;  %v7645_v47 = vadd.f32 %v6687_v46, %v9676_v62  ;;  %v7614_v15 = vadd.f32 %v6463_v1, %v9664_v31  ;;  %v6689_v30 = vpop.f32.mrb[154].mxu1  ;;  %v6465_v21 = vpop.f32.mrb[155].mxu0 }
 0x662   :  { %v6754_v48 = vmax.f32 %v7644_v17, 0.0  ;;  %v6753_v49 = vmax.f32 %v7613_v42, 0.0  ;;  %v7646_v37 = vadd.f32 %v6689_v30, %v9668_v45  ;;  %v7615_v55 = vadd.f32 %v6465_v21, %v9672_v54  ;;  %v6691_v22 = vpop.f32.mrb[155].mxu1 }
 0x663   :  { %6816 = vst [vmem:[#allocation13 + $0x180] sm:$0xff] %v6752_v43  ;;  %v6755_v20 = vmax.f32 %v7645_v47, 0.0  ;;  %v6756_v40 = vmax.f32 %v7614_v15, 0.0  ;;  %v7647_v28 = vadd.f32 %v6691_v22, %v9676_v62 }
 0x664   :  { %6818 = vst [vmem:[#allocation13 + $0x190] sm:$0xff] %v6754_v48  ;;  %6817 = vst [vmem:[#allocation13 + $0x188] sm:$0xff] %v6753_v49  ;;  %v6758_v57 = vmax.f32 %v7646_v37, 0.0  ;;  %v6757_v58 = vmax.f32 %v7615_v55, 0.0 }
 0x665   :  { %6819 = vst [vmem:[#allocation13 + $0x198] sm:$0xff] %v6755_v20  ;;  %6820 = vst [vmem:[#allocation13 + $0x1a0] sm:$0xff] %v6756_v40  ;;  %v6759_v16 = vmax.f32 %v7647_v28, 0.0 }
 0x666   :  { %6822 = vst [vmem:[#allocation13 + $0x1b0] sm:$0xff] %v6758_v57  ;;  %6821 = vst [vmem:[#allocation13 + $0x1a8] sm:$0xff] %v6757_v58  ;;  %v6469_v41 = vpop.f32.mrb[156].mxu0 }
 0x667   :  { %6823 = vst [vmem:[#allocation13 + $0x1b8] sm:$0xff] %v6759_v16  ;;  %v7616_v12 = vadd.f32 %v6469_v41, %v9664_v31  ;;  %v6695_v38 = vpop.f32.mrb[156].mxu1  ;;  %v6471_v60 = vpop.f32.mrb[157].mxu0 }
 0x668   :  { %v7648_v5 = vadd.f32 %v6695_v38, %v9668_v45  ;;  %v7617_v0 = vadd.f32 %v6471_v60, %v9672_v54  ;;  %v6697_v2 = vpop.f32.mrb[157].mxu1  ;;  %v6473_v63 = vpop.f32.mrb[158].mxu0 }
 0x669   :  { %v6760_v3 = vmax.f32 %v7616_v12, 0.0  ;;  %v7649_v9 = vadd.f32 %v6697_v2, %v9676_v62  ;;  %v7618_v4 = vadd.f32 %v6473_v63, %v9664_v31  ;;  %v6699_v26 = vpop.f32.mrb[158].mxu1  ;;  %v6475_v32 = vpop.f32.mrb[159].mxu0 }
 0x66a   :  { %v6762_v18 = vmax.f32 %v7648_v5, 0.0  ;;  %v6761_v51 = vmax.f32 %v7617_v0, 0.0  ;;  %v7650_v50 = vadd.f32 %v6699_v26, %v9668_v45  ;;  %v7619_v14 = vadd.f32 %v6475_v32, %v9672_v54  ;;  %v6701_v34 = vpop.f32.mrb[159].mxu1 }
 0x66b   :  { %6824 = vst [vmem:[#allocation13 + $0x1c0] sm:$0xff] %v6760_v3  ;;  %v6763_v10 = vmax.f32 %v7649_v9, 0.0  ;;  %v6764_v36 = vmax.f32 %v7618_v4, 0.0  ;;  %v7651_v52 = vadd.f32 %v6701_v34, %v9676_v62 }
 0x66c   :  { %6826 = vst [vmem:[#allocation13 + $0x1d0] sm:$0xff] %v6762_v18  ;;  %6825 = vst [vmem:[#allocation13 + $0x1c8] sm:$0xff] %v6761_v51  ;;  %v6766_v61 = vmax.f32 %v7650_v50, 0.0  ;;  %v6765_v31 = vmax.f32 %v7619_v14, 0.0 }
 0x66d   :  { %6827 = vst [vmem:[#allocation13 + $0x1d8] sm:$0xff] %v6763_v10  ;;  %6828 = vst [vmem:[#allocation13 + $0x1e0] sm:$0xff] %v6764_v36  ;;  %v6767_v44 = vmax.f32 %v7651_v52, 0.0 }
 0x66e   :  { %6830 = vst [vmem:[#allocation13 + $0x1f0] sm:$0xff] %v6766_v61  ;;  %6829 = vst [vmem:[#allocation13 + $0x1e8] sm:$0xff] %v6765_v31 }
 0x66f   :  { %6831 = vst [vmem:[#allocation13 + $0x1f8] sm:$0xff] %v6767_v44 }
 0x670   :  { %9134 = shalt.err (!%p9131_p10)
}
 0x671   :  { %s9135_s14 = scalar_lea.hbm %s9762_s8, 8192 }
 0x672   :  { %p9136_p11 = scmp.ne.s32.totalorder %s9762_s8, %s9135_s14  ;;  %p9139_p12 = scmp.lt.u32.totalorder %s9135_s14, %s9762_s8 }
 0x674   :  { %p9141_p13 = pnand %p9139_p12, %p9136_p11 }
 0x676   :  { %9144 = shalt.err (!%p9141_p13)
}
 0x677   :  { %s9164_s21 = smov 512   ;;  %s9165_s3 = smov 32  }
 0x678   :  { %6843 = dma.vmem_to_hbm [thread:$0]  %s6838_s9, 8192, %s9762_s8, [#allocation4], %s9164_s21, %s9164_s21, %s9165_s3  }
 0x679   :  { %9153 = dma.done.wait [#allocation4], 8192  }
 0x67a   :  { %9154 = vsyncadd [#allocation4], 4294959104 }
 0x67b   :  { %6847 = vsyncpa [#allocation3], 1 }
 0x67c   :  { %6848 = vsyncpa [#allocation6], 1 }
 0x67d   :  { %6849 = vsyncpa [#allocation9], 1 }
 0x67e   :  { %6850 = vsyncpa [#allocation12], 1 }
 0x67f   :  { %6851 = vsyncpa [#allocation4], 1 }

// kernel: tpu_custom_call.1
= control target key start
LH: loop header
LB: loop body
LE: loop exit
PB: predicated region body
PF: predicated region fallthrough
CT: control target
= control target key end

     0   :  { %13 = vsyncpa [#allocation3], 0  ;;  %s9754_s0 = inlined_call_operand.hbm [shape: bf16[128,512], index: 0, kind: input, shape index: {}]   ;;  %s9755_s1 = inlined_call_operand.hbm [shape: bf16[512,512], index: 1, kind: input, shape index: {}]   ;;  %s9756_s2 = inlined_call_operand.hbm [shape: bf16[512,512], index: 2, kind: input, shape index: {}]   ;;  %s9757_s3 = inlined_call_operand.hbm [shape: bf16[512,512], index: 3, kind: input, shape index: {}]   ;;  %s9758_s4 = inlined_call_operand.vmem [shape: f32[1,512], index: 4, kind: input, shape index: {}]   ;;  %s9759_s5 = inlined_call_operand.hbm [shape: bf16[512,512], index: 5, kind: input, shape index: {}]   ;;  %s9760_s6 = inlined_call_operand.hbm [shape: bf16[512,512], index: 6, kind: input, shape index: {}]   ;;  %s9761_s7 = inlined_call_operand.vmem [shape: f32[1,512], index: 7, kind: input, shape index: {}]   ;;  %s9762_s8 = inlined_call_operand.hbm [shape: f32[128,512], index: 8, kind: output, shape index: {}]  }
   0x1   :  { %14 = vsyncpa [#allocation6], 0 }
   0x2   :  { %15 = vsyncpa [#allocation9], 0 }
   0x3   :  { %16 = vsyncpa [#allocation12], 0 }
   0x4   :  { %17 = vsyncpa [#allocation4], 0  ;;  %s9155_s27 = smov [#allocation5]   ;;  %s9156_s29 = smov [#allocation8]  }
   0x5   :  { %s35_s28 = sshll.u32 %s9155_s27, 4  ;;  %s59_s30 = sshll.u32 %s9156_s29, 4  ;;  %s36_s28 = int_to_ptr.vmem [resolvable:$true] %s35_s28  ;;  %s9211_s30 = int_to_ptr.vmem [resolvable:$true] %s59_s30 }
   0x6   :  { %s8991_s11 = scalar_lea.hbm %s9755_s1, 16384 }
   0x7   :  { %p8992_p0 = scmp.ne.s32.totalorder %s9755_s1, %s8991_s11  ;;  %p8995_p1 = scmp.lt.u32.totalorder %s8991_s11, %s9755_s1 }
   0x9   :  { %p8997_p2 = pnand %p8995_p1, %p8992_p0 }
   0xb   :  { %9000 = shalt.err (!%p8997_p2)
}
   0xc   :  { %s9001_s16 = scalar_lea.vmem %s36_s28, 16384  ;;  %p9006_p4 = scmp.lt.s32.totalorder %s36_s28, %s36_s28 }
   0xd   :  { %p9002_p3 = scmp.ne.s32.totalorder %s36_s28, %s9001_s16  ;;  %p9007_p5 = scmp.lt.s32.totalorder %s9001_s16, %s9001_s16 }
   0xf   :  { %p9008_p6 = por %p9007_p5, %p9006_p4 }
  0x11   :  { %p9009_p7 = pnand %p9008_p6, %p9002_p3 }
  0x13   :  { %9012 = shalt.err (!%p9009_p7)
}
  0x14   :  { %s9157_s17 = smov 256   ;;  %s9158_s18 = smov 16  }
  0x15   :  { %41 = dma.hbm_to_vmem [thread:$0]  %s9755_s1, 16384, %s36_s28, [#allocation6], %s9157_s17, %s9157_s17, %s9158_s18  }
  0x16   :  { %s9013_s23 = scalar_lea.hbm %s9757_s3, 16384 }
  0x17   :  { %p9014_p8 = scmp.ne.s32.totalorder %s9757_s3, %s9013_s23  ;;  %p9017_p9 = scmp.lt.u32.totalorder %s9013_s23, %s9757_s3 }
  0x19   :  { %p9019_p10 = pnand %p9017_p9, %p9014_p8 }
  0x1b   :  { %9022 = shalt.err (!%p9019_p10)
}
  0x1c   :  { %s9023_s29 = scalar_lea.vmem %s9211_s30, 16384  ;;  %p9028_p12 = scmp.lt.s32.totalorder %s9211_s30, %s9211_s30 }
  0x1d   :  { %p9024_p11 = scmp.ne.s32.totalorder %s9211_s30, %s9023_s29  ;;  %p9029_p13 = scmp.lt.s32.totalorder %s9023_s29, %s9023_s29 }
  0x1f   :  { %p9030_p0 = por %p9029_p13, %p9028_p12 }
  0x21   :  { %p9031_p1 = pnand %p9030_p0, %p9024_p11 }
  0x23   :  { %9034 = shalt.err (!%p9031_p1)
}
  0x24   :  { %65 = dma.hbm_to_vmem [thread:$0]  %s9757_s3, 16384, %s9211_s30, [#allocation9], %s9157_s17, %s9157_s17, %s9158_s18  }
  0x25   :  { %s9159_s9 = smov [#allocation2]   ;;  %s9160_s11 = smov [#allocation7]  }
  0x26   :  { %s23_s10 = sshll.u32 %s9159_s9, 4  ;;  %s47_s12 = sshll.u32 %s9160_s11, 4  ;;  %s24_s10 = int_to_ptr.vmem [resolvable:$true] %s23_s10  ;;  %s9248_s12 = int_to_ptr.vmem [resolvable:$true] %s47_s12 }
  0x27   :  { %s9035_s15 = scalar_lea.hbm %s9754_s0, 4096 }
  0x28   :  { %p9036_p2 = scmp.ne.s32.totalorder %s9754_s0, %s9035_s15  ;;  %p9039_p3 = scmp.lt.u32.totalorder %s9035_s15, %s9754_s0 }
  0x2a   :  { %p9041_p4 = pnand %p9039_p3, %p9036_p2 }
  0x2c   :  { %9044 = shalt.err (!%p9041_p4)
}
  0x2d   :  { %s9045_s3 = scalar_lea.vmem %s24_s10, 4096  ;;  %p9050_p6 = scmp.lt.s32.totalorder %s24_s10, %s24_s10 }
  0x2e   :  { %p9046_p5 = scmp.ne.s32.totalorder %s24_s10, %s9045_s3  ;;  %p9051_p7 = scmp.lt.s32.totalorder %s9045_s3, %s9045_s3 }
  0x30   :  { %p9052_p8 = por %p9051_p7, %p9050_p6 }
  0x32   :  { %p9053_p9 = pnand %p9052_p8, %p9046_p5 }
  0x34   :  { %9056 = shalt.err (!%p9053_p9)
}
  0x35   :  { %29 = dma.hbm_to_vmem [thread:$0]  %s9754_s0, 4096, %s24_s10, [#allocation3], %s9157_s17, %s9157_s17, %s9158_s18  }
  0x36   :  { %s9057_s25 = scalar_lea.hbm %s9756_s2, 16384 }
  0x37   :  { %p9058_p10 = scmp.ne.s32.totalorder %s9756_s2, %s9057_s25  ;;  %p9061_p11 = scmp.lt.u32.totalorder %s9057_s25, %s9756_s2 }
  0x39   :  { %p9063_p12 = pnand %p9061_p11, %p9058_p10 }
  0x3b   :  { %9066 = shalt.err (!%p9063_p12)
}
  0x3c   :  { %s9067_s28 = scalar_lea.vmem %s9248_s12, 16384  ;;  %p9072_p0 = scmp.lt.s32.totalorder %s9248_s12, %s9248_s12 }
  0x3d   :  { %p9068_p13 = scmp.ne.s32.totalorder %s9248_s12, %s9067_s28  ;;  %p9073_p1 = scmp.lt.s32.totalorder %s9067_s28, %s9067_s28 }
  0x3f   :  { %p9074_p2 = por %p9073_p1, %p9072_p0 }
  0x41   :  { %p9075_p3 = pnand %p9074_p2, %p9068_p13 }
  0x43   :  { %9078 = shalt.err (!%p9075_p3)
}
  0x44   :  { %53 = dma.hbm_to_vmem [thread:$0]  %s9756_s2, 16384, %s9248_s12, [#allocation6], %s9157_s17, %s9157_s17, %s9158_s18  }
  0x45   :  { %s9161_s10 = smov [#allocation10]   ;;  %s9162_s13 = smov [#allocation11]  }
  0x46   :  { %s73_s11 = sshll.u32 %s9161_s10, 4  ;;  %s85_s14 = sshll.u32 %s9162_s13, 4  ;;  %s74_s11 = int_to_ptr.vmem [resolvable:$true] %s73_s11  ;;  %s9285_s14 = int_to_ptr.vmem [resolvable:$true] %s85_s14 }
  0x47   :  { %s9079_s19 = scalar_lea.hbm %s9759_s5, 16384 }
  0x48   :  { %p9080_p4 = scmp.ne.s32.totalorder %s9759_s5, %s9079_s19  ;;  %p9083_p5 = scmp.lt.u32.totalorder %s9079_s19, %s9759_s5 }
  0x4a   :  { %p9085_p6 = pnand %p9083_p5, %p9080_p4 }
  0x4c   :  { %9088 = shalt.err (!%p9085_p6)
}
  0x4d   :  { %s9089_s2 = scalar_lea.vmem %s74_s11, 16384  ;;  %p9094_p8 = scmp.lt.s32.totalorder %s74_s11, %s74_s11 }
  0x4e   :  { %p9090_p7 = scmp.ne.s32.totalorder %s74_s11, %s9089_s2  ;;  %p9095_p9 = scmp.lt.s32.totalorder %s9089_s2, %s9089_s2 }
  0x50   :  { %p9096_p10 = por %p9095_p9, %p9094_p8 }
  0x52   :  { %p9097_p11 = pnand %p9096_p10, %p9090_p7 }
  0x54   :  { %9100 = shalt.err (!%p9097_p11)
}
  0x55   :  { %79 = dma.hbm_to_vmem [thread:$0]  %s9759_s5, 16384, %s74_s11, [#allocation9], %s9157_s17, %s9157_s17, %s9158_s18  }
  0x56   :  { %s9101_s25 = scalar_lea.hbm %s9760_s6, 16384 }
  0x57   :  { %p9102_p12 = scmp.ne.s32.totalorder %s9760_s6, %s9101_s25  ;;  %p9105_p13 = scmp.lt.u32.totalorder %s9101_s25, %s9760_s6 }
  0x59   :  { %p9107_p0 = pnand %p9105_p13, %p9102_p12 }
  0x5b   :  { %9110 = shalt.err (!%p9107_p0)
}
  0x5c   :  { %s9111_s28 = scalar_lea.vmem %s9285_s14, 16384  ;;  %p9116_p2 = scmp.lt.s32.totalorder %s9285_s14, %s9285_s14 }
  0x5d   :  { %p9112_p1 = scmp.ne.s32.totalorder %s9285_s14, %s9111_s28  ;;  %p9117_p3 = scmp.lt.s32.totalorder %s9111_s28, %s9111_s28 }
  0x5f   :  { %p9118_p4 = por %p9117_p3, %p9116_p2 }
  0x61   :  { %p9119_p5 = pnand %p9118_p4, %p9112_p1 }
  0x63   :  { %9122 = shalt.err (!%p9119_p5)
}
  0x64   :  { %91 = dma.hbm_to_vmem [thread:$0]  %s9760_s6, 16384, %s9285_s14, [#allocation12], %s9157_s17, %s9157_s17, %s9158_s18  }
  0x65   :  { %9145 = dma.done.wait [#allocation3], 4096  }
  0x66   :  { %9146 = vsyncadd [#allocation3], 4294963200 }
  0x67   :  { %9147 = dma.done.wait [#allocation6], 32768  }
  0x68   :  { %9148 = vsyncadd [#allocation6], 4294934528 }
  0x69   :  { %9149 = dma.done.wait [#allocation9], 32768  }
  0x6a   :  { %9150 = vsyncadd [#allocation9], 4294934528 }
  0x6b   :  { %9151 = dma.done.wait [#allocation12], 16384  }
  0x6c   :  { %9152 = vsyncadd [#allocation12], 4294950912  ;;  %v7983_v0 = vld [vmem:[#allocation5 + $0x4] ss:$16 sps:$4 sm:$0xff]   ;;  %v7985_v1 = vld [vmem:[#allocation5 + $0xc] ss:$16 sps:$4 sm:$0xff]  }
  0x6d   :  { %1072 = vmatprep.subr.bf16.mxu0 %v7983_v0  ;;  %v7987_v2 = vld [vmem:[#allocation5] ss:$16 sps:$4 sm:$0xff]   ;;  %v7988_v3 = vld [vmem:[#allocation5 + $0x8] ss:$16 sps:$4 sm:$0xff]   ;;  %1298 = vmatprep.subr.bf16.mxu1 %v7985_v1  ;;  %v7989_v4 = vld [vmem:[#allocation5 + $0x24] ss:$16 sps:$4 sm:$0xff]  }
  0x6e   :  { %1073 = vmatpush1.bf16.msra.mxu0 %v7987_v2  ;;  %1299 = vmatpush1.bf16.msra.mxu1 %v7988_v3  ;;  %v7991_v5 = vld [vmem:[#allocation5 + $0x2c] ss:$16 sps:$4 sm:$0xff]   ;;  %v7993_v6 = vld [vmem:[#allocation5 + $0x20] ss:$16 sps:$4 sm:$0xff]   ;;  %v7994_v7 = vld [vmem:[#allocation5 + $0x28] ss:$16 sps:$4 sm:$0xff]  }
  0x6f   :  { %1074 = vmatprep.subr.bf16.mxu0 %v7989_v4  ;;  %1300 = vmatprep.subr.bf16.mxu1 %v7991_v5  ;;  %v7995_v8 = vld [vmem:[#allocation5 + $0x44] ss:$16 sps:$4 sm:$0xff]   ;;  %v7997_v9 = vld [vmem:[#allocation5 + $0x4c] ss:$16 sps:$4 sm:$0xff]   ;;  %v7999_v10 = vld [vmem:[#allocation5 + $0x40] ss:$16 sps:$4 sm:$0xff]  }
  0x70   :  { %v8000_v11 = vld [vmem:[#allocation5 + $0x48] ss:$16 sps:$4 sm:$0xff]   ;;  %v8001_v12 = vld [vmem:[#allocation5 + $0x64] ss:$16 sps:$4 sm:$0xff]   ;;  %v8003_v13 = vld [vmem:[#allocation5 + $0x6c] ss:$16 sps:$4 sm:$0xff]  }
  0x71   :  { %v8005_v14 = vld [vmem:[#allocation5 + $0x60] ss:$16 sps:$4 sm:$0xff]   ;;  %v8006_v15 = vld [vmem:[#allocation5 + $0x68] ss:$16 sps:$4 sm:$0xff]   ;;  %v8007_v16 = vld [vmem:[#allocation5 + $0x84] ss:$16 sps:$4 sm:$0xff]  }
  0x72   :  { %1075 = vmatpush1.bf16.msra.mxu0 %v7993_v6  ;;  %1301 = vmatpush1.bf16.msra.mxu1 %v7994_v7  ;;  %v8009_v17 = vld [vmem:[#allocation5 + $0x8c] ss:$16 sps:$4 sm:$0xff]   ;;  %v8011_v18 = vld [vmem:[#allocation5 + $0x80] ss:$16 sps:$4 sm:$0xff]   ;;  %v8012_v19 = vld [vmem:[#allocation5 + $0x88] ss:$16 sps:$4 sm:$0xff]  }
  0x73   :  { %1076 = vmatprep.subr.bf16.mxu0 %v7995_v8  ;;  %1302 = vmatprep.subr.bf16.mxu1 %v7997_v9  ;;  %v8013_v20 = vld [vmem:[#allocation5 + $0xa4] ss:$16 sps:$4 sm:$0xff]   ;;  %v8015_v21 = vld [vmem:[#allocation5 + $0xac] ss:$16 sps:$4 sm:$0xff]   ;;  %v8017_v22 = vld [vmem:[#allocation5 + $0xa0] ss:$16 sps:$4 sm:$0xff]  }
  0x74   :  { %v8018_v23 = vld [vmem:[#allocation5 + $0xa8] ss:$16 sps:$4 sm:$0xff]   ;;  %v8019_v24 = vld [vmem:[#allocation5 + $0xc4] ss:$16 sps:$4 sm:$0xff]   ;;  %v8021_v25 = vld [vmem:[#allocation5 + $0xcc] ss:$16 sps:$4 sm:$0xff]  }
  0x75   :  { %v8023_v26 = vld [vmem:[#allocation5 + $0xc0] ss:$16 sps:$4 sm:$0xff]   ;;  %v8024_v27 = vld [vmem:[#allocation5 + $0xc8] ss:$16 sps:$4 sm:$0xff]   ;;  %v8025_v28 = vld [vmem:[#allocation5 + $0xe4] ss:$16 sps:$4 sm:$0xff]  }
  0x76   :  { %1077 = vmatpush1.bf16.msra.mxu0 %v7999_v10  ;;  %1303 = vmatpush1.bf16.msra.mxu1 %v8000_v11  ;;  %v8027_v29 = vld [vmem:[#allocation5 + $0xec] ss:$16 sps:$4 sm:$0xff]   ;;  %v8029_v30 = vld [vmem:[#allocation5 + $0xe0] ss:$16 sps:$4 sm:$0xff]   ;;  %v8030_v31 = vld [vmem:[#allocation5 + $0xe8] ss:$16 sps:$4 sm:$0xff]  }
  0x77   :  { %1078 = vmatprep.subr.bf16.mxu0 %v8001_v12  ;;  %1304 = vmatprep.subr.bf16.mxu1 %v8003_v13  ;;  %v8031_v32 = vld [vmem:[#allocation5 + $0x104] ss:$16 sps:$4 sm:$0xff]   ;;  %v8033_v33 = vld [vmem:[#allocation5 + $0x10c] ss:$16 sps:$4 sm:$0xff]   ;;  %v8035_v34 = vld [vmem:[#allocation5 + $0x100] ss:$16 sps:$4 sm:$0xff]  }
  0x78   :  { %v8036_v35 = vld [vmem:[#allocation5 + $0x108] ss:$16 sps:$4 sm:$0xff]   ;;  %v8037_v36 = vld [vmem:[#allocation5 + $0x124] ss:$16 sps:$4 sm:$0xff]   ;;  %v8039_v37 = vld [vmem:[#allocation5 + $0x12c] ss:$16 sps:$4 sm:$0xff]  }
  0x79   :  { %v8041_v38 = vld [vmem:[#allocation5 + $0x120] ss:$16 sps:$4 sm:$0xff]   ;;  %v8042_v39 = vld [vmem:[#allocation5 + $0x128] ss:$16 sps:$4 sm:$0xff]   ;;  %v8043_v40 = vld [vmem:[#allocation5 + $0x144] ss:$16 sps:$4 sm:$0xff]  }
  0x7a   :  { %1079 = vmatpush1.bf16.msra.mxu0 %v8005_v14  ;;  %1305 = vmatpush1.bf16.msra.mxu1 %v8006_v15  ;;  %v8045_v41 = vld [vmem:[#allocation5 + $0x14c] ss:$16 sps:$4 sm:$0xff]   ;;  %v8047_v42 = vld [vmem:[#allocation5 + $0x140] ss:$16 sps:$4 sm:$0xff]   ;;  %v8048_v43 = vld [vmem:[#allocation5 + $0x148] ss:$16 sps:$4 sm:$0xff]  }
  0x7b   :  { %1080 = vmatprep.subr.bf16.mxu0 %v8007_v16  ;;  %1306 = vmatprep.subr.bf16.mxu1 %v8009_v17  ;;  %v8049_v44 = vld [vmem:[#allocation5 + $0x164] ss:$16 sps:$4 sm:$0xff]   ;;  %v8051_v45 = vld [vmem:[#allocation5 + $0x16c] ss:$16 sps:$4 sm:$0xff]   ;;  %v8053_v46 = vld [vmem:[#allocation5 + $0x160] ss:$16 sps:$4 sm:$0xff]  }
  0x7c   :  { %v8054_v47 = vld [vmem:[#allocation5 + $0x168] ss:$16 sps:$4 sm:$0xff]   ;;  %v8081_v48 = vld [vmem:[#allocation2 + $0x4] ss:$16 sps:$4 sm:$0xff]   ;;  %v8057_v50 = vld [vmem:[#allocation5 + $0x18c] ss:$16 sps:$4 sm:$0xff]  }
  0x7d   :  { %v8055_v49 = vld [vmem:[#allocation5 + $0x184] ss:$16 sps:$4 sm:$0xff]   ;;  %1104 = vmatprep.mubr.bf16.mxu0 %v8081_v48  ;;  %1330 = vmatprep.mubr.bf16.mxu1 %v8081_v48  ;;  %v8059_v51 = vld [vmem:[#allocation5 + $0x180] ss:$16 sps:$4 sm:$0xff]   ;;  %v8060_v52 = vld [vmem:[#allocation5 + $0x188] ss:$16 sps:$4 sm:$0xff]  }
  0x7e   :  { %1081 = vmatpush1.bf16.msra.mxu0 %v8011_v18  ;;  %1307 = vmatpush1.bf16.msra.mxu1 %v8012_v19  ;;  %v8061_v53 = vld [vmem:[#allocation5 + $0x1a4] ss:$16 sps:$4 sm:$0xff]   ;;  %v8063_v54 = vld [vmem:[#allocation5 + $0x1ac] ss:$16 sps:$4 sm:$0xff]   ;;  %v8065_v55 = vld [vmem:[#allocation5 + $0x1a0] ss:$16 sps:$4 sm:$0xff]  }
  0x7f   :  { %1082 = vmatprep.subr.bf16.mxu0 %v8013_v20  ;;  %1308 = vmatprep.subr.bf16.mxu1 %v8015_v21  ;;  %v8066_v56 = vld [vmem:[#allocation5 + $0x1a8] ss:$16 sps:$4 sm:$0xff]   ;;  %v8067_v57 = vld [vmem:[#allocation5 + $0x1c4] ss:$16 sps:$4 sm:$0xff]   ;;  %v8069_v58 = vld [vmem:[#allocation5 + $0x1cc] ss:$16 sps:$4 sm:$0xff]  }
  0x80   :  { %v8071_v59 = vld [vmem:[#allocation5 + $0x1c0] ss:$16 sps:$4 sm:$0xff]   ;;  %v8072_v60 = vld [vmem:[#allocation5 + $0x1c8] ss:$16 sps:$4 sm:$0xff]   ;;  %v8073_v61 = vld [vmem:[#allocation5 + $0x1e4] ss:$16 sps:$4 sm:$0xff]  }
  0x81   :  { %v8075_v62 = vld [vmem:[#allocation5 + $0x1ec] ss:$16 sps:$4 sm:$0xff]   ;;  %v8077_v63 = vld [vmem:[#allocation5 + $0x1e0] ss:$16 sps:$4 sm:$0xff]   ;;  %v8078_v0 = vld [vmem:[#allocation5 + $0x1e8] ss:$16 sps:$4 sm:$0xff]  }
  0x82   :  { %1083 = vmatpush1.bf16.msra.mxu0 %v8017_v22  ;;  %1309 = vmatpush1.bf16.msra.mxu1 %v8018_v23  ;;  %v8084_v1 = vld [vmem:[#allocation5 + $0x204] ss:$16 sps:$4 sm:$0xff]   ;;  %v8087_v2 = vld [vmem:[#allocation5 + $0x20c] ss:$16 sps:$4 sm:$0xff]   ;;  %v8079_v3 = vld [vmem:[#allocation2] ss:$16 sps:$4 sm:$0xff]  }
  0x83   :  { %1084 = vmatprep.subr.bf16.mxu0 %v8019_v24  ;;  %1310 = vmatprep.subr.bf16.mxu1 %v8021_v25  ;;  %v8082_v4 = vld [vmem:[#allocation5 + $0x200] ss:$16 sps:$4 sm:$0xff]   ;;  %v8085_v5 = vld [vmem:[#allocation5 + $0x208] ss:$16 sps:$4 sm:$0xff]   ;;  %v8090_v6 = vld [vmem:[#allocation5 + $0x224] ss:$16 sps:$4 sm:$0xff]  }
  0x84   :  { %v8093_v7 = vld [vmem:[#allocation5 + $0x22c] ss:$16 sps:$4 sm:$0xff]   ;;  %v8094_v8 = vld [vmem:[#allocation2 + $0x24] ss:$16 sps:$4 sm:$0xff]   ;;  %v8088_v9 = vld [vmem:[#allocation5 + $0x220] ss:$16 sps:$4 sm:$0xff]  }
  0x85   :  { %v8091_v10 = vld [vmem:[#allocation5 + $0x228] ss:$16 sps:$4 sm:$0xff]   ;;  %v8099_v11 = vld [vmem:[#allocation5 + $0x244] ss:$16 sps:$4 sm:$0xff]   ;;  %v8102_v12 = vld [vmem:[#allocation5 + $0x24c] ss:$16 sps:$4 sm:$0xff]  }
  0x86   :  { %1085 = vmatpush1.bf16.msra.mxu0 %v8023_v26  ;;  %1311 = vmatpush1.bf16.msra.mxu1 %v8024_v27  ;;  %v8096_v13 = vld [vmem:[#allocation2 + $0x20] ss:$16 sps:$4 sm:$0xff]   ;;  %v8100_v15 = vld [vmem:[#allocation5 + $0x248] ss:$16 sps:$4 sm:$0xff]   ;;  %v8105_v16 = vld [vmem:[#allocation5 + $0x264] ss:$16 sps:$4 sm:$0xff]  }
  0x87   :  { %1086 = vmatprep.subr.bf16.mxu0 %v8025_v28  ;;  %1312 = vmatprep.subr.bf16.mxu1 %v8027_v29  ;;  %v8097_v14 = vld [vmem:[#allocation5 + $0x240] ss:$16 sps:$4 sm:$0xff]   ;;  %v8108_v17 = vld [vmem:[#allocation5 + $0x26c] ss:$16 sps:$4 sm:$0xff]   ;;  %v8109_v18 = vld [vmem:[#allocation2 + $0x44] ss:$16 sps:$4 sm:$0xff]  }
  0x88   :  { %v8103_v19 = vld [vmem:[#allocation5 + $0x260] ss:$16 sps:$4 sm:$0xff]   ;;  %v8106_v20 = vld [vmem:[#allocation5 + $0x268] ss:$16 sps:$4 sm:$0xff]   ;;  %v8114_v21 = vld [vmem:[#allocation5 + $0x284] ss:$16 sps:$4 sm:$0xff]  }
  0x89   :  { %v8117_v22 = vld [vmem:[#allocation5 + $0x28c] ss:$16 sps:$4 sm:$0xff]   ;;  %v8111_v23 = vld [vmem:[#allocation2 + $0x40] ss:$16 sps:$4 sm:$0xff]   ;;  %v8115_v25 = vld [vmem:[#allocation5 + $0x288] ss:$16 sps:$4 sm:$0xff]  }
  0x8a   :  { %1087 = vmatpush1.bf16.msra.mxu0 %v8029_v30  ;;  %1313 = vmatpush1.bf16.msra.mxu1 %v8030_v31  ;;  %v8112_v24 = vld [vmem:[#allocation5 + $0x280] ss:$16 sps:$4 sm:$0xff]   ;;  %v8120_v26 = vld [vmem:[#allocation5 + $0x2a4] ss:$16 sps:$4 sm:$0xff]   ;;  %v8123_v27 = vld [vmem:[#allocation5 + $0x2ac] ss:$16 sps:$4 sm:$0xff]  }
  0x8b   :  { %1088 = vmatprep.subr.bf16.mxu0 %v8031_v32  ;;  %1314 = vmatprep.subr.bf16.mxu1 %v8033_v33  ;;  %v8124_v28 = vld [vmem:[#allocation2 + $0x64] ss:$16 sps:$4 sm:$0xff]   ;;  %v8118_v29 = vld [vmem:[#allocation5 + $0x2a0] ss:$16 sps:$4 sm:$0xff]   ;;  %v8121_v30 = vld [vmem:[#allocation5 + $0x2a8] ss:$16 sps:$4 sm:$0xff]  }
  0x8c   :  { %v8129_v31 = vld [vmem:[#allocation5 + $0x2c4] ss:$16 sps:$4 sm:$0xff]   ;;  %v8132_v32 = vld [vmem:[#allocation5 + $0x2cc] ss:$16 sps:$4 sm:$0xff]   ;;  %v8126_v33 = vld [vmem:[#allocation2 + $0x60] ss:$16 sps:$4 sm:$0xff]  }
  0x8d   :  { %v8154_v48 = vld [vmem:[#allocation2 + $0xa4] ss:$16 sps:$4 sm:$0xff]  }
  0x8e   :  { %1089 = vmatpush1.bf16.msra.mxu0 %v8035_v34  ;;  %1315 = vmatpush1.bf16.msra.mxu1 %v8036_v35  ;;  %v8127_v34 = vld [vmem:[#allocation5 + $0x2c0] ss:$16 sps:$4 sm:$0xff]   ;;  %v8130_v35 = vld [vmem:[#allocation5 + $0x2c8] ss:$16 sps:$4 sm:$0xff]  }
  0x8f   :  { %1090 = vmatprep.subr.bf16.mxu0 %v8037_v36  ;;  %1316 = vmatprep.subr.bf16.mxu1 %v8039_v37  ;;  %v8135_v36 = vld [vmem:[#allocation5 + $0x2e4] ss:$16 sps:$4 sm:$0xff]   ;;  %v8138_v37 = vld [vmem:[#allocation5 + $0x2ec] ss:$16 sps:$4 sm:$0xff]  }
  0x92   :  { %1091 = vmatpush1.bf16.msra.mxu0 %v8041_v38  ;;  %1317 = vmatpush1.bf16.msra.mxu1 %v8042_v39  ;;  %v8139_v38 = vld [vmem:[#allocation2 + $0x84] ss:$16 sps:$4 sm:$0xff]   ;;  %v8133_v39 = vld [vmem:[#allocation5 + $0x2e0] ss:$16 sps:$4 sm:$0xff]  }
  0x93   :  { %1092 = vmatprep.subr.bf16.mxu0 %v8043_v40  ;;  %1318 = vmatprep.subr.bf16.mxu1 %v8045_v41  ;;  %v8136_v40 = vld [vmem:[#allocation5 + $0x2e8] ss:$16 sps:$4 sm:$0xff]   ;;  %v8144_v41 = vld [vmem:[#allocation5 + $0x304] ss:$16 sps:$4 sm:$0xff]  }
  0x96   :  { %1093 = vmatpush1.bf16.msra.mxu0 %v8047_v42  ;;  %1319 = vmatpush1.bf16.msra.mxu1 %v8048_v43  ;;  %v8147_v42 = vld [vmem:[#allocation5 + $0x30c] ss:$16 sps:$4 sm:$0xff]   ;;  %v8141_v43 = vld [vmem:[#allocation2 + $0x80] ss:$16 sps:$4 sm:$0xff]  }
  0x97   :  { %1094 = vmatprep.subr.bf16.mxu0 %v8049_v44  ;;  %1320 = vmatprep.subr.bf16.mxu1 %v8051_v45  ;;  %v8142_v44 = vld [vmem:[#allocation5 + $0x300] ss:$16 sps:$4 sm:$0xff]   ;;  %v8145_v45 = vld [vmem:[#allocation5 + $0x308] ss:$16 sps:$4 sm:$0xff]  }
  0x9a   :  { %1095 = vmatpush1.bf16.msra.mxu0 %v8053_v46  ;;  %1321 = vmatpush1.bf16.msra.mxu1 %v8054_v47  ;;  %v8150_v46 = vld [vmem:[#allocation5 + $0x324] ss:$16 sps:$4 sm:$0xff]   ;;  %v8153_v47 = vld [vmem:[#allocation5 + $0x32c] ss:$16 sps:$4 sm:$0xff]  }
  0x9b   :  { %1096 = vmatprep.subr.bf16.mxu0 %v8055_v49  ;;  %1322 = vmatprep.subr.bf16.mxu1 %v8057_v50  ;;  %v8148_v49 = vld [vmem:[#allocation5 + $0x320] ss:$16 sps:$4 sm:$0xff]   ;;  %v8151_v50 = vld [vmem:[#allocation5 + $0x328] ss:$16 sps:$4 sm:$0xff]  }
  0x9e   :  { %1097 = vmatpush1.bf16.msra.mxu0 %v8059_v51  ;;  %1323 = vmatpush1.bf16.msra.mxu1 %v8060_v52  ;;  %v8159_v51 = vld [vmem:[#allocation5 + $0x344] ss:$16 sps:$4 sm:$0xff]   ;;  %v8162_v52 = vld [vmem:[#allocation5 + $0x34c] ss:$16 sps:$4 sm:$0xff]  }
  0x9f   :  { %1098 = vmatprep.subr.bf16.mxu0 %v8061_v53  ;;  %1324 = vmatprep.subr.bf16.mxu1 %v8063_v54  ;;  %v8156_v53 = vld [vmem:[#allocation2 + $0xa0] ss:$16 sps:$4 sm:$0xff]  }
  0xa0   :  { %v8157_v54 = vld [vmem:[#allocation5 + $0x340] ss:$16 sps:$4 sm:$0xff]  }
  0xa2   :  { %1099 = vmatpush1.bf16.msra.mxu0 %v8065_v55  ;;  %1325 = vmatpush1.bf16.msra.mxu1 %v8066_v56  ;;  %v8160_v55 = vld [vmem:[#allocation5 + $0x348] ss:$16 sps:$4 sm:$0xff]   ;;  %v8165_v56 = vld [vmem:[#allocation5 + $0x364] ss:$16 sps:$4 sm:$0xff]  }
  0xa3   :  { %1100 = vmatprep.subr.bf16.mxu0 %v8067_v57  ;;  %1326 = vmatprep.subr.bf16.mxu1 %v8069_v58  ;;  %v8168_v57 = vld [vmem:[#allocation5 + $0x36c] ss:$16 sps:$4 sm:$0xff]   ;;  %v8169_v58 = vld [vmem:[#allocation2 + $0xc4] ss:$16 sps:$4 sm:$0xff]  }
  0xa6   :  { %1101 = vmatpush1.bf16.msra.mxu0 %v8071_v59  ;;  %1327 = vmatpush1.bf16.msra.mxu1 %v8072_v60  ;;  %v8163_v59 = vld [vmem:[#allocation5 + $0x360] ss:$16 sps:$4 sm:$0xff]   ;;  %v8166_v60 = vld [vmem:[#allocation5 + $0x368] ss:$16 sps:$4 sm:$0xff]  }
  0xa7   :  { %1102 = vmatprep.subr.bf16.mxu0 %v8073_v61  ;;  %1328 = vmatprep.subr.bf16.mxu1 %v8075_v62  ;;  %v8174_v61 = vld [vmem:[#allocation5 + $0x384] ss:$16 sps:$4 sm:$0xff]   ;;  %v8177_v62 = vld [vmem:[#allocation5 + $0x38c] ss:$16 sps:$4 sm:$0xff]  }
  0xaa   :  { %1103 = vmatpush1.bf16.msra.mxu0 %v8077_v63  ;;  %1329 = vmatpush1.bf16.msra.mxu1 %v8078_v0  ;;  %v8171_v63 = vld [vmem:[#allocation2 + $0xc0] ss:$16 sps:$4 sm:$0xff]  }
  0xab   :  { %1185 = vmatprep.subr.bf16.mxu0 %v8084_v1  ;;  %1411 = vmatprep.subr.bf16.mxu1 %v8087_v2  ;;  %v8172_v0 = vld [vmem:[#allocation5 + $0x380] ss:$16 sps:$4 sm:$0xff]   ;;  %v8175_v1 = vld [vmem:[#allocation5 + $0x388] ss:$16 sps:$4 sm:$0xff]   ;;  %v8180_v2 = vld [vmem:[#allocation5 + $0x3a4] ss:$16 sps:$4 sm:$0xff]  }
  0xad   :  { %1105 = vmatmul.mubr.bf16.vlgmr.msra.gmra.mrb[0].mxu0 %v8079_v3  ;;  %1331 = vmatmul.mubr.bf16.vlgmr.msra.gmra.mrb[0].mxu1 %v8079_v3  ;;  %v8183_v3 = vld [vmem:[#allocation5 + $0x3ac] ss:$16 sps:$4 sm:$0xff]  }
  0xae   :  { %1186 = vmatpush1.bf16.msra.mxu0 %v8082_v4  ;;  %1412 = vmatpush1.bf16.msra.mxu1 %v8085_v5  ;;  %v8184_v4 = vld [vmem:[#allocation2 + $0xe4] ss:$16 sps:$4 sm:$0xff]   ;;  %v8178_v5 = vld [vmem:[#allocation5 + $0x3a0] ss:$16 sps:$4 sm:$0xff]  }
  0xaf   :  { %1187 = vmatprep.subr.bf16.mxu0 %v8090_v6  ;;  %1413 = vmatprep.subr.bf16.mxu1 %v8093_v7  ;;  %v8181_v6 = vld [vmem:[#allocation5 + $0x3a8] ss:$16 sps:$4 sm:$0xff]   ;;  %v8189_v7 = vld [vmem:[#allocation5 + $0x3c4] ss:$16 sps:$4 sm:$0xff]  }
  0xb0   :  { %1114 = vmatprep.mubr.bf16.mxu0 %v8094_v8  ;;  %1340 = vmatprep.mubr.bf16.mxu1 %v8094_v8  ;;  %v8192_v8 = vld [vmem:[#allocation5 + $0x3cc] ss:$16 sps:$4 sm:$0xff]  }
  0xb2   :  { %1188 = vmatpush1.bf16.msra.mxu0 %v8088_v9  ;;  %1414 = vmatpush1.bf16.msra.mxu1 %v8091_v10  ;;  %v8186_v9 = vld [vmem:[#allocation2 + $0xe0] ss:$16 sps:$4 sm:$0xff]  }
  0xb3   :  { %1189 = vmatprep.subr.bf16.mxu0 %v8099_v11  ;;  %1415 = vmatprep.subr.bf16.mxu1 %v8102_v12  ;;  %v8187_v10 = vld [vmem:[#allocation5 + $0x3c0] ss:$16 sps:$4 sm:$0xff]   ;;  %v8190_v11 = vld [vmem:[#allocation5 + $0x3c8] ss:$16 sps:$4 sm:$0xff]   ;;  %v8195_v12 = vld [vmem:[#allocation5 + $0x3e4] ss:$16 sps:$4 sm:$0xff]  }
  0xb5   :  { %1115 = vmatmul.mubr.bf16.gmra.mrb[4].mxu0 %v8096_v13  ;;  %1341 = vmatmul.mubr.bf16.gmra.mrb[4].mxu1 %v8096_v13  ;;  %v8198_v13 = vld [vmem:[#allocation5 + $0x3ec] ss:$16 sps:$4 sm:$0xff]  }
  0xb6   :  { %1190 = vmatpush1.bf16.msra.mxu0 %v8097_v14  ;;  %1416 = vmatpush1.bf16.msra.mxu1 %v8100_v15  ;;  %v8201_v14 = vld [vmem:[#allocation2 + $0xc] ss:$16 sps:$4 sm:$0xff]   ;;  %v8193_v15 = vld [vmem:[#allocation5 + $0x3e0] ss:$16 sps:$4 sm:$0xff]  }
  0xb7   :  { %1191 = vmatprep.subr.bf16.mxu0 %v8105_v16  ;;  %1417 = vmatprep.subr.bf16.mxu1 %v8108_v17  ;;  %v8196_v16 = vld [vmem:[#allocation5 + $0x3e8] ss:$16 sps:$4 sm:$0xff]   ;;  %v8225_v17 = vld [vmem:[#allocation7 + $0x4] ss:$16 sps:$4 sm:$0xff]  }
  0xb8   :  { %1124 = vmatprep.mubr.bf16.mxu0 %v8109_v18  ;;  %1350 = vmatprep.mubr.bf16.mxu1 %v8109_v18  ;;  %v8228_v18 = vld [vmem:[#allocation7 + $0xc] ss:$16 sps:$4 sm:$0xff]  }
  0xba   :  { %1192 = vmatpush1.bf16.msra.mxu0 %v8103_v19  ;;  %1418 = vmatpush1.bf16.msra.mxu1 %v8106_v20  ;;  %v8199_v19 = vld [vmem:[#allocation2 + $0x8] ss:$16 sps:$4 sm:$0xff]   ;;  %v8202_v20 = vld [vmem:[#allocation2 + $0x2c] ss:$16 sps:$4 sm:$0xff]  }
  0xbb   :  { %1193 = vmatprep.subr.bf16.mxu0 %v8114_v21  ;;  %1419 = vmatprep.subr.bf16.mxu1 %v8117_v22  ;;  %v8223_v21 = vld [vmem:[#allocation7] ss:$16 sps:$4 sm:$0xff]   ;;  %v8226_v22 = vld [vmem:[#allocation7 + $0x8] ss:$16 sps:$4 sm:$0xff]  }
  0xbd   :  { %1125 = vmatmul.mubr.bf16.gmra.mrb[8].mxu0 %v8111_v23  ;;  %1351 = vmatmul.mubr.bf16.gmra.mrb[8].mxu1 %v8111_v23  ;;  %v8231_v23 = vld [vmem:[#allocation7 + $0x24] ss:$16 sps:$4 sm:$0xff]  }
  0xbe   :  { %1194 = vmatpush1.bf16.msra.mxu0 %v8112_v24  ;;  %1420 = vmatpush1.bf16.msra.mxu1 %v8115_v25  ;;  %v8234_v24 = vld [vmem:[#allocation7 + $0x2c] ss:$16 sps:$4 sm:$0xff]   ;;  %v8229_v25 = vld [vmem:[#allocation7 + $0x20] ss:$16 sps:$4 sm:$0xff]  }
  0xbf   :  { %1195 = vmatprep.subr.bf16.mxu0 %v8120_v26  ;;  %1421 = vmatprep.subr.bf16.mxu1 %v8123_v27  ;;  %v8232_v26 = vld [vmem:[#allocation7 + $0x28] ss:$16 sps:$4 sm:$0xff]   ;;  %v8237_v27 = vld [vmem:[#allocation7 + $0x44] ss:$16 sps:$4 sm:$0xff]  }
  0xc0   :  { %1134 = vmatprep.mubr.bf16.mxu0 %v8124_v28  ;;  %1360 = vmatprep.mubr.bf16.mxu1 %v8124_v28  ;;  %v8240_v28 = vld [vmem:[#allocation7 + $0x4c] ss:$16 sps:$4 sm:$0xff]  }
  0xc2   :  { %1196 = vmatpush1.bf16.msra.mxu0 %v8118_v29  ;;  %1422 = vmatpush1.bf16.msra.mxu1 %v8121_v30  ;;  %v8204_v29 = vld [vmem:[#allocation2 + $0x28] ss:$16 sps:$4 sm:$0xff]   ;;  %v8205_v30 = vld [vmem:[#allocation2 + $0x4c] ss:$16 sps:$4 sm:$0xff]  }
  0xc3   :  { %1197 = vmatprep.subr.bf16.mxu0 %v8129_v31  ;;  %1423 = vmatprep.subr.bf16.mxu1 %v8132_v32  ;;  %v8235_v31 = vld [vmem:[#allocation7 + $0x40] ss:$16 sps:$4 sm:$0xff]   ;;  %v8238_v32 = vld [vmem:[#allocation7 + $0x48] ss:$16 sps:$4 sm:$0xff]  }
  0xc5   :  { %1135 = vmatmul.mubr.bf16.gmra.mrb[12].mxu0 %v8126_v33  ;;  %1361 = vmatmul.mubr.bf16.gmra.mrb[12].mxu1 %v8126_v33  ;;  %v8243_v33 = vld [vmem:[#allocation7 + $0x64] ss:$16 sps:$4 sm:$0xff]  }
  0xc6   :  { %1198 = vmatpush1.bf16.msra.mxu0 %v8127_v34  ;;  %1424 = vmatpush1.bf16.msra.mxu1 %v8130_v35  ;;  %v8246_v34 = vld [vmem:[#allocation7 + $0x6c] ss:$16 sps:$4 sm:$0xff]   ;;  %v8241_v35 = vld [vmem:[#allocation7 + $0x60] ss:$16 sps:$4 sm:$0xff]  }
  0xc7   :  { %1199 = vmatprep.subr.bf16.mxu0 %v8135_v36  ;;  %1425 = vmatprep.subr.bf16.mxu1 %v8138_v37  ;;  %v8207_v36 = vld [vmem:[#allocation2 + $0x48] ss:$16 sps:$4 sm:$0xff]  }
  0xc8   :  { %1144 = vmatprep.mubr.bf16.mxu0 %v8139_v38  ;;  %1370 = vmatprep.mubr.bf16.mxu1 %v8139_v38  ;;  %v8244_v37 = vld [vmem:[#allocation7 + $0x68] ss:$16 sps:$4 sm:$0xff]   ;;  %v8208_v38 = vld [vmem:[#allocation2 + $0x6c] ss:$16 sps:$4 sm:$0xff]  }
  0xca   :  { %1200 = vmatpush1.bf16.msra.mxu0 %v8133_v39  ;;  %1426 = vmatpush1.bf16.msra.mxu1 %v8136_v40  ;;  %v8249_v39 = vld [vmem:[#allocation7 + $0x84] ss:$16 sps:$4 sm:$0xff]   ;;  %v8252_v40 = vld [vmem:[#allocation7 + $0x8c] ss:$16 sps:$4 sm:$0xff]  }
  0xcb   :  { %1201 = vmatprep.subr.bf16.mxu0 %v8144_v41  ;;  %1427 = vmatprep.subr.bf16.mxu1 %v8147_v42  ;;  %v8247_v41 = vld [vmem:[#allocation7 + $0x80] ss:$16 sps:$4 sm:$0xff]   ;;  %v8250_v42 = vld [vmem:[#allocation7 + $0x88] ss:$16 sps:$4 sm:$0xff]  }
  0xcd   :  { %1145 = vmatmul.mubr.bf16.gmra.mrb[16].mxu0 %v8141_v43  ;;  %1371 = vmatmul.mubr.bf16.gmra.mrb[16].mxu1 %v8141_v43  ;;  %v8255_v43 = vld [vmem:[#allocation7 + $0xa4] ss:$16 sps:$4 sm:$0xff]  }
  0xce   :  { %1202 = vmatpush1.bf16.msra.mxu0 %v8142_v44  ;;  %1428 = vmatpush1.bf16.msra.mxu1 %v8145_v45  ;;  %v8258_v44 = vld [vmem:[#allocation7 + $0xac] ss:$16 sps:$4 sm:$0xff]   ;;  %v8253_v45 = vld [vmem:[#allocation7 + $0xa0] ss:$16 sps:$4 sm:$0xff]  }
  0xcf   :  { %1203 = vmatprep.subr.bf16.mxu0 %v8150_v46  ;;  %1429 = vmatprep.subr.bf16.mxu1 %v8153_v47  ;;  %v8256_v46 = vld [vmem:[#allocation7 + $0xa8] ss:$16 sps:$4 sm:$0xff]   ;;  %v8261_v47 = vld [vmem:[#allocation7 + $0xc4] ss:$16 sps:$4 sm:$0xff]  }
  0xd0   :  { %1154 = vmatprep.mubr.bf16.mxu0 %v8154_v48  ;;  %1380 = vmatprep.mubr.bf16.mxu1 %v8154_v48  ;;  %v8264_v48 = vld [vmem:[#allocation7 + $0xcc] ss:$16 sps:$4 sm:$0xff]  }
  0xd2   :  { %1204 = vmatpush1.bf16.msra.mxu0 %v8148_v49  ;;  %1430 = vmatpush1.bf16.msra.mxu1 %v8151_v50  ;;  %v8210_v49 = vld [vmem:[#allocation2 + $0x68] ss:$16 sps:$4 sm:$0xff]   ;;  %v8211_v50 = vld [vmem:[#allocation2 + $0x8c] ss:$16 sps:$4 sm:$0xff]  }
  0xd3   :  { %1205 = vmatprep.subr.bf16.mxu0 %v8159_v51  ;;  %1431 = vmatprep.subr.bf16.mxu1 %v8162_v52  ;;  %v8259_v51 = vld [vmem:[#allocation7 + $0xc0] ss:$16 sps:$4 sm:$0xff]   ;;  %v8262_v52 = vld [vmem:[#allocation7 + $0xc8] ss:$16 sps:$4 sm:$0xff]  }
  0xd5   :  { %1155 = vmatmul.mubr.bf16.gmra.mrb[20].mxu0 %v8156_v53  ;;  %1381 = vmatmul.mubr.bf16.gmra.mrb[20].mxu1 %v8156_v53  ;;  %v8267_v53 = vld [vmem:[#allocation7 + $0xe4] ss:$16 sps:$4 sm:$0xff]  }
  0xd6   :  { %1206 = vmatpush1.bf16.msra.mxu0 %v8157_v54  ;;  %1432 = vmatpush1.bf16.msra.mxu1 %v8160_v55  ;;  %v8270_v54 = vld [vmem:[#allocation7 + $0xec] ss:$16 sps:$4 sm:$0xff]   ;;  %v8265_v55 = vld [vmem:[#allocation7 + $0xe0] ss:$16 sps:$4 sm:$0xff]  }
  0xd7   :  { %1207 = vmatprep.subr.bf16.mxu0 %v8165_v56  ;;  %1433 = vmatprep.subr.bf16.mxu1 %v8168_v57  ;;  %v8268_v56 = vld [vmem:[#allocation7 + $0xe8] ss:$16 sps:$4 sm:$0xff]   ;;  %v8273_v57 = vld [vmem:[#allocation7 + $0x104] ss:$16 sps:$4 sm:$0xff]  }
  0xd8   :  { %1164 = vmatprep.mubr.bf16.mxu0 %v8169_v58  ;;  %1390 = vmatprep.mubr.bf16.mxu1 %v8169_v58  ;;  %v8276_v58 = vld [vmem:[#allocation7 + $0x10c] ss:$16 sps:$4 sm:$0xff]  }
  0xda   :  { %1208 = vmatpush1.bf16.msra.mxu0 %v8163_v59  ;;  %1434 = vmatpush1.bf16.msra.mxu1 %v8166_v60  ;;  %v8213_v59 = vld [vmem:[#allocation2 + $0x88] ss:$16 sps:$4 sm:$0xff]   ;;  %v8214_v60 = vld [vmem:[#allocation2 + $0xac] ss:$16 sps:$4 sm:$0xff]  }
  0xdb   :  { %1209 = vmatprep.subr.bf16.mxu0 %v8174_v61  ;;  %1435 = vmatprep.subr.bf16.mxu1 %v8177_v62  ;;  %v8271_v61 = vld [vmem:[#allocation7 + $0x100] ss:$16 sps:$4 sm:$0xff]   ;;  %v8274_v62 = vld [vmem:[#allocation7 + $0x108] ss:$16 sps:$4 sm:$0xff]  }
  0xdd   :  { %1165 = vmatmul.mubr.bf16.gmra.mrb[24].mxu0 %v8171_v63  ;;  %1391 = vmatmul.mubr.bf16.gmra.mrb[24].mxu1 %v8171_v63  ;;  %v8279_v63 = vld [vmem:[#allocation7 + $0x124] ss:$16 sps:$4 sm:$0xff]  }
  0xde   :  { %1210 = vmatpush1.bf16.msra.mxu0 %v8172_v0  ;;  %1436 = vmatpush1.bf16.msra.mxu1 %v8175_v1  ;;  %v8282_v0 = vld [vmem:[#allocation7 + $0x12c] ss:$16 sps:$4 sm:$0xff]   ;;  %v8277_v1 = vld [vmem:[#allocation7 + $0x120] ss:$16 sps:$4 sm:$0xff]  }
  0xdf   :  { %1211 = vmatprep.subr.bf16.mxu0 %v8180_v2  ;;  %1437 = vmatprep.subr.bf16.mxu1 %v8183_v3  ;;  %v8280_v2 = vld [vmem:[#allocation7 + $0x128] ss:$16 sps:$4 sm:$0xff]   ;;  %v8285_v3 = vld [vmem:[#allocation7 + $0x144] ss:$16 sps:$4 sm:$0xff]  }
  0xe0   :  { %1174 = vmatprep.mubr.bf16.mxu0 %v8184_v4  ;;  %1400 = vmatprep.mubr.bf16.mxu1 %v8184_v4  ;;  %v8288_v4 = vld [vmem:[#allocation7 + $0x14c] ss:$16 sps:$4 sm:$0xff]  }
  0xe2   :  { %1212 = vmatpush1.bf16.msra.mxu0 %v8178_v5  ;;  %1438 = vmatpush1.bf16.msra.mxu1 %v8181_v6  ;;  %v8216_v5 = vld [vmem:[#allocation2 + $0xa8] ss:$16 sps:$4 sm:$0xff]   ;;  %v8217_v6 = vld [vmem:[#allocation2 + $0xcc] ss:$16 sps:$4 sm:$0xff]  }
  0xe3   :  { %1213 = vmatprep.subr.bf16.mxu0 %v8189_v7  ;;  %1439 = vmatprep.subr.bf16.mxu1 %v8192_v8  ;;  %v8283_v7 = vld [vmem:[#allocation7 + $0x140] ss:$16 sps:$4 sm:$0xff]   ;;  %v8286_v8 = vld [vmem:[#allocation7 + $0x148] ss:$16 sps:$4 sm:$0xff]  }
  0xe5   :  { %1175 = vmatmul.mubr.bf16.gmra.mrb[28].mxu0 %v8186_v9  ;;  %1401 = vmatmul.mubr.bf16.gmra.mrb[28].mxu1 %v8186_v9  ;;  %v8291_v9 = vld [vmem:[#allocation7 + $0x164] ss:$16 sps:$4 sm:$0xff]  }
  0xe6   :  { %1214 = vmatpush1.bf16.msra.mxu0 %v8187_v10  ;;  %1440 = vmatpush1.bf16.msra.mxu1 %v8190_v11  ;;  %v8294_v10 = vld [vmem:[#allocation7 + $0x16c] ss:$16 sps:$4 sm:$0xff]   ;;  %v8289_v11 = vld [vmem:[#allocation7 + $0x160] ss:$16 sps:$4 sm:$0xff]  }
  0xe7   :  { %1215 = vmatprep.subr.bf16.mxu0 %v8195_v12  ;;  %1441 = vmatprep.subr.bf16.mxu1 %v8198_v13  ;;  %v8292_v12 = vld [vmem:[#allocation7 + $0x168] ss:$16 sps:$4 sm:$0xff]   ;;  %v8297_v13 = vld [vmem:[#allocation7 + $0x184] ss:$16 sps:$4 sm:$0xff]  }
  0xe8   :  { %1217 = vmatprep.mubr.bf16.mxu0 %v8201_v14  ;;  %1443 = vmatprep.mubr.bf16.mxu1 %v8201_v14  ;;  %v8300_v14 = vld [vmem:[#allocation7 + $0x18c] ss:$16 sps:$4 sm:$0xff]  }
  0xea   :  { %1216 = vmatpush1.bf16.msra.mxu0 %v8193_v15  ;;  %1442 = vmatpush1.bf16.msra.mxu1 %v8196_v16  ;;  %v8219_v15 = vld [vmem:[#allocation2 + $0xc8] ss:$16 sps:$4 sm:$0xff]   ;;  %v8220_v16 = vld [vmem:[#allocation2 + $0xec] ss:$16 sps:$4 sm:$0xff]  }
  0xeb   :  { %2388 = vmatprep.subr.bf16.mxu0 %v8225_v17  ;;  %2614 = vmatprep.subr.bf16.mxu1 %v8228_v18  ;;  %v8295_v17 = vld [vmem:[#allocation7 + $0x180] ss:$16 sps:$4 sm:$0xff]   ;;  %v8298_v18 = vld [vmem:[#allocation7 + $0x188] ss:$16 sps:$4 sm:$0xff]  }
  0xed   :  { %1218 = vmatmul.mubr.bf16.vlgmr.msra.gmra.mrb[0].mxu0 %v8199_v19  ;;  %1444 = vmatmul.mubr.bf16.vlgmr.msra.gmra.mrb[0].mxu1 %v8199_v19  ;;  %v8303_v19 = vld [vmem:[#allocation7 + $0x1a4] ss:$16 sps:$4 sm:$0xff]  }
  0xee   :  { %1227 = vmatprep.mubr.bf16.mxu0 %v8202_v20  ;;  %1453 = vmatprep.mubr.bf16.mxu1 %v8202_v20  ;;  %v8306_v20 = vld [vmem:[#allocation7 + $0x1ac] ss:$16 sps:$4 sm:$0xff]  }
  0xef   :  { %2389 = vmatpush1.bf16.msra.mxu0 %v8223_v21  ;;  %2615 = vmatpush1.bf16.msra.mxu1 %v8226_v22  ;;  %v8301_v21 = vld [vmem:[#allocation7 + $0x1a0] ss:$16 sps:$4 sm:$0xff]   ;;  %v8304_v22 = vld [vmem:[#allocation7 + $0x1a8] ss:$16 sps:$4 sm:$0xff]  }
  0xf0   :  { %2390 = vmatprep.subr.bf16.mxu0 %v8231_v23  ;;  %2616 = vmatprep.subr.bf16.mxu1 %v8234_v24  ;;  %v8222_v23 = vld [vmem:[#allocation2 + $0xe8] ss:$16 sps:$4 sm:$0xff]   ;;  %v8309_v24 = vld [vmem:[#allocation7 + $0x1c4] ss:$16 sps:$4 sm:$0xff]  }
  0xf3   :  { %2391 = vmatpush1.bf16.msra.mxu0 %v8229_v25  ;;  %2617 = vmatpush1.bf16.msra.mxu1 %v8232_v26  ;;  %v8312_v25 = vld [vmem:[#allocation7 + $0x1cc] ss:$16 sps:$4 sm:$0xff]   ;;  %v8307_v26 = vld [vmem:[#allocation7 + $0x1c0] ss:$16 sps:$4 sm:$0xff]  }
  0xf4   :  { %2392 = vmatprep.subr.bf16.mxu0 %v8237_v27  ;;  %2618 = vmatprep.subr.bf16.mxu1 %v8240_v28  ;;  %v8310_v27 = vld [vmem:[#allocation7 + $0x1c8] ss:$16 sps:$4 sm:$0xff]   ;;  %v8315_v28 = vld [vmem:[#allocation7 + $0x1e4] ss:$16 sps:$4 sm:$0xff]  }
  0xf5   :  { %1228 = vmatmul.mubr.bf16.gmra.mrb[4].mxu0 %v8204_v29  ;;  %1454 = vmatmul.mubr.bf16.gmra.mrb[4].mxu1 %v8204_v29  ;;  %v8318_v29 = vld [vmem:[#allocation7 + $0x1ec] ss:$16 sps:$4 sm:$0xff]  }
  0xf6   :  { %1237 = vmatprep.mubr.bf16.mxu0 %v8205_v30  ;;  %1463 = vmatprep.mubr.bf16.mxu1 %v8205_v30  ;;  %v8313_v30 = vld [vmem:[#allocation7 + $0x1e0] ss:$16 sps:$4 sm:$0xff]  }
  0xf7   :  { %2393 = vmatpush1.bf16.msra.mxu0 %v8235_v31  ;;  %2619 = vmatpush1.bf16.msra.mxu1 %v8238_v32  ;;  %v8316_v31 = vld [vmem:[#allocation7 + $0x1e8] ss:$16 sps:$4 sm:$0xff]   ;;  %v8321_v32 = vld [vmem:[#allocation7 + $0x204] ss:$16 sps:$4 sm:$0xff]  }
  0xf8   :  { %2394 = vmatprep.subr.bf16.mxu0 %v8243_v33  ;;  %2620 = vmatprep.subr.bf16.mxu1 %v8246_v34  ;;  %v8324_v33 = vld [vmem:[#allocation7 + $0x20c] ss:$16 sps:$4 sm:$0xff]  }
  0xfb   :  { %2395 = vmatpush1.bf16.msra.mxu0 %v8241_v35  ;;  %2621 = vmatpush1.bf16.msra.mxu1 %v8244_v37 }
  0xfc   :  { %2396 = vmatprep.subr.bf16.mxu0 %v8249_v39  ;;  %2622 = vmatprep.subr.bf16.mxu1 %v8252_v40 }
  0xfd   :  { %1238 = vmatmul.mubr.bf16.gmra.mrb[8].mxu0 %v8207_v36  ;;  %1464 = vmatmul.mubr.bf16.gmra.mrb[8].mxu1 %v8207_v36 }
  0xfe   :  { %1247 = vmatprep.mubr.bf16.mxu0 %v8208_v38  ;;  %1473 = vmatprep.mubr.bf16.mxu1 %v8208_v38 }
  0xff   :  { %2397 = vmatpush1.bf16.msra.mxu0 %v8247_v41  ;;  %2623 = vmatpush1.bf16.msra.mxu1 %v8250_v42 }
 0x100   :  { %2398 = vmatprep.subr.bf16.mxu0 %v8255_v43  ;;  %2624 = vmatprep.subr.bf16.mxu1 %v8258_v44 }
 0x103   :  { %2399 = vmatpush1.bf16.msra.mxu0 %v8253_v45  ;;  %2625 = vmatpush1.bf16.msra.mxu1 %v8256_v46 }
 0x104   :  { %2400 = vmatprep.subr.bf16.mxu0 %v8261_v47  ;;  %2626 = vmatprep.subr.bf16.mxu1 %v8264_v48 }
 0x105   :  { %1248 = vmatmul.mubr.bf16.gmra.mrb[12].mxu0 %v8210_v49  ;;  %1474 = vmatmul.mubr.bf16.gmra.mrb[12].mxu1 %v8210_v49 }
 0x106   :  { %1257 = vmatprep.mubr.bf16.mxu0 %v8211_v50  ;;  %1483 = vmatprep.mubr.bf16.mxu1 %v8211_v50 }
 0x107   :  { %2401 = vmatpush1.bf16.msra.mxu0 %v8259_v51  ;;  %2627 = vmatpush1.bf16.msra.mxu1 %v8262_v52 }
 0x108   :  { %2402 = vmatprep.subr.bf16.mxu0 %v8267_v53  ;;  %2628 = vmatprep.subr.bf16.mxu1 %v8270_v54  ;;  %v8319_v54 = vld [vmem:[#allocation7 + $0x200] ss:$16 sps:$4 sm:$0xff]  }
 0x10b   :  { %2403 = vmatpush1.bf16.msra.mxu0 %v8265_v55  ;;  %2629 = vmatpush1.bf16.msra.mxu1 %v8268_v56  ;;  %v8322_v55 = vld [vmem:[#allocation7 + $0x208] ss:$16 sps:$4 sm:$0xff]   ;;  %v8327_v56 = vld [vmem:[#allocation7 + $0x224] ss:$16 sps:$4 sm:$0xff]  }
 0x10c   :  { %2404 = vmatprep.subr.bf16.mxu0 %v8273_v57  ;;  %2630 = vmatprep.subr.bf16.mxu1 %v8276_v58  ;;  %v8330_v57 = vld [vmem:[#allocation7 + $0x22c] ss:$16 sps:$4 sm:$0xff]  }
 0x10d   :  { %1258 = vmatmul.mubr.bf16.gmra.mrb[16].mxu0 %v8213_v59  ;;  %1484 = vmatmul.mubr.bf16.gmra.mrb[16].mxu1 %v8213_v59 }
 0x10e   :  { %1267 = vmatprep.mubr.bf16.mxu0 %v8214_v60  ;;  %1493 = vmatprep.mubr.bf16.mxu1 %v8214_v60 }
 0x10f   :  { %2405 = vmatpush1.bf16.msra.mxu0 %v8271_v61  ;;  %2631 = vmatpush1.bf16.msra.mxu1 %v8274_v62  ;;  %v8325_v62 = vld [vmem:[#allocation7 + $0x220] ss:$16 sps:$4 sm:$0xff]  }
 0x110   :  { %2406 = vmatprep.subr.bf16.mxu0 %v8279_v63  ;;  %2632 = vmatprep.subr.bf16.mxu1 %v8282_v0  ;;  %v8328_v63 = vld [vmem:[#allocation7 + $0x228] ss:$16 sps:$4 sm:$0xff]  }
 0x113   :  { %2407 = vmatpush1.bf16.msra.mxu0 %v8277_v1  ;;  %2633 = vmatpush1.bf16.msra.mxu1 %v8280_v2  ;;  %v8333_v2 = vld [vmem:[#allocation7 + $0x244] ss:$16 sps:$4 sm:$0xff]  }
 0x114   :  { %2408 = vmatprep.subr.bf16.mxu0 %v8285_v3  ;;  %2634 = vmatprep.subr.bf16.mxu1 %v8288_v4  ;;  %v8336_v3 = vld [vmem:[#allocation7 + $0x24c] ss:$16 sps:$4 sm:$0xff]  }
 0x115   :  { %1268 = vmatmul.mubr.bf16.gmra.mrb[20].mxu0 %v8216_v5  ;;  %1494 = vmatmul.mubr.bf16.gmra.mrb[20].mxu1 %v8216_v5 }
 0x116   :  { %1277 = vmatprep.mubr.bf16.mxu0 %v8217_v6  ;;  %1503 = vmatprep.mubr.bf16.mxu1 %v8217_v6 }
 0x117   :  { %2409 = vmatpush1.bf16.msra.mxu0 %v8283_v7  ;;  %2635 = vmatpush1.bf16.msra.mxu1 %v8286_v8 }
 0x118   :  { %2410 = vmatprep.subr.bf16.mxu0 %v8291_v9  ;;  %2636 = vmatprep.subr.bf16.mxu1 %v8294_v10 }
 0x11b   :  { %2411 = vmatpush1.bf16.msra.mxu0 %v8289_v11  ;;  %2637 = vmatpush1.bf16.msra.mxu1 %v8292_v12 }
 0x11c   :  { %2412 = vmatprep.subr.bf16.mxu0 %v8297_v13  ;;  %2638 = vmatprep.subr.bf16.mxu1 %v8300_v14 }
 0x11d   :  { %1278 = vmatmul.mubr.bf16.gmra.mrb[24].mxu0 %v8219_v15  ;;  %1504 = vmatmul.mubr.bf16.gmra.mrb[24].mxu1 %v8219_v15 }
 0x11e   :  { %1287 = vmatprep.mubr.bf16.mxu0 %v8220_v16  ;;  %1513 = vmatprep.mubr.bf16.mxu1 %v8220_v16 }
 0x11f   :  { %2413 = vmatpush1.bf16.msra.mxu0 %v8295_v17  ;;  %2639 = vmatpush1.bf16.msra.mxu1 %v8298_v18  ;;  %v8331_v18 = vld [vmem:[#allocation7 + $0x240] ss:$16 sps:$4 sm:$0xff]  }
 0x120   :  { %2414 = vmatprep.subr.bf16.mxu0 %v8303_v19  ;;  %2640 = vmatprep.subr.bf16.mxu1 %v8306_v20  ;;  %v8334_v19 = vld [vmem:[#allocation7 + $0x248] ss:$16 sps:$4 sm:$0xff]   ;;  %v8339_v20 = vld [vmem:[#allocation7 + $0x264] ss:$16 sps:$4 sm:$0xff]  }
 0x123   :  { %2415 = vmatpush1.bf16.msra.mxu0 %v8301_v21  ;;  %2641 = vmatpush1.bf16.msra.mxu1 %v8304_v22  ;;  %v8342_v21 = vld [vmem:[#allocation7 + $0x26c] ss:$16 sps:$4 sm:$0xff]  }
 0x124   :  { %2416 = vmatprep.subr.bf16.mxu0 %v8309_v24  ;;  %2642 = vmatprep.subr.bf16.mxu1 %v8312_v25 }
 0x125   :  { %1288 = vmatmul.mubr.bf16.gmra.mrb[28].mxu0 %v8222_v23  ;;  %1514 = vmatmul.mubr.bf16.gmra.mrb[28].mxu1 %v8222_v23 }
 0x127   :  { %2417 = vmatpush1.bf16.msra.mxu0 %v8307_v26  ;;  %2643 = vmatpush1.bf16.msra.mxu1 %v8310_v27  ;;  %v8337_v26 = vld [vmem:[#allocation7 + $0x260] ss:$16 sps:$4 sm:$0xff]   ;;  %v8340_v27 = vld [vmem:[#allocation7 + $0x268] ss:$16 sps:$4 sm:$0xff]  }
 0x128   :  { %2418 = vmatprep.subr.bf16.mxu0 %v8315_v28  ;;  %2644 = vmatprep.subr.bf16.mxu1 %v8318_v29 }
 0x12b   :  { %2419 = vmatpush1.bf16.msra.mxu0 %v8313_v30  ;;  %2645 = vmatpush1.bf16.msra.mxu1 %v8316_v31  ;;  %v8345_v30 = vld [vmem:[#allocation7 + $0x284] ss:$16 sps:$4 sm:$0xff]   ;;  %v8348_v31 = vld [vmem:[#allocation7 + $0x28c] ss:$16 sps:$4 sm:$0xff]  }
 0x12c   :  { %2501 = vmatprep.subr.bf16.mxu0 %v8321_v32  ;;  %2727 = vmatprep.subr.bf16.mxu1 %v8324_v33 }
 0x1c0   :  { %v1219_v34 = vpop.f32.mrb[0].mxu0  ;;  %v1445_v35 = vpop.f32.mrb[0].mxu1 }
 0x1c1   :  { %v1221_v36 = vpop.f32.mrb[1].mxu0  ;;  %v1447_v37 = vpop.f32.mrb[1].mxu1  ;;  %v1524_v40 = vmax.f32 %v1219_v34, 0.0  ;;  %v1526_v41 = vmax.f32 %v1445_v35, 0.0 }
 0x1c2   :  { %v1223_v38 = vpop.f32.mrb[2].mxu0  ;;  %v1449_v39 = vpop.f32.mrb[2].mxu1  ;;  %v1525_v46 = vmax.f32 %v1221_v36, 0.0  ;;  %v1527_v47 = vmax.f32 %v1447_v37, 0.0 }
 0x1c3   :  { %v1528_v42 = vmax.f32 %v1223_v38, 0.0  ;;  %v1530_v43 = vmax.f32 %v1449_v39, 0.0  ;;  %v1225_v44 = vpop.f32.mrb[3].mxu0  ;;  %v1451_v45 = vpop.f32.mrb[3].mxu1 }
 0x1c4   :  { %v1529_v48 = vmax.f32 %v1225_v44, 0.0  ;;  %v1531_v49 = vmax.f32 %v1451_v45, 0.0 }
 0x1c5   :  { %v1588_v50 = vpack.c.bf16 %v1528_v42, %v1524_v40  ;;  %v9322_v51 = vpack.c.bf16 %v1530_v43, %v1526_v41 }
 0x1c6   :  { %v1589_v52 = vpack.c.bf16 %v1529_v48, %v1525_v46  ;;  %v9324_v53 = vpack.c.bf16 %v1531_v49, %v1527_v47  ;;  %v8343_v46 = vld [vmem:[#allocation7 + $0x280] ss:$16 sps:$4 sm:$0xff]   ;;  %v8346_v47 = vld [vmem:[#allocation7 + $0x288] ss:$16 sps:$4 sm:$0xff]   ;;  %v8351_v48 = vld [vmem:[#allocation7 + $0x2a4] ss:$16 sps:$4 sm:$0xff]  }
 0x1c7   :  { %v8354_v49 = vld [vmem:[#allocation7 + $0x2ac] ss:$16 sps:$4 sm:$0xff]  }
 0x1c8   :  { %v1229_v58 = vpop.f32.mrb[4].mxu0  ;;  %v1455_v59 = vpop.f32.mrb[4].mxu1  ;;  %2420 = vmatprep.mubr.bf16.mxu0 %v1589_v52  ;;  %2646 = vmatprep.mubr.bf16.mxu1 %v1589_v52 }
 0x1c9   :  { %v1231_v60 = vpop.f32.mrb[5].mxu0  ;;  %v1457_v61 = vpop.f32.mrb[5].mxu1  ;;  %2421 = vmatmul.mubr.bf16.vlgmr.msra.gmra.mrb[32].mxu0 %v1588_v50  ;;  %2647 = vmatmul.mubr.bf16.vlgmr.msra.gmra.mrb[32].mxu1 %v1588_v50  ;;  %v1532_v4 = vmax.f32 %v1229_v58, 0.0  ;;  %v1534_v5 = vmax.f32 %v1455_v59, 0.0 }
 0x1ca   :  { %v1233_v0 = vpop.f32.mrb[6].mxu0  ;;  %v1459_v1 = vpop.f32.mrb[6].mxu1  ;;  %2502 = vmatpush1.bf16.msra.mxu0 %v8319_v54  ;;  %2728 = vmatpush1.bf16.msra.mxu1 %v8322_v55  ;;  %v1533_v10 = vmax.f32 %v1231_v60, 0.0  ;;  %v1535_v11 = vmax.f32 %v1457_v61, 0.0  ;;  %v8357_v60 = vld [vmem:[#allocation7 + $0x2c4] ss:$16 sps:$4 sm:$0xff]  }
 0x1cb   :  { %v1536_v6 = vmax.f32 %v1233_v0, 0.0  ;;  %v1538_v7 = vmax.f32 %v1459_v1, 0.0  ;;  %v1235_v8 = vpop.f32.mrb[7].mxu0  ;;  %v1461_v9 = vpop.f32.mrb[7].mxu1  ;;  %2503 = vmatprep.subr.bf16.mxu0 %v8327_v56  ;;  %2729 = vmatprep.subr.bf16.mxu1 %v8330_v57  ;;  %v8349_v56 = vld [vmem:[#allocation7 + $0x2a0] ss:$16 sps:$4 sm:$0xff]  }
 0x1cc   :  { %v1537_v12 = vmax.f32 %v1235_v8, 0.0  ;;  %v1539_v13 = vmax.f32 %v1461_v9, 0.0  ;;  %v8352_v57 = vld [vmem:[#allocation7 + $0x2a8] ss:$16 sps:$4 sm:$0xff]   ;;  %v8360_v61 = vld [vmem:[#allocation7 + $0x2cc] ss:$16 sps:$4 sm:$0xff]  }
 0x1cd   :  { %v1592_v14 = vpack.c.bf16 %v1536_v6, %v1532_v4  ;;  %v9326_v15 = vpack.c.bf16 %v1538_v7, %v1534_v5 }
 0x1ce   :  { %v1593_v16 = vpack.c.bf16 %v1537_v12, %v1533_v10  ;;  %v9328_v17 = vpack.c.bf16 %v1539_v13, %v1535_v11  ;;  %2504 = vmatpush1.bf16.msra.mxu0 %v8325_v62  ;;  %2730 = vmatpush1.bf16.msra.mxu1 %v8328_v63  ;;  %v8355_v12 = vld [vmem:[#allocation7 + $0x2c0] ss:$16 sps:$4 sm:$0xff]   ;;  %v8358_v13 = vld [vmem:[#allocation7 + $0x2c8] ss:$16 sps:$4 sm:$0xff]  }
 0x1cf   :  { %2505 = vmatprep.subr.bf16.mxu0 %v8333_v2  ;;  %2731 = vmatprep.subr.bf16.mxu1 %v8336_v3 }
 0x1d0   :  { %v1239_v22 = vpop.f32.mrb[8].mxu0  ;;  %v1465_v23 = vpop.f32.mrb[8].mxu1  ;;  %2430 = vmatprep.mubr.bf16.mxu0 %v1593_v16  ;;  %2656 = vmatprep.mubr.bf16.mxu1 %v1593_v16  ;;  %v8366_v16 = vld [vmem:[#allocation7 + $0x2ec] ss:$16 sps:$4 sm:$0xff]  }
 0x1d1   :  { %v1241_v24 = vpop.f32.mrb[9].mxu0  ;;  %v1467_v25 = vpop.f32.mrb[9].mxu1  ;;  %2431 = vmatmul.mubr.bf16.gmra.mrb[36].mxu0 %v1592_v14  ;;  %2657 = vmatmul.mubr.bf16.gmra.mrb[36].mxu1 %v1592_v14  ;;  %v1540_v32 = vmax.f32 %v1239_v22, 0.0  ;;  %v1542_v33 = vmax.f32 %v1465_v23, 0.0  ;;  %v8363_v14 = vld [vmem:[#allocation7 + $0x2e4] ss:$16 sps:$4 sm:$0xff]  }
 0x1d2   :  { %v1243_v28 = vpop.f32.mrb[10].mxu0  ;;  %v1469_v29 = vpop.f32.mrb[10].mxu1  ;;  %2506 = vmatpush1.bf16.msra.mxu0 %v8331_v18  ;;  %2732 = vmatpush1.bf16.msra.mxu1 %v8334_v19  ;;  %v1541_v38 = vmax.f32 %v1241_v24, 0.0  ;;  %v1543_v39 = vmax.f32 %v1467_v25, 0.0  ;;  %v8361_v22 = vld [vmem:[#allocation7 + $0x2e0] ss:$16 sps:$4 sm:$0xff]  }
 0x1d3   :  { %v1544_v34 = vmax.f32 %v1243_v28, 0.0  ;;  %v1546_v35 = vmax.f32 %v1469_v29, 0.0  ;;  %v1245_v36 = vpop.f32.mrb[11].mxu0  ;;  %v1471_v37 = vpop.f32.mrb[11].mxu1  ;;  %2507 = vmatprep.subr.bf16.mxu0 %v8339_v20  ;;  %2733 = vmatprep.subr.bf16.mxu1 %v8342_v21  ;;  %v8364_v23 = vld [vmem:[#allocation7 + $0x2e8] ss:$16 sps:$4 sm:$0xff]  }
 0x1d4   :  { %v1545_v40 = vmax.f32 %v1245_v36, 0.0  ;;  %v1547_v41 = vmax.f32 %v1471_v37, 0.0 }
 0x1d5   :  { %v1596_v42 = vpack.c.bf16 %v1544_v34, %v1540_v32  ;;  %v9330_v43 = vpack.c.bf16 %v1546_v35, %v1542_v33 }
 0x1d6   :  { %v1597_v44 = vpack.c.bf16 %v1545_v40, %v1541_v38  ;;  %v9332_v45 = vpack.c.bf16 %v1547_v41, %v1543_v39  ;;  %2508 = vmatpush1.bf16.msra.mxu0 %v8337_v26  ;;  %2734 = vmatpush1.bf16.msra.mxu1 %v8340_v27  ;;  %v8369_v26 = vld [vmem:[#allocation7 + $0x304] ss:$16 sps:$4 sm:$0xff]   ;;  %v8372_v27 = vld [vmem:[#allocation7 + $0x30c] ss:$16 sps:$4 sm:$0xff]  }
 0x1d7   :  { %2509 = vmatprep.subr.bf16.mxu0 %v8345_v30  ;;  %2735 = vmatprep.subr.bf16.mxu1 %v8348_v31 }
 0x1d8   :  { %v1249_v50 = vpop.f32.mrb[12].mxu0  ;;  %v1475_v52 = vpop.f32.mrb[12].mxu1  ;;  %2440 = vmatprep.mubr.bf16.mxu0 %v1597_v44  ;;  %2666 = vmatprep.mubr.bf16.mxu1 %v1597_v44  ;;  %v8370_v44 = vld [vmem:[#allocation7 + $0x308] ss:$16 sps:$4 sm:$0xff]  }
 0x1d9   :  { %v1251_v54 = vpop.f32.mrb[13].mxu0  ;;  %v1477_v55 = vpop.f32.mrb[13].mxu1  ;;  %2441 = vmatmul.mubr.bf16.gmra.mrb[40].mxu0 %v1596_v42  ;;  %2667 = vmatmul.mubr.bf16.gmra.mrb[40].mxu1 %v1596_v42  ;;  %v1548_v62 = vmax.f32 %v1249_v50, 0.0  ;;  %v1550_v63 = vmax.f32 %v1475_v52, 0.0  ;;  %v8367_v42 = vld [vmem:[#allocation7 + $0x300] ss:$16 sps:$4 sm:$0xff]  }
 0x1da   :  { %v1253_v58 = vpop.f32.mrb[14].mxu0  ;;  %v1479_v59 = vpop.f32.mrb[14].mxu1  ;;  %2510 = vmatpush1.bf16.msra.mxu0 %v8343_v46  ;;  %2736 = vmatpush1.bf16.msra.mxu1 %v8346_v47  ;;  %v1549_v4 = vmax.f32 %v1251_v54, 0.0  ;;  %v1551_v5 = vmax.f32 %v1477_v55, 0.0  ;;  %v8375_v46 = vld [vmem:[#allocation7 + $0x324] ss:$16 sps:$4 sm:$0xff]  }
 0x1db   :  { %v1552_v0 = vmax.f32 %v1253_v58, 0.0  ;;  %v1554_v1 = vmax.f32 %v1479_v59, 0.0  ;;  %v1255_v2 = vpop.f32.mrb[15].mxu0  ;;  %v1481_v3 = vpop.f32.mrb[15].mxu1  ;;  %2511 = vmatprep.subr.bf16.mxu0 %v8351_v48  ;;  %2737 = vmatprep.subr.bf16.mxu1 %v8354_v49  ;;  %v8378_v47 = vld [vmem:[#allocation7 + $0x32c] ss:$16 sps:$4 sm:$0xff]  }
 0x1dc   :  { %v1553_v6 = vmax.f32 %v1255_v2, 0.0  ;;  %v1555_v7 = vmax.f32 %v1481_v3, 0.0  ;;  %v8373_v54 = vld [vmem:[#allocation7 + $0x320] ss:$16 sps:$4 sm:$0xff]   ;;  %v8376_v55 = vld [vmem:[#allocation7 + $0x328] ss:$16 sps:$4 sm:$0xff]  }
 0x1dd   :  { %v1600_v8 = vpack.c.bf16 %v1552_v0, %v1548_v62  ;;  %v9334_v9 = vpack.c.bf16 %v1554_v1, %v1550_v63  ;;  %v8381_v58 = vld [vmem:[#allocation7 + $0x344] ss:$16 sps:$4 sm:$0xff]   ;;  %v8384_v59 = vld [vmem:[#allocation7 + $0x34c] ss:$16 sps:$4 sm:$0xff]  }
 0x1de   :  { %v1601_v10 = vpack.c.bf16 %v1553_v6, %v1549_v4  ;;  %v9336_v11 = vpack.c.bf16 %v1555_v7, %v1551_v5  ;;  %2512 = vmatpush1.bf16.msra.mxu0 %v8349_v56  ;;  %2738 = vmatpush1.bf16.msra.mxu1 %v8352_v57 }
 0x1df   :  { %2513 = vmatprep.subr.bf16.mxu0 %v8357_v60  ;;  %2739 = vmatprep.subr.bf16.mxu1 %v8360_v61 }
 0x1e0   :  { %v1259_v18 = vpop.f32.mrb[16].mxu0  ;;  %v1485_v19 = vpop.f32.mrb[16].mxu1  ;;  %2450 = vmatprep.mubr.bf16.mxu0 %v1601_v10  ;;  %2676 = vmatprep.mubr.bf16.mxu1 %v1601_v10 }
 0x1e1   :  { %v1261_v20 = vpop.f32.mrb[17].mxu0  ;;  %v1487_v21 = vpop.f32.mrb[17].mxu1  ;;  %2451 = vmatmul.mubr.bf16.gmra.mrb[44].mxu0 %v1600_v8  ;;  %2677 = vmatmul.mubr.bf16.gmra.mrb[44].mxu1 %v1600_v8  ;;  %v1556_v28 = vmax.f32 %v1259_v18, 0.0  ;;  %v1558_v29 = vmax.f32 %v1485_v19, 0.0 }
 0x1e2   :  { %v1263_v24 = vpop.f32.mrb[18].mxu0  ;;  %v1489_v25 = vpop.f32.mrb[18].mxu1  ;;  %2514 = vmatpush1.bf16.msra.mxu0 %v8355_v12  ;;  %2740 = vmatpush1.bf16.msra.mxu1 %v8358_v13  ;;  %v1557_v34 = vmax.f32 %v1261_v20, 0.0  ;;  %v1559_v35 = vmax.f32 %v1487_v21, 0.0  ;;  %v8379_v12 = vld [vmem:[#allocation7 + $0x340] ss:$16 sps:$4 sm:$0xff]  }
 0x1e3   :  { %v1560_v30 = vmax.f32 %v1263_v24, 0.0  ;;  %v1562_v31 = vmax.f32 %v1489_v25, 0.0  ;;  %v1265_v32 = vpop.f32.mrb[19].mxu0  ;;  %v1491_v33 = vpop.f32.mrb[19].mxu1  ;;  %2515 = vmatprep.subr.bf16.mxu0 %v8363_v14  ;;  %2741 = vmatprep.subr.bf16.mxu1 %v8366_v16  ;;  %v8382_v13 = vld [vmem:[#allocation7 + $0x348] ss:$16 sps:$4 sm:$0xff]  }
 0x1e4   :  { %v1561_v36 = vmax.f32 %v1265_v32, 0.0  ;;  %v1563_v37 = vmax.f32 %v1491_v33, 0.0  ;;  %v8387_v14 = vld [vmem:[#allocation7 + $0x364] ss:$16 sps:$4 sm:$0xff]   ;;  %v8390_v16 = vld [vmem:[#allocation7 + $0x36c] ss:$16 sps:$4 sm:$0xff]  }
 0x1e5   :  { %v1604_v38 = vpack.c.bf16 %v1560_v30, %v1556_v28  ;;  %v9338_v39 = vpack.c.bf16 %v1562_v31, %v1558_v29 }
 0x1e6   :  { %v1605_v40 = vpack.c.bf16 %v1561_v36, %v1557_v34  ;;  %v9340_v41 = vpack.c.bf16 %v1563_v37, %v1559_v35  ;;  %2516 = vmatpush1.bf16.msra.mxu0 %v8361_v22  ;;  %2742 = vmatpush1.bf16.msra.mxu1 %v8364_v23  ;;  %v8385_v22 = vld [vmem:[#allocation7 + $0x360] ss:$16 sps:$4 sm:$0xff]   ;;  %v8388_v23 = vld [vmem:[#allocation7 + $0x368] ss:$16 sps:$4 sm:$0xff]  }
 0x1e7   :  { %2517 = vmatprep.subr.bf16.mxu0 %v8369_v26  ;;  %2743 = vmatprep.subr.bf16.mxu1 %v8372_v27  ;;  %v8393_v26 = vld [vmem:[#allocation7 + $0x384] ss:$16 sps:$4 sm:$0xff]   ;;  %v8396_v27 = vld [vmem:[#allocation7 + $0x38c] ss:$16 sps:$4 sm:$0xff]  }
 0x1e8   :  { %v1269_v48 = vpop.f32.mrb[20].mxu0  ;;  %v1495_v49 = vpop.f32.mrb[20].mxu1  ;;  %2460 = vmatprep.mubr.bf16.mxu0 %v1605_v40  ;;  %2686 = vmatprep.mubr.bf16.mxu1 %v1605_v40 }
 0x1e9   :  { %v1271_v50 = vpop.f32.mrb[21].mxu0  ;;  %v1497_v52 = vpop.f32.mrb[21].mxu1  ;;  %2461 = vmatmul.mubr.bf16.gmra.mrb[48].mxu0 %v1604_v38  ;;  %2687 = vmatmul.mubr.bf16.gmra.mrb[48].mxu1 %v1604_v38  ;;  %v1564_v60 = vmax.f32 %v1269_v48, 0.0  ;;  %v1566_v61 = vmax.f32 %v1495_v49, 0.0  ;;  %v8399_v48 = vld [vmem:[#allocation7 + $0x3a4] ss:$16 sps:$4 sm:$0xff]  }
 0x1ea   :  { %v1273_v56 = vpop.f32.mrb[22].mxu0  ;;  %v1499_v57 = vpop.f32.mrb[22].mxu1  ;;  %2518 = vmatpush1.bf16.msra.mxu0 %v8367_v42  ;;  %2744 = vmatpush1.bf16.msra.mxu1 %v8370_v44  ;;  %v1565_v2 = vmax.f32 %v1271_v50, 0.0  ;;  %v1567_v3 = vmax.f32 %v1497_v52, 0.0  ;;  %v8402_v49 = vld [vmem:[#allocation7 + $0x3ac] ss:$16 sps:$4 sm:$0xff]  }
 0x1eb   :  { %v1568_v62 = vmax.f32 %v1273_v56, 0.0  ;;  %v1570_v63 = vmax.f32 %v1499_v57, 0.0  ;;  %v1275_v0 = vpop.f32.mrb[23].mxu0  ;;  %v1501_v1 = vpop.f32.mrb[23].mxu1  ;;  %2519 = vmatprep.subr.bf16.mxu0 %v8375_v46  ;;  %2745 = vmatprep.subr.bf16.mxu1 %v8378_v47  ;;  %v8391_v46 = vld [vmem:[#allocation7 + $0x380] ss:$16 sps:$4 sm:$0xff]  }
 0x1ec   :  { %v1569_v4 = vmax.f32 %v1275_v0, 0.0  ;;  %v1571_v5 = vmax.f32 %v1501_v1, 0.0  ;;  %v8394_v47 = vld [vmem:[#allocation7 + $0x388] ss:$16 sps:$4 sm:$0xff]   ;;  %v8397_v56 = vld [vmem:[#allocation7 + $0x3a0] ss:$16 sps:$4 sm:$0xff]  }
 0x1ed   :  { %v1608_v6 = vpack.c.bf16 %v1568_v62, %v1564_v60  ;;  %v9342_v7 = vpack.c.bf16 %v1570_v63, %v1566_v61  ;;  %v8400_v57 = vld [vmem:[#allocation7 + $0x3a8] ss:$16 sps:$4 sm:$0xff]   ;;  %v8405_v60 = vld [vmem:[#allocation7 + $0x3c4] ss:$16 sps:$4 sm:$0xff]   ;;  %v8408_v61 = vld [vmem:[#allocation7 + $0x3cc] ss:$16 sps:$4 sm:$0xff]  }
 0x1ee   :  { %v1609_v8 = vpack.c.bf16 %v1569_v4, %v1565_v2  ;;  %v9344_v10 = vpack.c.bf16 %v1571_v5, %v1567_v3  ;;  %2520 = vmatpush1.bf16.msra.mxu0 %v8373_v54  ;;  %2746 = vmatpush1.bf16.msra.mxu1 %v8376_v55 }
 0x1ef   :  { %2521 = vmatprep.subr.bf16.mxu0 %v8381_v58  ;;  %2747 = vmatprep.subr.bf16.mxu1 %v8384_v59 }
 0x1f0   :  { %v1279_v18 = vpop.f32.mrb[24].mxu0  ;;  %v1505_v19 = vpop.f32.mrb[24].mxu1  ;;  %2470 = vmatprep.mubr.bf16.mxu0 %v1609_v8  ;;  %2696 = vmatprep.mubr.bf16.mxu1 %v1609_v8 }
 0x1f1   :  { %v1281_v20 = vpop.f32.mrb[25].mxu0  ;;  %v1507_v21 = vpop.f32.mrb[25].mxu1  ;;  %2471 = vmatmul.mubr.bf16.gmra.mrb[52].mxu0 %v1608_v6  ;;  %2697 = vmatmul.mubr.bf16.gmra.mrb[52].mxu1 %v1608_v6  ;;  %v1572_v28 = vmax.f32 %v1279_v18, 0.0  ;;  %v1574_v29 = vmax.f32 %v1505_v19, 0.0  ;;  %v8403_v18 = vld [vmem:[#allocation7 + $0x3c0] ss:$16 sps:$4 sm:$0xff]  }
 0x1f2   :  { %v1283_v24 = vpop.f32.mrb[26].mxu0  ;;  %v1509_v25 = vpop.f32.mrb[26].mxu1  ;;  %2522 = vmatpush1.bf16.msra.mxu0 %v8379_v12  ;;  %2748 = vmatpush1.bf16.msra.mxu1 %v8382_v13  ;;  %v1573_v34 = vmax.f32 %v1281_v20, 0.0  ;;  %v1575_v35 = vmax.f32 %v1507_v21, 0.0  ;;  %v8406_v19 = vld [vmem:[#allocation7 + $0x3c8] ss:$16 sps:$4 sm:$0xff]  }
 0x1f3   :  { %v1576_v30 = vmax.f32 %v1283_v24, 0.0  ;;  %v1578_v31 = vmax.f32 %v1509_v25, 0.0  ;;  %v1285_v32 = vpop.f32.mrb[27].mxu0  ;;  %v1511_v33 = vpop.f32.mrb[27].mxu1  ;;  %2523 = vmatprep.subr.bf16.mxu0 %v8387_v14  ;;  %2749 = vmatprep.subr.bf16.mxu1 %v8390_v16  ;;  %v8411_v20 = vld [vmem:[#allocation7 + $0x3e4] ss:$16 sps:$4 sm:$0xff]  }
 0x1f4   :  { %v1577_v36 = vmax.f32 %v1285_v32, 0.0  ;;  %v1579_v37 = vmax.f32 %v1511_v33, 0.0  ;;  %v8414_v21 = vld [vmem:[#allocation7 + $0x3ec] ss:$16 sps:$4 sm:$0xff]   ;;  %v8417_v24 = vld [vmem:[#allocation8 + $0x4] ss:$16 sps:$4 sm:$0xff]  }
 0x1f5   :  { %v1612_v38 = vpack.c.bf16 %v1576_v30, %v1572_v28  ;;  %v9346_v40 = vpack.c.bf16 %v1578_v31, %v1574_v29  ;;  %v8420_v25 = vld [vmem:[#allocation8 + $0xc] ss:$16 sps:$4 sm:$0xff]   ;;  %v8423_v28 = vld [vmem:[#allocation8 + $0x24] ss:$16 sps:$4 sm:$0xff]   ;;  %v8424_v30 = vld [vmem:[#allocation8 + $0x28] ss:$16 sps:$4 sm:$0xff]  }
 0x1f6   :  { %v1613_v42 = vpack.c.bf16 %v1577_v36, %v1573_v34  ;;  %v9348_v44 = vpack.c.bf16 %v1579_v37, %v1575_v35  ;;  %2524 = vmatpush1.bf16.msra.mxu0 %v8385_v22  ;;  %2750 = vmatpush1.bf16.msra.mxu1 %v8388_v23  ;;  %v8409_v22 = vld [vmem:[#allocation7 + $0x3e0] ss:$16 sps:$4 sm:$0xff]   ;;  %v8412_v23 = vld [vmem:[#allocation7 + $0x3e8] ss:$16 sps:$4 sm:$0xff]   ;;  %v8426_v29 = vld [vmem:[#allocation8 + $0x2c] ss:$16 sps:$4 sm:$0xff]  }
 0x1f7   :  { %2525 = vmatprep.subr.bf16.mxu0 %v8393_v26  ;;  %2751 = vmatprep.subr.bf16.mxu1 %v8396_v27  ;;  %v8415_v26 = vld [vmem:[#allocation8] ss:$16 sps:$4 sm:$0xff]   ;;  %v8418_v27 = vld [vmem:[#allocation8 + $0x8] ss:$16 sps:$4 sm:$0xff]   ;;  %v8429_v31 = vld [vmem:[#allocation8 + $0x44] ss:$16 sps:$4 sm:$0xff]  }
 0x1f8   :  { %v1289_v50 = vpop.f32.mrb[28].mxu0  ;;  %v1515_v52 = vpop.f32.mrb[28].mxu1  ;;  %2480 = vmatprep.mubr.bf16.mxu0 %v1613_v42  ;;  %2706 = vmatprep.mubr.bf16.mxu1 %v1613_v42  ;;  %v8432_v32 = vld [vmem:[#allocation8 + $0x4c] ss:$16 sps:$4 sm:$0xff]   ;;  %v8427_v33 = vld [vmem:[#allocation8 + $0x40] ss:$16 sps:$4 sm:$0xff]  }
 0x1f9   :  { %v1291_v54 = vpop.f32.mrb[29].mxu0  ;;  %v1517_v55 = vpop.f32.mrb[29].mxu1  ;;  %2481 = vmatmul.mubr.bf16.gmra.mrb[56].mxu0 %v1612_v38  ;;  %2707 = vmatmul.mubr.bf16.gmra.mrb[56].mxu1 %v1612_v38  ;;  %v1580_v62 = vmax.f32 %v1289_v50, 0.0  ;;  %v1582_v63 = vmax.f32 %v1515_v52, 0.0  ;;  %v8430_v34 = vld [vmem:[#allocation8 + $0x48] ss:$16 sps:$4 sm:$0xff]  }
 0x1fa   :  { %v1293_v58 = vpop.f32.mrb[30].mxu0  ;;  %v1519_v59 = vpop.f32.mrb[30].mxu1  ;;  %2526 = vmatpush1.bf16.msra.mxu0 %v8391_v46  ;;  %2752 = vmatpush1.bf16.msra.mxu1 %v8394_v47  ;;  %v1581_v4 = vmax.f32 %v1291_v54, 0.0  ;;  %v1583_v5 = vmax.f32 %v1517_v55, 0.0  ;;  %v8435_v35 = vld [vmem:[#allocation8 + $0x64] ss:$16 sps:$4 sm:$0xff]  }
 0x1fb   :  { %v1584_v0 = vmax.f32 %v1293_v58, 0.0  ;;  %v1586_v1 = vmax.f32 %v1519_v59, 0.0  ;;  %v1295_v2 = vpop.f32.mrb[31].mxu0  ;;  %v1521_v3 = vpop.f32.mrb[31].mxu1  ;;  %2527 = vmatprep.subr.bf16.mxu0 %v8399_v48  ;;  %2753 = vmatprep.subr.bf16.mxu1 %v8402_v49  ;;  %v8436_v36 = vld [vmem:[#allocation8 + $0x68] ss:$16 sps:$4 sm:$0xff]  }
 0x1fc   :  { %v1585_v6 = vmax.f32 %v1295_v2, 0.0  ;;  %v1587_v8 = vmax.f32 %v1521_v3, 0.0  ;;  %v8441_v37 = vld [vmem:[#allocation8 + $0x84] ss:$16 sps:$4 sm:$0xff]   ;;  %v8444_v38 = vld [vmem:[#allocation8 + $0x8c] ss:$16 sps:$4 sm:$0xff]  }
 0x1fd   :  { %v1616_v12 = vpack.c.bf16 %v1584_v0, %v1580_v62  ;;  %v9350_v13 = vpack.c.bf16 %v1586_v1, %v1582_v63  ;;  %v8439_v42 = vld [vmem:[#allocation8 + $0x80] ss:$16 sps:$4 sm:$0xff]   ;;  %v8442_v46 = vld [vmem:[#allocation8 + $0x88] ss:$16 sps:$4 sm:$0xff]   ;;  %v8447_v47 = vld [vmem:[#allocation8 + $0xa4] ss:$16 sps:$4 sm:$0xff]  }
 0x1fe   :  { %v1617_v14 = vpack.c.bf16 %v1585_v6, %v1581_v4  ;;  %v9352_v16 = vpack.c.bf16 %v1587_v8, %v1583_v5  ;;  %2528 = vmatpush1.bf16.msra.mxu0 %v8397_v56  ;;  %2754 = vmatpush1.bf16.msra.mxu1 %v8400_v57  ;;  %v8448_v48 = vld [vmem:[#allocation8 + $0xa8] ss:$16 sps:$4 sm:$0xff]   ;;  %v8453_v49 = vld [vmem:[#allocation8 + $0xc4] ss:$16 sps:$4 sm:$0xff]   ;;  %v8456_v50 = vld [vmem:[#allocation8 + $0xcc] ss:$16 sps:$4 sm:$0xff]  }
 0x1ff   :  { %2529 = vmatprep.subr.bf16.mxu0 %v8405_v60  ;;  %2755 = vmatprep.subr.bf16.mxu1 %v8408_v61  ;;  %v8451_v52 = vld [vmem:[#allocation8 + $0xc0] ss:$16 sps:$4 sm:$0xff]   ;;  %v8454_v54 = vld [vmem:[#allocation8 + $0xc8] ss:$16 sps:$4 sm:$0xff]   ;;  %v8459_v55 = vld [vmem:[#allocation8 + $0xe4] ss:$16 sps:$4 sm:$0xff]  }
 0x200   :  { %2490 = vmatprep.mubr.bf16.mxu0 %v1617_v14  ;;  %2716 = vmatprep.mubr.bf16.mxu1 %v1617_v14  ;;  %v8460_v56 = vld [vmem:[#allocation8 + $0xe8] ss:$16 sps:$4 sm:$0xff]   ;;  %v8465_v57 = vld [vmem:[#allocation8 + $0x104] ss:$16 sps:$4 sm:$0xff]   ;;  %v8468_v58 = vld [vmem:[#allocation8 + $0x10c] ss:$16 sps:$4 sm:$0xff]  }
 0x201   :  { %2491 = vmatmul.mubr.bf16.gmra.mrb[60].mxu0 %v1616_v12  ;;  %2717 = vmatmul.mubr.bf16.gmra.mrb[60].mxu1 %v1616_v12  ;;  %v8463_v59 = vld [vmem:[#allocation8 + $0x100] ss:$16 sps:$4 sm:$0xff]   ;;  %v8466_v60 = vld [vmem:[#allocation8 + $0x108] ss:$16 sps:$4 sm:$0xff]   ;;  %v8471_v61 = vld [vmem:[#allocation8 + $0x124] ss:$16 sps:$4 sm:$0xff]  }
 0x202   :  { %2530 = vmatpush1.bf16.msra.mxu0 %v8403_v18  ;;  %2533 = vmatprep.mubr.bf16.mxu0 %v9324_v53  ;;  %v8472_v62 = vld [vmem:[#allocation8 + $0x128] ss:$16 sps:$4 sm:$0xff]   ;;  %v8477_v63 = vld [vmem:[#allocation8 + $0x144] ss:$16 sps:$4 sm:$0xff]   ;;  %v8480_v0 = vld [vmem:[#allocation8 + $0x14c] ss:$16 sps:$4 sm:$0xff]  }
 0x203   :  { %2756 = vmatpush1.bf16.msra.mxu1 %v8406_v19  ;;  %2759 = vmatprep.mubr.bf16.mxu1 %v9324_v53  ;;  %v8421_v53 = vld [vmem:[#allocation8 + $0x20] ss:$16 sps:$4 sm:$0xff]   ;;  %v8478_v2 = vld [vmem:[#allocation8 + $0x148] ss:$16 sps:$4 sm:$0xff]   ;;  %v8483_v3 = vld [vmem:[#allocation8 + $0x164] ss:$16 sps:$4 sm:$0xff]  }
 0x204   :  { %2531 = vmatprep.subr.bf16.mxu0 %v8411_v20  ;;  %2757 = vmatprep.subr.bf16.mxu1 %v8414_v21  ;;  %v8475_v1 = vld [vmem:[#allocation8 + $0x140] ss:$16 sps:$4 sm:$0xff]   ;;  %v8484_v4 = vld [vmem:[#allocation8 + $0x168] ss:$16 sps:$4 sm:$0xff]   ;;  %v8489_v5 = vld [vmem:[#allocation8 + $0x184] ss:$16 sps:$4 sm:$0xff]  }
 0x205   :  { %v8492_v6 = vld [vmem:[#allocation8 + $0x18c] ss:$16 sps:$4 sm:$0xff]   ;;  %v8487_v8 = vld [vmem:[#allocation8 + $0x180] ss:$16 sps:$4 sm:$0xff]   ;;  %v8490_v12 = vld [vmem:[#allocation8 + $0x188] ss:$16 sps:$4 sm:$0xff]  }
 0x206   :  { %2532 = vmatpush1.bf16.msra.mxu0 %v8409_v22  ;;  %v8495_v14 = vld [vmem:[#allocation8 + $0x1a4] ss:$16 sps:$4 sm:$0xff]   ;;  %v8496_v18 = vld [vmem:[#allocation8 + $0x1a8] ss:$16 sps:$4 sm:$0xff]   ;;  %v8504_v20 = vld [vmem:[#allocation8 + $0x1cc] ss:$16 sps:$4 sm:$0xff]  }
 0x207   :  { %2758 = vmatpush1.bf16.msra.mxu1 %v8412_v23  ;;  %3662 = vmatprep.subr.bf16.mxu0 %v8417_v24  ;;  %v8501_v19 = vld [vmem:[#allocation8 + $0x1c4] ss:$16 sps:$4 sm:$0xff]   ;;  %v8499_v21 = vld [vmem:[#allocation8 + $0x1c0] ss:$16 sps:$4 sm:$0xff]   ;;  %v8502_v22 = vld [vmem:[#allocation8 + $0x1c8] ss:$16 sps:$4 sm:$0xff]  }
 0x208   :  { %3888 = vmatprep.subr.bf16.mxu1 %v8420_v25  ;;  %v8505_v23 = vld [vmem:[#allocation8 + $0x1e0] ss:$16 sps:$4 sm:$0xff]   ;;  %v8508_v24 = vld [vmem:[#allocation8 + $0x1e8] ss:$16 sps:$4 sm:$0xff]   ;;  %v8513_v25 = vld [vmem:[#allocation8 + $0x204] ss:$16 sps:$4 sm:$0xff]  }
 0x209   :  { %2534 = vmatmul.mubr.bf16.vlgmr.msra.gmra.mrb[32].mxu0 %v9322_v51 }
 0x20a   :  { %2760 = vmatmul.mubr.bf16.vlgmr.msra.gmra.mrb[32].mxu1 %v9322_v51  ;;  %2543 = vmatprep.mubr.bf16.mxu0 %v9328_v17  ;;  %v8438_v51 = vld [vmem:[#allocation8 + $0x6c] ss:$16 sps:$4 sm:$0xff]  }
 0x20b   :  { %2769 = vmatprep.mubr.bf16.mxu1 %v9328_v17  ;;  %3663 = vmatpush1.bf16.msra.mxu0 %v8415_v26  ;;  %v8433_v17 = vld [vmem:[#allocation8 + $0x60] ss:$16 sps:$4 sm:$0xff]   ;;  %v8516_v26 = vld [vmem:[#allocation8 + $0x20c] ss:$16 sps:$4 sm:$0xff]  }
 0x20c   :  { %3889 = vmatpush1.bf16.msra.mxu1 %v8418_v27  ;;  %3664 = vmatprep.subr.bf16.mxu0 %v8423_v28 }
 0x20d   :  { %3890 = vmatprep.subr.bf16.mxu1 %v8426_v29 }
 0x20f   :  { %3665 = vmatpush1.bf16.msra.mxu0 %v8421_v53 }
 0x210   :  { %3891 = vmatpush1.bf16.msra.mxu1 %v8424_v30  ;;  %3666 = vmatprep.subr.bf16.mxu0 %v8429_v31 }
 0x211   :  { %2544 = vmatmul.mubr.bf16.gmra.mrb[36].mxu0 %v9326_v15  ;;  %3892 = vmatprep.subr.bf16.mxu1 %v8432_v32 }
 0x212   :  { %2770 = vmatmul.mubr.bf16.gmra.mrb[36].mxu1 %v9326_v15  ;;  %2553 = vmatprep.mubr.bf16.mxu0 %v9332_v45  ;;  %v8450_v15 = vld [vmem:[#allocation8 + $0xac] ss:$16 sps:$4 sm:$0xff]  }
 0x213   :  { %2779 = vmatprep.mubr.bf16.mxu1 %v9332_v45  ;;  %3667 = vmatpush1.bf16.msra.mxu0 %v8427_v33  ;;  %v8445_v45 = vld [vmem:[#allocation8 + $0xa0] ss:$16 sps:$4 sm:$0xff]  }
 0x214   :  { %3893 = vmatpush1.bf16.msra.mxu1 %v8430_v34  ;;  %3668 = vmatprep.subr.bf16.mxu0 %v8435_v35 }
 0x215   :  { %3894 = vmatprep.subr.bf16.mxu1 %v8438_v51  ;;  %v8511_v51 = vld [vmem:[#allocation8 + $0x200] ss:$16 sps:$4 sm:$0xff]  }
 0x217   :  { %3669 = vmatpush1.bf16.msra.mxu0 %v8433_v17  ;;  %v8514_v17 = vld [vmem:[#allocation8 + $0x208] ss:$16 sps:$4 sm:$0xff]  }
 0x218   :  { %3895 = vmatpush1.bf16.msra.mxu1 %v8436_v36  ;;  %3670 = vmatprep.subr.bf16.mxu0 %v8441_v37  ;;  %v8519_v37 = vld [vmem:[#allocation8 + $0x224] ss:$16 sps:$4 sm:$0xff]  }
 0x219   :  { %2554 = vmatmul.mubr.bf16.gmra.mrb[40].mxu0 %v9330_v43  ;;  %3896 = vmatprep.subr.bf16.mxu1 %v8444_v38  ;;  %v8522_v38 = vld [vmem:[#allocation8 + $0x22c] ss:$16 sps:$4 sm:$0xff]  }
 0x21a   :  { %2780 = vmatmul.mubr.bf16.gmra.mrb[40].mxu1 %v9330_v43  ;;  %2563 = vmatprep.mubr.bf16.mxu0 %v9336_v11  ;;  %v8462_v43 = vld [vmem:[#allocation8 + $0xec] ss:$16 sps:$4 sm:$0xff]  }
 0x21b   :  { %2789 = vmatprep.mubr.bf16.mxu1 %v9336_v11  ;;  %3671 = vmatpush1.bf16.msra.mxu0 %v8439_v42  ;;  %v8457_v11 = vld [vmem:[#allocation8 + $0xe0] ss:$16 sps:$4 sm:$0xff]  }
 0x21c   :  { %3897 = vmatpush1.bf16.msra.mxu1 %v8442_v46  ;;  %3672 = vmatprep.subr.bf16.mxu0 %v8447_v47  ;;  %v8517_v46 = vld [vmem:[#allocation8 + $0x220] ss:$16 sps:$4 sm:$0xff]   ;;  %v8520_v47 = vld [vmem:[#allocation8 + $0x228] ss:$16 sps:$4 sm:$0xff]  }
 0x21d   :  { %3898 = vmatprep.subr.bf16.mxu1 %v8450_v15 }
 0x21f   :  { %3673 = vmatpush1.bf16.msra.mxu0 %v8445_v45 }
 0x220   :  { %3899 = vmatpush1.bf16.msra.mxu1 %v8448_v48  ;;  %3674 = vmatprep.subr.bf16.mxu0 %v8453_v49  ;;  %v8525_v48 = vld [vmem:[#allocation8 + $0x244] ss:$16 sps:$4 sm:$0xff]   ;;  %v8528_v49 = vld [vmem:[#allocation8 + $0x24c] ss:$16 sps:$4 sm:$0xff]  }
 0x221   :  { %2564 = vmatmul.mubr.bf16.gmra.mrb[44].mxu0 %v9334_v9  ;;  %3900 = vmatprep.subr.bf16.mxu1 %v8456_v50 }
 0x222   :  { %2790 = vmatmul.mubr.bf16.gmra.mrb[44].mxu1 %v9334_v9  ;;  %2573 = vmatprep.mubr.bf16.mxu0 %v9340_v41  ;;  %v8474_v9 = vld [vmem:[#allocation8 + $0x12c] ss:$16 sps:$4 sm:$0xff]  }
 0x223   :  { %2799 = vmatprep.mubr.bf16.mxu1 %v9340_v41  ;;  %3675 = vmatpush1.bf16.msra.mxu0 %v8451_v52  ;;  %v8469_v41 = vld [vmem:[#allocation8 + $0x120] ss:$16 sps:$4 sm:$0xff]  }
 0x224   :  { %3901 = vmatpush1.bf16.msra.mxu1 %v8454_v54  ;;  %3676 = vmatprep.subr.bf16.mxu0 %v8459_v55 }
 0x225   :  { %3902 = vmatprep.subr.bf16.mxu1 %v8462_v43 }
 0x227   :  { %3677 = vmatpush1.bf16.msra.mxu0 %v8457_v11 }
 0x228   :  { %3903 = vmatpush1.bf16.msra.mxu1 %v8460_v56  ;;  %3678 = vmatprep.subr.bf16.mxu0 %v8465_v57 }
 0x229   :  { %2574 = vmatmul.mubr.bf16.gmra.mrb[48].mxu0 %v9338_v39  ;;  %3904 = vmatprep.subr.bf16.mxu1 %v8468_v58  ;;  %v8523_v58 = vld [vmem:[#allocation8 + $0x240] ss:$16 sps:$4 sm:$0xff]  }
 0x22a   :  { %2800 = vmatmul.mubr.bf16.gmra.mrb[48].mxu1 %v9338_v39  ;;  %2583 = vmatprep.mubr.bf16.mxu0 %v9344_v10  ;;  %v8486_v39 = vld [vmem:[#allocation8 + $0x16c] ss:$16 sps:$4 sm:$0xff]  }
 0x22b   :  { %2809 = vmatprep.mubr.bf16.mxu1 %v9344_v10  ;;  %3679 = vmatpush1.bf16.msra.mxu0 %v8463_v59  ;;  %v8481_v10 = vld [vmem:[#allocation8 + $0x160] ss:$16 sps:$4 sm:$0xff]   ;;  %v8526_v59 = vld [vmem:[#allocation8 + $0x248] ss:$16 sps:$4 sm:$0xff]  }
 0x22c   :  { %3905 = vmatpush1.bf16.msra.mxu1 %v8466_v60  ;;  %3680 = vmatprep.subr.bf16.mxu0 %v8471_v61  ;;  %v8531_v61 = vld [vmem:[#allocation8 + $0x264] ss:$16 sps:$4 sm:$0xff]  }
 0x22d   :  { %3906 = vmatprep.subr.bf16.mxu1 %v8474_v9  ;;  %v8534_v9 = vld [vmem:[#allocation8 + $0x26c] ss:$16 sps:$4 sm:$0xff]  }
 0x22f   :  { %3681 = vmatpush1.bf16.msra.mxu0 %v8469_v41 }
 0x230   :  { %3907 = vmatpush1.bf16.msra.mxu1 %v8472_v62  ;;  %3682 = vmatprep.subr.bf16.mxu0 %v8477_v63  ;;  %v8529_v62 = vld [vmem:[#allocation8 + $0x260] ss:$16 sps:$4 sm:$0xff]   ;;  %v8532_v63 = vld [vmem:[#allocation8 + $0x268] ss:$16 sps:$4 sm:$0xff]  }
 0x231   :  { %2584 = vmatmul.mubr.bf16.gmra.mrb[52].mxu0 %v9342_v7  ;;  %3908 = vmatprep.subr.bf16.mxu1 %v8480_v0 }
 0x232   :  { %2810 = vmatmul.mubr.bf16.gmra.mrb[52].mxu1 %v9342_v7  ;;  %2593 = vmatprep.mubr.bf16.mxu0 %v9348_v44  ;;  %v8498_v7 = vld [vmem:[#allocation8 + $0x1ac] ss:$16 sps:$4 sm:$0xff]  }
 0x233   :  { %2819 = vmatprep.mubr.bf16.mxu1 %v9348_v44  ;;  %3683 = vmatpush1.bf16.msra.mxu0 %v8475_v1  ;;  %v8493_v44 = vld [vmem:[#allocation8 + $0x1a0] ss:$16 sps:$4 sm:$0xff]  }
 0x234   :  { %3909 = vmatpush1.bf16.msra.mxu1 %v8478_v2  ;;  %3684 = vmatprep.subr.bf16.mxu0 %v8483_v3  ;;  %v8537_v2 = vld [vmem:[#allocation8 + $0x284] ss:$16 sps:$4 sm:$0xff]   ;;  %v8540_v3 = vld [vmem:[#allocation8 + $0x28c] ss:$16 sps:$4 sm:$0xff]  }
 0x235   :  { %3910 = vmatprep.subr.bf16.mxu1 %v8486_v39 }
 0x237   :  { %3685 = vmatpush1.bf16.msra.mxu0 %v8481_v10 }
 0x238   :  { %3911 = vmatpush1.bf16.msra.mxu1 %v8484_v4  ;;  %3686 = vmatprep.subr.bf16.mxu0 %v8489_v5 }
 0x239   :  { %2594 = vmatmul.mubr.bf16.gmra.mrb[56].mxu0 %v9346_v40  ;;  %3912 = vmatprep.subr.bf16.mxu1 %v8492_v6 }
 0x23a   :  { %2820 = vmatmul.mubr.bf16.gmra.mrb[56].mxu1 %v9346_v40  ;;  %2603 = vmatprep.mubr.bf16.mxu0 %v9352_v16  ;;  %v8507_v40 = vld [vmem:[#allocation8 + $0x1e4] ss:$16 sps:$4 sm:$0xff]  }
 0x23b   :  { %2829 = vmatprep.mubr.bf16.mxu1 %v9352_v16  ;;  %3687 = vmatpush1.bf16.msra.mxu0 %v8487_v8  ;;  %v8510_v16 = vld [vmem:[#allocation8 + $0x1ec] ss:$16 sps:$4 sm:$0xff]  }
 0x23c   :  { %3913 = vmatpush1.bf16.msra.mxu1 %v8490_v12  ;;  %3688 = vmatprep.subr.bf16.mxu0 %v8495_v14 }
 0x23d   :  { %3914 = vmatprep.subr.bf16.mxu1 %v8498_v7  ;;  %v8535_v7 = vld [vmem:[#allocation8 + $0x280] ss:$16 sps:$4 sm:$0xff]  }
 0x23f   :  { %3689 = vmatpush1.bf16.msra.mxu0 %v8493_v44  ;;  %v8538_v44 = vld [vmem:[#allocation8 + $0x288] ss:$16 sps:$4 sm:$0xff]  }
 0x240   :  { %3915 = vmatpush1.bf16.msra.mxu1 %v8496_v18  ;;  %3690 = vmatprep.subr.bf16.mxu0 %v8501_v19  ;;  %v8543_v19 = vld [vmem:[#allocation8 + $0x2a4] ss:$16 sps:$4 sm:$0xff]  }
 0x241   :  { %2604 = vmatmul.mubr.bf16.gmra.mrb[60].mxu0 %v9350_v13  ;;  %3916 = vmatprep.subr.bf16.mxu1 %v8504_v20  ;;  %v8546_v20 = vld [vmem:[#allocation8 + $0x2ac] ss:$16 sps:$4 sm:$0xff]  }
 0x242   :  { %2830 = vmatmul.mubr.bf16.gmra.mrb[60].mxu1 %v9350_v13 }
 0x243   :  { %3691 = vmatpush1.bf16.msra.mxu0 %v8499_v21 }
 0x244   :  { %3917 = vmatpush1.bf16.msra.mxu1 %v8502_v22  ;;  %3692 = vmatprep.subr.bf16.mxu0 %v8507_v40  ;;  %v8541_v22 = vld [vmem:[#allocation8 + $0x2a0] ss:$16 sps:$4 sm:$0xff]   ;;  %v8544_v40 = vld [vmem:[#allocation8 + $0x2a8] ss:$16 sps:$4 sm:$0xff]  }
 0x245   :  { %3918 = vmatprep.subr.bf16.mxu1 %v8510_v16 }
 0x247   :  { %3693 = vmatpush1.bf16.msra.mxu0 %v8505_v23 }
 0x248   :  { %3919 = vmatpush1.bf16.msra.mxu1 %v8508_v24  ;;  %3775 = vmatprep.subr.bf16.mxu0 %v8513_v25  ;;  %v8549_v24 = vld [vmem:[#allocation8 + $0x2c4] ss:$16 sps:$4 sm:$0xff]   ;;  %v8552_v25 = vld [vmem:[#allocation8 + $0x2cc] ss:$16 sps:$4 sm:$0xff]  }
 0x249   :  { %4001 = vmatprep.subr.bf16.mxu1 %v8516_v26 }
 0x2dc   :  { %v2535_v27 = vpop.f32.mrb[32].mxu0 }
 0x2dd   :  { %v2761_v28 = vpop.f32.mrb[32].mxu1  ;;  %v2537_v29 = vpop.f32.mrb[33].mxu0 }
 0x2de   :  { %v2763_v53 = vpop.f32.mrb[33].mxu1  ;;  %v2539_v30 = vpop.f32.mrb[34].mxu0 }
 0x2df   :  { %v2840_v13 = vpack.c.bf16 %v2539_v30, %v2535_v27  ;;  %v2765_v31 = vpop.f32.mrb[34].mxu1  ;;  %v2541_v32 = vpop.f32.mrb[35].mxu0 }
 0x2e0   :  { %v9386_v33 = vpack.c.bf16 %v2765_v31, %v2761_v28  ;;  %v2841_v34 = vpack.c.bf16 %v2541_v32, %v2537_v29  ;;  %v2767_v35 = vpop.f32.mrb[35].mxu1  ;;  %v8547_v32 = vld [vmem:[#allocation8 + $0x2c0] ss:$16 sps:$4 sm:$0xff]  }
 0x2e1   :  { %v9388_v36 = vpack.c.bf16 %v2767_v35, %v2763_v53 }
 0x2e2   :  { %3694 = vmatprep.mubr.bf16.mxu0 %v2841_v34  ;;  %3920 = vmatprep.mubr.bf16.mxu1 %v2841_v34  ;;  %v8550_v34 = vld [vmem:[#allocation8 + $0x2c8] ss:$16 sps:$4 sm:$0xff]  }
 0x2e3   :  { %3695 = vmatmul.mubr.bf16.vlgmr.msra.gmra.mrb[64].mxu0 %v2840_v13  ;;  %3921 = vmatmul.mubr.bf16.vlgmr.msra.gmra.mrb[64].mxu1 %v2840_v13 }
 0x2e4   :  { %v2545_v42 = vpop.f32.mrb[36].mxu0  ;;  %3776 = vmatpush1.bf16.msra.mxu0 %v8511_v51  ;;  %4002 = vmatpush1.bf16.msra.mxu1 %v8514_v17  ;;  %v8555_v51 = vld [vmem:[#allocation8 + $0x2e4] ss:$16 sps:$4 sm:$0xff]   ;;  %v8558_v17 = vld [vmem:[#allocation8 + $0x2ec] ss:$16 sps:$4 sm:$0xff]  }
 0x2e5   :  { %v2771_v15 = vpop.f32.mrb[36].mxu1  ;;  %v2547_v45 = vpop.f32.mrb[37].mxu0  ;;  %3777 = vmatprep.subr.bf16.mxu0 %v8519_v37  ;;  %4003 = vmatprep.subr.bf16.mxu1 %v8522_v38  ;;  %v8553_v38 = vld [vmem:[#allocation8 + $0x2e0] ss:$16 sps:$4 sm:$0xff]  }
 0x2e6   :  { %v2773_v50 = vpop.f32.mrb[37].mxu1  ;;  %v2549_v52 = vpop.f32.mrb[38].mxu0 }
 0x2e7   :  { %v2844_v54 = vpack.c.bf16 %v2549_v52, %v2545_v42  ;;  %v2775_v55 = vpop.f32.mrb[38].mxu1  ;;  %v2551_v43 = vpop.f32.mrb[39].mxu0  ;;  %v8556_v42 = vld [vmem:[#allocation8 + $0x2e8] ss:$16 sps:$4 sm:$0xff]  }
 0x2e8   :  { %v9390_v11 = vpack.c.bf16 %v2775_v55, %v2771_v15  ;;  %v2845_v56 = vpack.c.bf16 %v2551_v43, %v2547_v45  ;;  %v2777_v57 = vpop.f32.mrb[39].mxu1  ;;  %3778 = vmatpush1.bf16.msra.mxu0 %v8517_v46  ;;  %4004 = vmatpush1.bf16.msra.mxu1 %v8520_v47  ;;  %v8561_v15 = vld [vmem:[#allocation8 + $0x304] ss:$16 sps:$4 sm:$0xff]   ;;  %v8564_v45 = vld [vmem:[#allocation8 + $0x30c] ss:$16 sps:$4 sm:$0xff]  }
 0x2e9   :  { %v9392_v60 = vpack.c.bf16 %v2777_v57, %v2773_v50  ;;  %3779 = vmatprep.subr.bf16.mxu0 %v8525_v48  ;;  %4005 = vmatprep.subr.bf16.mxu1 %v8528_v49  ;;  %v8559_v57 = vld [vmem:[#allocation8 + $0x300] ss:$16 sps:$4 sm:$0xff]  }
 0x2ea   :  { %3704 = vmatprep.mubr.bf16.mxu0 %v2845_v56  ;;  %3930 = vmatprep.mubr.bf16.mxu1 %v2845_v56 }
 0x2eb   :  { %3705 = vmatmul.mubr.bf16.gmra.mrb[68].mxu0 %v2844_v54  ;;  %3931 = vmatmul.mubr.bf16.gmra.mrb[68].mxu1 %v2844_v54 }
 0x2ec   :  { %v2555_v41 = vpop.f32.mrb[40].mxu0  ;;  %3780 = vmatpush1.bf16.msra.mxu0 %v8523_v58  ;;  %4006 = vmatpush1.bf16.msra.mxu1 %v8526_v59  ;;  %v8562_v58 = vld [vmem:[#allocation8 + $0x308] ss:$16 sps:$4 sm:$0xff]  }
 0x2ed   :  { %v2781_v0 = vpop.f32.mrb[40].mxu1  ;;  %v2557_v1 = vpop.f32.mrb[41].mxu0  ;;  %3781 = vmatprep.subr.bf16.mxu0 %v8531_v61  ;;  %4007 = vmatprep.subr.bf16.mxu1 %v8534_v9  ;;  %v8567_v61 = vld [vmem:[#allocation8 + $0x324] ss:$16 sps:$4 sm:$0xff]   ;;  %v8570_v9 = vld [vmem:[#allocation8 + $0x32c] ss:$16 sps:$4 sm:$0xff]  }
 0x2ee   :  { %v2783_v39 = vpop.f32.mrb[41].mxu1  ;;  %v2559_v10 = vpop.f32.mrb[42].mxu0 }
 0x2ef   :  { %v2848_v4 = vpack.c.bf16 %v2559_v10, %v2555_v41  ;;  %v2785_v5 = vpop.f32.mrb[42].mxu1  ;;  %v2561_v6 = vpop.f32.mrb[43].mxu0 }
 0x2f0   :  { %v9394_v8 = vpack.c.bf16 %v2785_v5, %v2781_v0  ;;  %v2849_v12 = vpack.c.bf16 %v2561_v6, %v2557_v1  ;;  %v2787_v14 = vpop.f32.mrb[43].mxu1  ;;  %3782 = vmatpush1.bf16.msra.mxu0 %v8529_v62  ;;  %4008 = vmatpush1.bf16.msra.mxu1 %v8532_v63  ;;  %v8565_v62 = vld [vmem:[#allocation8 + $0x320] ss:$16 sps:$4 sm:$0xff]   ;;  %v8568_v63 = vld [vmem:[#allocation8 + $0x328] ss:$16 sps:$4 sm:$0xff]  }
 0x2f1   :  { %v9396_v18 = vpack.c.bf16 %v2787_v14, %v2783_v39  ;;  %3783 = vmatprep.subr.bf16.mxu0 %v8537_v2  ;;  %4009 = vmatprep.subr.bf16.mxu1 %v8540_v3  ;;  %v8573_v2 = vld [vmem:[#allocation8 + $0x344] ss:$16 sps:$4 sm:$0xff]   ;;  %v8576_v3 = vld [vmem:[#allocation8 + $0x34c] ss:$16 sps:$4 sm:$0xff]  }
 0x2f2   :  { %3714 = vmatprep.mubr.bf16.mxu0 %v2849_v12  ;;  %3940 = vmatprep.mubr.bf16.mxu1 %v2849_v12 }
 0x2f3   :  { %3715 = vmatmul.mubr.bf16.gmra.mrb[72].mxu0 %v2848_v4  ;;  %3941 = vmatmul.mubr.bf16.gmra.mrb[72].mxu1 %v2848_v4 }
 0x2f4   :  { %v2565_v21 = vpop.f32.mrb[44].mxu0  ;;  %3784 = vmatpush1.bf16.msra.mxu0 %v8535_v7  ;;  %4010 = vmatpush1.bf16.msra.mxu1 %v8538_v44  ;;  %v8571_v44 = vld [vmem:[#allocation8 + $0x340] ss:$16 sps:$4 sm:$0xff]  }
 0x2f5   :  { %v2791_v16 = vpop.f32.mrb[44].mxu1  ;;  %v2567_v23 = vpop.f32.mrb[45].mxu0  ;;  %3785 = vmatprep.subr.bf16.mxu0 %v8543_v19  ;;  %4011 = vmatprep.subr.bf16.mxu1 %v8546_v20  ;;  %v8574_v19 = vld [vmem:[#allocation8 + $0x348] ss:$16 sps:$4 sm:$0xff]  }
 0x2f6   :  { %v2793_v26 = vpop.f32.mrb[45].mxu1  ;;  %v2569_v27 = vpop.f32.mrb[46].mxu0 }
 0x2f7   :  { %v2852_v28 = vpack.c.bf16 %v2569_v27, %v2565_v21  ;;  %v2795_v29 = vpop.f32.mrb[46].mxu1  ;;  %v2571_v53 = vpop.f32.mrb[47].mxu0  ;;  %v8579_v21 = vld [vmem:[#allocation8 + $0x364] ss:$16 sps:$4 sm:$0xff]   ;;  %v8588_v27 = vld [vmem:[#allocation8 + $0x38c] ss:$16 sps:$4 sm:$0xff]  }
 0x2f8   :  { %v9398_v30 = vpack.c.bf16 %v2795_v29, %v2791_v16  ;;  %v2853_v13 = vpack.c.bf16 %v2571_v53, %v2567_v23  ;;  %v2797_v31 = vpop.f32.mrb[47].mxu1  ;;  %3786 = vmatpush1.bf16.msra.mxu0 %v8541_v22  ;;  %4012 = vmatpush1.bf16.msra.mxu1 %v8544_v40  ;;  %v8582_v22 = vld [vmem:[#allocation8 + $0x36c] ss:$16 sps:$4 sm:$0xff]   ;;  %v8577_v16 = vld [vmem:[#allocation8 + $0x360] ss:$16 sps:$4 sm:$0xff]  }
 0x2f9   :  { %v9400_v35 = vpack.c.bf16 %v2797_v31, %v2793_v26  ;;  %3787 = vmatprep.subr.bf16.mxu0 %v8549_v24  ;;  %4013 = vmatprep.subr.bf16.mxu1 %v8552_v25  ;;  %v8580_v23 = vld [vmem:[#allocation8 + $0x368] ss:$16 sps:$4 sm:$0xff]   ;;  %v8585_v26 = vld [vmem:[#allocation8 + $0x384] ss:$16 sps:$4 sm:$0xff]  }
 0x2fa   :  { %3724 = vmatprep.mubr.bf16.mxu0 %v2853_v13  ;;  %3950 = vmatprep.mubr.bf16.mxu1 %v2853_v13 }
 0x2fb   :  { %3725 = vmatmul.mubr.bf16.gmra.mrb[76].mxu0 %v2852_v28  ;;  %3951 = vmatmul.mubr.bf16.gmra.mrb[76].mxu1 %v2852_v28 }
 0x2fc   :  { %v2575_v37 = vpop.f32.mrb[48].mxu0  ;;  %3788 = vmatpush1.bf16.msra.mxu0 %v8547_v32  ;;  %4014 = vmatpush1.bf16.msra.mxu1 %v8550_v34 }
 0x2fd   :  { %v2801_v46 = vpop.f32.mrb[48].mxu1  ;;  %v2577_v47 = vpop.f32.mrb[49].mxu0  ;;  %3789 = vmatprep.subr.bf16.mxu0 %v8555_v51  ;;  %4015 = vmatprep.subr.bf16.mxu1 %v8558_v17  ;;  %v8583_v17 = vld [vmem:[#allocation8 + $0x380] ss:$16 sps:$4 sm:$0xff]  }
 0x2fe   :  { %v2803_v48 = vpop.f32.mrb[49].mxu1  ;;  %v2579_v49 = vpop.f32.mrb[50].mxu0 }
 0x2ff   :  { %v2856_v50 = vpack.c.bf16 %v2579_v49, %v2575_v37  ;;  %v2805_v52 = vpop.f32.mrb[50].mxu1  ;;  %v2581_v54 = vpop.f32.mrb[51].mxu0  ;;  %v8586_v37 = vld [vmem:[#allocation8 + $0x388] ss:$16 sps:$4 sm:$0xff]  }
 0x300   :  { %v9402_v55 = vpack.c.bf16 %v2805_v52, %v2801_v46  ;;  %v2857_v43 = vpack.c.bf16 %v2581_v54, %v2577_v47  ;;  %v2807_v56 = vpop.f32.mrb[51].mxu1  ;;  %3790 = vmatpush1.bf16.msra.mxu0 %v8553_v38  ;;  %4016 = vmatpush1.bf16.msra.mxu1 %v8556_v42  ;;  %v8591_v42 = vld [vmem:[#allocation8 + $0x3a4] ss:$16 sps:$4 sm:$0xff]   ;;  %v8594_v46 = vld [vmem:[#allocation8 + $0x3ac] ss:$16 sps:$4 sm:$0xff]  }
 0x301   :  { %v9404_v59 = vpack.c.bf16 %v2807_v56, %v2803_v48  ;;  %3791 = vmatprep.subr.bf16.mxu0 %v8561_v15  ;;  %4017 = vmatprep.subr.bf16.mxu1 %v8564_v45  ;;  %v8589_v15 = vld [vmem:[#allocation8 + $0x3a0] ss:$16 sps:$4 sm:$0xff]   ;;  %v8592_v45 = vld [vmem:[#allocation8 + $0x3a8] ss:$16 sps:$4 sm:$0xff]   ;;  %v8600_v52 = vld [vmem:[#allocation8 + $0x3cc] ss:$16 sps:$4 sm:$0xff]  }
 0x302   :  { %3734 = vmatprep.mubr.bf16.mxu0 %v2857_v43  ;;  %3960 = vmatprep.mubr.bf16.mxu1 %v2857_v43 }
 0x303   :  { %3735 = vmatmul.mubr.bf16.gmra.mrb[80].mxu0 %v2856_v50  ;;  %3961 = vmatmul.mubr.bf16.gmra.mrb[80].mxu1 %v2856_v50  ;;  %v8597_v50 = vld [vmem:[#allocation8 + $0x3c4] ss:$16 sps:$4 sm:$0xff]  }
 0x304   :  { %v2585_v41 = vpop.f32.mrb[52].mxu0  ;;  %3792 = vmatpush1.bf16.msra.mxu0 %v8559_v57  ;;  %4018 = vmatpush1.bf16.msra.mxu1 %v8562_v58 }
 0x305   :  { %v2811_v0 = vpop.f32.mrb[52].mxu1  ;;  %v2587_v1 = vpop.f32.mrb[53].mxu0  ;;  %3793 = vmatprep.subr.bf16.mxu0 %v8567_v61  ;;  %4019 = vmatprep.subr.bf16.mxu1 %v8570_v9 }
 0x306   :  { %v2813_v39 = vpop.f32.mrb[53].mxu1  ;;  %v2589_v10 = vpop.f32.mrb[54].mxu0 }
 0x307   :  { %v2860_v4 = vpack.c.bf16 %v2589_v10, %v2585_v41  ;;  %v2815_v5 = vpop.f32.mrb[54].mxu1  ;;  %v2591_v6 = vpop.f32.mrb[55].mxu0  ;;  %v8609_v10 = vld [vmem:[#allocation10 + $0x4] ss:$16 sps:$4 sm:$0xff]  }
 0x308   :  { %v9406_v12 = vpack.c.bf16 %v2815_v5, %v2811_v0  ;;  %v2861_v14 = vpack.c.bf16 %v2591_v6, %v2587_v1  ;;  %v2817_v7 = vpop.f32.mrb[55].mxu1  ;;  %3794 = vmatpush1.bf16.msra.mxu0 %v8565_v62  ;;  %4020 = vmatpush1.bf16.msra.mxu1 %v8568_v63  ;;  %v8595_v62 = vld [vmem:[#allocation8 + $0x3c0] ss:$16 sps:$4 sm:$0xff]   ;;  %v8598_v0 = vld [vmem:[#allocation8 + $0x3c8] ss:$16 sps:$4 sm:$0xff]  }
 0x309   :  { %v9408_v20 = vpack.c.bf16 %v2817_v7, %v2813_v39  ;;  %3795 = vmatprep.subr.bf16.mxu0 %v8573_v2  ;;  %4021 = vmatprep.subr.bf16.mxu1 %v8576_v3  ;;  %v8603_v1 = vld [vmem:[#allocation8 + $0x3e4] ss:$16 sps:$4 sm:$0xff]   ;;  %v8606_v2 = vld [vmem:[#allocation8 + $0x3ec] ss:$16 sps:$4 sm:$0xff]   ;;  %v8601_v3 = vld [vmem:[#allocation8 + $0x3e0] ss:$16 sps:$4 sm:$0xff]  }
 0x30a   :  { %3744 = vmatprep.mubr.bf16.mxu0 %v2861_v14  ;;  %3970 = vmatprep.mubr.bf16.mxu1 %v2861_v14  ;;  %v8604_v39 = vld [vmem:[#allocation8 + $0x3e8] ss:$16 sps:$4 sm:$0xff]   ;;  %v8607_v5 = vld [vmem:[#allocation10] ss:$16 sps:$4 sm:$0xff]   ;;  %v8615_v14 = vld [vmem:[#allocation10 + $0x24] ss:$16 sps:$4 sm:$0xff]  }
 0x30b   :  { %3745 = vmatmul.mubr.bf16.gmra.mrb[84].mxu0 %v2860_v4  ;;  %3971 = vmatmul.mubr.bf16.gmra.mrb[84].mxu1 %v2860_v4  ;;  %v8612_v4 = vld [vmem:[#allocation10 + $0xc] ss:$16 sps:$4 sm:$0xff]   ;;  %v8610_v6 = vld [vmem:[#allocation10 + $0x8] ss:$16 sps:$4 sm:$0xff]  }
 0x30c   :  { %v2595_v40 = vpop.f32.mrb[56].mxu0  ;;  %3796 = vmatpush1.bf16.msra.mxu0 %v8571_v44  ;;  %4022 = vmatpush1.bf16.msra.mxu1 %v8574_v19  ;;  %v8618_v7 = vld [vmem:[#allocation10 + $0x2c] ss:$16 sps:$4 sm:$0xff]   ;;  %v8616_v44 = vld [vmem:[#allocation10 + $0x28] ss:$16 sps:$4 sm:$0xff]  }
 0x30d   :  { %v2821_v24 = vpop.f32.mrb[56].mxu1  ;;  %v2597_v25 = vpop.f32.mrb[57].mxu0  ;;  %3797 = vmatprep.subr.bf16.mxu0 %v8579_v21  ;;  %4023 = vmatprep.subr.bf16.mxu1 %v8582_v22  ;;  %v8621_v19 = vld [vmem:[#allocation10 + $0x44] ss:$16 sps:$4 sm:$0xff]   ;;  %v8624_v21 = vld [vmem:[#allocation10 + $0x4c] ss:$16 sps:$4 sm:$0xff]  }
 0x30e   :  { %v2823_v28 = vpop.f32.mrb[57].mxu1  ;;  %v2599_v29 = vpop.f32.mrb[58].mxu0  ;;  %v8619_v22 = vld [vmem:[#allocation10 + $0x40] ss:$16 sps:$4 sm:$0xff]  }
 0x30f   :  { %v2864_v53 = vpack.c.bf16 %v2599_v29, %v2595_v40  ;;  %v2825_v13 = vpop.f32.mrb[58].mxu1  ;;  %v2601_v31 = vpop.f32.mrb[59].mxu0  ;;  %v8622_v40 = vld [vmem:[#allocation10 + $0x48] ss:$16 sps:$4 sm:$0xff]  }
 0x310   :  { %v9410_v32 = vpack.c.bf16 %v2825_v13, %v2821_v24  ;;  %v2865_v34 = vpack.c.bf16 %v2601_v31, %v2597_v25  ;;  %v2827_v51 = vpop.f32.mrb[59].mxu1  ;;  %3798 = vmatpush1.bf16.msra.mxu0 %v8577_v16  ;;  %4024 = vmatpush1.bf16.msra.mxu1 %v8580_v23  ;;  %v8627_v16 = vld [vmem:[#allocation10 + $0x64] ss:$16 sps:$4 sm:$0xff]   ;;  %v8628_v23 = vld [vmem:[#allocation10 + $0x68] ss:$16 sps:$4 sm:$0xff]  }
 0x311   :  { %v9412_v38 = vpack.c.bf16 %v2827_v51, %v2823_v28  ;;  %3799 = vmatprep.subr.bf16.mxu0 %v8585_v26  ;;  %4025 = vmatprep.subr.bf16.mxu1 %v8588_v27  ;;  %v8633_v24 = vld [vmem:[#allocation10 + $0x84] ss:$16 sps:$4 sm:$0xff]   ;;  %v8636_v25 = vld [vmem:[#allocation10 + $0x8c] ss:$16 sps:$4 sm:$0xff]   ;;  %v8631_v26 = vld [vmem:[#allocation10 + $0x80] ss:$16 sps:$4 sm:$0xff]  }
 0x312   :  { %3754 = vmatprep.mubr.bf16.mxu0 %v2865_v34  ;;  %3980 = vmatprep.mubr.bf16.mxu1 %v2865_v34  ;;  %v8634_v27 = vld [vmem:[#allocation10 + $0x88] ss:$16 sps:$4 sm:$0xff]   ;;  %v8639_v28 = vld [vmem:[#allocation10 + $0xa4] ss:$16 sps:$4 sm:$0xff]   ;;  %v8648_v13 = vld [vmem:[#allocation10 + $0xcc] ss:$16 sps:$4 sm:$0xff]  }
 0x313   :  { %3755 = vmatmul.mubr.bf16.gmra.mrb[88].mxu0 %v2864_v53  ;;  %3981 = vmatmul.mubr.bf16.gmra.mrb[88].mxu1 %v2864_v53  ;;  %v8640_v29 = vld [vmem:[#allocation10 + $0xa8] ss:$16 sps:$4 sm:$0xff]   ;;  %v8645_v53 = vld [vmem:[#allocation10 + $0xc4] ss:$16 sps:$4 sm:$0xff]   ;;  %v8643_v31 = vld [vmem:[#allocation10 + $0xc0] ss:$16 sps:$4 sm:$0xff]  }
 0x314   :  { %v2605_v47 = vpop.f32.mrb[60].mxu0  ;;  %3800 = vmatpush1.bf16.msra.mxu0 %v8583_v17  ;;  %4026 = vmatpush1.bf16.msra.mxu1 %v8586_v37  ;;  %v8646_v34 = vld [vmem:[#allocation10 + $0xc8] ss:$16 sps:$4 sm:$0xff]   ;;  %v8651_v51 = vld [vmem:[#allocation10 + $0xe4] ss:$16 sps:$4 sm:$0xff]  }
 0x315   :  { %v2831_v48 = vpop.f32.mrb[60].mxu1  ;;  %v2607_v49 = vpop.f32.mrb[61].mxu0  ;;  %3801 = vmatprep.subr.bf16.mxu0 %v8591_v42  ;;  %4027 = vmatprep.subr.bf16.mxu1 %v8594_v46  ;;  %v8652_v17 = vld [vmem:[#allocation10 + $0xe8] ss:$16 sps:$4 sm:$0xff]   ;;  %v8657_v37 = vld [vmem:[#allocation10 + $0x104] ss:$16 sps:$4 sm:$0xff]  }
 0x316   :  { %v2833_v54 = vpop.f32.mrb[61].mxu1  ;;  %v2609_v43 = vpop.f32.mrb[62].mxu0  ;;  %v8660_v42 = vld [vmem:[#allocation10 + $0x10c] ss:$16 sps:$4 sm:$0xff]   ;;  %v8655_v46 = vld [vmem:[#allocation10 + $0x100] ss:$16 sps:$4 sm:$0xff]  }
 0x317   :  { %v2868_v56 = vpack.c.bf16 %v2609_v43, %v2605_v47  ;;  %v2835_v57 = vpop.f32.mrb[62].mxu1  ;;  %v2611_v58 = vpop.f32.mrb[63].mxu0  ;;  %v8658_v47 = vld [vmem:[#allocation10 + $0x108] ss:$16 sps:$4 sm:$0xff]  }
 0x318   :  { %v9414_v61 = vpack.c.bf16 %v2835_v57, %v2831_v48  ;;  %v2869_v9 = vpack.c.bf16 %v2611_v58, %v2607_v49  ;;  %v2837_v41 = vpop.f32.mrb[63].mxu1  ;;  %3802 = vmatpush1.bf16.msra.mxu0 %v8589_v15  ;;  %4028 = vmatpush1.bf16.msra.mxu1 %v8592_v45  ;;  %v8663_v15 = vld [vmem:[#allocation10 + $0x124] ss:$16 sps:$4 sm:$0xff]   ;;  %v8664_v45 = vld [vmem:[#allocation10 + $0x128] ss:$16 sps:$4 sm:$0xff]  }
 0x319   :  { %v9416_v63 = vpack.c.bf16 %v2837_v41, %v2833_v54  ;;  %3803 = vmatprep.subr.bf16.mxu0 %v8597_v50  ;;  %4029 = vmatprep.subr.bf16.mxu1 %v8600_v52  ;;  %v8669_v48 = vld [vmem:[#allocation10 + $0x144] ss:$16 sps:$4 sm:$0xff]   ;;  %v8672_v49 = vld [vmem:[#allocation10 + $0x14c] ss:$16 sps:$4 sm:$0xff]   ;;  %v8667_v50 = vld [vmem:[#allocation10 + $0x140] ss:$16 sps:$4 sm:$0xff]  }
 0x31a   :  { %3764 = vmatprep.mubr.bf16.mxu0 %v2869_v9  ;;  %3990 = vmatprep.mubr.bf16.mxu1 %v2869_v9  ;;  %v8670_v52 = vld [vmem:[#allocation10 + $0x148] ss:$16 sps:$4 sm:$0xff]   ;;  %v8675_v54 = vld [vmem:[#allocation10 + $0x164] ss:$16 sps:$4 sm:$0xff]   ;;  %v8684_v57 = vld [vmem:[#allocation10 + $0x18c] ss:$16 sps:$4 sm:$0xff]  }
 0x31b   :  { %3765 = vmatmul.mubr.bf16.gmra.mrb[92].mxu0 %v2868_v56  ;;  %3991 = vmatmul.mubr.bf16.gmra.mrb[92].mxu1 %v2868_v56  ;;  %v8676_v43 = vld [vmem:[#allocation10 + $0x168] ss:$16 sps:$4 sm:$0xff]   ;;  %v8681_v56 = vld [vmem:[#allocation10 + $0x184] ss:$16 sps:$4 sm:$0xff]   ;;  %v8679_v58 = vld [vmem:[#allocation10 + $0x180] ss:$16 sps:$4 sm:$0xff]  }
 0x31c   :  { %3804 = vmatpush1.bf16.msra.mxu0 %v8595_v62  ;;  %3807 = vmatprep.mubr.bf16.mxu0 %v9388_v36  ;;  %v8682_v9 = vld [vmem:[#allocation10 + $0x188] ss:$16 sps:$4 sm:$0xff]   ;;  %v8687_v41 = vld [vmem:[#allocation10 + $0x1a4] ss:$16 sps:$4 sm:$0xff]  }
 0x31d   :  { %4030 = vmatpush1.bf16.msra.mxu1 %v8598_v0  ;;  %4033 = vmatprep.mubr.bf16.mxu1 %v9388_v36  ;;  %v8613_v36 = vld [vmem:[#allocation10 + $0x20] ss:$16 sps:$4 sm:$0xff]   ;;  %v8688_v62 = vld [vmem:[#allocation10 + $0x1a8] ss:$16 sps:$4 sm:$0xff]   ;;  %v8693_v0 = vld [vmem:[#allocation10 + $0x1c4] ss:$16 sps:$4 sm:$0xff]  }
 0x31e   :  { %3805 = vmatprep.subr.bf16.mxu0 %v8603_v1  ;;  %4031 = vmatprep.subr.bf16.mxu1 %v8606_v2  ;;  %v8696_v1 = vld [vmem:[#allocation10 + $0x1cc] ss:$16 sps:$4 sm:$0xff]   ;;  %v8691_v2 = vld [vmem:[#allocation10 + $0x1c0] ss:$16 sps:$4 sm:$0xff]  }
 0x320   :  { %3806 = vmatpush1.bf16.msra.mxu0 %v8601_v3  ;;  %v8702_v3 = vld [vmem:[#allocation10 + $0x1ec] ss:$16 sps:$4 sm:$0xff]  }
 0x321   :  { %4032 = vmatpush1.bf16.msra.mxu1 %v8604_v39  ;;  %4978 = vmatprep.subr.bf16.mxu0 %v8609_v10  ;;  %v8697_v39 = vld [vmem:[#allocation10 + $0x1e0] ss:$16 sps:$4 sm:$0xff]   ;;  %v8700_v10 = vld [vmem:[#allocation10 + $0x1e8] ss:$16 sps:$4 sm:$0xff]  }
 0x322   :  { %5204 = vmatprep.subr.bf16.mxu1 %v8612_v4  ;;  %v8705_v4 = vld [vmem:[#allocation10 + $0x204] ss:$16 sps:$4 sm:$0xff]  }
 0x323   :  { %3808 = vmatmul.mubr.bf16.vlgmr.msra.gmra.mrb[64].mxu0 %v9386_v33 }
 0x324   :  { %4034 = vmatmul.mubr.bf16.vlgmr.msra.gmra.mrb[64].mxu1 %v9386_v33  ;;  %3817 = vmatprep.mubr.bf16.mxu0 %v9392_v60  ;;  %v8630_v33 = vld [vmem:[#allocation10 + $0x6c] ss:$16 sps:$4 sm:$0xff]  }
 0x325   :  { %4043 = vmatprep.mubr.bf16.mxu1 %v9392_v60  ;;  %4979 = vmatpush1.bf16.msra.mxu0 %v8607_v5  ;;  %v8625_v60 = vld [vmem:[#allocation10 + $0x60] ss:$16 sps:$4 sm:$0xff]   ;;  %v8708_v5 = vld [vmem:[#allocation10 + $0x20c] ss:$16 sps:$4 sm:$0xff]  }
 0x326   :  { %5205 = vmatpush1.bf16.msra.mxu1 %v8610_v6  ;;  %4980 = vmatprep.subr.bf16.mxu0 %v8615_v14 }
 0x327   :  { %5206 = vmatprep.subr.bf16.mxu1 %v8618_v7  ;;  %v3000_v7 = vld [vmem:[%s9758_s4] sm:$0xf] }
 0x329   :  { %4981 = vmatpush1.bf16.msra.mxu0 %v8613_v36 }
 0x32a   :  { %5207 = vmatpush1.bf16.msra.mxu1 %v8616_v44  ;;  %4982 = vmatprep.subr.bf16.mxu0 %v8621_v19 }
 0x32b   :  { %3818 = vmatmul.mubr.bf16.gmra.mrb[68].mxu0 %v9390_v11  ;;  %5208 = vmatprep.subr.bf16.mxu1 %v8624_v21 }
 0x32c   :  { %4044 = vmatmul.mubr.bf16.gmra.mrb[68].mxu1 %v9390_v11  ;;  %3827 = vmatprep.mubr.bf16.mxu0 %v9396_v18  ;;  %v8642_v11 = vld [vmem:[#allocation10 + $0xac] ss:$16 sps:$4 sm:$0xff]  }
 0x32d   :  { %4053 = vmatprep.mubr.bf16.mxu1 %v9396_v18  ;;  %4983 = vmatpush1.bf16.msra.mxu0 %v8619_v22  ;;  %v8637_v18 = vld [vmem:[#allocation10 + $0xa0] ss:$16 sps:$4 sm:$0xff]  }
 0x32e   :  { %5209 = vmatpush1.bf16.msra.mxu1 %v8622_v40  ;;  %4984 = vmatprep.subr.bf16.mxu0 %v8627_v16 }
 0x32f   :  { %5210 = vmatprep.subr.bf16.mxu1 %v8630_v33 }
 0x331   :  { %4985 = vmatpush1.bf16.msra.mxu0 %v8625_v60 }
 0x332   :  { %5211 = vmatpush1.bf16.msra.mxu1 %v8628_v23  ;;  %4986 = vmatprep.subr.bf16.mxu0 %v8633_v24 }
 0x333   :  { %3828 = vmatmul.mubr.bf16.gmra.mrb[72].mxu0 %v9394_v8  ;;  %5212 = vmatprep.subr.bf16.mxu1 %v8636_v25 }
 0x334   :  { %4054 = vmatmul.mubr.bf16.gmra.mrb[72].mxu1 %v9394_v8  ;;  %3837 = vmatprep.mubr.bf16.mxu0 %v9400_v35  ;;  %v8654_v8 = vld [vmem:[#allocation10 + $0xec] ss:$16 sps:$4 sm:$0xff]  }
 0x335   :  { %4063 = vmatprep.mubr.bf16.mxu1 %v9400_v35  ;;  %4987 = vmatpush1.bf16.msra.mxu0 %v8631_v26  ;;  %v8649_v35 = vld [vmem:[#allocation10 + $0xe0] ss:$16 sps:$4 sm:$0xff]  }
 0x336   :  { %5213 = vmatpush1.bf16.msra.mxu1 %v8634_v27  ;;  %4988 = vmatprep.subr.bf16.mxu0 %v8639_v28 }
 0x337   :  { %5214 = vmatprep.subr.bf16.mxu1 %v8642_v11 }
 0x339   :  { %4989 = vmatpush1.bf16.msra.mxu0 %v8637_v18 }
 0x33a   :  { %5215 = vmatpush1.bf16.msra.mxu1 %v8640_v29  ;;  %4990 = vmatprep.subr.bf16.mxu0 %v8645_v53 }
 0x33b   :  { %3838 = vmatmul.mubr.bf16.gmra.mrb[76].mxu0 %v9398_v30  ;;  %5216 = vmatprep.subr.bf16.mxu1 %v8648_v13 }
 0x33c   :  { %4064 = vmatmul.mubr.bf16.gmra.mrb[76].mxu1 %v9398_v30  ;;  %3847 = vmatprep.mubr.bf16.mxu0 %v9404_v59  ;;  %v8666_v30 = vld [vmem:[#allocation10 + $0x12c] ss:$16 sps:$4 sm:$0xff]  }
 0x33d   :  { %4073 = vmatprep.mubr.bf16.mxu1 %v9404_v59  ;;  %4991 = vmatpush1.bf16.msra.mxu0 %v8643_v31  ;;  %v8661_v59 = vld [vmem:[#allocation10 + $0x120] ss:$16 sps:$4 sm:$0xff]  }
 0x33e   :  { %5217 = vmatpush1.bf16.msra.mxu1 %v8646_v34  ;;  %4992 = vmatprep.subr.bf16.mxu0 %v8651_v51 }
 0x33f   :  { %5218 = vmatprep.subr.bf16.mxu1 %v8654_v8 }
 0x341   :  { %4993 = vmatpush1.bf16.msra.mxu0 %v8649_v35 }
 0x342   :  { %5219 = vmatpush1.bf16.msra.mxu1 %v8652_v17  ;;  %4994 = vmatprep.subr.bf16.mxu0 %v8657_v37 }
 0x343   :  { %3848 = vmatmul.mubr.bf16.gmra.mrb[80].mxu0 %v9402_v55  ;;  %5220 = vmatprep.subr.bf16.mxu1 %v8660_v42 }
 0x344   :  { %4074 = vmatmul.mubr.bf16.gmra.mrb[80].mxu1 %v9402_v55  ;;  %3857 = vmatprep.mubr.bf16.mxu0 %v9408_v20  ;;  %v8678_v55 = vld [vmem:[#allocation10 + $0x16c] ss:$16 sps:$4 sm:$0xff]  }
 0x345   :  { %4083 = vmatprep.mubr.bf16.mxu1 %v9408_v20  ;;  %4995 = vmatpush1.bf16.msra.mxu0 %v8655_v46  ;;  %v8673_v20 = vld [vmem:[#allocation10 + $0x160] ss:$16 sps:$4 sm:$0xff]  }
 0x346   :  { %5221 = vmatpush1.bf16.msra.mxu1 %v8658_v47  ;;  %4996 = vmatprep.subr.bf16.mxu0 %v8663_v15 }
 0x347   :  { %5222 = vmatprep.subr.bf16.mxu1 %v8666_v30 }
 0x349   :  { %4997 = vmatpush1.bf16.msra.mxu0 %v8661_v59 }
 0x34a   :  { %5223 = vmatpush1.bf16.msra.mxu1 %v8664_v45  ;;  %4998 = vmatprep.subr.bf16.mxu0 %v8669_v48 }
 0x34b   :  { %3858 = vmatmul.mubr.bf16.gmra.mrb[84].mxu0 %v9406_v12  ;;  %5224 = vmatprep.subr.bf16.mxu1 %v8672_v49  ;;  %v8703_v49 = vld [vmem:[#allocation10 + $0x200] ss:$16 sps:$4 sm:$0xff]  }
 0x34c   :  { %4084 = vmatmul.mubr.bf16.gmra.mrb[84].mxu1 %v9406_v12  ;;  %3867 = vmatprep.mubr.bf16.mxu0 %v9412_v38  ;;  %v8690_v12 = vld [vmem:[#allocation10 + $0x1ac] ss:$16 sps:$4 sm:$0xff]  }
 0x34d   :  { %4093 = vmatprep.mubr.bf16.mxu1 %v9412_v38  ;;  %4999 = vmatpush1.bf16.msra.mxu0 %v8667_v50  ;;  %v8685_v38 = vld [vmem:[#allocation10 + $0x1a0] ss:$16 sps:$4 sm:$0xff]   ;;  %v8706_v50 = vld [vmem:[#allocation10 + $0x208] ss:$16 sps:$4 sm:$0xff]  }
 0x34e   :  { %5225 = vmatpush1.bf16.msra.mxu1 %v8670_v52  ;;  %5000 = vmatprep.subr.bf16.mxu0 %v8675_v54 }
 0x34f   :  { %5226 = vmatprep.subr.bf16.mxu1 %v8678_v55 }
 0x351   :  { %5001 = vmatpush1.bf16.msra.mxu0 %v8673_v20 }
 0x352   :  { %5227 = vmatpush1.bf16.msra.mxu1 %v8676_v43  ;;  %5002 = vmatprep.subr.bf16.mxu0 %v8681_v56  ;;  %v8711_v43 = vld [vmem:[#allocation10 + $0x224] ss:$16 sps:$4 sm:$0xff]   ;;  %v8714_v56 = vld [vmem:[#allocation10 + $0x22c] ss:$16 sps:$4 sm:$0xff]  }
 0x353   :  { %3868 = vmatmul.mubr.bf16.gmra.mrb[88].mxu0 %v9410_v32  ;;  %5228 = vmatprep.subr.bf16.mxu1 %v8684_v57 }
 0x354   :  { %4094 = vmatmul.mubr.bf16.gmra.mrb[88].mxu1 %v9410_v32  ;;  %3877 = vmatprep.mubr.bf16.mxu0 %v9416_v63  ;;  %v8694_v32 = vld [vmem:[#allocation10 + $0x1c8] ss:$16 sps:$4 sm:$0xff]  }
 0x355   :  { %4103 = vmatprep.mubr.bf16.mxu1 %v9416_v63  ;;  %5003 = vmatpush1.bf16.msra.mxu0 %v8679_v58  ;;  %v8699_v63 = vld [vmem:[#allocation10 + $0x1e4] ss:$16 sps:$4 sm:$0xff]  }
 0x356   :  { %5229 = vmatpush1.bf16.msra.mxu1 %v8682_v9  ;;  %5004 = vmatprep.subr.bf16.mxu0 %v8687_v41 }
 0x357   :  { %5230 = vmatprep.subr.bf16.mxu1 %v8690_v12 }
 0x359   :  { %5005 = vmatpush1.bf16.msra.mxu0 %v8685_v38 }
 0x35a   :  { %5231 = vmatpush1.bf16.msra.mxu1 %v8688_v62  ;;  %5006 = vmatprep.subr.bf16.mxu0 %v8693_v0 }
 0x35b   :  { %3878 = vmatmul.mubr.bf16.gmra.mrb[92].mxu0 %v9414_v61  ;;  %5232 = vmatprep.subr.bf16.mxu1 %v8696_v1 }
 0x35c   :  { %4104 = vmatmul.mubr.bf16.gmra.mrb[92].mxu1 %v9414_v61  ;;  %v3002_v61 = vlaneseq }
 0x35d   :  { %5007 = vmatpush1.bf16.msra.mxu0 %v8691_v2 }
 0x35e   :  { %5233 = vmatpush1.bf16.msra.mxu1 %v8694_v32  ;;  %5008 = vmatprep.subr.bf16.mxu0 %v8699_v63  ;;  %v9450_v6 = vshrl.u32 %v3002_v61, 7  ;;  %v8709_v63 = vld [vmem:[#allocation10 + $0x220] ss:$16 sps:$4 sm:$0xff]   ;;  %v8720_v61 = vld [vmem:[#allocation10 + $0x24c] ss:$16 sps:$4 sm:$0xff]  }
 0x35f   :  { %5234 = vmatprep.subr.bf16.mxu1 %v8702_v3  ;;  %v8712_v3 = vld [vmem:[#allocation10 + $0x228] ss:$16 sps:$4 sm:$0xff]  }
 0x360   :  { %v3004_v14 = vsub.s32 0, %v9450_v6  ;;  %v3012_v36 = vsub.s32 2, %v9450_v6  ;;  %v3008_v44 = vsub.s32 1, %v9450_v6  ;;  %v3016_v19 = vsub.s32 3, %v9450_v6 }
 0x361   :  { %5009 = vmatpush1.bf16.msra.mxu0 %v8697_v39 }
 0x362   :  { %5235 = vmatpush1.bf16.msra.mxu1 %v8700_v10  ;;  %5091 = vmatprep.subr.bf16.mxu0 %v8705_v4  ;;  %v9461_v21 = vrot.slane %v3000_v7, %v3004_v14  ;;  %v9465_v22 = vrot.slane %v3000_v7, %v3012_v36  ;;  %v9469_v40 = vrot.slane %v3000_v7, %v3008_v44 }
 0x363   :  { %5317 = vmatprep.subr.bf16.mxu1 %v8708_v5  ;;  %v9473_v16 = vrot.slane %v3000_v7, %v3016_v19  ;;  %v8717_v5 = vld [vmem:[#allocation10 + $0x244] ss:$16 sps:$4 sm:$0xff]  }
 0x3f6   :  { %v3809_v33 = vpop.f32.mrb[64].mxu0 }
 0x3f7   :  { %v7524_v60 = vadd.f32 %v3809_v33, %v9461_v21  ;;  %v4035_v23 = vpop.f32.mrb[64].mxu1  ;;  %v3811_v24 = vpop.f32.mrb[65].mxu0 }
 0x3f8   :  { %v7556_v25 = vadd.f32 %v4035_v23, %v9465_v22  ;;  %v7525_v26 = vadd.f32 %v3811_v24, %v9469_v40  ;;  %v4037_v27 = vpop.f32.mrb[65].mxu1  ;;  %v3813_v28 = vpop.f32.mrb[66].mxu0 }
 0x3f9   :  { %v7557_v11 = vadd.f32 %v4037_v27, %v9473_v16  ;;  %v7526_v18 = vadd.f32 %v3813_v28, %v9461_v21  ;;  %v4039_v29 = vpop.f32.mrb[66].mxu1  ;;  %v3815_v53 = vpop.f32.mrb[67].mxu0  ;;  %v4114_v51 = vmax.f32 %v7524_v60, 0.0 }
 0x3fa   :  { %v7558_v13 = vadd.f32 %v4039_v29, %v9465_v22  ;;  %v7527_v31 = vadd.f32 %v3815_v53, %v9469_v40  ;;  %v4041_v34 = vpop.f32.mrb[67].mxu1  ;;  %v4116_v17 = vmax.f32 %v7556_v25, 0.0  ;;  %v4115_v37 = vmax.f32 %v7525_v26, 0.0  ;;  %v8718_v29 = vld [vmem:[#allocation10 + $0x248] ss:$16 sps:$4 sm:$0xff]  }
 0x3fb   :  { %v4118_v8 = vmax.f32 %v7526_v18, 0.0  ;;  %v7559_v35 = vadd.f32 %v4041_v34, %v9473_v16  ;;  %v4117_v47 = vmax.f32 %v7557_v11, 0.0  ;;  %v8715_v18 = vld [vmem:[#allocation10 + $0x240] ss:$16 sps:$4 sm:$0xff]  }
 0x3fc   :  { %v4120_v42 = vmax.f32 %v7558_v13, 0.0  ;;  %v4119_v46 = vmax.f32 %v7527_v31, 0.0 }
 0x3fd   :  { %v4178_v15 = vpack.c.bf16 %v4118_v8, %v4114_v51  ;;  %v4121_v30 = vmax.f32 %v7559_v35, 0.0  ;;  %v8723_v51 = vld [vmem:[#allocation10 + $0x264] ss:$16 sps:$4 sm:$0xff]   ;;  %v8726_v8 = vld [vmem:[#allocation10 + $0x26c] ss:$16 sps:$4 sm:$0xff]  }
 0x3fe   :  { %v9483_v59 = vpack.c.bf16 %v4120_v42, %v4116_v17  ;;  %v4179_v45 = vpack.c.bf16 %v4119_v46, %v4115_v37  ;;  %v3819_v48 = vpop.f32.mrb[68].mxu0 }
 0x3ff   :  { %v9485_v52 = vpack.c.bf16 %v4121_v30, %v4117_v47  ;;  %v7528_v54 = vadd.f32 %v3819_v48, %v9461_v21  ;;  %v4045_v55 = vpop.f32.mrb[68].mxu1  ;;  %v3821_v20 = vpop.f32.mrb[69].mxu0 }
 0x400   :  { %v7560_v57 = vadd.f32 %v4045_v55, %v9465_v22  ;;  %v7529_v58 = vadd.f32 %v3821_v20, %v9469_v40  ;;  %v4047_v9 = vpop.f32.mrb[69].mxu1  ;;  %v3823_v41 = vpop.f32.mrb[70].mxu0  ;;  %5010 = vmatprep.mubr.bf16.mxu0 %v4179_v45  ;;  %5236 = vmatprep.mubr.bf16.mxu1 %v4179_v45 }
 0x401   :  { %v7561_v12 = vadd.f32 %v4047_v9, %v9473_v16  ;;  %v7530_v38 = vadd.f32 %v3823_v41, %v9461_v21  ;;  %v4049_v62 = vpop.f32.mrb[70].mxu1  ;;  %v3825_v0 = vpop.f32.mrb[71].mxu0  ;;  %5011 = vmatmul.mubr.bf16.vlgmr.msra.gmra.mrb[96].mxu0 %v4178_v15  ;;  %5237 = vmatmul.mubr.bf16.vlgmr.msra.gmra.mrb[96].mxu1 %v4178_v15  ;;  %v4122_v39 = vmax.f32 %v7528_v54, 0.0  ;;  %v8724_v54 = vld [vmem:[#allocation10 + $0x268] ss:$16 sps:$4 sm:$0xff]  }
 0x402   :  { %v7562_v1 = vadd.f32 %v4049_v62, %v9465_v22  ;;  %v7531_v2 = vadd.f32 %v3825_v0, %v9469_v40  ;;  %v4051_v32 = vpop.f32.mrb[71].mxu1  ;;  %5092 = vmatpush1.bf16.msra.mxu0 %v8703_v49  ;;  %5318 = vmatpush1.bf16.msra.mxu1 %v8706_v50  ;;  %v4124_v7 = vmax.f32 %v7560_v57, 0.0  ;;  %v4123_v33 = vmax.f32 %v7529_v58, 0.0  ;;  %v8721_v50 = vld [vmem:[#allocation10 + $0x260] ss:$16 sps:$4 sm:$0xff]  }
 0x403   :  { %v4126_v10 = vmax.f32 %v7530_v38, 0.0  ;;  %v7563_v4 = vadd.f32 %v4051_v32, %v9473_v16  ;;  %5093 = vmatprep.subr.bf16.mxu0 %v8711_v43  ;;  %5319 = vmatprep.subr.bf16.mxu1 %v8714_v56  ;;  %v4125_v24 = vmax.f32 %v7561_v12, 0.0  ;;  %v8729_v56 = vld [vmem:[#allocation10 + $0x284] ss:$16 sps:$4 sm:$0xff]   ;;  %v8732_v57 = vld [vmem:[#allocation10 + $0x28c] ss:$16 sps:$4 sm:$0xff]  }
 0x404   :  { %v4128_v60 = vmax.f32 %v7562_v1, 0.0  ;;  %v4127_v23 = vmax.f32 %v7531_v2, 0.0 }
 0x405   :  { %v4182_v25 = vpack.c.bf16 %v4126_v10, %v4122_v39  ;;  %v4129_v26 = vmax.f32 %v7563_v4, 0.0 }
 0x406   :  { %v9495_v27 = vpack.c.bf16 %v4128_v60, %v4124_v7  ;;  %v4183_v28 = vpack.c.bf16 %v4127_v23, %v4123_v33  ;;  %v3829_v11 = vpop.f32.mrb[72].mxu0  ;;  %5094 = vmatpush1.bf16.msra.mxu0 %v8709_v63  ;;  %5320 = vmatpush1.bf16.msra.mxu1 %v8712_v3  ;;  %v8727_v63 = vld [vmem:[#allocation10 + $0x280] ss:$16 sps:$4 sm:$0xff]   ;;  %v8730_v3 = vld [vmem:[#allocation10 + $0x288] ss:$16 sps:$4 sm:$0xff]  }
 0x407   :  { %v9497_v53 = vpack.c.bf16 %v4129_v26, %v4125_v24  ;;  %v7532_v13 = vadd.f32 %v3829_v11, %v9461_v21  ;;  %v4055_v31 = vpop.f32.mrb[72].mxu1  ;;  %v3831_v34 = vpop.f32.mrb[73].mxu0  ;;  %5095 = vmatprep.subr.bf16.mxu0 %v8717_v5  ;;  %5321 = vmatprep.subr.bf16.mxu1 %v8720_v61  ;;  %v8735_v61 = vld [vmem:[#allocation10 + $0x2a4] ss:$16 sps:$4 sm:$0xff]   ;;  %v8738_v7 = vld [vmem:[#allocation10 + $0x2ac] ss:$16 sps:$4 sm:$0xff]  }
 0x408   :  { %v7564_v35 = vadd.f32 %v4055_v31, %v9465_v22  ;;  %v7533_v17 = vadd.f32 %v3831_v34, %v9469_v40  ;;  %v4057_v37 = vpop.f32.mrb[73].mxu1  ;;  %v3833_v42 = vpop.f32.mrb[74].mxu0  ;;  %5020 = vmatprep.mubr.bf16.mxu0 %v4183_v28  ;;  %5246 = vmatprep.mubr.bf16.mxu1 %v4183_v28  ;;  %v8733_v31 = vld [vmem:[#allocation10 + $0x2a0] ss:$16 sps:$4 sm:$0xff]   ;;  %v8736_v34 = vld [vmem:[#allocation10 + $0x2a8] ss:$16 sps:$4 sm:$0xff]  }
 0x409   :  { %v7565_v46 = vadd.f32 %v4057_v37, %v9473_v16  ;;  %v7534_v47 = vadd.f32 %v3833_v42, %v9461_v21  ;;  %v4059_v15 = vpop.f32.mrb[74].mxu1  ;;  %v3835_v30 = vpop.f32.mrb[75].mxu0  ;;  %5021 = vmatmul.mubr.bf16.gmra.mrb[100].mxu0 %v4182_v25  ;;  %5247 = vmatmul.mubr.bf16.gmra.mrb[100].mxu1 %v4182_v25  ;;  %v4130_v55 = vmax.f32 %v7532_v13, 0.0  ;;  %v8744_v37 = vld [vmem:[#allocation10 + $0x2cc] ss:$16 sps:$4 sm:$0xff]  }
 0x40a   :  { %v7566_v45 = vadd.f32 %v4059_v15, %v9465_v22  ;;  %v7535_v48 = vadd.f32 %v3835_v30, %v9469_v40  ;;  %v4061_v49 = vpop.f32.mrb[75].mxu1  ;;  %5096 = vmatpush1.bf16.msra.mxu0 %v8715_v18  ;;  %5322 = vmatpush1.bf16.msra.mxu1 %v8718_v29  ;;  %v4132_v58 = vmax.f32 %v7564_v35, 0.0  ;;  %v4131_v9 = vmax.f32 %v7533_v17, 0.0  ;;  %v8741_v17 = vld [vmem:[#allocation10 + $0x2c4] ss:$16 sps:$4 sm:$0xff]  }
 0x40b   :  { %v4134_v20 = vmax.f32 %v7534_v47, 0.0  ;;  %v7567_v43 = vadd.f32 %v4061_v49, %v9473_v16  ;;  %5097 = vmatprep.subr.bf16.mxu0 %v8723_v51  ;;  %5323 = vmatprep.subr.bf16.mxu1 %v8726_v8  ;;  %v4133_v38 = vmax.f32 %v7565_v46, 0.0 }
 0x40c   :  { %v4136_v41 = vmax.f32 %v7566_v45, 0.0  ;;  %v4135_v12 = vmax.f32 %v7535_v48, 0.0 }
 0x40d   :  { %v4186_v62 = vpack.c.bf16 %v4134_v20, %v4130_v55  ;;  %v4137_v0 = vmax.f32 %v7567_v43, 0.0  ;;  %v8739_v55 = vld [vmem:[#allocation10 + $0x2c0] ss:$16 sps:$4 sm:$0xff]   ;;  %v8742_v20 = vld [vmem:[#allocation10 + $0x2c8] ss:$16 sps:$4 sm:$0xff]  }
 0x40e   :  { %v9507_v1 = vpack.c.bf16 %v4136_v41, %v4132_v58  ;;  %v4187_v2 = vpack.c.bf16 %v4135_v12, %v4131_v9  ;;  %v3839_v32 = vpop.f32.mrb[76].mxu0  ;;  %5098 = vmatpush1.bf16.msra.mxu0 %v8721_v50  ;;  %5324 = vmatpush1.bf16.msra.mxu1 %v8724_v54  ;;  %v8747_v9 = vld [vmem:[#allocation10 + $0x2e4] ss:$16 sps:$4 sm:$0xff]   ;;  %v8750_v41 = vld [vmem:[#allocation10 + $0x2ec] ss:$16 sps:$4 sm:$0xff]  }
 0x40f   :  { %v9509_v39 = vpack.c.bf16 %v4137_v0, %v4133_v38  ;;  %v7536_v10 = vadd.f32 %v3839_v32, %v9461_v21  ;;  %v4065_v4 = vpop.f32.mrb[76].mxu1  ;;  %v3841_v5 = vpop.f32.mrb[77].mxu0  ;;  %5099 = vmatprep.subr.bf16.mxu0 %v8729_v56  ;;  %5325 = vmatprep.subr.bf16.mxu1 %v8732_v57 }
 0x410   :  { %v7568_v33 = vadd.f32 %v4065_v4, %v9465_v22  ;;  %v7537_v60 = vadd.f32 %v3841_v5, %v9469_v40  ;;  %v4067_v23 = vpop.f32.mrb[77].mxu1  ;;  %v3843_v24 = vpop.f32.mrb[78].mxu0  ;;  %5030 = vmatprep.mubr.bf16.mxu0 %v4187_v2  ;;  %5256 = vmatprep.mubr.bf16.mxu1 %v4187_v2 }
 0x411   :  { %v7569_v25 = vadd.f32 %v4067_v23, %v9473_v16  ;;  %v7538_v26 = vadd.f32 %v3843_v24, %v9461_v21  ;;  %v4069_v28 = vpop.f32.mrb[78].mxu1  ;;  %v3845_v11 = vpop.f32.mrb[79].mxu0  ;;  %5031 = vmatmul.mubr.bf16.gmra.mrb[104].mxu0 %v4186_v62  ;;  %5257 = vmatmul.mubr.bf16.gmra.mrb[104].mxu1 %v4186_v62  ;;  %v4138_v51 = vmax.f32 %v7536_v10, 0.0  ;;  %v8753_v24 = vld [vmem:[#allocation10 + $0x304] ss:$16 sps:$4 sm:$0xff]  }
 0x412   :  { %v7570_v18 = vadd.f32 %v4069_v28, %v9465_v22  ;;  %v7539_v29 = vadd.f32 %v3845_v11, %v9469_v40  ;;  %v4071_v13 = vpop.f32.mrb[79].mxu1  ;;  %5100 = vmatpush1.bf16.msra.mxu0 %v8727_v63  ;;  %5326 = vmatpush1.bf16.msra.mxu1 %v8730_v3  ;;  %v4140_v42 = vmax.f32 %v7568_v33, 0.0  ;;  %v4139_v46 = vmax.f32 %v7537_v60, 0.0 }
 0x413   :  { %v4142_v8 = vmax.f32 %v7538_v26, 0.0  ;;  %v7571_v35 = vadd.f32 %v4071_v13, %v9473_v16  ;;  %5101 = vmatprep.subr.bf16.mxu0 %v8735_v61  ;;  %5327 = vmatprep.subr.bf16.mxu1 %v8738_v7  ;;  %v4141_v30 = vmax.f32 %v7569_v25, 0.0  ;;  %v8745_v61 = vld [vmem:[#allocation10 + $0x2e0] ss:$16 sps:$4 sm:$0xff]   ;;  %v8748_v7 = vld [vmem:[#allocation10 + $0x2e8] ss:$16 sps:$4 sm:$0xff]  }
 0x414   :  { %v4144_v47 = vmax.f32 %v7570_v18, 0.0  ;;  %v4143_v15 = vmax.f32 %v7539_v29, 0.0  ;;  %v8756_v25 = vld [vmem:[#allocation10 + $0x30c] ss:$16 sps:$4 sm:$0xff]  }
 0x415   :  { %v4190_v45 = vpack.c.bf16 %v4142_v8, %v4138_v51  ;;  %v4145_v48 = vmax.f32 %v7571_v35, 0.0  ;;  %v8751_v35 = vld [vmem:[#allocation10 + $0x300] ss:$16 sps:$4 sm:$0xff]  }
 0x416   :  { %v9519_v49 = vpack.c.bf16 %v4144_v47, %v4140_v42  ;;  %v4191_v50 = vpack.c.bf16 %v4143_v15, %v4139_v46  ;;  %v3849_v54 = vpop.f32.mrb[80].mxu0  ;;  %5102 = vmatpush1.bf16.msra.mxu0 %v8733_v31  ;;  %5328 = vmatpush1.bf16.msra.mxu1 %v8736_v34  ;;  %v8759_v15 = vld [vmem:[#allocation10 + $0x324] ss:$16 sps:$4 sm:$0xff]  }
 0x417   :  { %v9521_v43 = vpack.c.bf16 %v4145_v48, %v4141_v30  ;;  %v7540_v56 = vadd.f32 %v3849_v54, %v9461_v21  ;;  %v4075_v57 = vpop.f32.mrb[80].mxu1  ;;  %v3851_v58 = vpop.f32.mrb[81].mxu0  ;;  %5103 = vmatprep.subr.bf16.mxu0 %v8741_v17  ;;  %5329 = vmatprep.subr.bf16.mxu1 %v8744_v37  ;;  %v8754_v17 = vld [vmem:[#allocation10 + $0x308] ss:$16 sps:$4 sm:$0xff]   ;;  %v8762_v30 = vld [vmem:[#allocation10 + $0x32c] ss:$16 sps:$4 sm:$0xff]  }
 0x418   :  { %v7572_v12 = vadd.f32 %v4075_v57, %v9465_v22  ;;  %v7541_v38 = vadd.f32 %v3851_v58, %v9469_v40  ;;  %v4077_v62 = vpop.f32.mrb[81].mxu1  ;;  %v3853_v0 = vpop.f32.mrb[82].mxu0  ;;  %5040 = vmatprep.mubr.bf16.mxu0 %v4191_v50  ;;  %5266 = vmatprep.mubr.bf16.mxu1 %v4191_v50 }
 0x419   :  { %v7573_v2 = vadd.f32 %v4077_v62, %v9473_v16  ;;  %v7542_v32 = vadd.f32 %v3853_v0, %v9461_v21  ;;  %v4079_v63 = vpop.f32.mrb[82].mxu1  ;;  %v3855_v3 = vpop.f32.mrb[83].mxu0  ;;  %5041 = vmatmul.mubr.bf16.gmra.mrb[108].mxu0 %v4190_v45  ;;  %5267 = vmatmul.mubr.bf16.gmra.mrb[108].mxu1 %v4190_v45  ;;  %v4146_v33 = vmax.f32 %v7540_v56, 0.0 }
 0x41a   :  { %v7574_v10 = vadd.f32 %v4079_v63, %v9465_v22  ;;  %v7543_v4 = vadd.f32 %v3855_v3, %v9469_v40  ;;  %v4081_v5 = vpop.f32.mrb[83].mxu1  ;;  %5104 = vmatpush1.bf16.msra.mxu0 %v8739_v55  ;;  %5330 = vmatpush1.bf16.msra.mxu1 %v8742_v20  ;;  %v4148_v26 = vmax.f32 %v7572_v12, 0.0  ;;  %v4147_v28 = vmax.f32 %v7541_v38, 0.0  ;;  %v8757_v12 = vld [vmem:[#allocation10 + $0x320] ss:$16 sps:$4 sm:$0xff]  }
 0x41b   :  { %v4150_v60 = vmax.f32 %v7542_v32, 0.0  ;;  %v7575_v23 = vadd.f32 %v4081_v5, %v9473_v16  ;;  %5105 = vmatprep.subr.bf16.mxu0 %v8747_v9  ;;  %5331 = vmatprep.subr.bf16.mxu1 %v8750_v41  ;;  %v4149_v29 = vmax.f32 %v7573_v2, 0.0  ;;  %v8760_v38 = vld [vmem:[#allocation10 + $0x328] ss:$16 sps:$4 sm:$0xff]   ;;  %v8765_v32 = vld [vmem:[#allocation10 + $0x344] ss:$16 sps:$4 sm:$0xff]  }
 0x41c   :  { %v4152_v11 = vmax.f32 %v7574_v10, 0.0  ;;  %v4151_v18 = vmax.f32 %v7543_v4, 0.0  ;;  %v8768_v63 = vld [vmem:[#allocation10 + $0x34c] ss:$16 sps:$4 sm:$0xff]  }
 0x41d   :  { %v4194_v13 = vpack.c.bf16 %v4150_v60, %v4146_v33  ;;  %v4153_v31 = vmax.f32 %v7575_v23, 0.0 }
 0x41e   :  { %v9531_v34 = vpack.c.bf16 %v4152_v11, %v4148_v26  ;;  %v4195_v51 = vpack.c.bf16 %v4151_v18, %v4147_v28  ;;  %v3859_v8 = vpop.f32.mrb[84].mxu0  ;;  %5106 = vmatpush1.bf16.msra.mxu0 %v8745_v61  ;;  %5332 = vmatpush1.bf16.msra.mxu1 %v8748_v7  ;;  %v8766_v26 = vld [vmem:[#allocation10 + $0x348] ss:$16 sps:$4 sm:$0xff]  }
 0x41f   :  { %v9533_v37 = vpack.c.bf16 %v4153_v31, %v4149_v29  ;;  %v7544_v42 = vadd.f32 %v3859_v8, %v9461_v21  ;;  %v4085_v46 = vpop.f32.mrb[84].mxu1  ;;  %v3861_v47 = vpop.f32.mrb[85].mxu0  ;;  %5107 = vmatprep.subr.bf16.mxu0 %v8753_v24  ;;  %5333 = vmatprep.subr.bf16.mxu1 %v8756_v25  ;;  %v8763_v25 = vld [vmem:[#allocation10 + $0x340] ss:$16 sps:$4 sm:$0xff]   ;;  %v8774_v31 = vld [vmem:[#allocation10 + $0x36c] ss:$16 sps:$4 sm:$0xff]  }
 0x420   :  { %v7576_v45 = vadd.f32 %v4085_v46, %v9465_v22  ;;  %v7545_v48 = vadd.f32 %v3861_v47, %v9469_v40  ;;  %v4087_v50 = vpop.f32.mrb[85].mxu1  ;;  %v3863_v54 = vpop.f32.mrb[86].mxu0  ;;  %5050 = vmatprep.mubr.bf16.mxu0 %v4195_v51  ;;  %5276 = vmatprep.mubr.bf16.mxu1 %v4195_v51 }
 0x421   :  { %v7577_v55 = vadd.f32 %v4087_v50, %v9473_v16  ;;  %v7546_v20 = vadd.f32 %v3863_v54, %v9461_v21  ;;  %v4089_v56 = vpop.f32.mrb[86].mxu1  ;;  %v3865_v57 = vpop.f32.mrb[87].mxu0  ;;  %5051 = vmatmul.mubr.bf16.gmra.mrb[112].mxu0 %v4194_v13  ;;  %5277 = vmatmul.mubr.bf16.gmra.mrb[112].mxu1 %v4194_v13  ;;  %v4154_v62 = vmax.f32 %v7544_v42, 0.0  ;;  %v8771_v13 = vld [vmem:[#allocation10 + $0x364] ss:$16 sps:$4 sm:$0xff]  }
 0x422   :  { %v7578_v58 = vadd.f32 %v4089_v56, %v9465_v22  ;;  %v7547_v9 = vadd.f32 %v3865_v57, %v9469_v40  ;;  %v4091_v41 = vpop.f32.mrb[87].mxu1  ;;  %5108 = vmatpush1.bf16.msra.mxu0 %v8751_v35  ;;  %5334 = vmatpush1.bf16.msra.mxu1 %v8754_v17  ;;  %v4156_v3 = vmax.f32 %v7576_v45, 0.0  ;;  %v4155_v10 = vmax.f32 %v7545_v48, 0.0  ;;  %v8769_v50 = vld [vmem:[#allocation10 + $0x360] ss:$16 sps:$4 sm:$0xff]  }
 0x423   :  { %v4158_v0 = vmax.f32 %v7546_v20, 0.0  ;;  %v7579_v2 = vadd.f32 %v4091_v41, %v9473_v16  ;;  %5109 = vmatprep.subr.bf16.mxu0 %v8759_v15  ;;  %5335 = vmatprep.subr.bf16.mxu1 %v8762_v30  ;;  %v4157_v61 = vmax.f32 %v7577_v55, 0.0  ;;  %v8772_v54 = vld [vmem:[#allocation10 + $0x368] ss:$16 sps:$4 sm:$0xff]   ;;  %v8777_v57 = vld [vmem:[#allocation10 + $0x384] ss:$16 sps:$4 sm:$0xff]  }
 0x424   :  { %v4160_v4 = vmax.f32 %v7578_v58, 0.0  ;;  %v4159_v5 = vmax.f32 %v7547_v9, 0.0  ;;  %v8780_v58 = vld [vmem:[#allocation10 + $0x38c] ss:$16 sps:$4 sm:$0xff]  }
 0x425   :  { %v4198_v7 = vpack.c.bf16 %v4158_v0, %v4154_v62  ;;  %v4161_v33 = vmax.f32 %v7579_v2, 0.0 }
 0x426   :  { %v9543_v60 = vpack.c.bf16 %v4160_v4, %v4156_v3  ;;  %v4199_v23 = vpack.c.bf16 %v4159_v5, %v4155_v10  ;;  %v3869_v24 = vpop.f32.mrb[88].mxu0  ;;  %5110 = vmatpush1.bf16.msra.mxu0 %v8757_v12  ;;  %5336 = vmatpush1.bf16.msra.mxu1 %v8760_v38  ;;  %v8775_v10 = vld [vmem:[#allocation10 + $0x380] ss:$16 sps:$4 sm:$0xff]   ;;  %v8778_v4 = vld [vmem:[#allocation10 + $0x388] ss:$16 sps:$4 sm:$0xff]  }
 0x427   :  { %v9545_v28 = vpack.c.bf16 %v4161_v33, %v4157_v61  ;;  %v7548_v11 = vadd.f32 %v3869_v24, %v9461_v21  ;;  %v4095_v18 = vpop.f32.mrb[88].mxu1  ;;  %v3871_v29 = vpop.f32.mrb[89].mxu0  ;;  %5111 = vmatprep.subr.bf16.mxu0 %v8765_v32  ;;  %5337 = vmatprep.subr.bf16.mxu1 %v8768_v63  ;;  %v8786_v24 = vld [vmem:[#allocation10 + $0x3ac] ss:$16 sps:$4 sm:$0xff]  }
 0x428   :  { %v7580_v51 = vadd.f32 %v4095_v18, %v9465_v22  ;;  %v7549_v8 = vadd.f32 %v3871_v29, %v9469_v40  ;;  %v4097_v35 = vpop.f32.mrb[89].mxu1  ;;  %v3873_v17 = vpop.f32.mrb[90].mxu0  ;;  %5060 = vmatprep.mubr.bf16.mxu0 %v4199_v23  ;;  %5286 = vmatprep.mubr.bf16.mxu1 %v4199_v23  ;;  %v8783_v23 = vld [vmem:[#allocation10 + $0x3a4] ss:$16 sps:$4 sm:$0xff]  }
 0x429   :  { %v7581_v42 = vadd.f32 %v4097_v35, %v9473_v16  ;;  %v7550_v46 = vadd.f32 %v3873_v17, %v9461_v21  ;;  %v4099_v47 = vpop.f32.mrb[90].mxu1  ;;  %v3875_v15 = vpop.f32.mrb[91].mxu0  ;;  %5061 = vmatmul.mubr.bf16.gmra.mrb[116].mxu0 %v4198_v7  ;;  %5287 = vmatmul.mubr.bf16.gmra.mrb[116].mxu1 %v4198_v7  ;;  %v4162_v55 = vmax.f32 %v7548_v11, 0.0 }
 0x42a   :  { %v7582_v30 = vadd.f32 %v4099_v47, %v9465_v22  ;;  %v7551_v45 = vadd.f32 %v3875_v15, %v9469_v40  ;;  %v4101_v48 = vpop.f32.mrb[91].mxu1  ;;  %5112 = vmatpush1.bf16.msra.mxu0 %v8763_v25  ;;  %5338 = vmatpush1.bf16.msra.mxu1 %v8766_v26  ;;  %v4164_v9 = vmax.f32 %v7580_v51, 0.0  ;;  %v4163_v41 = vmax.f32 %v7549_v8, 0.0 }
 0x42b   :  { %v4166_v20 = vmax.f32 %v7550_v46, 0.0  ;;  %v7583_v56 = vadd.f32 %v4101_v48, %v9473_v16  ;;  %5113 = vmatprep.subr.bf16.mxu0 %v8771_v13  ;;  %5339 = vmatprep.subr.bf16.mxu1 %v8774_v31  ;;  %v4165_v62 = vmax.f32 %v7581_v42, 0.0  ;;  %v8781_v42 = vld [vmem:[#allocation10 + $0x3a0] ss:$16 sps:$4 sm:$0xff]   ;;  %v8784_v46 = vld [vmem:[#allocation10 + $0x3a8] ss:$16 sps:$4 sm:$0xff]  }
 0x42c   :  { %v4168_v12 = vmax.f32 %v7582_v30, 0.0  ;;  %v4167_v38 = vmax.f32 %v7551_v45, 0.0  ;;  %v8792_v45 = vld [vmem:[#allocation10 + $0x3cc] ss:$16 sps:$4 sm:$0xff]  }
 0x42d   :  { %v4202_v0 = vpack.c.bf16 %v4166_v20, %v4162_v55  ;;  %v4169_v2 = vmax.f32 %v7583_v56, 0.0 }
 0x42e   :  { %v9555_v32 = vpack.c.bf16 %v4168_v12, %v4164_v9  ;;  %v4203_v63 = vpack.c.bf16 %v4167_v38, %v4163_v41  ;;  %v3879_v3 = vpop.f32.mrb[92].mxu0  ;;  %5114 = vmatpush1.bf16.msra.mxu0 %v8769_v50  ;;  %5340 = vmatpush1.bf16.msra.mxu1 %v8772_v54  ;;  %v8795_v41 = vld [vmem:[#allocation10 + $0x3e4] ss:$16 sps:$4 sm:$0xff]   ;;  %v8798_v12 = vld [vmem:[#allocation10 + $0x3ec] ss:$16 sps:$4 sm:$0xff]  }
 0x42f   :  { %v9557_v5 = vpack.c.bf16 %v4169_v2, %v4165_v62  ;;  %v7552_v61 = vadd.f32 %v3879_v3, %v9461_v21  ;;  %v4105_v7 = vpop.f32.mrb[92].mxu1  ;;  %v3881_v33 = vpop.f32.mrb[93].mxu0  ;;  %5115 = vmatprep.subr.bf16.mxu0 %v8777_v57  ;;  %5341 = vmatprep.subr.bf16.mxu1 %v8780_v58  ;;  %v8787_v58 = vld [vmem:[#allocation10 + $0x3c0] ss:$16 sps:$4 sm:$0xff]   ;;  %v8796_v62 = vld [vmem:[#allocation10 + $0x3e8] ss:$16 sps:$4 sm:$0xff]  }
 0x430   :  { %v7584_v25 = vadd.f32 %v4105_v7, %v9465_v22  ;;  %v7553_v26 = vadd.f32 %v3881_v33, %v9469_v40  ;;  %v4107_v11 = vpop.f32.mrb[93].mxu1  ;;  %v3883_v18 = vpop.f32.mrb[94].mxu0  ;;  %5070 = vmatprep.mubr.bf16.mxu0 %v4203_v63  ;;  %5296 = vmatprep.mubr.bf16.mxu1 %v4203_v63  ;;  %v8793_v38 = vld [vmem:[#allocation10 + $0x3e0] ss:$16 sps:$4 sm:$0xff]   ;;  %v8804_v2 = vld [vmem:[#allocation11 + $0xc] ss:$16 sps:$4 sm:$0xff]  }
 0x431   :  { %v7585_v29 = vadd.f32 %v4107_v11, %v9473_v16  ;;  %v7554_v13 = vadd.f32 %v3883_v18, %v9461_v21  ;;  %v4109_v31 = vpop.f32.mrb[94].mxu1  ;;  %v3885_v51 = vpop.f32.mrb[95].mxu0  ;;  %5071 = vmatmul.mubr.bf16.gmra.mrb[120].mxu0 %v4202_v0  ;;  %5297 = vmatmul.mubr.bf16.gmra.mrb[120].mxu1 %v4202_v0  ;;  %v4170_v47 = vmax.f32 %v7552_v61, 0.0  ;;  %v8789_v21 = vld [vmem:[#allocation10 + $0x3c4] ss:$16 sps:$4 sm:$0xff]  }
 0x432   :  { %v7586_v8 = vadd.f32 %v4109_v31, %v9465_v22  ;;  %v7555_v35 = vadd.f32 %v3885_v51, %v9469_v40  ;;  %v4111_v17 = vpop.f32.mrb[95].mxu1  ;;  %5116 = vmatpush1.bf16.msra.mxu0 %v8775_v10  ;;  %5342 = vmatpush1.bf16.msra.mxu1 %v8778_v4  ;;  %v4172_v48 = vmax.f32 %v7584_v25, 0.0  ;;  %v4171_v50 = vmax.f32 %v7553_v26, 0.0  ;;  %v8801_v0 = vld [vmem:[#allocation11 + $0x4] ss:$16 sps:$4 sm:$0xff]  }
 0x433   :  { %v4174_v15 = vmax.f32 %v7554_v13, 0.0  ;;  %v7587_v30 = vadd.f32 %v4111_v17, %v9473_v16  ;;  %5117 = vmatprep.subr.bf16.mxu0 %v8783_v23  ;;  %5343 = vmatprep.subr.bf16.mxu1 %v8786_v24  ;;  %v4173_v22 = vmax.f32 %v7585_v29, 0.0  ;;  %v8790_v16 = vld [vmem:[#allocation10 + $0x3c8] ss:$16 sps:$4 sm:$0xff]   ;;  %v8799_v63 = vld [vmem:[#allocation11] ss:$16 sps:$4 sm:$0xff]  }
 0x434   :  { %v4176_v54 = vmax.f32 %v7586_v8, 0.0  ;;  %v4175_v55 = vmax.f32 %v7555_v35, 0.0  ;;  %v8802_v3 = vld [vmem:[#allocation11 + $0x8] ss:$16 sps:$4 sm:$0xff]   ;;  %v8807_v10 = vld [vmem:[#allocation11 + $0x24] ss:$16 sps:$4 sm:$0xff]  }
 0x435   :  { %v4206_v20 = vpack.c.bf16 %v4174_v15, %v4170_v47  ;;  %v4177_v40 = vmax.f32 %v7587_v30, 0.0  ;;  %v8810_v4 = vld [vmem:[#allocation11 + $0x2c] ss:$16 sps:$4 sm:$0xff]   ;;  %v8808_v61 = vld [vmem:[#allocation11 + $0x28] ss:$16 sps:$4 sm:$0xff]  }
 0x436   :  { %v9567_v56 = vpack.c.bf16 %v4176_v54, %v4172_v48  ;;  %v4207_v57 = vpack.c.bf16 %v4175_v55, %v4171_v50  ;;  %5118 = vmatpush1.bf16.msra.mxu0 %v8781_v42  ;;  %5344 = vmatpush1.bf16.msra.mxu1 %v8784_v46  ;;  %v8813_v7 = vld [vmem:[#allocation11 + $0x44] ss:$16 sps:$4 sm:$0xff]   ;;  %v8816_v33 = vld [vmem:[#allocation11 + $0x4c] ss:$16 sps:$4 sm:$0xff]   ;;  %v8811_v23 = vld [vmem:[#allocation11 + $0x40] ss:$16 sps:$4 sm:$0xff]  }
 0x437   :  { %v9569_v9 = vpack.c.bf16 %v4177_v40, %v4173_v22  ;;  %5119 = vmatprep.subr.bf16.mxu0 %v8789_v21  ;;  %5345 = vmatprep.subr.bf16.mxu1 %v8792_v45  ;;  %v8814_v24 = vld [vmem:[#allocation11 + $0x48] ss:$16 sps:$4 sm:$0xff]   ;;  %v8819_v25 = vld [vmem:[#allocation11 + $0x64] ss:$16 sps:$4 sm:$0xff]   ;;  %v8828_v18 = vld [vmem:[#allocation11 + $0x8c] ss:$16 sps:$4 sm:$0xff]  }
 0x438   :  { %5080 = vmatprep.mubr.bf16.mxu0 %v4207_v57  ;;  %5306 = vmatprep.mubr.bf16.mxu1 %v4207_v57  ;;  %v8820_v26 = vld [vmem:[#allocation11 + $0x68] ss:$16 sps:$4 sm:$0xff]   ;;  %v8825_v11 = vld [vmem:[#allocation11 + $0x84] ss:$16 sps:$4 sm:$0xff]   ;;  %v8823_v29 = vld [vmem:[#allocation11 + $0x80] ss:$16 sps:$4 sm:$0xff]  }
 0x439   :  { %5081 = vmatmul.mubr.bf16.gmra.mrb[124].mxu0 %v4206_v20  ;;  %5307 = vmatmul.mubr.bf16.gmra.mrb[124].mxu1 %v4206_v20  ;;  %v8826_v13 = vld [vmem:[#allocation11 + $0x88] ss:$16 sps:$4 sm:$0xff]   ;;  %v8831_v31 = vld [vmem:[#allocation11 + $0xa4] ss:$16 sps:$4 sm:$0xff]   ;;  %v8840_v35 = vld [vmem:[#allocation11 + $0xcc] ss:$16 sps:$4 sm:$0xff]  }
 0x43a   :  { %5120 = vmatpush1.bf16.msra.mxu0 %v8787_v58  ;;  %5123 = vmatprep.mubr.bf16.mxu0 %v9485_v52  ;;  %v8832_v51 = vld [vmem:[#allocation11 + $0xa8] ss:$16 sps:$4 sm:$0xff]   ;;  %v8837_v8 = vld [vmem:[#allocation11 + $0xc4] ss:$16 sps:$4 sm:$0xff]   ;;  %v8835_v17 = vld [vmem:[#allocation11 + $0xc0] ss:$16 sps:$4 sm:$0xff]  }
 0x43b   :  { %5346 = vmatpush1.bf16.msra.mxu1 %v8790_v16  ;;  %5349 = vmatprep.mubr.bf16.mxu1 %v9485_v52  ;;  %v8805_v52 = vld [vmem:[#allocation11 + $0x20] ss:$16 sps:$4 sm:$0xff]   ;;  %v8838_v42 = vld [vmem:[#allocation11 + $0xc8] ss:$16 sps:$4 sm:$0xff]   ;;  %v8843_v46 = vld [vmem:[#allocation11 + $0xe4] ss:$16 sps:$4 sm:$0xff]  }
 0x43c   :  { %5121 = vmatprep.subr.bf16.mxu0 %v8795_v41  ;;  %5347 = vmatprep.subr.bf16.mxu1 %v8798_v12  ;;  %v8844_v47 = vld [vmem:[#allocation11 + $0xe8] ss:$16 sps:$4 sm:$0xff]   ;;  %v8849_v15 = vld [vmem:[#allocation11 + $0x104] ss:$16 sps:$4 sm:$0xff]   ;;  %v8852_v30 = vld [vmem:[#allocation11 + $0x10c] ss:$16 sps:$4 sm:$0xff]  }
 0x43d   :  { %v8847_v21 = vld [vmem:[#allocation11 + $0x100] ss:$16 sps:$4 sm:$0xff]   ;;  %v8850_v45 = vld [vmem:[#allocation11 + $0x108] ss:$16 sps:$4 sm:$0xff]   ;;  %v8855_v48 = vld [vmem:[#allocation11 + $0x124] ss:$16 sps:$4 sm:$0xff]  }
 0x43e   :  { %5122 = vmatpush1.bf16.msra.mxu0 %v8793_v38  ;;  %v8856_v50 = vld [vmem:[#allocation11 + $0x128] ss:$16 sps:$4 sm:$0xff]   ;;  %v8861_v54 = vld [vmem:[#allocation11 + $0x144] ss:$16 sps:$4 sm:$0xff]   ;;  %v8864_v55 = vld [vmem:[#allocation11 + $0x14c] ss:$16 sps:$4 sm:$0xff]  }
 0x43f   :  { %5348 = vmatpush1.bf16.msra.mxu1 %v8796_v62  ;;  %6252 = vmatprep.subr.bf16.mxu0 %v8801_v0  ;;  %v8859_v22 = vld [vmem:[#allocation11 + $0x140] ss:$16 sps:$4 sm:$0xff]   ;;  %v8862_v20 = vld [vmem:[#allocation11 + $0x148] ss:$16 sps:$4 sm:$0xff]   ;;  %v8867_v40 = vld [vmem:[#allocation11 + $0x164] ss:$16 sps:$4 sm:$0xff]  }
 0x440   :  { %6478 = vmatprep.subr.bf16.mxu1 %v8804_v2  ;;  %v8868_v57 = vld [vmem:[#allocation11 + $0x168] ss:$16 sps:$4 sm:$0xff]   ;;  %v8873_v58 = vld [vmem:[#allocation11 + $0x184] ss:$16 sps:$4 sm:$0xff]   ;;  %v8876_v16 = vld [vmem:[#allocation11 + $0x18c] ss:$16 sps:$4 sm:$0xff]  }
 0x441   :  { %5124 = vmatmul.mubr.bf16.vlgmr.msra.gmra.mrb[96].mxu0 %v9483_v59  ;;  %v8871_v41 = vld [vmem:[#allocation11 + $0x180] ss:$16 sps:$4 sm:$0xff]   ;;  %v8874_v12 = vld [vmem:[#allocation11 + $0x188] ss:$16 sps:$4 sm:$0xff]   ;;  %v8879_v38 = vld [vmem:[#allocation11 + $0x1a4] ss:$16 sps:$4 sm:$0xff]  }
 0x442   :  { %5350 = vmatmul.mubr.bf16.vlgmr.msra.gmra.mrb[96].mxu1 %v9483_v59  ;;  %5133 = vmatprep.mubr.bf16.mxu0 %v9497_v53  ;;  %v8822_v59 = vld [vmem:[#allocation11 + $0x6c] ss:$16 sps:$4 sm:$0xff]   ;;  %v8880_v62 = vld [vmem:[#allocation11 + $0x1a8] ss:$16 sps:$4 sm:$0xff]   ;;  %v8885_v0 = vld [vmem:[#allocation11 + $0x1c4] ss:$16 sps:$4 sm:$0xff]  }
 0x443   :  { %5359 = vmatprep.mubr.bf16.mxu1 %v9497_v53  ;;  %6253 = vmatpush1.bf16.msra.mxu0 %v8799_v63  ;;  %v8817_v53 = vld [vmem:[#allocation11 + $0x60] ss:$16 sps:$4 sm:$0xff]   ;;  %v8888_v2 = vld [vmem:[#allocation11 + $0x1cc] ss:$16 sps:$4 sm:$0xff]  }
 0x444   :  { %6479 = vmatpush1.bf16.msra.mxu1 %v8802_v3  ;;  %6254 = vmatprep.subr.bf16.mxu0 %v8807_v10  ;;  %v8883_v63 = vld [vmem:[#allocation11 + $0x1c0] ss:$16 sps:$4 sm:$0xff]   ;;  %v8886_v3 = vld [vmem:[#allocation11 + $0x1c8] ss:$16 sps:$4 sm:$0xff]  }
 0x445   :  { %6480 = vmatprep.subr.bf16.mxu1 %v8810_v4  ;;  %v8889_v10 = vld [vmem:[#allocation11 + $0x1e0] ss:$16 sps:$4 sm:$0xff]   ;;  %v8892_v4 = vld [vmem:[#allocation11 + $0x1e8] ss:$16 sps:$4 sm:$0xff]  }
 0x447   :  { %6255 = vmatpush1.bf16.msra.mxu0 %v8805_v52  ;;  %v8897_v52 = vld [vmem:[#allocation11 + $0x204] ss:$16 sps:$4 sm:$0xff]  }
 0x448   :  { %6481 = vmatpush1.bf16.msra.mxu1 %v8808_v61  ;;  %6256 = vmatprep.subr.bf16.mxu0 %v8813_v7  ;;  %v8900_v61 = vld [vmem:[#allocation11 + $0x20c] ss:$16 sps:$4 sm:$0xff]  }
 0x449   :  { %5134 = vmatmul.mubr.bf16.gmra.mrb[100].mxu0 %v9495_v27  ;;  %6482 = vmatprep.subr.bf16.mxu1 %v8816_v33 }
 0x44a   :  { %5360 = vmatmul.mubr.bf16.gmra.mrb[100].mxu1 %v9495_v27  ;;  %5143 = vmatprep.mubr.bf16.mxu0 %v9509_v39  ;;  %v8834_v27 = vld [vmem:[#allocation11 + $0xac] ss:$16 sps:$4 sm:$0xff]  }
 0x44b   :  { %5369 = vmatprep.mubr.bf16.mxu1 %v9509_v39  ;;  %6257 = vmatpush1.bf16.msra.mxu0 %v8811_v23  ;;  %v8829_v39 = vld [vmem:[#allocation11 + $0xa0] ss:$16 sps:$4 sm:$0xff]  }
 0x44c   :  { %6483 = vmatpush1.bf16.msra.mxu1 %v8814_v24  ;;  %6258 = vmatprep.subr.bf16.mxu0 %v8819_v25 }
 0x44d   :  { %6484 = vmatprep.subr.bf16.mxu1 %v8822_v59 }
 0x44f   :  { %6259 = vmatpush1.bf16.msra.mxu0 %v8817_v53 }
 0x450   :  { %6485 = vmatpush1.bf16.msra.mxu1 %v8820_v26  ;;  %6260 = vmatprep.subr.bf16.mxu0 %v8825_v11 }
 0x451   :  { %5144 = vmatmul.mubr.bf16.gmra.mrb[104].mxu0 %v9507_v1  ;;  %6486 = vmatprep.subr.bf16.mxu1 %v8828_v18 }
 0x452   :  { %5370 = vmatmul.mubr.bf16.gmra.mrb[104].mxu1 %v9507_v1  ;;  %5153 = vmatprep.mubr.bf16.mxu0 %v9521_v43  ;;  %v8846_v1 = vld [vmem:[#allocation11 + $0xec] ss:$16 sps:$4 sm:$0xff]  }
 0x453   :  { %5379 = vmatprep.mubr.bf16.mxu1 %v9521_v43  ;;  %6261 = vmatpush1.bf16.msra.mxu0 %v8823_v29  ;;  %v8841_v43 = vld [vmem:[#allocation11 + $0xe0] ss:$16 sps:$4 sm:$0xff]  }
 0x454   :  { %6487 = vmatpush1.bf16.msra.mxu1 %v8826_v13  ;;  %6262 = vmatprep.subr.bf16.mxu0 %v8831_v31  ;;  %v8895_v29 = vld [vmem:[#allocation11 + $0x200] ss:$16 sps:$4 sm:$0xff]   ;;  %v8898_v13 = vld [vmem:[#allocation11 + $0x208] ss:$16 sps:$4 sm:$0xff]  }
 0x455   :  { %6488 = vmatprep.subr.bf16.mxu1 %v8834_v27  ;;  %v8903_v27 = vld [vmem:[#allocation11 + $0x224] ss:$16 sps:$4 sm:$0xff]  }
 0x457   :  { %6263 = vmatpush1.bf16.msra.mxu0 %v8829_v39  ;;  %v8906_v39 = vld [vmem:[#allocation11 + $0x22c] ss:$16 sps:$4 sm:$0xff]  }
 0x458   :  { %6489 = vmatpush1.bf16.msra.mxu1 %v8832_v51  ;;  %6264 = vmatprep.subr.bf16.mxu0 %v8837_v8  ;;  %v8901_v8 = vld [vmem:[#allocation11 + $0x220] ss:$16 sps:$4 sm:$0xff]  }
 0x459   :  { %5154 = vmatmul.mubr.bf16.gmra.mrb[108].mxu0 %v9519_v49  ;;  %6490 = vmatprep.subr.bf16.mxu1 %v8840_v35  ;;  %v8904_v35 = vld [vmem:[#allocation11 + $0x228] ss:$16 sps:$4 sm:$0xff]  }
 0x45a   :  { %5380 = vmatmul.mubr.bf16.gmra.mrb[108].mxu1 %v9519_v49  ;;  %5163 = vmatprep.mubr.bf16.mxu0 %v9533_v37  ;;  %v8858_v49 = vld [vmem:[#allocation11 + $0x12c] ss:$16 sps:$4 sm:$0xff]  }
 0x45b   :  { %5389 = vmatprep.mubr.bf16.mxu1 %v9533_v37  ;;  %6265 = vmatpush1.bf16.msra.mxu0 %v8835_v17  ;;  %v8853_v37 = vld [vmem:[#allocation11 + $0x120] ss:$16 sps:$4 sm:$0xff]  }
 0x45c   :  { %6491 = vmatpush1.bf16.msra.mxu1 %v8838_v42  ;;  %6266 = vmatprep.subr.bf16.mxu0 %v8843_v46  ;;  %v8909_v46 = vld [vmem:[#allocation11 + $0x244] ss:$16 sps:$4 sm:$0xff]  }
 0x45d   :  { %6492 = vmatprep.subr.bf16.mxu1 %v8846_v1  ;;  %v8912_v1 = vld [vmem:[#allocation11 + $0x24c] ss:$16 sps:$4 sm:$0xff]  }
 0x45f   :  { %6267 = vmatpush1.bf16.msra.mxu0 %v8841_v43 }
 0x460   :  { %6493 = vmatpush1.bf16.msra.mxu1 %v8844_v47  ;;  %6268 = vmatprep.subr.bf16.mxu0 %v8849_v15 }
 0x461   :  { %5164 = vmatmul.mubr.bf16.gmra.mrb[112].mxu0 %v9531_v34  ;;  %6494 = vmatprep.subr.bf16.mxu1 %v8852_v30 }
 0x462   :  { %5390 = vmatmul.mubr.bf16.gmra.mrb[112].mxu1 %v9531_v34  ;;  %5173 = vmatprep.mubr.bf16.mxu0 %v9545_v28  ;;  %v8870_v34 = vld [vmem:[#allocation11 + $0x16c] ss:$16 sps:$4 sm:$0xff]  }
 0x463   :  { %5399 = vmatprep.mubr.bf16.mxu1 %v9545_v28  ;;  %6269 = vmatpush1.bf16.msra.mxu0 %v8847_v21  ;;  %v8865_v28 = vld [vmem:[#allocation11 + $0x160] ss:$16 sps:$4 sm:$0xff]  }
 0x464   :  { %6495 = vmatpush1.bf16.msra.mxu1 %v8850_v45  ;;  %6270 = vmatprep.subr.bf16.mxu0 %v8855_v48 }
 0x465   :  { %6496 = vmatprep.subr.bf16.mxu1 %v8858_v49 }
 0x467   :  { %6271 = vmatpush1.bf16.msra.mxu0 %v8853_v37  ;;  %v8907_v37 = vld [vmem:[#allocation11 + $0x240] ss:$16 sps:$4 sm:$0xff]  }
 0x468   :  { %6497 = vmatpush1.bf16.msra.mxu1 %v8856_v50  ;;  %6272 = vmatprep.subr.bf16.mxu0 %v8861_v54  ;;  %v8910_v50 = vld [vmem:[#allocation11 + $0x248] ss:$16 sps:$4 sm:$0xff]  }
 0x469   :  { %5174 = vmatmul.mubr.bf16.gmra.mrb[116].mxu0 %v9543_v60  ;;  %6498 = vmatprep.subr.bf16.mxu1 %v8864_v55  ;;  %v8915_v55 = vld [vmem:[#allocation11 + $0x264] ss:$16 sps:$4 sm:$0xff]  }
 0x46a   :  { %5400 = vmatmul.mubr.bf16.gmra.mrb[116].mxu1 %v9543_v60  ;;  %5183 = vmatprep.mubr.bf16.mxu0 %v9557_v5  ;;  %v8882_v60 = vld [vmem:[#allocation11 + $0x1ac] ss:$16 sps:$4 sm:$0xff]  }
 0x46b   :  { %5409 = vmatprep.mubr.bf16.mxu1 %v9557_v5  ;;  %6273 = vmatpush1.bf16.msra.mxu0 %v8859_v22  ;;  %v8877_v5 = vld [vmem:[#allocation11 + $0x1a0] ss:$16 sps:$4 sm:$0xff]   ;;  %v8918_v22 = vld [vmem:[#allocation11 + $0x26c] ss:$16 sps:$4 sm:$0xff]  }
 0x46c   :  { %6499 = vmatpush1.bf16.msra.mxu1 %v8862_v20  ;;  %6274 = vmatprep.subr.bf16.mxu0 %v8867_v40  ;;  %v8913_v40 = vld [vmem:[#allocation11 + $0x260] ss:$16 sps:$4 sm:$0xff]  }
 0x46d   :  { %6500 = vmatprep.subr.bf16.mxu1 %v8870_v34  ;;  %v8916_v34 = vld [vmem:[#allocation11 + $0x268] ss:$16 sps:$4 sm:$0xff]  }
 0x46f   :  { %6275 = vmatpush1.bf16.msra.mxu0 %v8865_v28 }
 0x470   :  { %6501 = vmatpush1.bf16.msra.mxu1 %v8868_v57  ;;  %6276 = vmatprep.subr.bf16.mxu0 %v8873_v58  ;;  %v8921_v58 = vld [vmem:[#allocation11 + $0x284] ss:$16 sps:$4 sm:$0xff]  }
 0x471   :  { %5184 = vmatmul.mubr.bf16.gmra.mrb[120].mxu0 %v9555_v32  ;;  %6502 = vmatprep.subr.bf16.mxu1 %v8876_v16  ;;  %v8924_v16 = vld [vmem:[#allocation11 + $0x28c] ss:$16 sps:$4 sm:$0xff]  }
 0x472   :  { %5410 = vmatmul.mubr.bf16.gmra.mrb[120].mxu1 %v9555_v32  ;;  %5193 = vmatprep.mubr.bf16.mxu0 %v9569_v9  ;;  %v8891_v32 = vld [vmem:[#allocation11 + $0x1e4] ss:$16 sps:$4 sm:$0xff]  }
 0x473   :  { %5419 = vmatprep.mubr.bf16.mxu1 %v9569_v9  ;;  %6277 = vmatpush1.bf16.msra.mxu0 %v8871_v41  ;;  %v8894_v9 = vld [vmem:[#allocation11 + $0x1ec] ss:$16 sps:$4 sm:$0xff]  }
 0x474   :  { %6503 = vmatpush1.bf16.msra.mxu1 %v8874_v12  ;;  %6278 = vmatprep.subr.bf16.mxu0 %v8879_v38 }
 0x475   :  { %6504 = vmatprep.subr.bf16.mxu1 %v8882_v60 }
 0x477   :  { %6279 = vmatpush1.bf16.msra.mxu0 %v8877_v5 }
 0x478   :  { %6505 = vmatpush1.bf16.msra.mxu1 %v8880_v62  ;;  %6280 = vmatprep.subr.bf16.mxu0 %v8885_v0 }
 0x479   :  { %5194 = vmatmul.mubr.bf16.gmra.mrb[124].mxu0 %v9567_v56  ;;  %6506 = vmatprep.subr.bf16.mxu1 %v8888_v2 }
 0x47a   :  { %5420 = vmatmul.mubr.bf16.gmra.mrb[124].mxu1 %v9567_v56 }
 0x47b   :  { %6281 = vmatpush1.bf16.msra.mxu0 %v8883_v63  ;;  %v8919_v63 = vld [vmem:[#allocation11 + $0x280] ss:$16 sps:$4 sm:$0xff]  }
 0x47c   :  { %6507 = vmatpush1.bf16.msra.mxu1 %v8886_v3  ;;  %6282 = vmatprep.subr.bf16.mxu0 %v8891_v32  ;;  %v8922_v3 = vld [vmem:[#allocation11 + $0x288] ss:$16 sps:$4 sm:$0xff]  }
 0x47d   :  { %6508 = vmatprep.subr.bf16.mxu1 %v8894_v9  ;;  %v8927_v9 = vld [vmem:[#allocation11 + $0x2a4] ss:$16 sps:$4 sm:$0xff]  }
 0x47f   :  { %6283 = vmatpush1.bf16.msra.mxu0 %v8889_v10  ;;  %v8930_v10 = vld [vmem:[#allocation11 + $0x2ac] ss:$16 sps:$4 sm:$0xff]  }
 0x480   :  { %6509 = vmatpush1.bf16.msra.mxu1 %v8892_v4  ;;  %6365 = vmatprep.subr.bf16.mxu0 %v8897_v52  ;;  %v8925_v52 = vld [vmem:[#allocation11 + $0x2a0] ss:$16 sps:$4 sm:$0xff]  }
 0x481   :  { %6591 = vmatprep.subr.bf16.mxu1 %v8900_v61  ;;  %v8928_v61 = vld [vmem:[#allocation11 + $0x2a8] ss:$16 sps:$4 sm:$0xff]  }
 0x514   :  { %v5125_v7 = vpop.f32.mrb[96].mxu0 }
 0x515   :  { %v5351_v33 = vpop.f32.mrb[96].mxu1  ;;  %v5127_v23 = vpop.f32.mrb[97].mxu0 }
 0x516   :  { %v5353_v24 = vpop.f32.mrb[97].mxu1  ;;  %v5129_v25 = vpop.f32.mrb[98].mxu0 }
 0x517   :  { %v5430_v56 = vpack.c.bf16 %v5129_v25, %v5125_v7  ;;  %v5355_v59 = vpop.f32.mrb[98].mxu1  ;;  %v5131_v53 = vpop.f32.mrb[99].mxu0 }
 0x518   :  { %v9603_v26 = vpack.c.bf16 %v5355_v59, %v5351_v33  ;;  %v5431_v11 = vpack.c.bf16 %v5131_v53, %v5127_v23  ;;  %v5357_v18 = vpop.f32.mrb[99].mxu1  ;;  %v8933_v23 = vld [vmem:[#allocation11 + $0x2c4] ss:$16 sps:$4 sm:$0xff]  }
 0x519   :  { %v9605_v31 = vpack.c.bf16 %v5357_v18, %v5353_v24  ;;  %v8936_v24 = vld [vmem:[#allocation11 + $0x2cc] ss:$16 sps:$4 sm:$0xff]  }
 0x51a   :  { %6284 = vmatprep.mubr.bf16.mxu0 %v5431_v11  ;;  %6510 = vmatprep.mubr.bf16.mxu1 %v5431_v11 }
 0x51b   :  { %6285 = vmatmul.mubr.bf16.vlgmr.msra.gmra.mrb[128].mxu0 %v5430_v56  ;;  %6511 = vmatmul.mubr.bf16.vlgmr.msra.gmra.mrb[128].mxu1 %v5430_v56 }
 0x51c   :  { %v5135_v51 = vpop.f32.mrb[100].mxu0  ;;  %6366 = vmatpush1.bf16.msra.mxu0 %v8895_v29  ;;  %6592 = vmatpush1.bf16.msra.mxu1 %v8898_v13 }
 0x51d   :  { %v5361_v17 = vpop.f32.mrb[100].mxu1  ;;  %v5137_v42 = vpop.f32.mrb[101].mxu0  ;;  %6367 = vmatprep.subr.bf16.mxu0 %v8903_v27  ;;  %6593 = vmatprep.subr.bf16.mxu1 %v8906_v39  ;;  %v8931_v27 = vld [vmem:[#allocation11 + $0x2c0] ss:$16 sps:$4 sm:$0xff]   ;;  %v8934_v39 = vld [vmem:[#allocation11 + $0x2c8] ss:$16 sps:$4 sm:$0xff]  }
 0x51e   :  { %v5363_v43 = vpop.f32.mrb[101].mxu1  ;;  %v5139_v47 = vpop.f32.mrb[102].mxu0 }
 0x51f   :  { %v5434_v15 = vpack.c.bf16 %v5139_v47, %v5135_v51  ;;  %v5365_v30 = vpop.f32.mrb[102].mxu1  ;;  %v5141_v21 = vpop.f32.mrb[103].mxu0  ;;  %v8945_v47 = vld [vmem:[#allocation11 + $0x304] ss:$16 sps:$4 sm:$0xff]  }
 0x520   :  { %v9607_v45 = vpack.c.bf16 %v5365_v30, %v5361_v17  ;;  %v5435_v48 = vpack.c.bf16 %v5141_v21, %v5137_v42  ;;  %v5367_v49 = vpop.f32.mrb[103].mxu1  ;;  %6368 = vmatpush1.bf16.msra.mxu0 %v8901_v8  ;;  %6594 = vmatpush1.bf16.msra.mxu1 %v8904_v35  ;;  %v8939_v8 = vld [vmem:[#allocation11 + $0x2e4] ss:$16 sps:$4 sm:$0xff]   ;;  %v8942_v35 = vld [vmem:[#allocation11 + $0x2ec] ss:$16 sps:$4 sm:$0xff]  }
 0x521   :  { %v9609_v54 = vpack.c.bf16 %v5367_v49, %v5363_v43  ;;  %6369 = vmatprep.subr.bf16.mxu0 %v8909_v46  ;;  %6595 = vmatprep.subr.bf16.mxu1 %v8912_v1  ;;  %v8937_v42 = vld [vmem:[#allocation11 + $0x2e0] ss:$16 sps:$4 sm:$0xff]   ;;  %v8940_v46 = vld [vmem:[#allocation11 + $0x2e8] ss:$16 sps:$4 sm:$0xff]  }
 0x522   :  { %6294 = vmatprep.mubr.bf16.mxu0 %v5435_v48  ;;  %6520 = vmatprep.mubr.bf16.mxu1 %v5435_v48 }
 0x523   :  { %6295 = vmatmul.mubr.bf16.gmra.mrb[132].mxu0 %v5434_v15  ;;  %6521 = vmatmul.mubr.bf16.gmra.mrb[132].mxu1 %v5434_v15  ;;  %v8948_v15 = vld [vmem:[#allocation11 + $0x30c] ss:$16 sps:$4 sm:$0xff]  }
 0x524   :  { %v5145_v20 = vpop.f32.mrb[104].mxu0  ;;  %6370 = vmatpush1.bf16.msra.mxu0 %v8907_v37  ;;  %6596 = vmatpush1.bf16.msra.mxu1 %v8910_v50 }
 0x525   :  { %v5371_v28 = vpop.f32.mrb[104].mxu1  ;;  %v5147_v57 = vpop.f32.mrb[105].mxu0  ;;  %6371 = vmatprep.subr.bf16.mxu0 %v8915_v55  ;;  %6597 = vmatprep.subr.bf16.mxu1 %v8918_v22 }
 0x526   :  { %v5373_v41 = vpop.f32.mrb[105].mxu1  ;;  %v5149_v12 = vpop.f32.mrb[106].mxu0 }
 0x527   :  { %v5438_v38 = vpack.c.bf16 %v5149_v12, %v5145_v20  ;;  %v5375_v60 = vpop.f32.mrb[106].mxu1  ;;  %v5151_v5 = vpop.f32.mrb[107].mxu0  ;;  %v8943_v20 = vld [vmem:[#allocation11 + $0x300] ss:$16 sps:$4 sm:$0xff]  }
 0x528   :  { %v9611_v62 = vpack.c.bf16 %v5375_v60, %v5371_v28  ;;  %v5439_v0 = vpack.c.bf16 %v5151_v5, %v5147_v57  ;;  %v5377_v2 = vpop.f32.mrb[107].mxu1  ;;  %6372 = vmatpush1.bf16.msra.mxu0 %v8913_v40  ;;  %6598 = vmatpush1.bf16.msra.mxu1 %v8916_v34  ;;  %v8946_v40 = vld [vmem:[#allocation11 + $0x308] ss:$16 sps:$4 sm:$0xff]   ;;  %v8951_v28 = vld [vmem:[#allocation11 + $0x324] ss:$16 sps:$4 sm:$0xff]  }
 0x529   :  { %v9613_v32 = vpack.c.bf16 %v5377_v2, %v5373_v41  ;;  %6373 = vmatprep.subr.bf16.mxu0 %v8921_v58  ;;  %6599 = vmatprep.subr.bf16.mxu1 %v8924_v16  ;;  %v8954_v57 = vld [vmem:[#allocation11 + $0x32c] ss:$16 sps:$4 sm:$0xff]   ;;  %v8949_v16 = vld [vmem:[#allocation11 + $0x320] ss:$16 sps:$4 sm:$0xff]   ;;  %v8952_v41 = vld [vmem:[#allocation11 + $0x328] ss:$16 sps:$4 sm:$0xff]  }
 0x52a   :  { %6304 = vmatprep.mubr.bf16.mxu0 %v5439_v0  ;;  %6530 = vmatprep.mubr.bf16.mxu1 %v5439_v0  ;;  %v8957_v60 = vld [vmem:[#allocation11 + $0x344] ss:$16 sps:$4 sm:$0xff]   ;;  %v8960_v5 = vld [vmem:[#allocation11 + $0x34c] ss:$16 sps:$4 sm:$0xff]  }
 0x52b   :  { %6305 = vmatmul.mubr.bf16.gmra.mrb[136].mxu0 %v5438_v38  ;;  %6531 = vmatmul.mubr.bf16.gmra.mrb[136].mxu1 %v5438_v38 }
 0x52c   :  { %v5155_v4 = vpop.f32.mrb[108].mxu0  ;;  %6374 = vmatpush1.bf16.msra.mxu0 %v8919_v63  ;;  %6600 = vmatpush1.bf16.msra.mxu1 %v8922_v3 }
 0x52d   :  { %v5381_v7 = vpop.f32.mrb[108].mxu1  ;;  %v5157_v33 = vpop.f32.mrb[109].mxu0  ;;  %6375 = vmatprep.subr.bf16.mxu0 %v8927_v9  ;;  %6601 = vmatprep.subr.bf16.mxu1 %v8930_v10 }
 0x52e   :  { %v5383_v25 = vpop.f32.mrb[109].mxu1  ;;  %v5159_v56 = vpop.f32.mrb[110].mxu0 }
 0x52f   :  { %v5442_v59 = vpack.c.bf16 %v5159_v56, %v5155_v4  ;;  %v5385_v53 = vpop.f32.mrb[110].mxu1  ;;  %v5161_v11 = vpop.f32.mrb[111].mxu0  ;;  %v8961_v56 = vld [vmem:[#allocation11 + $0x360] ss:$16 sps:$4 sm:$0xff]  }
 0x530   :  { %v9615_v18 = vpack.c.bf16 %v5385_v53, %v5381_v7  ;;  %v5443_v29 = vpack.c.bf16 %v5161_v11, %v5157_v33  ;;  %v5387_v13 = vpop.f32.mrb[111].mxu1  ;;  %6376 = vmatpush1.bf16.msra.mxu0 %v8925_v52  ;;  %6602 = vmatpush1.bf16.msra.mxu1 %v8928_v61  ;;  %v8955_v61 = vld [vmem:[#allocation11 + $0x340] ss:$16 sps:$4 sm:$0xff]   ;;  %v8958_v7 = vld [vmem:[#allocation11 + $0x348] ss:$16 sps:$4 sm:$0xff]  }
 0x531   :  { %v9617_v51 = vpack.c.bf16 %v5387_v13, %v5383_v25  ;;  %6377 = vmatprep.subr.bf16.mxu0 %v8933_v23  ;;  %6603 = vmatprep.subr.bf16.mxu1 %v8936_v24  ;;  %v8963_v23 = vld [vmem:[#allocation11 + $0x364] ss:$16 sps:$4 sm:$0xff]   ;;  %v8966_v24 = vld [vmem:[#allocation11 + $0x36c] ss:$16 sps:$4 sm:$0xff]  }
 0x532   :  { %6314 = vmatprep.mubr.bf16.mxu0 %v5443_v29  ;;  %6540 = vmatprep.mubr.bf16.mxu1 %v5443_v29  ;;  %v8969_v29 = vld [vmem:[#allocation11 + $0x384] ss:$16 sps:$4 sm:$0xff]   ;;  %v8972_v13 = vld [vmem:[#allocation11 + $0x38c] ss:$16 sps:$4 sm:$0xff]  }
 0x533   :  { %6315 = vmatmul.mubr.bf16.gmra.mrb[140].mxu0 %v5442_v59  ;;  %6541 = vmatmul.mubr.bf16.gmra.mrb[140].mxu1 %v5442_v59  ;;  %v8964_v59 = vld [vmem:[#allocation11 + $0x368] ss:$16 sps:$4 sm:$0xff]  }
 0x534   :  { %v5165_v17 = vpop.f32.mrb[112].mxu0  ;;  %6378 = vmatpush1.bf16.msra.mxu0 %v8931_v27  ;;  %6604 = vmatpush1.bf16.msra.mxu1 %v8934_v39 }
 0x535   :  { %v5391_v1 = vpop.f32.mrb[112].mxu1  ;;  %v5167_v43 = vpop.f32.mrb[113].mxu0  ;;  %6379 = vmatprep.subr.bf16.mxu0 %v8939_v8  ;;  %6605 = vmatprep.subr.bf16.mxu1 %v8942_v35 }
 0x536   :  { %v5393_v30 = vpop.f32.mrb[113].mxu1  ;;  %v5169_v21 = vpop.f32.mrb[114].mxu0 }
 0x537   :  { %v5446_v48 = vpack.c.bf16 %v5169_v21, %v5165_v17  ;;  %v5395_v49 = vpop.f32.mrb[114].mxu1  ;;  %v5171_v37 = vpop.f32.mrb[115].mxu0  ;;  %v8978_v21 = vld [vmem:[#allocation11 + $0x3ac] ss:$16 sps:$4 sm:$0xff]  }
 0x538   :  { %v9619_v50 = vpack.c.bf16 %v5395_v49, %v5391_v1  ;;  %v5447_v55 = vpack.c.bf16 %v5171_v37, %v5167_v43  ;;  %v5397_v22 = vpop.f32.mrb[115].mxu1  ;;  %6380 = vmatpush1.bf16.msra.mxu0 %v8937_v42  ;;  %6606 = vmatpush1.bf16.msra.mxu1 %v8940_v46  ;;  %v8967_v43 = vld [vmem:[#allocation11 + $0x380] ss:$16 sps:$4 sm:$0xff]   ;;  %v8976_v37 = vld [vmem:[#allocation11 + $0x3a8] ss:$16 sps:$4 sm:$0xff]  }
 0x539   :  { %v9621_v34 = vpack.c.bf16 %v5397_v22, %v5393_v30  ;;  %6381 = vmatprep.subr.bf16.mxu0 %v8945_v47  ;;  %6607 = vmatprep.subr.bf16.mxu1 %v8948_v15  ;;  %v8970_v47 = vld [vmem:[#allocation11 + $0x388] ss:$16 sps:$4 sm:$0xff]   ;;  %v8975_v30 = vld [vmem:[#allocation11 + $0x3a4] ss:$16 sps:$4 sm:$0xff]   ;;  %v8973_v49 = vld [vmem:[#allocation11 + $0x3a0] ss:$16 sps:$4 sm:$0xff]  }
 0x53a   :  { %6324 = vmatprep.mubr.bf16.mxu0 %v5447_v55  ;;  %6550 = vmatprep.mubr.bf16.mxu1 %v5447_v55 }
 0x53b   :  { %6325 = vmatmul.mubr.bf16.gmra.mrb[144].mxu0 %v5446_v48  ;;  %6551 = vmatmul.mubr.bf16.gmra.mrb[144].mxu1 %v5446_v48 }
 0x53c   :  { %v5175_v58 = vpop.f32.mrb[116].mxu0  ;;  %6382 = vmatpush1.bf16.msra.mxu0 %v8943_v20  ;;  %6608 = vmatpush1.bf16.msra.mxu1 %v8946_v40  ;;  %v8981_v20 = vld [vmem:[#allocation11 + $0x3c4] ss:$16 sps:$4 sm:$0xff]   ;;  %v8984_v40 = vld [vmem:[#allocation11 + $0x3cc] ss:$16 sps:$4 sm:$0xff]  }
 0x53d   :  { %v5401_v12 = vpop.f32.mrb[116].mxu1  ;;  %v5177_v38 = vpop.f32.mrb[117].mxu0  ;;  %6383 = vmatprep.subr.bf16.mxu0 %v8951_v28  ;;  %6609 = vmatprep.subr.bf16.mxu1 %v8954_v57 }
 0x53e   :  { %v5403_v0 = vpop.f32.mrb[117].mxu1  ;;  %v5179_v2 = vpop.f32.mrb[118].mxu0 }
 0x53f   :  { %v5450_v63 = vpack.c.bf16 %v5179_v2, %v5175_v58  ;;  %v5405_v3 = vpop.f32.mrb[118].mxu1  ;;  %v5181_v9 = vpop.f32.mrb[119].mxu0  ;;  %v8982_v2 = vld [vmem:[#allocation11 + $0x3c8] ss:$16 sps:$4 sm:$0xff]  }
 0x540   :  { %v9623_v10 = vpack.c.bf16 %v5405_v3, %v5401_v12  ;;  %v5451_v4 = vpack.c.bf16 %v5181_v9, %v5177_v38  ;;  %v5407_v52 = vpop.f32.mrb[119].mxu1  ;;  %6384 = vmatpush1.bf16.msra.mxu0 %v8949_v16  ;;  %6610 = vmatpush1.bf16.msra.mxu1 %v8952_v41  ;;  %v8990_v3 = vld [vmem:[#allocation11 + $0x3ec] ss:$16 sps:$4 sm:$0xff]   ;;  %v8985_v9 = vld [vmem:[#allocation11 + $0x3e0] ss:$16 sps:$4 sm:$0xff]  }
 0x541   :  { %v9625_v33 = vpack.c.bf16 %v5407_v52, %v5403_v0  ;;  %6385 = vmatprep.subr.bf16.mxu0 %v8957_v60  ;;  %6611 = vmatprep.subr.bf16.mxu1 %v8960_v5  ;;  %v8979_v5 = vld [vmem:[#allocation11 + $0x3c0] ss:$16 sps:$4 sm:$0xff]  }
 0x542   :  { %6334 = vmatprep.mubr.bf16.mxu0 %v5451_v4  ;;  %6560 = vmatprep.mubr.bf16.mxu1 %v5451_v4  ;;  %v8988_v4 = vld [vmem:[#allocation11 + $0x3e8] ss:$16 sps:$4 sm:$0xff]  }
 0x543   :  { %6335 = vmatmul.mubr.bf16.gmra.mrb[148].mxu0 %v5450_v63  ;;  %6561 = vmatmul.mubr.bf16.gmra.mrb[148].mxu1 %v5450_v63  ;;  %v8987_v63 = vld [vmem:[#allocation11 + $0x3e4] ss:$16 sps:$4 sm:$0xff]  }
 0x544   :  { %v5185_v25 = vpop.f32.mrb[120].mxu0  ;;  %6386 = vmatpush1.bf16.msra.mxu0 %v8955_v61  ;;  %6612 = vmatpush1.bf16.msra.mxu1 %v8958_v7 }
 0x545   :  { %v5411_v53 = vpop.f32.mrb[120].mxu1  ;;  %v5187_v11 = vpop.f32.mrb[121].mxu0  ;;  %6387 = vmatprep.subr.bf16.mxu0 %v8963_v23  ;;  %6613 = vmatprep.subr.bf16.mxu1 %v8966_v24 }
 0x546   :  { %v5413_v27 = vpop.f32.mrb[121].mxu1  ;;  %v5189_v39 = vpop.f32.mrb[122].mxu0 }
 0x547   :  { %v5454_v8 = vpack.c.bf16 %v5189_v39, %v5185_v25  ;;  %v5415_v35 = vpop.f32.mrb[122].mxu1  ;;  %v5191_v17 = vpop.f32.mrb[123].mxu0 }
 0x548   :  { %v9627_v42 = vpack.c.bf16 %v5415_v35, %v5411_v53  ;;  %v5455_v46 = vpack.c.bf16 %v5191_v17, %v5187_v11  ;;  %v5417_v1 = vpop.f32.mrb[123].mxu1  ;;  %6388 = vmatpush1.bf16.msra.mxu0 %v8961_v56  ;;  %6614 = vmatpush1.bf16.msra.mxu1 %v8964_v59 }
 0x549   :  { %v9629_v15 = vpack.c.bf16 %v5417_v1, %v5413_v27  ;;  %6389 = vmatprep.subr.bf16.mxu0 %v8969_v29  ;;  %6615 = vmatprep.subr.bf16.mxu1 %v8972_v13 }
 0x54a   :  { %6344 = vmatprep.mubr.bf16.mxu0 %v5455_v46  ;;  %6570 = vmatprep.mubr.bf16.mxu1 %v5455_v46 }
 0x54b   :  { %6345 = vmatmul.mubr.bf16.gmra.mrb[152].mxu0 %v5454_v8  ;;  %6571 = vmatmul.mubr.bf16.gmra.mrb[152].mxu1 %v5454_v8 }
 0x54c   :  { %v5195_v48 = vpop.f32.mrb[124].mxu0  ;;  %6390 = vmatpush1.bf16.msra.mxu0 %v8967_v43  ;;  %6616 = vmatpush1.bf16.msra.mxu1 %v8970_v47 }
 0x54d   :  { %v5421_v55 = vpop.f32.mrb[124].mxu1  ;;  %v5197_v22 = vpop.f32.mrb[125].mxu0  ;;  %6391 = vmatprep.subr.bf16.mxu0 %v8975_v30  ;;  %6617 = vmatprep.subr.bf16.mxu1 %v8978_v21 }
 0x54e   :  { %v5423_v28 = vpop.f32.mrb[125].mxu1  ;;  %v5199_v57 = vpop.f32.mrb[126].mxu0 }
 0x54f   :  { %v5458_v58 = vpack.c.bf16 %v5199_v57, %v5195_v48  ;;  %v5425_v16 = vpop.f32.mrb[126].mxu1  ;;  %v5201_v41 = vpop.f32.mrb[127].mxu0 }
 0x550   :  { %v5460_v12 = vpack.c.bf16 %v5425_v16, %v5421_v55  ;;  %v5459_v38 = vpack.c.bf16 %v5201_v41, %v5197_v22  ;;  %v5427_v60 = vpop.f32.mrb[127].mxu1  ;;  %6392 = vmatpush1.bf16.msra.mxu0 %v8973_v49  ;;  %6618 = vmatpush1.bf16.msra.mxu1 %v8976_v37 }
 0x551   :  { %v5461_v0 = vpack.c.bf16 %v5427_v60, %v5423_v28  ;;  %6393 = vmatprep.subr.bf16.mxu0 %v8981_v20  ;;  %6619 = vmatprep.subr.bf16.mxu1 %v8984_v40 }
 0x552   :  { %6354 = vmatprep.mubr.bf16.mxu0 %v5459_v38  ;;  %6580 = vmatprep.mubr.bf16.mxu1 %v5459_v38 }
 0x553   :  { %6355 = vmatmul.mubr.bf16.gmra.mrb[156].mxu0 %v5458_v58  ;;  %6581 = vmatmul.mubr.bf16.gmra.mrb[156].mxu1 %v5458_v58 }
 0x554   :  { %6394 = vmatpush1.bf16.msra.mxu0 %v8979_v5  ;;  %6397 = vmatprep.mubr.bf16.mxu0 %v9605_v31 }
 0x555   :  { %6620 = vmatpush1.bf16.msra.mxu1 %v8982_v2  ;;  %6623 = vmatprep.mubr.bf16.mxu1 %v9605_v31 }
 0x556   :  { %6395 = vmatprep.subr.bf16.mxu0 %v8987_v63  ;;  %6621 = vmatprep.subr.bf16.mxu1 %v8990_v3 }
 0x558   :  { %6396 = vmatpush1.bf16.msra.mxu0 %v8985_v9 }
 0x559   :  { %6622 = vmatpush1.bf16.msra.mxu1 %v8988_v4 }
 0x55b   :  { %6398 = vmatmul.mubr.bf16.vlgmr.msra.gmra.mrb[128].mxu0 %v9603_v26 }
 0x55c   :  { %6624 = vmatmul.mubr.bf16.vlgmr.msra.gmra.mrb[128].mxu1 %v9603_v26  ;;  %6407 = vmatprep.mubr.bf16.mxu0 %v9609_v54  ;;  %v5590_v26 = vld [vmem:[%s9761_s7] sm:$0xf]  ;;  %s9163_s7 = smov [#allocation13]  }
 0x55d   :  { %6633 = vmatprep.mubr.bf16.mxu1 %v9609_v54  ;;  %v9664_v31 = vrot.slane %v5590_v26, %v3004_v14  ;;  %v9672_v54 = vrot.slane %v5590_v26, %v3008_v44  ;;  %s6837_s9 = sshll.u32 %s9163_s7, 4  ;;  %s6838_s9 = int_to_ptr.vmem [resolvable:$true] %s6837_s9 }
 0x55e   :  { %s9123_s10 = scalar_lea.vmem %s6838_s9, 8192  ;;  %p9128_p7 = scmp.lt.s32.totalorder %s6838_s9, %s6838_s9 }
 0x55f   :  { %p9124_p6 = scmp.ne.s32.totalorder %s6838_s9, %s9123_s10  ;;  %p9129_p8 = scmp.lt.s32.totalorder %s9123_s10, %s9123_s10 }
 0x561   :  { %p9130_p9 = por %p9129_p8, %p9128_p7 }
 0x563   :  { %6408 = vmatmul.mubr.bf16.gmra.mrb[132].mxu0 %v9607_v45  ;;  %p9131_p10 = pnand %p9130_p9, %p9124_p6 }
 0x564   :  { %6634 = vmatmul.mubr.bf16.gmra.mrb[132].mxu1 %v9607_v45  ;;  %6417 = vmatprep.mubr.bf16.mxu0 %v9613_v32  ;;  %v9668_v45 = vrot.slane %v5590_v26, %v3012_v36 }
 0x565   :  { %6643 = vmatprep.mubr.bf16.mxu1 %v9613_v32 }
 0x56b   :  { %6418 = vmatmul.mubr.bf16.gmra.mrb[136].mxu0 %v9611_v62 }
 0x56c   :  { %6644 = vmatmul.mubr.bf16.gmra.mrb[136].mxu1 %v9611_v62  ;;  %6427 = vmatprep.mubr.bf16.mxu0 %v9617_v51  ;;  %v9676_v62 = vrot.slane %v5590_v26, %v3016_v19 }
 0x56d   :  { %6653 = vmatprep.mubr.bf16.mxu1 %v9617_v51 }
 0x573   :  { %6428 = vmatmul.mubr.bf16.gmra.mrb[140].mxu0 %v9615_v18 }
 0x574   :  { %6654 = vmatmul.mubr.bf16.gmra.mrb[140].mxu1 %v9615_v18  ;;  %6437 = vmatprep.mubr.bf16.mxu0 %v9621_v34 }
 0x575   :  { %6663 = vmatprep.mubr.bf16.mxu1 %v9621_v34 }
 0x57b   :  { %6438 = vmatmul.mubr.bf16.gmra.mrb[144].mxu0 %v9619_v50 }
 0x57c   :  { %6664 = vmatmul.mubr.bf16.gmra.mrb[144].mxu1 %v9619_v50  ;;  %6447 = vmatprep.mubr.bf16.mxu0 %v9625_v33 }
 0x57d   :  { %6673 = vmatprep.mubr.bf16.mxu1 %v9625_v33 }
 0x583   :  { %6448 = vmatmul.mubr.bf16.gmra.mrb[148].mxu0 %v9623_v10 }
 0x584   :  { %6674 = vmatmul.mubr.bf16.gmra.mrb[148].mxu1 %v9623_v10  ;;  %6457 = vmatprep.mubr.bf16.mxu0 %v9629_v15 }
 0x585   :  { %6683 = vmatprep.mubr.bf16.mxu1 %v9629_v15 }
 0x58b   :  { %6458 = vmatmul.mubr.bf16.gmra.mrb[152].mxu0 %v9627_v42 }
 0x58c   :  { %6684 = vmatmul.mubr.bf16.gmra.mrb[152].mxu1 %v9627_v42  ;;  %6467 = vmatprep.mubr.bf16.mxu0 %v5461_v0 }
 0x58d   :  { %6693 = vmatprep.mubr.bf16.mxu1 %v5461_v0 }
 0x593   :  { %6468 = vmatmul.mubr.bf16.gmra.mrb[156].mxu0 %v5460_v12 }
 0x594   :  { %6694 = vmatmul.mubr.bf16.gmra.mrb[156].mxu1 %v5460_v12 }
 0x62e   :  { %v6399_v32 = vpop.f32.mrb[128].mxu0 }
 0x62f   :  { %v7588_v18 = vadd.f32 %v6399_v32, %v9664_v31  ;;  %v6625_v51 = vpop.f32.mrb[128].mxu1  ;;  %v6401_v50 = vpop.f32.mrb[129].mxu0 }
 0x630   :  { %v7620_v14 = vadd.f32 %v6625_v51, %v9668_v45  ;;  %v7589_v34 = vadd.f32 %v6401_v50, %v9672_v54  ;;  %v6627_v10 = vpop.f32.mrb[129].mxu1  ;;  %v6403_v36 = vpop.f32.mrb[130].mxu0 }
 0x631   :  { %v6704_v52 = vmax.f32 %v7588_v18, 0.0  ;;  %v7621_v61 = vadd.f32 %v6627_v10, %v9676_v62  ;;  %v7590_v44 = vadd.f32 %v6403_v36, %v9664_v31  ;;  %v6629_v7 = vpop.f32.mrb[130].mxu1  ;;  %v6405_v6 = vpop.f32.mrb[131].mxu0 }
 0x632   :  { %v6706_v19 = vmax.f32 %v7620_v14, 0.0  ;;  %v6705_v33 = vmax.f32 %v7589_v34, 0.0  ;;  %v7622_v23 = vadd.f32 %v6629_v7, %v9668_v45  ;;  %v7591_v24 = vadd.f32 %v6405_v6, %v9672_v54  ;;  %v6631_v25 = vpop.f32.mrb[131].mxu1 }
 0x633   :  { %6768 = vst [vmem:[#allocation13] sm:$0xff] %v6704_v52  ;;  %v6707_v56 = vmax.f32 %v7621_v61, 0.0  ;;  %v6708_v59 = vmax.f32 %v7590_v44, 0.0  ;;  %v7623_v53 = vadd.f32 %v6631_v25, %v9676_v62 }
 0x634   :  { %6770 = vst [vmem:[#allocation13 + $0x10] sm:$0xff] %v6706_v19  ;;  %6769 = vst [vmem:[#allocation13 + $0x8] sm:$0xff] %v6705_v33  ;;  %v6710_v11 = vmax.f32 %v7622_v23, 0.0  ;;  %v6709_v29 = vmax.f32 %v7591_v24, 0.0 }
 0x635   :  { %6771 = vst [vmem:[#allocation13 + $0x18] sm:$0xff] %v6707_v56  ;;  %6772 = vst [vmem:[#allocation13 + $0x20] sm:$0xff] %v6708_v59  ;;  %v6711_v13 = vmax.f32 %v7623_v53, 0.0 }
 0x636   :  { %6774 = vst [vmem:[#allocation13 + $0x30] sm:$0xff] %v6710_v11  ;;  %6773 = vst [vmem:[#allocation13 + $0x28] sm:$0xff] %v6709_v29  ;;  %v6409_v27 = vpop.f32.mrb[132].mxu0 }
 0x637   :  { %6775 = vst [vmem:[#allocation13 + $0x38] sm:$0xff] %v6711_v13  ;;  %v7592_v39 = vadd.f32 %v6409_v27, %v9664_v31  ;;  %v6635_v8 = vpop.f32.mrb[132].mxu1  ;;  %v6411_v35 = vpop.f32.mrb[133].mxu0 }
 0x638   :  { %v7624_v17 = vadd.f32 %v6635_v8, %v9668_v45  ;;  %v7593_v42 = vadd.f32 %v6411_v35, %v9672_v54  ;;  %v6637_v46 = vpop.f32.mrb[133].mxu1  ;;  %v6413_v1 = vpop.f32.mrb[134].mxu0 }
 0x639   :  { %v6712_v43 = vmax.f32 %v7592_v39, 0.0  ;;  %v7625_v47 = vadd.f32 %v6637_v46, %v9676_v62  ;;  %v7594_v15 = vadd.f32 %v6413_v1, %v9664_v31  ;;  %v6639_v30 = vpop.f32.mrb[134].mxu1  ;;  %v6415_v21 = vpop.f32.mrb[135].mxu0 }
 0x63a   :  { %v6714_v48 = vmax.f32 %v7624_v17, 0.0  ;;  %v6713_v49 = vmax.f32 %v7593_v42, 0.0  ;;  %v7626_v37 = vadd.f32 %v6639_v30, %v9668_v45  ;;  %v7595_v55 = vadd.f32 %v6415_v21, %v9672_v54  ;;  %v6641_v22 = vpop.f32.mrb[135].mxu1 }
 0x63b   :  { %6776 = vst [vmem:[#allocation13 + $0x40] sm:$0xff] %v6712_v43  ;;  %v6715_v20 = vmax.f32 %v7625_v47, 0.0  ;;  %v6716_v40 = vmax.f32 %v7594_v15, 0.0  ;;  %v7627_v28 = vadd.f32 %v6641_v22, %v9676_v62 }
 0x63c   :  { %6778 = vst [vmem:[#allocation13 + $0x50] sm:$0xff] %v6714_v48  ;;  %6777 = vst [vmem:[#allocation13 + $0x48] sm:$0xff] %v6713_v49  ;;  %v6718_v57 = vmax.f32 %v7626_v37, 0.0  ;;  %v6717_v58 = vmax.f32 %v7595_v55, 0.0 }
 0x63d   :  { %6779 = vst [vmem:[#allocation13 + $0x58] sm:$0xff] %v6715_v20  ;;  %6780 = vst [vmem:[#allocation13 + $0x60] sm:$0xff] %v6716_v40  ;;  %v6719_v16 = vmax.f32 %v7627_v28, 0.0 }
 0x63e   :  { %6782 = vst [vmem:[#allocation13 + $0x70] sm:$0xff] %v6718_v57  ;;  %6781 = vst [vmem:[#allocation13 + $0x68] sm:$0xff] %v6717_v58  ;;  %v6419_v41 = vpop.f32.mrb[136].mxu0 }
 0x63f   :  { %6783 = vst [vmem:[#allocation13 + $0x78] sm:$0xff] %v6719_v16  ;;  %v7596_v12 = vadd.f32 %v6419_v41, %v9664_v31  ;;  %v6645_v38 = vpop.f32.mrb[136].mxu1  ;;  %v6421_v60 = vpop.f32.mrb[137].mxu0 }
 0x640   :  { %v7628_v5 = vadd.f32 %v6645_v38, %v9668_v45  ;;  %v7597_v0 = vadd.f32 %v6421_v60, %v9672_v54  ;;  %v6647_v2 = vpop.f32.mrb[137].mxu1  ;;  %v6423_v63 = vpop.f32.mrb[138].mxu0 }
 0x641   :  { %v6720_v3 = vmax.f32 %v7596_v12, 0.0  ;;  %v7629_v9 = vadd.f32 %v6647_v2, %v9676_v62  ;;  %v7598_v4 = vadd.f32 %v6423_v63, %v9664_v31  ;;  %v6649_v26 = vpop.f32.mrb[138].mxu1  ;;  %v6425_v32 = vpop.f32.mrb[139].mxu0 }
 0x642   :  { %v6722_v18 = vmax.f32 %v7628_v5, 0.0  ;;  %v6721_v51 = vmax.f32 %v7597_v0, 0.0  ;;  %v7630_v50 = vadd.f32 %v6649_v26, %v9668_v45  ;;  %v7599_v14 = vadd.f32 %v6425_v32, %v9672_v54  ;;  %v6651_v34 = vpop.f32.mrb[139].mxu1 }
 0x643   :  { %6784 = vst [vmem:[#allocation13 + $0x80] sm:$0xff] %v6720_v3  ;;  %v6723_v10 = vmax.f32 %v7629_v9, 0.0  ;;  %v6724_v36 = vmax.f32 %v7598_v4, 0.0  ;;  %v7631_v52 = vadd.f32 %v6651_v34, %v9676_v62 }
 0x644   :  { %6786 = vst [vmem:[#allocation13 + $0x90] sm:$0xff] %v6722_v18  ;;  %6785 = vst [vmem:[#allocation13 + $0x88] sm:$0xff] %v6721_v51  ;;  %v6726_v61 = vmax.f32 %v7630_v50, 0.0  ;;  %v6725_v44 = vmax.f32 %v7599_v14, 0.0 }
 0x645   :  { %6787 = vst [vmem:[#allocation13 + $0x98] sm:$0xff] %v6723_v10  ;;  %6788 = vst [vmem:[#allocation13 + $0xa0] sm:$0xff] %v6724_v36  ;;  %v6727_v7 = vmax.f32 %v7631_v52, 0.0 }
 0x646   :  { %6790 = vst [vmem:[#allocation13 + $0xb0] sm:$0xff] %v6726_v61  ;;  %6789 = vst [vmem:[#allocation13 + $0xa8] sm:$0xff] %v6725_v44  ;;  %v6429_v6 = vpop.f32.mrb[140].mxu0 }
 0x647   :  { %6791 = vst [vmem:[#allocation13 + $0xb8] sm:$0xff] %v6727_v7  ;;  %v7600_v19 = vadd.f32 %v6429_v6, %v9664_v31  ;;  %v6655_v33 = vpop.f32.mrb[140].mxu1  ;;  %v6431_v23 = vpop.f32.mrb[141].mxu0 }
 0x648   :  { %v7632_v24 = vadd.f32 %v6655_v33, %v9668_v45  ;;  %v7601_v25 = vadd.f32 %v6431_v23, %v9672_v54  ;;  %v6657_v56 = vpop.f32.mrb[141].mxu1  ;;  %v6433_v59 = vpop.f32.mrb[142].mxu0 }
 0x649   :  { %v6728_v53 = vmax.f32 %v7600_v19, 0.0  ;;  %v7633_v11 = vadd.f32 %v6657_v56, %v9676_v62  ;;  %v7602_v29 = vadd.f32 %v6433_v59, %v9664_v31  ;;  %v6659_v13 = vpop.f32.mrb[142].mxu1  ;;  %v6435_v27 = vpop.f32.mrb[143].mxu0 }
 0x64a   :  { %v6730_v39 = vmax.f32 %v7632_v24, 0.0  ;;  %v6729_v8 = vmax.f32 %v7601_v25, 0.0  ;;  %v7634_v35 = vadd.f32 %v6659_v13, %v9668_v45  ;;  %v7603_v17 = vadd.f32 %v6435_v27, %v9672_v54  ;;  %v6661_v42 = vpop.f32.mrb[143].mxu1 }
 0x64b   :  { %6792 = vst [vmem:[#allocation13 + $0xc0] sm:$0xff] %v6728_v53  ;;  %v6731_v46 = vmax.f32 %v7633_v11, 0.0  ;;  %v6732_v1 = vmax.f32 %v7602_v29, 0.0  ;;  %v7635_v43 = vadd.f32 %v6661_v42, %v9676_v62 }
 0x64c   :  { %6794 = vst [vmem:[#allocation13 + $0xd0] sm:$0xff] %v6730_v39  ;;  %6793 = vst [vmem:[#allocation13 + $0xc8] sm:$0xff] %v6729_v8  ;;  %v6734_v47 = vmax.f32 %v7634_v35, 0.0  ;;  %v6733_v15 = vmax.f32 %v7603_v17, 0.0 }
 0x64d   :  { %6795 = vst [vmem:[#allocation13 + $0xd8] sm:$0xff] %v6731_v46  ;;  %6796 = vst [vmem:[#allocation13 + $0xe0] sm:$0xff] %v6732_v1  ;;  %v6735_v30 = vmax.f32 %v7635_v43, 0.0 }
 0x64e   :  { %6798 = vst [vmem:[#allocation13 + $0xf0] sm:$0xff] %v6734_v47  ;;  %6797 = vst [vmem:[#allocation13 + $0xe8] sm:$0xff] %v6733_v15  ;;  %v6439_v21 = vpop.f32.mrb[144].mxu0 }
 0x64f   :  { %6799 = vst [vmem:[#allocation13 + $0xf8] sm:$0xff] %v6735_v30  ;;  %v7604_v48 = vadd.f32 %v6439_v21, %v9664_v31  ;;  %v6665_v49 = vpop.f32.mrb[144].mxu1  ;;  %v6441_v37 = vpop.f32.mrb[145].mxu0 }
 0x650   :  { %v7636_v55 = vadd.f32 %v6665_v49, %v9668_v45  ;;  %v7605_v22 = vadd.f32 %v6441_v37, %v9672_v54  ;;  %v6667_v20 = vpop.f32.mrb[145].mxu1  ;;  %v6443_v40 = vpop.f32.mrb[146].mxu0 }
 0x651   :  { %v6736_v28 = vmax.f32 %v7604_v48, 0.0  ;;  %v7637_v57 = vadd.f32 %v6667_v20, %v9676_v62  ;;  %v7606_v58 = vadd.f32 %v6443_v40, %v9664_v31  ;;  %v6669_v16 = vpop.f32.mrb[146].mxu1  ;;  %v6445_v41 = vpop.f32.mrb[147].mxu0 }
 0x652   :  { %v6738_v12 = vmax.f32 %v7636_v55, 0.0  ;;  %v6737_v38 = vmax.f32 %v7605_v22, 0.0  ;;  %v7638_v60 = vadd.f32 %v6669_v16, %v9668_v45  ;;  %v7607_v5 = vadd.f32 %v6445_v41, %v9672_v54  ;;  %v6671_v0 = vpop.f32.mrb[147].mxu1 }
 0x653   :  { %6800 = vst [vmem:[#allocation13 + $0x100] sm:$0xff] %v6736_v28  ;;  %v6739_v2 = vmax.f32 %v7637_v57, 0.0  ;;  %v6740_v63 = vmax.f32 %v7606_v58, 0.0  ;;  %v7639_v3 = vadd.f32 %v6671_v0, %v9676_v62 }
 0x654   :  { %6802 = vst [vmem:[#allocation13 + $0x110] sm:$0xff] %v6738_v12  ;;  %6801 = vst [vmem:[#allocation13 + $0x108] sm:$0xff] %v6737_v38  ;;  %v6742_v9 = vmax.f32 %v7638_v60, 0.0  ;;  %v6741_v4 = vmax.f32 %v7607_v5, 0.0 }
 0x655   :  { %6803 = vst [vmem:[#allocation13 + $0x118] sm:$0xff] %v6739_v2  ;;  %6804 = vst [vmem:[#allocation13 + $0x120] sm:$0xff] %v6740_v63  ;;  %v6743_v26 = vmax.f32 %v7639_v3, 0.0 }
 0x656   :  { %6806 = vst [vmem:[#allocation13 + $0x130] sm:$0xff] %v6742_v9  ;;  %6805 = vst [vmem:[#allocation13 + $0x128] sm:$0xff] %v6741_v4  ;;  %v6449_v32 = vpop.f32.mrb[148].mxu0 }
 0x657   :  { %6807 = vst [vmem:[#allocation13 + $0x138] sm:$0xff] %v6743_v26  ;;  %v7608_v18 = vadd.f32 %v6449_v32, %v9664_v31  ;;  %v6675_v51 = vpop.f32.mrb[148].mxu1  ;;  %v6451_v50 = vpop.f32.mrb[149].mxu0 }
 0x658   :  { %v7640_v14 = vadd.f32 %v6675_v51, %v9668_v45  ;;  %v7609_v34 = vadd.f32 %v6451_v50, %v9672_v54  ;;  %v6677_v10 = vpop.f32.mrb[149].mxu1  ;;  %v6453_v36 = vpop.f32.mrb[150].mxu0 }
 0x659   :  { %v6744_v52 = vmax.f32 %v7608_v18, 0.0  ;;  %v7641_v61 = vadd.f32 %v6677_v10, %v9676_v62  ;;  %v7610_v44 = vadd.f32 %v6453_v36, %v9664_v31  ;;  %v6679_v7 = vpop.f32.mrb[150].mxu1  ;;  %v6455_v6 = vpop.f32.mrb[151].mxu0 }
 0x65a   :  { %v6746_v19 = vmax.f32 %v7640_v14, 0.0  ;;  %v6745_v33 = vmax.f32 %v7609_v34, 0.0  ;;  %v7642_v23 = vadd.f32 %v6679_v7, %v9668_v45  ;;  %v7611_v24 = vadd.f32 %v6455_v6, %v9672_v54  ;;  %v6681_v25 = vpop.f32.mrb[151].mxu1 }
 0x65b   :  { %6808 = vst [vmem:[#allocation13 + $0x140] sm:$0xff] %v6744_v52  ;;  %v6747_v56 = vmax.f32 %v7641_v61, 0.0  ;;  %v6748_v59 = vmax.f32 %v7610_v44, 0.0  ;;  %v7643_v53 = vadd.f32 %v6681_v25, %v9676_v62 }
 0x65c   :  { %6810 = vst [vmem:[#allocation13 + $0x150] sm:$0xff] %v6746_v19  ;;  %6809 = vst [vmem:[#allocation13 + $0x148] sm:$0xff] %v6745_v33  ;;  %v6750_v11 = vmax.f32 %v7642_v23, 0.0  ;;  %v6749_v29 = vmax.f32 %v7611_v24, 0.0 }
 0x65d   :  { %6811 = vst [vmem:[#allocation13 + $0x158] sm:$0xff] %v6747_v56  ;;  %6812 = vst [vmem:[#allocation13 + $0x160] sm:$0xff] %v6748_v59  ;;  %v6751_v13 = vmax.f32 %v7643_v53, 0.0 }
 0x65e   :  { %6814 = vst [vmem:[#allocation13 + $0x170] sm:$0xff] %v6750_v11  ;;  %6813 = vst [vmem:[#allocation13 + $0x168] sm:$0xff] %v6749_v29  ;;  %v6459_v27 = vpop.f32.mrb[152].mxu0 }
 0x65f   :  { %6815 = vst [vmem:[#allocation13 + $0x178] sm:$0xff] %v6751_v13  ;;  %v7612_v39 = vadd.f32 %v6459_v27, %v9664_v31  ;;  %v6685_v8 = vpop.f32.mrb[152].mxu1  ;;  %v6461_v35 = vpop.f32.mrb[153].mxu0 }
 0x660   :  { %v7644_v17 = vadd.f32 %v6685_v8, %v9668_v45  ;;  %v7613_v42 = vadd.f32 %v6461_v35, %v9672_v54  ;;  %v6687_v46 = vpop.f32.mrb[153].mxu1  ;;  %v6463_v1 = vpop.f32.mrb[154].mxu0 }
 0x661   :  { %v6752_v43 = vmax.f32 %v7612_v39, 0.0  ;;  %v7645_v47 = vadd.f32 %v6687_v46, %v9676_v62  ;;  %v7614_v15 = vadd.f32 %v6463_v1, %v9664_v31  ;;  %v6689_v30 = vpop.f32.mrb[154].mxu1  ;;  %v6465_v21 = vpop.f32.mrb[155].mxu0 }
 0x662   :  { %v6754_v48 = vmax.f32 %v7644_v17, 0.0  ;;  %v6753_v49 = vmax.f32 %v7613_v42, 0.0  ;;  %v7646_v37 = vadd.f32 %v6689_v30, %v9668_v45  ;;  %v7615_v55 = vadd.f32 %v6465_v21, %v9672_v54  ;;  %v6691_v22 = vpop.f32.mrb[155].mxu1 }
 0x663   :  { %6816 = vst [vmem:[#allocation13 + $0x180] sm:$0xff] %v6752_v43  ;;  %v6755_v20 = vmax.f32 %v7645_v47, 0.0  ;;  %v6756_v40 = vmax.f32 %v7614_v15, 0.0  ;;  %v7647_v28 = vadd.f32 %v6691_v22, %v9676_v62 }
 0x664   :  { %6818 = vst [vmem:[#allocation13 + $0x190] sm:$0xff] %v6754_v48  ;;  %6817 = vst [vmem:[#allocation13 + $0x188] sm:$0xff] %v6753_v49  ;;  %v6758_v57 = vmax.f32 %v7646_v37, 0.0  ;;  %v6757_v58 = vmax.f32 %v7615_v55, 0.0 }
 0x665   :  { %6819 = vst [vmem:[#allocation13 + $0x198] sm:$0xff] %v6755_v20  ;;  %6820 = vst [vmem:[#allocation13 + $0x1a0] sm:$0xff] %v6756_v40  ;;  %v6759_v16 = vmax.f32 %v7647_v28, 0.0 }
 0x666   :  { %6822 = vst [vmem:[#allocation13 + $0x1b0] sm:$0xff] %v6758_v57  ;;  %6821 = vst [vmem:[#allocation13 + $0x1a8] sm:$0xff] %v6757_v58  ;;  %v6469_v41 = vpop.f32.mrb[156].mxu0 }
 0x667   :  { %6823 = vst [vmem:[#allocation13 + $0x1b8] sm:$0xff] %v6759_v16  ;;  %v7616_v12 = vadd.f32 %v6469_v41, %v9664_v31  ;;  %v6695_v38 = vpop.f32.mrb[156].mxu1  ;;  %v6471_v60 = vpop.f32.mrb[157].mxu0 }
 0x668   :  { %v7648_v5 = vadd.f32 %v6695_v38, %v9668_v45  ;;  %v7617_v0 = vadd.f32 %v6471_v60, %v9672_v54  ;;  %v6697_v2 = vpop.f32.mrb[157].mxu1  ;;  %v6473_v63 = vpop.f32.mrb[158].mxu0 }
 0x669   :  { %v6760_v3 = vmax.f32 %v7616_v12, 0.0  ;;  %v7649_v9 = vadd.f32 %v6697_v2, %v9676_v62  ;;  %v7618_v4 = vadd.f32 %v6473_v63, %v9664_v31  ;;  %v6699_v26 = vpop.f32.mrb[158].mxu1  ;;  %v6475_v32 = vpop.f32.mrb[159].mxu0 }
 0x66a   :  { %v6762_v18 = vmax.f32 %v7648_v5, 0.0  ;;  %v6761_v51 = vmax.f32 %v7617_v0, 0.0  ;;  %v7650_v50 = vadd.f32 %v6699_v26, %v9668_v45  ;;  %v7619_v14 = vadd.f32 %v6475_v32, %v9672_v54  ;;  %v6701_v34 = vpop.f32.mrb[159].mxu1 }
 0x66b   :  { %6824 = vst [vmem:[#allocation13 + $0x1c0] sm:$0xff] %v6760_v3  ;;  %v6763_v10 = vmax.f32 %v7649_v9, 0.0  ;;  %v6764_v36 = vmax.f32 %v7618_v4, 0.0  ;;  %v7651_v52 = vadd.f32 %v6701_v34, %v9676_v62 }
 0x66c   :  { %6826 = vst [vmem:[#allocation13 + $0x1d0] sm:$0xff] %v6762_v18  ;;  %6825 = vst [vmem:[#allocation13 + $0x1c8] sm:$0xff] %v6761_v51  ;;  %v6766_v61 = vmax.f32 %v7650_v50, 0.0  ;;  %v6765_v31 = vmax.f32 %v7619_v14, 0.0 }
 0x66d   :  { %6827 = vst [vmem:[#allocation13 + $0x1d8] sm:$0xff] %v6763_v10  ;;  %6828 = vst [vmem:[#allocation13 + $0x1e0] sm:$0xff] %v6764_v36  ;;  %v6767_v44 = vmax.f32 %v7651_v52, 0.0 }
 0x66e   :  { %6830 = vst [vmem:[#allocation13 + $0x1f0] sm:$0xff] %v6766_v61  ;;  %6829 = vst [vmem:[#allocation13 + $0x1e8] sm:$0xff] %v6765_v31 }
 0x66f   :  { %6831 = vst [vmem:[#allocation13 + $0x1f8] sm:$0xff] %v6767_v44 }
 0x670   :  { %9134 = shalt.err (!%p9131_p10)
}
 0x671   :  { %s9135_s14 = scalar_lea.hbm %s9762_s8, 8192 }
 0x672   :  { %p9136_p11 = scmp.ne.s32.totalorder %s9762_s8, %s9135_s14  ;;  %p9139_p12 = scmp.lt.u32.totalorder %s9135_s14, %s9762_s8 }
 0x674   :  { %p9141_p13 = pnand %p9139_p12, %p9136_p11 }
 0x676   :  { %9144 = shalt.err (!%p9141_p13)
}
 0x677   :  { %s9164_s21 = smov 512   ;;  %s9165_s3 = smov 32  }
 0x678   :  { %6843 = dma.vmem_to_hbm [thread:$0]  %s6838_s9, 8192, %s9762_s8, [#allocation4], %s9164_s21, %s9164_s21, %s9165_s3  }
 0x679   :  { %9153 = dma.done.wait [#allocation4], 8192  }
 0x67a   :  { %9154 = vsyncadd [#allocation4], 4294959104 }
 0x67b   :  { %6847 = vsyncpa [#allocation3], 1 }
 0x67c   :  { %6848 = vsyncpa [#allocation6], 1 }
 0x67d   :  { %6849 = vsyncpa [#allocation9], 1 }
 0x67e   :  { %6850 = vsyncpa [#allocation12], 1 }
 0x67f   :  { %6851 = vsyncpa [#allocation4], 1 }

</bundles_post_ra>
